<compile_context>
chip_gen: v7x
topology: tpu7x:2x2x1
jax: 0.10.0
libtpu: 0.0.40
codegen_flags: <defaults>
</compile_context>

<pallas_src>
import jax
import jax.numpy as jnp
from jax.experimental import pallas as pl
from jax.experimental.pallas import tpu as pltpu

_EPS = 1e-5  # nn.InstanceNorm2d default eps (affine=False -> no gamma/beta)


# ----------------------------- in-kernel helpers -----------------------------

def _instance_norm(y_flat, inv_n):
    """y_flat: (H*W, C) f32. Per-channel normalization over spatial positions
    using single-pass (sum, sum-of-squares) biased-variance statistics."""
    mean = jnp.sum(y_flat, axis=0, keepdims=True) * inv_n
    ex2 = jnp.sum(y_flat * y_flat, axis=0, keepdims=True) * inv_n
    var = jnp.maximum(ex2 - mean * mean, 0.0)
    return (y_flat - mean) * jax.lax.rsqrt(var + _EPS)


def _reflect_pad_into(pad_ref, t, H, W):
    """Write ReflectionPad2d(1) of t (H,W,C) into pad_ref (H+2,W+2,C) scratch."""
    pad_ref[1:H + 1, 1:W + 1, :] = t
    pad_ref[1:H + 1, 0:1, :] = t[:, 1:2, :]
    pad_ref[1:H + 1, W + 1:W + 2, :] = t[:, W - 2:W - 1, :]
    pad_ref[0:1, 1:W + 1, :] = t[1:2, :, :]
    pad_ref[0:1, 0:1, :] = t[1:2, 1:2, :]
    pad_ref[0:1, W + 1:W + 2, :] = t[1:2, W - 2:W - 1, :]
    pad_ref[H + 1:H + 2, 1:W + 1, :] = t[H - 2:H - 1, :, :]
    pad_ref[H + 1:H + 2, 0:1, :] = t[H - 2:H - 1, 1:2, :]
    pad_ref[H + 1:H + 2, W + 1:W + 2, :] = t[H - 2:H - 1, W - 2:W - 1, :]


def _zero_pad_into(pad_ref, t, H, W, C):
    """Write zero-padded t (H,W,C) into pad_ref (H+2,W+2,C) scratch.
    Only the 1-pixel border is zeroed; the interior is fully overwritten."""
    zrow = jnp.zeros((1, W + 2, C), jnp.float32)
    pad_ref[0:1, :, :] = zrow
    pad_ref[H + 1:H + 2, :, :] = zrow
    zcol = jnp.zeros((H, 1, C), jnp.float32)
    pad_ref[1:H + 1, 0:1, :] = zcol
    pad_ref[1:H + 1, W + 1:W + 2, :] = zcol
    pad_ref[1:H + 1, 1:W + 1, :] = t


def _conv3x3_im2col(pad_ref, w9, b, H, W, C):
    """3x3 conv as a single im2col matmul: (H*W, 9C) @ (9C, C) on the MXU.
    pad_ref: (H+2,W+2,C) padded input scratch, w9: (9C, C) bf16, b: (1, C)."""
    hw = H * W
    taps = [pad_ref[dy:dy + H, dx:dx + W, :].reshape(hw, C)
            for dy in range(3) for dx in range(3)]
    patches = jnp.concatenate(taps, axis=-1).astype(jnp.bfloat16)   # (HW, 9C)
    y = jnp.dot(patches, w9, preferred_element_type=jnp.float32)    # f32 acc
    return y + b


# ---------------------------------- kernel -----------------------------------

def _fused_kernel(x_ref, w1_ref, b1_ref, wd_ref, bd_ref, w2_ref, b2_ref,
                  fw1_ref, fb1_ref, fw2_ref, fb2_ref, o_ref, pad_ref):
    _, H, W, C = x_ref.shape
    hw = H * W
    inv_hw = 1.0 / hw
    x = x_ref[0]                                           # (H, W, C) f32 shortcut

    # stage 1: ReflectionPad2d(1) + Conv2d(3x3) + InstanceNorm2d
    _reflect_pad_into(pad_ref, x, H, W)
    y1 = _conv3x3_im2col(pad_ref, w1_ref[...], b1_ref[...], H, W, C)
    t1 = _instance_norm(y1, inv_hw).reshape(H, W, C)

    # stage 2: FReLU = depthwise Conv2d(3x3, zero pad=1) + InstanceNorm2d, max
    _zero_pad_into(pad_ref, t1, H, W, C)
    wd = wd_ref[...]                                       # (9, C)
    acc = jnp.broadcast_to(bd_ref[...].reshape(1, 1, C), (H, W, C))
    for k in range(9):                                     # 9 VPU FMAs (depthwise)
        dy, dx = k // 3, k % 3
        acc = acc + pad_ref[dy:dy + H, dx:dx + W, :] * wd[k:k + 1, :].reshape(1, 1, C)
    tx = _instance_norm(acc.reshape(hw, C), inv_hw).reshape(H, W, C)
    t2 = jnp.maximum(t1, tx)

    # stage 3: ReflectionPad2d(1) + Conv2d(3x3) + InstanceNorm2d -> residual
    _reflect_pad_into(pad_ref, t2, H, W)
    y2 = _conv3x3_im2col(pad_ref, w2_ref[...], b2_ref[...], H, W, C)
    res = _instance_norm(y2, inv_hw)                       # (HW, C)

    # SE: squeeze (global mean) + excitation (Linear->ReLU->Linear->Sigmoid)
    sq = jnp.sum(res, axis=0, keepdims=True) * inv_hw      # (1, C)
    h = jnp.dot(sq, fw1_ref[...], preferred_element_type=jnp.float32) + fb1_ref[...]
    h = jnp.maximum(h, 0.0)
    z = jnp.dot(h, fw2_ref[...], preferred_element_type=jnp.float32) + fb2_ref[...]
    e = pl.reciprocal(1.0 + jnp.exp(-z), approx=True)      # sigmoid via EUP, (1, C)

    # relu(residual * excitation + shortcut)
    o_ref[0] = jnp.maximum(res.reshape(H, W, C) * e.reshape(1, 1, C) + x, 0.0)


# --------------------------------- wrapper -----------------------------------

def residual_se_block(x_nchw, params):
    N, C, H, W = x_nchw.shape
    x = jnp.transpose(x_nchw, (0, 2, 3, 1)).astype(jnp.float32)  # NHWC

    hp = params["fw1"].shape[1]

    def const_spec(shape):
        nd = len(shape)
        return pl.BlockSpec(shape, lambda n, _nd=nd: (0,) * _nd)

    img_spec = pl.BlockSpec((1, H, W, C), lambda n: (n, 0, 0, 0))

    out = pl.pallas_call(
        _fused_kernel,
        grid=(N,),
        in_specs=[img_spec,
                  const_spec((9 * C, C)), const_spec((1, C)),     # conv1 (bf16), bias
                  const_spec((9, C)), const_spec((1, C)),         # depthwise, bias
                  const_spec((9 * C, C)), const_spec((1, C)),     # conv2 (bf16), bias
                  const_spec((C, hp)), const_spec((1, hp)),       # excitation fc1
                  const_spec((hp, C)), const_spec((1, C))],       # excitation fc2
        out_specs=img_spec,
        out_shape=jax.ShapeDtypeStruct((N, H, W, C), jnp.float32),
        scratch_shapes=[pltpu.VMEM((H + 2, W + 2, C), jnp.float32)],
        compiler_params=pltpu.CompilerParams(
            dimension_semantics=("parallel",),
            vmem_limit_bytes=32 * 1024 * 1024),
    )(x, params["w1"], params["b1"], params["wd"], params["bd"],
      params["w2"], params["b2"],
      params["fw1"], params["fb1"], params["fw2"], params["fb2"])

    return jnp.transpose(out, (0, 3, 1, 2))  # back to NCHW


# --------------------------- deterministic params -----------------------------

def init_params(key, C, reduction=16, hidden_pad=128):
    hidden = max(C // reduction, 1)
    ks = jax.random.split(key, 10)

    def rnd(k, shape, scale=0.1):
        return scale * jax.random.normal(k, shape, jnp.float32)

    # conv weights: (3,3,Cin,Cout) HWIO -> im2col layout (9*Cin, Cout); bf16 MXU operands
    w1 = rnd(ks[0], (3, 3, C, C)).reshape(9 * C, C).astype(jnp.bfloat16)
    w2 = rnd(ks[4], (3, 3, C, C)).reshape(9 * C, C).astype(jnp.bfloat16)
    # depthwise conv (groups=C): one scalar per tap per channel -> (9, C), f32 (VPU)
    wd = rnd(ks[2], (3, 3, C)).reshape(9, C)

    fw1 = rnd(ks[6], (C, hidden))       # Linear(C, C//r) stored as (in, out)
    fb1 = rnd(ks[7], (1, hidden))
    fw2 = rnd(ks[8], (hidden, C))       # Linear(C//r, C) stored as (in, out)
    fb2 = rnd(ks[9], (1, C))
    # Zero-pad the tiny excitation hidden dim to a lane-friendly width.
    # Padded columns: weight=0, bias=0 -> relu(0)=0 -> contributes nothing (exact).
    fw1p = jnp.zeros((C, hidden_pad), jnp.float32).at[:, :hidden].set(fw1)
    fb1p = jnp.zeros((1, hidden_pad), jnp.float32).at[:, :hidden].set(fb1)
    fw2p = jnp.zeros((hidden_pad, C), jnp.float32).at[:hidden, :].set(fw2)

    return dict(
        w1=w1, b1=rnd(ks[1], (1, C)),
        wd=wd, bd=rnd(ks[3], (1, C)),
        w2=w2, b2=rnd(ks[5], (1, C)),
        fw1=fw1p, fb1=fb1p, fw2=fw2p, fb2=fb2,
    )


if __name__ == "__main__":
    key = jax.random.PRNGKey(0)
    kx, kp = jax.random.split(key)
    # in_features=32, reduction=16 -> excitation hidden dim = 2
    N, C, H, W = 2, 32, 16, 16
    x = jax.random.normal(kx, (N, C, H, W), jnp.float32)
    params = init_params(kp, C, reduction=16)

    out = jax.jit(residual_se_block)(x, params)
    out = jax.block_until_ready(out)
    assert out.shape == (N, C, H, W)
    assert bool(jnp.all(jnp.isfinite(out)))
    assert bool(jnp.all(out >= 0.0))  # final relu
    print("KERNEL_OK")
</pallas_src>

<mosaic_0001>
module attributes {stable_mosaic.version = 11 : i64} {
  func.func @_fused_kernel(%arg0: i32, %arg1: memref<1x16x16x32xf32, #tpu.memory_space<vmem>>, %arg2: memref<288x32xbf16, #tpu.memory_space<vmem>>, %arg3: memref<1x32xf32, #tpu.memory_space<vmem>>, %arg4: memref<9x32xf32, #tpu.memory_space<vmem>>, %arg5: memref<1x32xf32, #tpu.memory_space<vmem>>, %arg6: memref<288x32xbf16, #tpu.memory_space<vmem>>, %arg7: memref<1x32xf32, #tpu.memory_space<vmem>>, %arg8: memref<32x128xf32, #tpu.memory_space<vmem>>, %arg9: memref<1x128xf32, #tpu.memory_space<vmem>>, %arg10: memref<128x32xf32, #tpu.memory_space<vmem>>, %arg11: memref<1x32xf32, #tpu.memory_space<vmem>>, %arg12: memref<1x16x16x32xf32, #tpu.memory_space<vmem>>, %arg13: memref<18x18x32xf32, #tpu.memory_space<vmem>>) attributes {dimension_semantics = [#tpu.dimension_semantics<parallel>], iteration_bounds = array<i64: 2>, scalar_prefetch = 0 : i64, scratch_operands = 1 : i64, tpu.core_type = #tpu.core_type<tc>, window_params = [{transform_indices = @transform_0, window_bounds = array<i64: 1, 16, 16, 32>}, {pipeline_mode = #tpu.pipeline_mode<synchronous>, transform_indices = @transform_1, window_bounds = array<i64: 288, 32>}, {pipeline_mode = #tpu.pipeline_mode<synchronous>, transform_indices = @transform_2, window_bounds = array<i64: 1, 32>}, {pipeline_mode = #tpu.pipeline_mode<synchronous>, transform_indices = @transform_3, window_bounds = array<i64: 9, 32>}, {pipeline_mode = #tpu.pipeline_mode<synchronous>, transform_indices = @transform_4, window_bounds = array<i64: 1, 32>}, {pipeline_mode = #tpu.pipeline_mode<synchronous>, transform_indices = @transform_5, window_bounds = array<i64: 288, 32>}, {pipeline_mode = #tpu.pipeline_mode<synchronous>, transform_indices = @transform_6, window_bounds = array<i64: 1, 32>}, {pipeline_mode = #tpu.pipeline_mode<synchronous>, transform_indices = @transform_7, window_bounds = array<i64: 32, 128>}, {pipeline_mode = #tpu.pipeline_mode<synchronous>, transform_indices = @transform_8, window_bounds = array<i64: 1, 128>}, {pipeline_mode = #tpu.pipeline_mode<synchronous>, transform_indices = @transform_9, window_bounds = array<i64: 128, 32>}, {pipeline_mode = #tpu.pipeline_mode<synchronous>, transform_indices = @transform_10, window_bounds = array<i64: 1, 32>}, {transform_indices = @transform_11, window_bounds = array<i64: 1, 16, 16, 32>}]} {
    %c0 = arith.constant 0 : index
    %c0_0 = arith.constant 0 : index
    %c0_1 = arith.constant 0 : index
    %c0_2 = arith.constant 0 : index
    %0 = vector.load %arg1[%c0, %c0_0, %c0_1, %c0_2] : memref<1x16x16x32xf32, #tpu.memory_space<vmem>>, vector<1x16x16x32xf32>
    %1 = vector.shape_cast %0 : vector<1x16x16x32xf32> to vector<16x16x32xf32>
    %c1 = arith.constant 1 : index
    %c1_3 = arith.constant 1 : index
    %c0_4 = arith.constant 0 : index
    %2 = vector.load %arg13[%c1, %c1_3, %c0_4] : memref<18x18x32xf32, #tpu.memory_space<vmem>>, vector<16x16x32xf32>
    tpu.vector_store %arg13[%c1, %c1_3, %c0_4], %1 {strides = array<i32>} : memref<18x18x32xf32, #tpu.memory_space<vmem>>, vector<16x16x32xf32>,
    %3 = vector.extract_strided_slice %1 {offsets = [0, 1, 0], sizes = [16, 1, 32], strides = [1, 1, 1]} : vector<16x16x32xf32> to vector<16x1x32xf32>
    %c1_5 = arith.constant 1 : index
    %c0_6 = arith.constant 0 : index
    %c0_7 = arith.constant 0 : index
    %4 = vector.load %arg13[%c1_5, %c0_6, %c0_7] : memref<18x18x32xf32, #tpu.memory_space<vmem>>, vector<16x1x32xf32>
    tpu.vector_store %arg13[%c1_5, %c0_6, %c0_7], %3 {strides = array<i32>} : memref<18x18x32xf32, #tpu.memory_space<vmem>>, vector<16x1x32xf32>,
    %5 = vector.extract_strided_slice %1 {offsets = [0, 14, 0], sizes = [16, 1, 32], strides = [1, 1, 1]} : vector<16x16x32xf32> to vector<16x1x32xf32>
    %c1_8 = arith.constant 1 : index
    %c17 = arith.constant 17 : index
    %c0_9 = arith.constant 0 : index
    %6 = vector.load %arg13[%c1_8, %c17, %c0_9] : memref<18x18x32xf32, #tpu.memory_space<vmem>>, vector<16x1x32xf32>
    tpu.vector_store %arg13[%c1_8, %c17, %c0_9], %5 {strides = array<i32>} : memref<18x18x32xf32, #tpu.memory_space<vmem>>, vector<16x1x32xf32>,
    %7 = vector.extract_strided_slice %1 {offsets = [1, 0, 0], sizes = [1, 16, 32], strides = [1, 1, 1]} : vector<16x16x32xf32> to vector<1x16x32xf32>
    %c0_10 = arith.constant 0 : index
    %c1_11 = arith.constant 1 : index
    %c0_12 = arith.constant 0 : index
    %8 = vector.load %arg13[%c0_10, %c1_11, %c0_12] : memref<18x18x32xf32, #tpu.memory_space<vmem>>, vector<1x16x32xf32>
    tpu.vector_store %arg13[%c0_10, %c1_11, %c0_12], %7 {strides = array<i32>} : memref<18x18x32xf32, #tpu.memory_space<vmem>>, vector<1x16x32xf32>,
    %9 = vector.extract_strided_slice %1 {offsets = [1, 1, 0], sizes = [1, 1, 32], strides = [1, 1, 1]} : vector<16x16x32xf32> to vector<1x1x32xf32>
    %c0_13 = arith.constant 0 : index
    %c0_14 = arith.constant 0 : index
    %c0_15 = arith.constant 0 : index
    %10 = vector.load %arg13[%c0_13, %c0_14, %c0_15] : memref<18x18x32xf32, #tpu.memory_space<vmem>>, vector<1x1x32xf32>
    tpu.vector_store %arg13[%c0_13, %c0_14, %c0_15], %9 {strides = array<i32>} : memref<18x18x32xf32, #tpu.memory_space<vmem>>, vector<1x1x32xf32>,
    %11 = vector.extract_strided_slice %1 {offsets = [1, 14, 0], sizes = [1, 1, 32], strides = [1, 1, 1]} : vector<16x16x32xf32> to vector<1x1x32xf32>
    %c0_16 = arith.constant 0 : index
    %c17_17 = arith.constant 17 : index
    %c0_18 = arith.constant 0 : index
    %12 = vector.load %arg13[%c0_16, %c17_17, %c0_18] : memref<18x18x32xf32, #tpu.memory_space<vmem>>, vector<1x1x32xf32>
    tpu.vector_store %arg13[%c0_16, %c17_17, %c0_18], %11 {strides = array<i32>} : memref<18x18x32xf32, #tpu.memory_space<vmem>>, vector<1x1x32xf32>,
    %13 = vector.extract_strided_slice %1 {offsets = [14, 0, 0], sizes = [1, 16, 32], strides = [1, 1, 1]} : vector<16x16x32xf32> to vector<1x16x32xf32>
    %c17_19 = arith.constant 17 : index
    %c1_20 = arith.constant 1 : index
    %c0_21 = arith.constant 0 : index
    %14 = vector.load %arg13[%c17_19, %c1_20, %c0_21] : memref<18x18x32xf32, #tpu.memory_space<vmem>>, vector<1x16x32xf32>
    tpu.vector_store %arg13[%c17_19, %c1_20, %c0_21], %13 {strides = array<i32>} : memref<18x18x32xf32, #tpu.memory_space<vmem>>, vector<1x16x32xf32>,
    %15 = vector.extract_strided_slice %1 {offsets = [14, 1, 0], sizes = [1, 1, 32], strides = [1, 1, 1]} : vector<16x16x32xf32> to vector<1x1x32xf32>
    %c17_22 = arith.constant 17 : index
    %c0_23 = arith.constant 0 : index
    %c0_24 = arith.constant 0 : index
    %16 = vector.load %arg13[%c17_22, %c0_23, %c0_24] : memref<18x18x32xf32, #tpu.memory_space<vmem>>, vector<1x1x32xf32>
    tpu.vector_store %arg13[%c17_22, %c0_23, %c0_24], %15 {strides = array<i32>} : memref<18x18x32xf32, #tpu.memory_space<vmem>>, vector<1x1x32xf32>,
    %17 = vector.extract_strided_slice %1 {offsets = [14, 14, 0], sizes = [1, 1, 32], strides = [1, 1, 1]} : vector<16x16x32xf32> to vector<1x1x32xf32>
    %c17_25 = arith.constant 17 : index
    %c17_26 = arith.constant 17 : index
    %c0_27 = arith.constant 0 : index
    %18 = vector.load %arg13[%c17_25, %c17_26, %c0_27] : memref<18x18x32xf32, #tpu.memory_space<vmem>>, vector<1x1x32xf32>
    tpu.vector_store %arg13[%c17_25, %c17_26, %c0_27], %17 {strides = array<i32>} : memref<18x18x32xf32, #tpu.memory_space<vmem>>, vector<1x1x32xf32>,
    %c0_28 = arith.constant 0 : index
    %c0_29 = arith.constant 0 : index
    %19 = vector.load %arg2[%c0_28, %c0_29] : memref<288x32xbf16, #tpu.memory_space<vmem>>, vector<288x32xbf16>
    %c0_30 = arith.constant 0 : index
    %c0_31 = arith.constant 0 : index
    %20 = vector.load %arg3[%c0_30, %c0_31] : memref<1x32xf32, #tpu.memory_space<vmem>>, vector<1x32xf32>
    %c0_32 = arith.constant 0 : index
    %c0_33 = arith.constant 0 : index
    %c0_34 = arith.constant 0 : index
    %21 = vector.load %arg13[%c0_32, %c0_33, %c0_34] : memref<18x18x32xf32, #tpu.memory_space<vmem>>, vector<16x16x32xf32>
    %22 = vector.shape_cast %21 : vector<16x16x32xf32> to vector<256x32xf32>
    %c0_35 = arith.constant 0 : index
    %c1_36 = arith.constant 1 : index
    %c0_37 = arith.constant 0 : index
    %23 = vector.load %arg13[%c0_35, %c1_36, %c0_37] : memref<18x18x32xf32, #tpu.memory_space<vmem>>, vector<16x16x32xf32>
    %24 = vector.shape_cast %23 : vector<16x16x32xf32> to vector<256x32xf32>
    %c0_38 = arith.constant 0 : index
    %c2 = arith.constant 2 : index
    %c0_39 = arith.constant 0 : index
    %25 = vector.load %arg13[%c0_38, %c2, %c0_39] : memref<18x18x32xf32, #tpu.memory_space<vmem>>, vector<16x16x32xf32>
    %26 = vector.shape_cast %25 : vector<16x16x32xf32> to vector<256x32xf32>
    %c1_40 = arith.constant 1 : index
    %c0_41 = arith.constant 0 : index
    %c0_42 = arith.constant 0 : index
    %27 = vector.load %arg13[%c1_40, %c0_41, %c0_42] : memref<18x18x32xf32, #tpu.memory_space<vmem>>, vector<16x16x32xf32>
    %28 = vector.shape_cast %27 : vector<16x16x32xf32> to vector<256x32xf32>
    %c1_43 = arith.constant 1 : index
    %c1_44 = arith.constant 1 : index
    %c0_45 = arith.constant 0 : index
    %29 = vector.load %arg13[%c1_43, %c1_44, %c0_45] : memref<18x18x32xf32, #tpu.memory_space<vmem>>, vector<16x16x32xf32>
    %30 = vector.shape_cast %29 : vector<16x16x32xf32> to vector<256x32xf32>
    %c1_46 = arith.constant 1 : index
    %c2_47 = arith.constant 2 : index
    %c0_48 = arith.constant 0 : index
    %31 = vector.load %arg13[%c1_46, %c2_47, %c0_48] : memref<18x18x32xf32, #tpu.memory_space<vmem>>, vector<16x16x32xf32>
    %32 = vector.shape_cast %31 : vector<16x16x32xf32> to vector<256x32xf32>
    %c2_49 = arith.constant 2 : index
    %c0_50 = arith.constant 0 : index
    %c0_51 = arith.constant 0 : index
    %33 = vector.load %arg13[%c2_49, %c0_50, %c0_51] : memref<18x18x32xf32, #tpu.memory_space<vmem>>, vector<16x16x32xf32>
    %34 = vector.shape_cast %33 : vector<16x16x32xf32> to vector<256x32xf32>
    %c2_52 = arith.constant 2 : index
    %c1_53 = arith.constant 1 : index
    %c0_54 = arith.constant 0 : index
    %35 = vector.load %arg13[%c2_52, %c1_53, %c0_54] : memref<18x18x32xf32, #tpu.memory_space<vmem>>, vector<16x16x32xf32>
    %36 = vector.shape_cast %35 : vector<16x16x32xf32> to vector<256x32xf32>
    %c2_55 = arith.constant 2 : index
    %c2_56 = arith.constant 2 : index
    %c0_57 = arith.constant 0 : index
    %37 = vector.load %arg13[%c2_55, %c2_56, %c0_57] : memref<18x18x32xf32, #tpu.memory_space<vmem>>, vector<16x16x32xf32>
    %38 = vector.shape_cast %37 : vector<16x16x32xf32> to vector<256x32xf32>
    %39 = tpu.concatenate %22, %24, %26, %28, %30, %32, %34, %36, %38 in 1 : vector<256x32xf32>, vector<256x32xf32>, vector<256x32xf32>, vector<256x32xf32>, vector<256x32xf32>, vector<256x32xf32>, vector<256x32xf32>, vector<256x32xf32>, vector<256x32xf32> -> vector<256x288xf32>
    %40 = arith.truncf %39 : vector<256x288xf32> to vector<256x288xbf16>
    %cst = arith.constant dense<0.000000e+00> : vector<256x32xf32>
    %41 = tpu.matmul %40, %19, %cst {dimension_numbers = #tpu.dot_dimension_numbers<[1], [0], [0], [1], [0, 0, 1, 1], [], []>} : vector<256x288xbf16>, vector<288x32xbf16>, vector<256x32xf32> -> vector<256x32xf32>
    %42 = vector.broadcast %20 : vector<1x32xf32> to vector<256x32xf32>
    %43 = arith.addf %41, %42 : vector<256x32xf32>
    %cst_58 = arith.constant dense<0.000000e+00> : vector<32xf32>
    %44 = vector.multi_reduction <add>, %43, %cst_58 [0] : vector<256x32xf32> to vector<32xf32>
    %45 = vector.shape_cast %44 : vector<32xf32> to vector<1x32xf32>
    %cst_59 = arith.constant 3.906250e-03 : f32
    %46 = vector.broadcast %cst_59 : f32 to vector<1x32xf32>
    %47 = arith.mulf %45, %46 : vector<1x32xf32>
    %48 = arith.mulf %43, %43 : vector<256x32xf32>
    %cst_60 = arith.constant dense<0.000000e+00> : vector<32xf32>
    %49 = vector.multi_reduction <add>, %48, %cst_60 [0] : vector<256x32xf32> to vector<32xf32>
    %50 = vector.shape_cast %49 : vector<32xf32> to vector<1x32xf32>
    %cst_61 = arith.constant 3.906250e-03 : f32
    %51 = vector.broadcast %cst_61 : f32 to vector<1x32xf32>
    %52 = arith.mulf %50, %51 : vector<1x32xf32>
    %53 = arith.mulf %47, %47 : vector<1x32xf32>
    %54 = arith.subf %52, %53 : vector<1x32xf32>
    %cst_62 = arith.constant 0.000000e+00 : f32
    %55 = vector.broadcast %cst_62 : f32 to vector<1x32xf32>
    %56 = arith.maximumf %54, %55 : vector<1x32xf32>
    %57 = vector.broadcast %47 : vector<1x32xf32> to vector<256x32xf32>
    %58 = arith.subf %43, %57 : vector<256x32xf32>
    %cst_63 = arith.constant 9.99999974E-6 : f32
    %59 = vector.broadcast %cst_63 : f32 to vector<1x32xf32>
    %60 = arith.addf %56, %59 : vector<1x32xf32>
    %61 = math.rsqrt %60 : vector<1x32xf32>
    %62 = vector.broadcast %61 : vector<1x32xf32> to vector<256x32xf32>
    %63 = arith.mulf %58, %62 : vector<256x32xf32>
    %64 = vector.shape_cast %63 : vector<256x32xf32> to vector<16x16x32xf32>
    %cst_64 = arith.constant 0.000000e+00 : f32
    %65 = vector.broadcast %cst_64 : f32 to vector<1x18x32xf32>
    %c0_65 = arith.constant 0 : index
    %c0_66 = arith.constant 0 : index
    %c0_67 = arith.constant 0 : index
    %66 = vector.load %arg13[%c0_65, %c0_66, %c0_67] : memref<18x18x32xf32, #tpu.memory_space<vmem>>, vector<1x18x32xf32>
    tpu.vector_store %arg13[%c0_65, %c0_66, %c0_67], %65 {strides = array<i32>} : memref<18x18x32xf32, #tpu.memory_space<vmem>>, vector<1x18x32xf32>,
    %c17_68 = arith.constant 17 : index
    %c0_69 = arith.constant 0 : index
    %c0_70 = arith.constant 0 : index
    %67 = vector.load %arg13[%c17_68, %c0_69, %c0_70] : memref<18x18x32xf32, #tpu.memory_space<vmem>>, vector<1x18x32xf32>
    tpu.vector_store %arg13[%c17_68, %c0_69, %c0_70], %65 {strides = array<i32>} : memref<18x18x32xf32, #tpu.memory_space<vmem>>, vector<1x18x32xf32>,
    %cst_71 = arith.constant 0.000000e+00 : f32
    %68 = vector.broadcast %cst_71 : f32 to vector<16x1x32xf32>
    %c1_72 = arith.constant 1 : index
    %c0_73 = arith.constant 0 : index
    %c0_74 = arith.constant 0 : index
    %69 = vector.load %arg13[%c1_72, %c0_73, %c0_74] : memref<18x18x32xf32, #tpu.memory_space<vmem>>, vector<16x1x32xf32>
    tpu.vector_store %arg13[%c1_72, %c0_73, %c0_74], %68 {strides = array<i32>} : memref<18x18x32xf32, #tpu.memory_space<vmem>>, vector<16x1x32xf32>,
    %c1_75 = arith.constant 1 : index
    %c17_76 = arith.constant 17 : index
    %c0_77 = arith.constant 0 : index
    %70 = vector.load %arg13[%c1_75, %c17_76, %c0_77] : memref<18x18x32xf32, #tpu.memory_space<vmem>>, vector<16x1x32xf32>
    tpu.vector_store %arg13[%c1_75, %c17_76, %c0_77], %68 {strides = array<i32>} : memref<18x18x32xf32, #tpu.memory_space<vmem>>, vector<16x1x32xf32>,
    %c1_78 = arith.constant 1 : index
    %c1_79 = arith.constant 1 : index
    %c0_80 = arith.constant 0 : index
    %71 = vector.load %arg13[%c1_78, %c1_79, %c0_80] : memref<18x18x32xf32, #tpu.memory_space<vmem>>, vector<16x16x32xf32>
    tpu.vector_store %arg13[%c1_78, %c1_79, %c0_80], %64 {strides = array<i32>} : memref<18x18x32xf32, #tpu.memory_space<vmem>>, vector<16x16x32xf32>,
    %c0_81 = arith.constant 0 : index
    %c0_82 = arith.constant 0 : index
    %72 = vector.load %arg4[%c0_81, %c0_82] : memref<9x32xf32, #tpu.memory_space<vmem>>, vector<9x32xf32>
    %c0_83 = arith.constant 0 : index
    %c0_84 = arith.constant 0 : index
    %73 = vector.load %arg5[%c0_83, %c0_84] : memref<1x32xf32, #tpu.memory_space<vmem>>, vector<1x32xf32>
    %74 = vector.shape_cast %73 : vector<1x32xf32> to vector<1x1x32xf32>
    %75 = vector.shape_cast %74 : vector<1x1x32xf32> to vector<1x1x32xf32>
    %76 = vector.broadcast %75 : vector<1x1x32xf32> to vector<16x16x32xf32>
    %c0_85 = arith.constant 0 : index
    %c0_86 = arith.constant 0 : index
    %c0_87 = arith.constant 0 : index
    %77 = vector.load %arg13[%c0_85, %c0_86, %c0_87] : memref<18x18x32xf32, #tpu.memory_space<vmem>>, vector<16x16x32xf32>
    %78 = vector.extract_strided_slice %72 {offsets = [0, 0], sizes = [1, 32], strides = [1, 1]} : vector<9x32xf32> to vector<1x32xf32>
    %79 = vector.shape_cast %78 : vector<1x32xf32> to vector<1x1x32xf32>
    %80 = vector.broadcast %79 : vector<1x1x32xf32> to vector<16x16x32xf32>
    %81 = arith.mulf %77, %80 : vector<16x16x32xf32>
    %82 = arith.addf %76, %81 : vector<16x16x32xf32>
    %c0_88 = arith.constant 0 : index
    %c1_89 = arith.constant 1 : index
    %c0_90 = arith.constant 0 : index
    %83 = vector.load %arg13[%c0_88, %c1_89, %c0_90] : memref<18x18x32xf32, #tpu.memory_space<vmem>>, vector<16x16x32xf32>
    %84 = vector.extract_strided_slice %72 {offsets = [1, 0], sizes = [1, 32], strides = [1, 1]} : vector<9x32xf32> to vector<1x32xf32>
    %85 = vector.shape_cast %84 : vector<1x32xf32> to vector<1x1x32xf32>
    %86 = vector.broadcast %85 : vector<1x1x32xf32> to vector<16x16x32xf32>
    %87 = arith.mulf %83, %86 : vector<16x16x32xf32>
    %88 = arith.addf %82, %87 : vector<16x16x32xf32>
    %c0_91 = arith.constant 0 : index
    %c2_92 = arith.constant 2 : index
    %c0_93 = arith.constant 0 : index
    %89 = vector.load %arg13[%c0_91, %c2_92, %c0_93] : memref<18x18x32xf32, #tpu.memory_space<vmem>>, vector<16x16x32xf32>
    %90 = vector.extract_strided_slice %72 {offsets = [2, 0], sizes = [1, 32], strides = [1, 1]} : vector<9x32xf32> to vector<1x32xf32>
    %91 = vector.shape_cast %90 : vector<1x32xf32> to vector<1x1x32xf32>
    %92 = vector.broadcast %91 : vector<1x1x32xf32> to vector<16x16x32xf32>
    %93 = arith.mulf %89, %92 : vector<16x16x32xf32>
    %94 = arith.addf %88, %93 : vector<16x16x32xf32>
    %c1_94 = arith.constant 1 : index
    %c0_95 = arith.constant 0 : index
    %c0_96 = arith.constant 0 : index
    %95 = vector.load %arg13[%c1_94, %c0_95, %c0_96] : memref<18x18x32xf32, #tpu.memory_space<vmem>>, vector<16x16x32xf32>
    %96 = vector.extract_strided_slice %72 {offsets = [3, 0], sizes = [1, 32], strides = [1, 1]} : vector<9x32xf32> to vector<1x32xf32>
    %97 = vector.shape_cast %96 : vector<1x32xf32> to vector<1x1x32xf32>
    %98 = vector.broadcast %97 : vector<1x1x32xf32> to vector<16x16x32xf32>
    %99 = arith.mulf %95, %98 : vector<16x16x32xf32>
    %100 = arith.addf %94, %99 : vector<16x16x32xf32>
    %c1_97 = arith.constant 1 : index
    %c1_98 = arith.constant 1 : index
    %c0_99 = arith.constant 0 : index
    %101 = vector.load %arg13[%c1_97, %c1_98, %c0_99] : memref<18x18x32xf32, #tpu.memory_space<vmem>>, vector<16x16x32xf32>
    %102 = vector.extract_strided_slice %72 {offsets = [4, 0], sizes = [1, 32], strides = [1, 1]} : vector<9x32xf32> to vector<1x32xf32>
    %103 = vector.shape_cast %102 : vector<1x32xf32> to vector<1x1x32xf32>
    %104 = vector.broadcast %103 : vector<1x1x32xf32> to vector<16x16x32xf32>
    %105 = arith.mulf %101, %104 : vector<16x16x32xf32>
    %106 = arith.addf %100, %105 : vector<16x16x32xf32>
    %c1_100 = arith.constant 1 : index
    %c2_101 = arith.constant 2 : index
    %c0_102 = arith.constant 0 : index
    %107 = vector.load %arg13[%c1_100, %c2_101, %c0_102] : memref<18x18x32xf32, #tpu.memory_space<vmem>>, vector<16x16x32xf32>
    %108 = vector.extract_strided_slice %72 {offsets = [5, 0], sizes = [1, 32], strides = [1, 1]} : vector<9x32xf32> to vector<1x32xf32>
    %109 = vector.shape_cast %108 : vector<1x32xf32> to vector<1x1x32xf32>
    %110 = vector.broadcast %109 : vector<1x1x32xf32> to vector<16x16x32xf32>
    %111 = arith.mulf %107, %110 : vector<16x16x32xf32>
    %112 = arith.addf %106, %111 : vector<16x16x32xf32>
    %c2_103 = arith.constant 2 : index
    %c0_104 = arith.constant 0 : index
    %c0_105 = arith.constant 0 : index
    %113 = vector.load %arg13[%c2_103, %c0_104, %c0_105] : memref<18x18x32xf32, #tpu.memory_space<vmem>>, vector<16x16x32xf32>
    %114 = vector.extract_strided_slice %72 {offsets = [6, 0], sizes = [1, 32], strides = [1, 1]} : vector<9x32xf32> to vector<1x32xf32>
    %115 = vector.shape_cast %114 : vector<1x32xf32> to vector<1x1x32xf32>
    %116 = vector.broadcast %115 : vector<1x1x32xf32> to vector<16x16x32xf32>
    %117 = arith.mulf %113, %116 : vector<16x16x32xf32>
    %118 = arith.addf %112, %117 : vector<16x16x32xf32>
    %c2_106 = arith.constant 2 : index
    %c1_107 = arith.constant 1 : index
    %c0_108 = arith.constant 0 : index
    %119 = vector.load %arg13[%c2_106, %c1_107, %c0_108] : memref<18x18x32xf32, #tpu.memory_space<vmem>>, vector<16x16x32xf32>
    %120 = vector.extract_strided_slice %72 {offsets = [7, 0], sizes = [1, 32], strides = [1, 1]} : vector<9x32xf32> to vector<1x32xf32>
    %121 = vector.shape_cast %120 : vector<1x32xf32> to vector<1x1x32xf32>
    %122 = vector.broadcast %121 : vector<1x1x32xf32> to vector<16x16x32xf32>
    %123 = arith.mulf %119, %122 : vector<16x16x32xf32>
    %124 = arith.addf %118, %123 : vector<16x16x32xf32>
    %c2_109 = arith.constant 2 : index
    %c2_110 = arith.constant 2 : index
    %c0_111 = arith.constant 0 : index
    %125 = vector.load %arg13[%c2_109, %c2_110, %c0_111] : memref<18x18x32xf32, #tpu.memory_space<vmem>>, vector<16x16x32xf32>
    %126 = vector.extract_strided_slice %72 {offsets = [8, 0], sizes = [1, 32], strides = [1, 1]} : vector<9x32xf32> to vector<1x32xf32>
    %127 = vector.shape_cast %126 : vector<1x32xf32> to vector<1x1x32xf32>
    %128 = vector.broadcast %127 : vector<1x1x32xf32> to vector<16x16x32xf32>
    %129 = arith.mulf %125, %128 : vector<16x16x32xf32>
    %130 = arith.addf %124, %129 : vector<16x16x32xf32>
    %131 = vector.shape_cast %130 : vector<16x16x32xf32> to vector<256x32xf32>
    %cst_112 = arith.constant dense<0.000000e+00> : vector<32xf32>
    %132 = vector.multi_reduction <add>, %131, %cst_112 [0] : vector<256x32xf32> to vector<32xf32>
    %133 = vector.shape_cast %132 : vector<32xf32> to vector<1x32xf32>
    %cst_113 = arith.constant 3.906250e-03 : f32
    %134 = vector.broadcast %cst_113 : f32 to vector<1x32xf32>
    %135 = arith.mulf %133, %134 : vector<1x32xf32>
    %136 = arith.mulf %131, %131 : vector<256x32xf32>
    %cst_114 = arith.constant dense<0.000000e+00> : vector<32xf32>
    %137 = vector.multi_reduction <add>, %136, %cst_114 [0] : vector<256x32xf32> to vector<32xf32>
    %138 = vector.shape_cast %137 : vector<32xf32> to vector<1x32xf32>
    %cst_115 = arith.constant 3.906250e-03 : f32
    %139 = vector.broadcast %cst_115 : f32 to vector<1x32xf32>
    %140 = arith.mulf %138, %139 : vector<1x32xf32>
    %141 = arith.mulf %135, %135 : vector<1x32xf32>
    %142 = arith.subf %140, %141 : vector<1x32xf32>
    %cst_116 = arith.constant 0.000000e+00 : f32
    %143 = vector.broadcast %cst_116 : f32 to vector<1x32xf32>
    %144 = arith.maximumf %142, %143 : vector<1x32xf32>
    %145 = vector.broadcast %135 : vector<1x32xf32> to vector<256x32xf32>
    %146 = arith.subf %131, %145 : vector<256x32xf32>
    %cst_117 = arith.constant 9.99999974E-6 : f32
    %147 = vector.broadcast %cst_117 : f32 to vector<1x32xf32>
    %148 = arith.addf %144, %147 : vector<1x32xf32>
    %149 = math.rsqrt %148 : vector<1x32xf32>
    %150 = vector.broadcast %149 : vector<1x32xf32> to vector<256x32xf32>
    %151 = arith.mulf %146, %150 : vector<256x32xf32>
    %152 = vector.shape_cast %151 : vector<256x32xf32> to vector<16x16x32xf32>
    %153 = arith.maximumf %64, %152 : vector<16x16x32xf32>
    %c1_118 = arith.constant 1 : index
    %c1_119 = arith.constant 1 : index
    %c0_120 = arith.constant 0 : index
    %154 = vector.load %arg13[%c1_118, %c1_119, %c0_120] : memref<18x18x32xf32, #tpu.memory_space<vmem>>, vector<16x16x32xf32>
    tpu.vector_store %arg13[%c1_118, %c1_119, %c0_120], %153 {strides = array<i32>} : memref<18x18x32xf32, #tpu.memory_space<vmem>>, vector<16x16x32xf32>,
    %155 = vector.extract_strided_slice %153 {offsets = [0, 1, 0], sizes = [16, 1, 32], strides = [1, 1, 1]} : vector<16x16x32xf32> to vector<16x1x32xf32>
    %c1_121 = arith.constant 1 : index
    %c0_122 = arith.constant 0 : index
    %c0_123 = arith.constant 0 : index
    %156 = vector.load %arg13[%c1_121, %c0_122, %c0_123] : memref<18x18x32xf32, #tpu.memory_space<vmem>>, vector<16x1x32xf32>
    tpu.vector_store %arg13[%c1_121, %c0_122, %c0_123], %155 {strides = array<i32>} : memref<18x18x32xf32, #tpu.memory_space<vmem>>, vector<16x1x32xf32>,
    %157 = vector.extract_strided_slice %153 {offsets = [0, 14, 0], sizes = [16, 1, 32], strides = [1, 1, 1]} : vector<16x16x32xf32> to vector<16x1x32xf32>
    %c1_124 = arith.constant 1 : index
    %c17_125 = arith.constant 17 : index
    %c0_126 = arith.constant 0 : index
    %158 = vector.load %arg13[%c1_124, %c17_125, %c0_126] : memref<18x18x32xf32, #tpu.memory_space<vmem>>, vector<16x1x32xf32>
    tpu.vector_store %arg13[%c1_124, %c17_125, %c0_126], %157 {strides = array<i32>} : memref<18x18x32xf32, #tpu.memory_space<vmem>>, vector<16x1x32xf32>,
    %159 = vector.extract_strided_slice %153 {offsets = [1, 0, 0], sizes = [1, 16, 32], strides = [1, 1, 1]} : vector<16x16x32xf32> to vector<1x16x32xf32>
    %c0_127 = arith.constant 0 : index
    %c1_128 = arith.constant 1 : index
    %c0_129 = arith.constant 0 : index
    %160 = vector.load %arg13[%c0_127, %c1_128, %c0_129] : memref<18x18x32xf32, #tpu.memory_space<vmem>>, vector<1x16x32xf32>
    tpu.vector_store %arg13[%c0_127, %c1_128, %c0_129], %159 {strides = array<i32>} : memref<18x18x32xf32, #tpu.memory_space<vmem>>, vector<1x16x32xf32>,
    %161 = vector.extract_strided_slice %153 {offsets = [1, 1, 0], sizes = [1, 1, 32], strides = [1, 1, 1]} : vector<16x16x32xf32> to vector<1x1x32xf32>
    %c0_130 = arith.constant 0 : index
    %c0_131 = arith.constant 0 : index
    %c0_132 = arith.constant 0 : index
    %162 = vector.load %arg13[%c0_130, %c0_131, %c0_132] : memref<18x18x32xf32, #tpu.memory_space<vmem>>, vector<1x1x32xf32>
    tpu.vector_store %arg13[%c0_130, %c0_131, %c0_132], %161 {strides = array<i32>} : memref<18x18x32xf32, #tpu.memory_space<vmem>>, vector<1x1x32xf32>,
    %163 = vector.extract_strided_slice %153 {offsets = [1, 14, 0], sizes = [1, 1, 32], strides = [1, 1, 1]} : vector<16x16x32xf32> to vector<1x1x32xf32>
    %c0_133 = arith.constant 0 : index
    %c17_134 = arith.constant 17 : index
    %c0_135 = arith.constant 0 : index
    %164 = vector.load %arg13[%c0_133, %c17_134, %c0_135] : memref<18x18x32xf32, #tpu.memory_space<vmem>>, vector<1x1x32xf32>
    tpu.vector_store %arg13[%c0_133, %c17_134, %c0_135], %163 {strides = array<i32>} : memref<18x18x32xf32, #tpu.memory_space<vmem>>, vector<1x1x32xf32>,
    %165 = vector.extract_strided_slice %153 {offsets = [14, 0, 0], sizes = [1, 16, 32], strides = [1, 1, 1]} : vector<16x16x32xf32> to vector<1x16x32xf32>
    %c17_136 = arith.constant 17 : index
    %c1_137 = arith.constant 1 : index
    %c0_138 = arith.constant 0 : index
    %166 = vector.load %arg13[%c17_136, %c1_137, %c0_138] : memref<18x18x32xf32, #tpu.memory_space<vmem>>, vector<1x16x32xf32>
    tpu.vector_store %arg13[%c17_136, %c1_137, %c0_138], %165 {strides = array<i32>} : memref<18x18x32xf32, #tpu.memory_space<vmem>>, vector<1x16x32xf32>,
    %167 = vector.extract_strided_slice %153 {offsets = [14, 1, 0], sizes = [1, 1, 32], strides = [1, 1, 1]} : vector<16x16x32xf32> to vector<1x1x32xf32>
    %c17_139 = arith.constant 17 : index
    %c0_140 = arith.constant 0 : index
    %c0_141 = arith.constant 0 : index
    %168 = vector.load %arg13[%c17_139, %c0_140, %c0_141] : memref<18x18x32xf32, #tpu.memory_space<vmem>>, vector<1x1x32xf32>
    tpu.vector_store %arg13[%c17_139, %c0_140, %c0_141], %167 {strides = array<i32>} : memref<18x18x32xf32, #tpu.memory_space<vmem>>, vector<1x1x32xf32>,
    %169 = vector.extract_strided_slice %153 {offsets = [14, 14, 0], sizes = [1, 1, 32], strides = [1, 1, 1]} : vector<16x16x32xf32> to vector<1x1x32xf32>
    %c17_142 = arith.constant 17 : index
    %c17_143 = arith.constant 17 : index
    %c0_144 = arith.constant 0 : index
    %170 = vector.load %arg13[%c17_142, %c17_143, %c0_144] : memref<18x18x32xf32, #tpu.memory_space<vmem>>, vector<1x1x32xf32>
    tpu.vector_store %arg13[%c17_142, %c17_143, %c0_144], %169 {strides = array<i32>} : memref<18x18x32xf32, #tpu.memory_space<vmem>>, vector<1x1x32xf32>,
    %c0_145 = arith.constant 0 : index
    %c0_146 = arith.constant 0 : index
    %171 = vector.load %arg6[%c0_145, %c0_146] : memref<288x32xbf16, #tpu.memory_space<vmem>>, vector<288x32xbf16>
    %c0_147 = arith.constant 0 : index
    %c0_148 = arith.constant 0 : index
    %172 = vector.load %arg7[%c0_147, %c0_148] : memref<1x32xf32, #tpu.memory_space<vmem>>, vector<1x32xf32>
    %c0_149 = arith.constant 0 : index
    %c0_150 = arith.constant 0 : index
    %c0_151 = arith.constant 0 : index
    %173 = vector.load %arg13[%c0_149, %c0_150, %c0_151] : memref<18x18x32xf32, #tpu.memory_space<vmem>>, vector<16x16x32xf32>
    %174 = vector.shape_cast %173 : vector<16x16x32xf32> to vector<256x32xf32>
    %c0_152 = arith.constant 0 : index
    %c1_153 = arith.constant 1 : index
    %c0_154 = arith.constant 0 : index
    %175 = vector.load %arg13[%c0_152, %c1_153, %c0_154] : memref<18x18x32xf32, #tpu.memory_space<vmem>>, vector<16x16x32xf32>
    %176 = vector.shape_cast %175 : vector<16x16x32xf32> to vector<256x32xf32>
    %c0_155 = arith.constant 0 : index
    %c2_156 = arith.constant 2 : index
    %c0_157 = arith.constant 0 : index
    %177 = vector.load %arg13[%c0_155, %c2_156, %c0_157] : memref<18x18x32xf32, #tpu.memory_space<vmem>>, vector<16x16x32xf32>
    %178 = vector.shape_cast %177 : vector<16x16x32xf32> to vector<256x32xf32>
    %c1_158 = arith.constant 1 : index
    %c0_159 = arith.constant 0 : index
    %c0_160 = arith.constant 0 : index
    %179 = vector.load %arg13[%c1_158, %c0_159, %c0_160] : memref<18x18x32xf32, #tpu.memory_space<vmem>>, vector<16x16x32xf32>
    %180 = vector.shape_cast %179 : vector<16x16x32xf32> to vector<256x32xf32>
    %c1_161 = arith.constant 1 : index
    %c1_162 = arith.constant 1 : index
    %c0_163 = arith.constant 0 : index
    %181 = vector.load %arg13[%c1_161, %c1_162, %c0_163] : memref<18x18x32xf32, #tpu.memory_space<vmem>>, vector<16x16x32xf32>
    %182 = vector.shape_cast %181 : vector<16x16x32xf32> to vector<256x32xf32>
    %c1_164 = arith.constant 1 : index
    %c2_165 = arith.constant 2 : index
    %c0_166 = arith.constant 0 : index
    %183 = vector.load %arg13[%c1_164, %c2_165, %c0_166] : memref<18x18x32xf32, #tpu.memory_space<vmem>>, vector<16x16x32xf32>
    %184 = vector.shape_cast %183 : vector<16x16x32xf32> to vector<256x32xf32>
    %c2_167 = arith.constant 2 : index
    %c0_168 = arith.constant 0 : index
    %c0_169 = arith.constant 0 : index
    %185 = vector.load %arg13[%c2_167, %c0_168, %c0_169] : memref<18x18x32xf32, #tpu.memory_space<vmem>>, vector<16x16x32xf32>
    %186 = vector.shape_cast %185 : vector<16x16x32xf32> to vector<256x32xf32>
    %c2_170 = arith.constant 2 : index
    %c1_171 = arith.constant 1 : index
    %c0_172 = arith.constant 0 : index
    %187 = vector.load %arg13[%c2_170, %c1_171, %c0_172] : memref<18x18x32xf32, #tpu.memory_space<vmem>>, vector<16x16x32xf32>
    %188 = vector.shape_cast %187 : vector<16x16x32xf32> to vector<256x32xf32>
    %c2_173 = arith.constant 2 : index
    %c2_174 = arith.constant 2 : index
    %c0_175 = arith.constant 0 : index
    %189 = vector.load %arg13[%c2_173, %c2_174, %c0_175] : memref<18x18x32xf32, #tpu.memory_space<vmem>>, vector<16x16x32xf32>
    %190 = vector.shape_cast %189 : vector<16x16x32xf32> to vector<256x32xf32>
    %191 = tpu.concatenate %174, %176, %178, %180, %182, %184, %186, %188, %190 in 1 : vector<256x32xf32>, vector<256x32xf32>, vector<256x32xf32>, vector<256x32xf32>, vector<256x32xf32>, vector<256x32xf32>, vector<256x32xf32>, vector<256x32xf32>, vector<256x32xf32> -> vector<256x288xf32>
    %192 = arith.truncf %191 : vector<256x288xf32> to vector<256x288xbf16>
    %cst_176 = arith.constant dense<0.000000e+00> : vector<256x32xf32>
    %193 = tpu.matmul %192, %171, %cst_176 {dimension_numbers = #tpu.dot_dimension_numbers<[1], [0], [0], [1], [0, 0, 1, 1], [], []>} : vector<256x288xbf16>, vector<288x32xbf16>, vector<256x32xf32> -> vector<256x32xf32>
    %194 = vector.broadcast %172 : vector<1x32xf32> to vector<256x32xf32>
    %195 = arith.addf %193, %194 : vector<256x32xf32>
    %cst_177 = arith.constant dense<0.000000e+00> : vector<32xf32>
    %196 = vector.multi_reduction <add>, %195, %cst_177 [0] : vector<256x32xf32> to vector<32xf32>
    %197 = vector.shape_cast %196 : vector<32xf32> to vector<1x32xf32>
    %cst_178 = arith.constant 3.906250e-03 : f32
    %198 = vector.broadcast %cst_178 : f32 to vector<1x32xf32>
    %199 = arith.mulf %197, %198 : vector<1x32xf32>
    %200 = arith.mulf %195, %195 : vector<256x32xf32>
    %cst_179 = arith.constant dense<0.000000e+00> : vector<32xf32>
    %201 = vector.multi_reduction <add>, %200, %cst_179 [0] : vector<256x32xf32> to vector<32xf32>
    %202 = vector.shape_cast %201 : vector<32xf32> to vector<1x32xf32>
    %cst_180 = arith.constant 3.906250e-03 : f32
    %203 = vector.broadcast %cst_180 : f32 to vector<1x32xf32>
    %204 = arith.mulf %202, %203 : vector<1x32xf32>
    %205 = arith.mulf %199, %199 : vector<1x32xf32>
    %206 = arith.subf %204, %205 : vector<1x32xf32>
    %cst_181 = arith.constant 0.000000e+00 : f32
    %207 = vector.broadcast %cst_181 : f32 to vector<1x32xf32>
    %208 = arith.maximumf %206, %207 : vector<1x32xf32>
    %209 = vector.broadcast %199 : vector<1x32xf32> to vector<256x32xf32>
    %210 = arith.subf %195, %209 : vector<256x32xf32>
    %cst_182 = arith.constant 9.99999974E-6 : f32
    %211 = vector.broadcast %cst_182 : f32 to vector<1x32xf32>
    %212 = arith.addf %208, %211 : vector<1x32xf32>
    %213 = math.rsqrt %212 : vector<1x32xf32>
    %214 = vector.broadcast %213 : vector<1x32xf32> to vector<256x32xf32>
    %215 = arith.mulf %210, %214 : vector<256x32xf32>
    %cst_183 = arith.constant dense<0.000000e+00> : vector<32xf32>
    %216 = vector.multi_reduction <add>, %215, %cst_183 [0] : vector<256x32xf32> to vector<32xf32>
    %217 = vector.shape_cast %216 : vector<32xf32> to vector<1x32xf32>
    %cst_184 = arith.constant 3.906250e-03 : f32
    %218 = vector.broadcast %cst_184 : f32 to vector<1x32xf32>
    %219 = arith.mulf %217, %218 : vector<1x32xf32>
    %c0_185 = arith.constant 0 : index
    %c0_186 = arith.constant 0 : index
    %220 = vector.load %arg8[%c0_185, %c0_186] : memref<32x128xf32, #tpu.memory_space<vmem>>, vector<32x128xf32>
    %cst_187 = arith.constant dense<0.000000e+00> : vector<1x128xf32>
    %221 = tpu.matmul %219, %220, %cst_187 {dimension_numbers = #tpu.dot_dimension_numbers<[1], [0], [0], [1], [0, 0, 1, 1], [], []>} : vector<1x32xf32>, vector<32x128xf32>, vector<1x128xf32> -> vector<1x128xf32>
    %c0_188 = arith.constant 0 : index
    %c0_189 = arith.constant 0 : index
    %222 = vector.load %arg9[%c0_188, %c0_189] : memref<1x128xf32, #tpu.memory_space<vmem>>, vector<1x128xf32>
    %223 = arith.addf %221, %222 : vector<1x128xf32>
    %cst_190 = arith.constant 0.000000e+00 : f32
    %224 = vector.broadcast %cst_190 : f32 to vector<1x128xf32>
    %225 = arith.maximumf %223, %224 : vector<1x128xf32>
    %c0_191 = arith.constant 0 : index
    %c0_192 = arith.constant 0 : index
    %226 = vector.load %arg10[%c0_191, %c0_192] : memref<128x32xf32, #tpu.memory_space<vmem>>, vector<128x32xf32>
    %cst_193 = arith.constant dense<0.000000e+00> : vector<1x32xf32>
    %227 = tpu.matmul %225, %226, %cst_193 {dimension_numbers = #tpu.dot_dimension_numbers<[1], [0], [0], [1], [0, 0, 1, 1], [], []>} : vector<1x128xf32>, vector<128x32xf32>, vector<1x32xf32> -> vector<1x32xf32>
    %c0_194 = arith.constant 0 : index
    %c0_195 = arith.constant 0 : index
    %228 = vector.load %arg11[%c0_194, %c0_195] : memref<1x32xf32, #tpu.memory_space<vmem>>, vector<1x32xf32>
    %229 = arith.addf %227, %228 : vector<1x32xf32>
    %cst_196 = arith.constant 0.000000e+00 : f32
    %230 = vector.broadcast %cst_196 : f32 to vector<1x32xf32>
    %231 = arith.subf %230, %229 : vector<1x32xf32>
    %232 = math.exp %231 : vector<1x32xf32>
    %cst_197 = arith.constant 1.000000e+00 : f32
    %233 = vector.broadcast %cst_197 : f32 to vector<1x32xf32>
    %234 = arith.addf %233, %232 : vector<1x32xf32>
    %235 = tpu.reciprocal %234 {approx = true} : vector<1x32xf32> -> vector<1x32xf32>
    %236 = vector.shape_cast %215 : vector<256x32xf32> to vector<16x16x32xf32>
    %237 = vector.shape_cast %235 : vector<1x32xf32> to vector<1x1x32xf32>
    %238 = vector.broadcast %237 : vector<1x1x32xf32> to vector<16x16x32xf32>
    %239 = arith.mulf %236, %238 : vector<16x16x32xf32>
    %240 = arith.addf %239, %1 : vector<16x16x32xf32>
    %cst_198 = arith.constant 0.000000e+00 : f32
    %241 = vector.broadcast %cst_198 : f32 to vector<16x16x32xf32>
    %242 = arith.maximumf %240, %241 : vector<16x16x32xf32>
    %c0_199 = arith.constant 0 : index
    %c0_200 = arith.constant 0 : index
    %c0_201 = arith.constant 0 : index
    %c0_202 = arith.constant 0 : index
    %243 = vector.load %arg12[%c0_199, %c0_200, %c0_201, %c0_202] : memref<1x16x16x32xf32, #tpu.memory_space<vmem>>, vector<1x16x16x32xf32>
    %244 = vector.shape_cast %243 : vector<1x16x16x32xf32> to vector<16x16x32xf32>
    %245 = vector.shape_cast %242 : vector<16x16x32xf32> to vector<1x16x16x32xf32>
    tpu.vector_store %arg12[%c0_199, %c0_200, %c0_201, %c0_202], %245 {strides = array<i32>} : memref<1x16x16x32xf32, #tpu.memory_space<vmem>>, vector<1x16x16x32xf32>,
    return
  }
  func.func @transform_0(%arg0: i32) -> (i32, i32, i32, i32) {
    %c0_i32 = arith.constant 0 : i32
    %c0_i32_0 = arith.constant 0 : i32
    %c0_i32_1 = arith.constant 0 : i32
    %c0_i32_2 = arith.constant 0 : i32
    return %arg0, %c0_i32, %c0_i32_0, %c0_i32_1 : i32, i32, i32, i32
  }
  func.func @transform_1(%arg0: i32) -> (i32, i32) {
    %c0_i32 = arith.constant 0 : i32
    %c0_i32_0 = arith.constant 0 : i32
    %c0_i32_1 = arith.constant 0 : i32
    return %c0_i32, %c0_i32_0 : i32, i32
  }
  func.func @transform_2(%arg0: i32) -> (i32, i32) {
    %c0_i32 = arith.constant 0 : i32
    %c0_i32_0 = arith.constant 0 : i32
    %c0_i32_1 = arith.constant 0 : i32
    return %c0_i32, %c0_i32_0 : i32, i32
  }
  func.func @transform_3(%arg0: i32) -> (i32, i32) {
    %c0_i32 = arith.constant 0 : i32
    %c0_i32_0 = arith.constant 0 : i32
    %c0_i32_1 = arith.constant 0 : i32
    return %c0_i32, %c0_i32_0 : i32, i32
  }
  func.func @transform_4(%arg0: i32) -> (i32, i32) {
    %c0_i32 = arith.constant 0 : i32
    %c0_i32_0 = arith.constant 0 : i32
    %c0_i32_1 = arith.constant 0 : i32
    return %c0_i32, %c0_i32_0 : i32, i32
  }
  func.func @transform_5(%arg0: i32) -> (i32, i32) {
    %c0_i32 = arith.constant 0 : i32
    %c0_i32_0 = arith.constant 0 : i32
    %c0_i32_1 = arith.constant 0 : i32
    return %c0_i32, %c0_i32_0 : i32, i32
  }
  func.func @transform_6(%arg0: i32) -> (i32, i32) {
    %c0_i32 = arith.constant 0 : i32
    %c0_i32_0 = arith.constant 0 : i32
    %c0_i32_1 = arith.constant 0 : i32
    return %c0_i32, %c0_i32_0 : i32, i32
  }
  func.func @transform_7(%arg0: i32) -> (i32, i32) {
    %c0_i32 = arith.constant 0 : i32
    %c0_i32_0 = arith.constant 0 : i32
    %c0_i32_1 = arith.constant 0 : i32
    return %c0_i32, %c0_i32_0 : i32, i32
  }
  func.func @transform_8(%arg0: i32) -> (i32, i32) {
    %c0_i32 = arith.constant 0 : i32
    %c0_i32_0 = arith.constant 0 : i32
    %c0_i32_1 = arith.constant 0 : i32
    return %c0_i32, %c0_i32_0 : i32, i32
  }
  func.func @transform_9(%arg0: i32) -> (i32, i32) {
    %c0_i32 = arith.constant 0 : i32
    %c0_i32_0 = arith.constant 0 : i32
    %c0_i32_1 = arith.constant 0 : i32
    return %c0_i32, %c0_i32_0 : i32, i32
  }
  func.func @transform_10(%arg0: i32) -> (i32, i32) {
    %c0_i32 = arith.constant 0 : i32
    %c0_i32_0 = arith.constant 0 : i32
    %c0_i32_1 = arith.constant 0 : i32
    return %c0_i32, %c0_i32_0 : i32, i32
  }
  func.func @transform_11(%arg0: i32) -> (i32, i32, i32, i32) {
    %c0_i32 = arith.constant 0 : i32
    %c0_i32_0 = arith.constant 0 : i32
    %c0_i32_1 = arith.constant 0 : i32
    %c0_i32_2 = arith.constant 0 : i32
    return %arg0, %c0_i32, %c0_i32_0, %c0_i32_1 : i32, i32, i32, i32
  }
}

</mosaic_0001>

<bundles_post_ra>
// kernel: residual_se_block.1
= control target key start
LH: loop header
LB: loop body
LE: loop exit
PB: predicated region body
PF: predicated region fallthrough
CT: control target
= control target key end

     0   :  { %16 = vsyncpa [#allocation4], 0  ;;  %s13386_s0 = inlined_call_operand.vmem [shape: f32[2,16,16,32], index: 0, kind: input, shape index: {}]   ;;  %s13387_s1 = inlined_call_operand.vmem [shape: bf16[288,32], index: 1, kind: input, shape index: {}]   ;;  %s13388_s2 = inlined_call_operand.vmem [shape: f32[1,32], index: 2, kind: input, shape index: {}]   ;;  %s13389_s3 = inlined_call_operand.vmem [shape: f32[9,32], index: 3, kind: input, shape index: {}]   ;;  %s13390_s4 = inlined_call_operand.vmem [shape: f32[1,32], index: 4, kind: input, shape index: {}]   ;;  %s13391_s5 = inlined_call_operand.vmem [shape: bf16[288,32], index: 5, kind: input, shape index: {}]   ;;  %s13392_s6 = inlined_call_operand.hbm [shape: f32[1,32], index: 6, kind: input, shape index: {}]   ;;  %s13393_s7 = inlined_call_operand.hbm [shape: f32[32,128], index: 7, kind: input, shape index: {}]   ;;  %s13394_s8 = inlined_call_operand.hbm [shape: f32[1,128], index: 8, kind: input, shape index: {}]   ;;  %s13395_s9 = inlined_call_operand.vmem [shape: f32[128,32], index: 9, kind: input, shape index: {}]   ;;  %s13396_s10 = inlined_call_operand.vmem [shape: f32[1,32], index: 10, kind: input, shape index: {}]   ;;  %s13397_s11 = inlined_call_operand.hbm [shape: f32[2,16,16,32], index: 11, kind: output, shape index: {}]  }
   0x1   :  { %17 = vsyncpa [#allocation7], 0 }
   0x2   :  { %18 = vsyncpa [#allocation5], 0 }
   0x3   :  { %20 = vsyncpa [#allocation5 + $0x1], 0  ;;  %s8305_s17 = smov 0   ;;  %s8307_s18 = smov 0  }
   0x4   :  { %s8309_s19 = smov 0   ;;  %s8311_s20 = smov 0  }
   0x5 LB: > { %13585 = sst [smem:[#allocation13_spill]] %s8217_s17  ;;  %s8326_s21 = sadd.s32 4294967295, %s8229_s20   ;;  %s8229_s20 = sphi %s8311_s20, %s14052_s20   ;;  %s8225_s19 = sphi %s8309_s19, %s14054_s19   ;;  %s8221_s18 = sphi %s8307_s18, %s14056_s18   ;;  %s8217_s17 = sphi %s8305_s17, %s14055_s17  }
   0x6   : > { %13586 = sst [smem:[#allocation14_spill]] %s8225_s19  ;;  %s6460_s22 = sadd.s32 4294967294, %s8229_s20  }
   0x7   : > { %13587 = sst [smem:[#allocation15_spill]] %s8229_s20  ;;  %s8330_s23 = sadd.s32 1, %s8229_s20  }
   0x8   : > { %13588 = sst [smem:[#allocation16_spill]] %s8330_s23  ;;  %s269_s24 = sadd.s32 1, %s8225_s19 }
   0x9   : > { %s266_s25 = ssub.s32 %s8229_s20, %s8330_s23  ;;  %p279_p0 = scmp.ne.s32.totalorder %s8225_s19, %s8221_s18 }
   0xa   : > { %p267_p1 = scmp.eq.s32.totalorder %s266_s25, 0  ;;  %p280_p2 = scmp.eq.s32.totalorder %s8326_s21, 1 }
   0xb   : > { %p285_p3 = scmp.ne.s32.totalorder %s8221_s18, %s8217_s17  ;;  %p286_p4 = scmp.eq.s32.totalorder %s6460_s22, 1 }
   0xc   : > { %s8341_s26 = scalar_select %p267_p1, %s8225_s19, %s269_s24  }
   0xd   : > { %p8343_p5 = por %p280_p2, %p279_p0  ;;  %p8347_p6 = por %p286_p4, %p285_p3 }
   0xe   : > { %13589 = sst [smem:[#allocation17_spill]] %s8341_s26  ;;  %p6461_p7 = scmp.ge.s32.totalorder %s8229_s20, 1 }
   0xf   : > { %s13590_s27 = scalar_select %p8343_p5, 1, 0 }
  0x10   : > { %s13592_s28 = scalar_select %p8347_p6, 1, 0 }
  0x11   : > { %13591 = sst [smem:[#allocation18_spill]] %s13590_s27  ;;  %p293_p8 = scmp.lt.s32.totalorder %s8229_s20, 3 }
  0x12   : > { %13593 = sst [smem:[#allocation19_spill]] %s13592_s28  ;;  %p13401_p9 = scmp.eq.s32.totalorder %s8326_s21, 0 }
  0x13   : > { %p8354_p10 = pnand %p6461_p7, %p293_p8  ;;  %s8231_s30 = smov [#allocation6]  }
  0x14   : > { %s331_s12 = sshll.u32 %s8231_s30, 4  ;;  %s8232_s14 = smov [#allocation3]   ;;  %s8360_s12 = int_to_ptr.vmem [resolvable:$true] %s331_s12 }
  0x15   : > { %s13594_s29 = scalar_select %p8354_p10, 1, 0 }
  0x16   : > { %p7001_p11 = pneg %p8354_p10  ;;  %s321_s15 = sshll.u32 %s8232_s14, 4  ;;  %s8368_s15 = int_to_ptr.vmem [resolvable:$true] %s321_s15 }
  0x17   : > { %s8233_s16 = smov [#allocation8]   ;;  %s8075_s30 = scalar_lea.hbm %s13393_s7, 512 }
  0x18   : > { %p8364_p12 = pnand %p13401_p9, %p7001_p11  ;;  %s8370_s22 = sshll.u32 %s8233_s16, 4  ;;  %s346_s22 = int_to_ptr.vmem [resolvable:$true] %s8370_s22 }
  0x19   : > { %p8076_p13 = scmp.ne.s32.totalorder %s13393_s7, %s8075_s30  ;;  %p8082_p3 = scmp.lt.u32.totalorder %s8075_s30, %s13393_s7 }
  0x1a   : > { %p8380_p0 = pneg %p8364_p12 }
  0x1c   : > { %p8078_p1 = pnand %p8380_p0, %p8076_p13 }
  0x1e   : > { %p8079_p2 = pneg %p8078_p1 }
  0x20   : > { %p8084_p4 = pnand %p8082_p3, %p8079_p2 }
  0x22   : > { %8087 = shalt.err (!%p8084_p4)
}
  0x23   : > { %s8088_s19 = scalar_lea.vmem %s8360_s12, 512  ;;  %p8096_p9 = scmp.lt.s32.totalorder %s8360_s12, %s8360_s12 }
  0x24   : > { %p8089_p7 = scmp.ne.s32.totalorder %s8360_s12, %s8088_s19  ;;  %p8097_p6 = scmp.lt.s32.totalorder %s8088_s19, %s8088_s19 }
  0x26   : > { %p8091_p8 = pnand %p8089_p7, %p8380_p0  ;;  %p8098_p13 = por %p8097_p6, %p8096_p9 }
  0x28   : > { %p8092_p11 = pneg %p8091_p8 }
  0x2a   : > { %p8099_p1 = pnand %p8098_p13, %p8092_p11 }
  0x2c   : > { %8102 = shalt.err (!%p8099_p1)
}
  0x2d   : > { %s8234_s26 = smov 128   ;;  %s8235_s24 = smov 8  }
  0x2e   : > { %7007 = dma.hbm_to_vmem [thread:$0]  (!%p8364_p12), %s13393_s7, 512, %s8360_s12, [#allocation7], %s8234_s26, %s8234_s26, %s8235_s24  }
  0x2f   : > { %s8103_s28 = scalar_lea.hbm %s13392_s6, 16 }
  0x30   : > { %p8104_p6 = scmp.ne.s32.totalorder %s13392_s6, %s8103_s28  ;;  %p8110_p3 = scmp.lt.u32.totalorder %s8103_s28, %s13392_s6 }
  0x32   : > { %p8106_p9 = pnand %p8104_p6, %p8380_p0 }
  0x34   : > { %p8107_p2 = pneg %p8106_p9 }
  0x36   : > { %p8112_p4 = pnand %p8110_p3, %p8107_p2 }
  0x38   : > { %8115 = shalt.err (!%p8112_p4)
}
  0x39   : > { %s8116_s12 = scalar_lea.vmem %s8368_s15, 16  ;;  %s8123_s17 = scalar_lea.vmem %s8368_s15, 32 }
  0x3a   : > { %p8117_p7 = scmp.ne.s32.totalorder %s8368_s15, %s8116_s12  ;;  %p8124_p13 = scmp.lt.s32.totalorder %s8368_s15, %s8368_s15 }
  0x3b   : > { %p8125_p1 = scmp.lt.s32.totalorder %s8123_s17, %s8116_s12 }
  0x3c   : > { %p8119_p8 = pnand %p8117_p7, %p8380_p0 }
  0x3d   : > { %p8126_p6 = por %p8125_p1, %p8124_p13 }
  0x3e   : > { %p8120_p11 = pneg %p8119_p8 }
  0x40   : > { %p8127_p9 = pnand %p8126_p6, %p8120_p11 }
  0x42   : > { %8130 = shalt.err (!%p8127_p9)
}
  0x43   : > { %7004 = dma.hbm_to_vmem [thread:$0]  (!%p8364_p12), %s13392_s6, 16, %s8368_s15, [#allocation4]  }
  0x44   : > { %s8131_s24 = scalar_lea.hbm %s13394_s8, 16 }
  0x45   : > { %p8132_p2 = scmp.ne.s32.totalorder %s13394_s8, %s8131_s24  ;;  %p8138_p7 = scmp.lt.u32.totalorder %s8131_s24, %s13394_s8 }
  0x47   : > { %p8134_p3 = pnand %p8132_p2, %p8380_p0 }
  0x49   : > { %p8135_p4 = pneg %p8134_p3 }
  0x4b   : > { %p8140_p8 = pnand %p8138_p7, %p8135_p4 }
  0x4d   : > { %8143 = shalt.err (!%p8140_p8)
}
  0x4e   : > { %s8144_s19 = scalar_lea.vmem %s346_s22, 16  ;;  %s8151_s15 = scalar_lea.vmem %s346_s22, 32 }
  0x4f   : > { %p8145_p11 = scmp.ne.s32.totalorder %s346_s22, %s8144_s19  ;;  %p8152_p6 = scmp.lt.s32.totalorder %s346_s22, %s346_s22 }
  0x50   : > { %p8153_p9 = scmp.lt.s32.totalorder %s8151_s15, %s8144_s19 }
  0x51   : > { %p8147_p13 = pnand %p8145_p11, %p8380_p0 }
  0x52   : > { %p8154_p5 = por %p8153_p9, %p8152_p6 }
  0x53   : > { %p8148_p1 = pneg %p8147_p13 }
  0x55   : > { %p8155_p10 = pnand %p8154_p5, %p8148_p1 }
  0x57   : > { %8158 = shalt.err (!%p8155_p10)
}
  0x58   : > { %7010 = dma.hbm_to_vmem [thread:$0]  (!%p8364_p12), %s13394_s8, 16, %s346_s22, [#allocation7]  }
  0x59   : > { %p13597_p2 = scmp.ne.s32.totalorder %s13594_s29, 0 }
  0x5b   : > { %372 = sbr.rel (%p13597_p2) target bundleno = 2207 (0x89f), region = 64 }
  0x62   : > { %p13598_p3 = scmp.eq.s32.totalorder %s8326_s21, 0 }
  0x64   : > { %8204 = dma.done.wait (%p13598_p3), [#allocation4], 16   ;;  %p13599_p0 = pmov %p13598_p3 }
  0x66   : > { %8206 = vsyncadd (%p13599_p0), [#allocation4], 4294967280  ;;  %p13600_p4 = pmov %p13599_p0 }
  0x67   : > { %p13601_p5 = pmov %p13599_p0 }
  0x68   : > { %8208 = dma.done.wait (%p13600_p4), [#allocation7], 528  }
  0x69   : > { %8210 = vsyncadd (%p13601_p5), [#allocation7], 4294966768  ;;  %p420_p10 = scmp.lt.s32.totalorder %s8326_s21, 1  ;;  %vm459_vm0 = vcmask 261120   ;;  %vm492_vm1 = vcmask 254977   ;;  %vm509_vm2 = vcmask 260102  }
  0x6a   : > { %v8027_v18 = vld [vmem:[%s13387_s1 + $0x40] sm:$0xff]   ;;  %vm2603_vm3 = vcmask 253952   ;;  %vm2598_vm4 = vcmask 254976   ;;  %v13411_v30 = vmov 0.0   ;;  %s8237_s25 = smov 64   ;;  %s8238_s30 = smov 32  }
  0x6b   : > { %s421_s23 = scalar_select %p420_p10, %s8326_s21, 1  ;;  %v8028_v19 = vld [vmem:[%s13387_s1] sm:$0xff]   ;;  %6553 = vmatprep.subr.bf16.mxu0 %v8027_v18  ;;  %v8029_v56 = vld [vmem:[%s13387_s1 + $0x48] sm:$0xff]   ;;  %v8031_v58 = vld [vmem:[%s13387_s1 + $0x50] sm:$0xff]   ;;  %vm1661_vm5 = vcmask 523264   ;;  %vm1694_vm6 = vcmask 785408  }
  0x6c   : > { %6554 = vmatpush3.bf16.msra.mxu0 %v8028_v19  ;;  %s8239_s14 = smov 96   ;;  %v8030_v57 = vld [vmem:[%s13387_s1 + $0x8] sm:$0xff]   ;;  %v8032_v60 = vld [vmem:[%s13387_s1 + $0x10] sm:$0xff]   ;;  %v8033_v62 = vld [vmem:[%s13387_s1 + $0x58] sm:$0xff]   ;;  %vm8241_vm7 = vmmov 0   ;;  %s6552_s26 = sshll.u32 %s8326_s21, 12 }
  0x6d   : > { %s6551_s13 = sshll.u32 %s421_s23, 8  ;;  %6555 = vmatprep.subr.bf16.mxu0 %v8029_v56  ;;  %s13311_s19 = scalar_lea.hbm %s13397_s11, %s6552_s26 }
  0x6e   : > { %s8459_s20 = scalar_lea.vmem %s13386_s0, %s6551_s13  ;;  %s14046_s15 = sld [smem:[#allocation18_spill]] }
  0x6f   : > { %v8462_v0 = vld [vmem:[%s8459_s20 + $0x10] sm:$0xff]  ;;  %v8465_v1 = vld [vmem:[%s8459_s20 + $0x18] sm:$0xff]  ;;  %v8468_v2 = vld [vmem:[%s8459_s20] sm:$0xff]  ;;  %s8242_s23 = smov [#allocation9]  }
  0x70   : > { %13602 = vst [vmem:[#allocation20_spill] sm:$0xff] %v8462_v0  ;;  %13603 = vst [vmem:[#allocation21_spill] sm:$0xff] %v8465_v1  ;;  %v8483_v3 = vld [vmem:[%s8459_s20 + $0x8] sm:$0xff]  ;;  %v8494_v4 = vld [vmem:[%s8459_s20 + $0x20] sm:$0xff]  ;;  %6556 = vmatpush3.bf16.msra.mxu0 %v8030_v57 }
  0x71   : > { %13604 = vst [vmem:[#allocation22_spill] sm:$0xff] %v8468_v2  ;;  %462 = vst.msk [vmem:[#allocation2 + $0x31] sm:$0xff] %vm459_vm0, %v8462_v0  ;;  %v8497_v5 = vld [vmem:[%s8459_s20 + $0x28] sm:$0xff]  ;;  %v8512_v6 = vld [vmem:[%s8459_s20 + $0x30] sm:$0xff]  ;;  %6557 = vmatprep.subr.bf16.mxu0 %v8031_v58 }
  0x72   : > { %463 = vst.msk [vmem:[#allocation2 + $0x39] sm:$0xff] %vm459_vm0, %v8465_v1  ;;  %526 = vst.msk [vmem:[#allocation2 + $0x1] sm:$0xff] %vm459_vm0, %v8462_v0  ;;  %v8515_v7 = vld [vmem:[%s8459_s20 + $0x38] sm:$0xff]  ;;  %v8518_v8 = vld [vmem:[%s8459_s20 + $0x40] sm:$0xff] }
  0x73   : > { %494 = vst.msk [vmem:[#allocation2 + $0x2f] sm:$0x2] %vm492_vm1, %v8462_v0  ;;  %528 = vst.msk [vmem:[#allocation2 - $0x1] sm:$0x2] %vm492_vm1, %v8462_v0  ;;  %v8529_v9 = vld [vmem:[%s8459_s20 + $0x48] sm:$0xff]  ;;  %v8536_v10 = vld [vmem:[%s8459_s20 + $0x50] sm:$0xff] }
  0x74   : > { %527 = vst.msk [vmem:[#allocation2 + $0x9] sm:$0xff] %vm459_vm0, %v8465_v1  ;;  %13605 = vst [vmem:[#allocation23_spill] sm:$0xff] %v8483_v3  ;;  %v8539_v11 = vld [vmem:[%s8459_s20 + $0x58] sm:$0xff]  ;;  %v8554_v12 = vld [vmem:[%s8459_s20 + $0x60] sm:$0xff]  ;;  %6558 = vmatpush3.bf16.msra.mxu0 %v8032_v60  ;;  %p14047_p7 = scmp.ne.s32.totalorder %s14046_s15, 0 }
  0x75   : > { %460 = vst.msk [vmem:[#allocation2 + $0x19] sm:$0xff] %vm459_vm0, %v8468_v2  ;;  %13606 = vst [vmem:[#allocation24_spill] sm:$0xff] %v8494_v4  ;;  %v8557_v13 = vld [vmem:[%s8459_s20 + $0x68] sm:$0xff]  ;;  %v8560_v14 = vld [vmem:[%s8459_s20 + $0x70] sm:$0xff]  ;;  %6559 = vmatprep.subr.bf16.mxu0 %v8033_v62 }
  0x76   : > { %493 = vst.msk [vmem:[#allocation2 + $0x17] sm:$0x2] %vm492_vm1, %v8468_v2  ;;  %13607 = vst [vmem:[#allocation25_spill] sm:$0xff] %v8497_v5  ;;  %v8571_v15 = vld [vmem:[%s8459_s20 + $0x78] sm:$0xff]  ;;  %v8578_v16 = vld [vmem:[%s8459_s20 + $0x80] sm:$0xff] }
  0x77   : > { %511 = vst.msk [vmem:[#allocation2 + $0x3b] sm:$0x40] %vm509_vm2, %v8465_v1  ;;  %529 = vst.msk [vmem:[#allocation2 + $0xb] sm:$0x40] %vm509_vm2, %v8465_v1  ;;  %v8581_v17 = vld [vmem:[%s8459_s20 + $0x88] sm:$0xff]  ;;  %v8648_v53 = vld [vmem:[%s8459_s20 + $0x90] sm:$0xff] }
  0x78   : > { %461 = vst.msk [vmem:[#allocation2 + $0x21] sm:$0xff] %vm459_vm0, %v8483_v3  ;;  %464 = vst.msk [vmem:[#allocation2 + $0x49] sm:$0xff] %vm459_vm0, %v8494_v4  ;;  %v8613_v36 = vld [vmem:[#allocation2 + $0x31] sm:$0xff]  ;;  %v8684_v18 = vld [vmem:[%s8459_s20 + $0xa0] sm:$0xff] }
  0x79   : > { %510 = vst.msk [vmem:[#allocation2 + $0x23] sm:$0x40] %vm509_vm2, %v8483_v3  ;;  %512 = vst.msk [vmem:[#allocation2 + $0x53] sm:$0x40] %vm509_vm2, %v8497_v5  ;;  %v766_v21 = vld [vmem:[#allocation2 + $0x38] sm:$0xff]  ;;  %v604_v28 = vld [vmem:[#allocation2 + $0x1] sm:$0xff] }
  0x7a   : > { %465 = vst.msk [vmem:[#allocation2 + $0x51] sm:$0xff] %vm459_vm0, %v8497_v5  ;;  %13608 = vst [vmem:[#allocation26_spill] sm:$0xff] %v8512_v6  ;;  %v765_v20 = vld [vmem:[#allocation2 + $0x30] sm:$0xff]  ;;  %v8615_v37 = vld [vmem:[#allocation2 + $0x39] sm:$0xff] }
  0x7b   : > { %495 = vst.msk [vmem:[#allocation2 + $0x47] sm:$0x2] %vm492_vm1, %v8494_v4  ;;  %13609 = vst [vmem:[#allocation27_spill] sm:$0xff] %v8515_v7  ;;  %v636_v22 = vld [vmem:[#allocation2 + $0x2] sm:$0xff]  ;;  %v7077_v23 = vpack.i.bf16 %v766_v21, %v765_v20  ;;  %v734_v38 = vld [vmem:[#allocation2 + $0x32] sm:$0xff]  ;;  %v7087_v42 = vpack.i.bf16 %v8615_v37, %v8613_v36 }
  0x7c   : > { %13610 = vst [vmem:[#allocation28_spill] sm:$0xff] %v8518_v8  ;;  %466 = vst.msk [vmem:[#allocation2 + $0x61] sm:$0xff] %vm459_vm0, %v8512_v6  ;;  %v605_v29 = vld [vmem:[#allocation2 + $0x9] sm:$0xff]  ;;  %v8627_v43 = vld [vmem:[#allocation2 + $0x19] sm:$0xff] }
  0x7d   : > { %467 = vst.msk [vmem:[#allocation2 + $0x69] sm:$0xff] %vm459_vm0, %v8515_v7  ;;  %13611 = vst [vmem:[#allocation29_spill] sm:$0xff] %v8529_v9  ;;  %7078 = vrot.lane.b32.xlu1 %v7077_v23, %s8237_s25  ;;  %v8606_v32 = vld [vmem:[#allocation2 + $0x18] sm:$0xff]  ;;  %v7072_v33 = vpack.i.bf16 %v605_v29, %v604_v28  ;;  %v8687_v19 = vld [vmem:[%s8459_s20 + $0xa8] sm:$0xff] }
  0x7e   : > { %496 = vst.msk [vmem:[#allocation2 + $0x5f] sm:$0x2] %vm492_vm1, %v8512_v6  ;;  %497 = vst.msk [vmem:[#allocation2 + $0x77] sm:$0x2] %vm492_vm1, %v8518_v8  ;;  %v637_v26 = vld [vmem:[#allocation2 + $0xa] sm:$0xff]  ;;  %v735_v35 = vld [vmem:[#allocation2 + $0x3a] sm:$0xff] }
  0x7f   : > { %513 = vst.msk [vmem:[#allocation2 + $0x6b] sm:$0x40] %vm509_vm2, %v8515_v7  ;;  %13612 = vst [vmem:[#allocation30_spill] sm:$0xff] %v8536_v10  ;;  %v732_v24 = vld [vmem:[#allocation2 + $0x1a] sm:$0xff]  ;;  %v7082_v31 = vpack.i.bf16 %v637_v26, %v636_v22  ;;  %v1825_v39 = vpack.c.bf16 %v735_v35, %v734_v38  ;;  %v7097_v46 = vpack.i.bf16 %v735_v35, %v734_v38  ;;  %v8640_v50 = vld [vmem:[#allocation2 + $0x49] sm:$0xff] }
  0x80   : > { %468 = vst.msk [vmem:[#allocation2 + $0x79] sm:$0xff] %vm459_vm0, %v8518_v8  ;;  %13613 = vst [vmem:[#allocation31_spill] sm:$0xff] %v8539_v11  ;;  %v733_v25 = vld [vmem:[#allocation2 + $0x22] sm:$0xff]  ;;  %v8651_v54 = vld [vmem:[%s8459_s20 + $0x98] sm:$0xff] }
  0x81   : > { %469 = vst.msk [vmem:[#allocation2 + $0x81] sm:$0xff] %vm459_vm0, %v8529_v9  ;;  %470 = vst.msk [vmem:[#allocation2 + $0x91] sm:$0xff] %vm459_vm0, %v8536_v10  ;;  %v7067_v27 = vpack.i.bf16 %v733_v25, %v732_v24  ;;  %v8609_v34 = vld [vmem:[#allocation2 + $0x20] sm:$0xff]  ;;  %7083 = vrot.lane.b32.xlu1 %v7082_v31, %s8237_s25  ;;  %v8622_v41 = vld [vmem:[#allocation2 + $0x52] sm:$0xff]  ;;  %6839 = vmatprep.mubr.msk.bf16.mxu1 %vm459_vm0, %v1825_v39 }
  0x82   : > { %514 = vst.msk [vmem:[#allocation2 + $0x83] sm:$0x40] %vm509_vm2, %v8529_v9  ;;  %515 = vst.msk [vmem:[#allocation2 + $0x9b] sm:$0x40] %vm509_vm2, %v8539_v11  ;;  %v7092_v40 = vpack.i.bf16 %v8609_v34, %v8606_v32  ;;  %v8629_v44 = vld [vmem:[#allocation2 + $0x21] sm:$0xff]  ;;  %v768_v48 = vld [vmem:[#allocation2 + $0x50] sm:$0xff] }
  0x83   : > { %471 = vst.msk [vmem:[#allocation2 + $0x99] sm:$0xff] %vm459_vm0, %v8539_v11  ;;  %13614 = vst [vmem:[#allocation32_spill] sm:$0xff] %v8554_v12  ;;  %7068 = vrot.lane.b32.xlu0 %v7067_v27, %s8238_s30  ;;  %v7102_v45 = vpack.i.bf16 %v8629_v44, %v8627_v43  ;;  %v767_v47 = vld [vmem:[#allocation2 + $0x48] sm:$0xff]  ;;  %v8642_v51 = vld [vmem:[#allocation2 + $0x51] sm:$0xff] }
  0x84   : > { %498 = vst.msk [vmem:[#allocation2 + $0x8f] sm:$0x2] %vm492_vm1, %v8536_v10  ;;  %13615 = vst [vmem:[#allocation33_spill] sm:$0xff] %v8557_v13  ;;  %v7107_v49 = vpack.i.bf16 %v768_v48, %v767_v47  ;;  %v8645_v52 = vld [vmem:[#allocation2 + $0x4a] sm:$0xff]  ;;  %v7117_v55 = vpack.i.bf16 %v8642_v51, %v8640_v50  ;;  %v8034_v20 = vld [vmem:[%s13387_s1 + $0x18] sm:$0xff]  }
  0x85   : > { %13616 = vst [vmem:[#allocation34_spill] sm:$0xff] %v8560_v14  ;;  %472 = vst.msk [vmem:[#allocation2 + $0xa9] sm:$0xff] %vm459_vm0, %v8554_v12  ;;  %7093 = vrot.lane.b32.xlu1 %v7092_v40, %s8239_s14  ;;  %v769_v59 = vld [vmem:[#allocation2 + $0x60] sm:$0xff]  ;;  %v7127_v61 = vpack.i.bf16 %v8622_v41, %v8645_v52  ;;  %v770_v63 = vld [vmem:[#allocation2 + $0x68] sm:$0xff]  ;;  %6560 = vmatpush3.bf16.msra.mxu0 %v8034_v20 }
  0x86   : > { %473 = vst.msk [vmem:[#allocation2 + $0xb1] sm:$0xff] %vm459_vm0, %v8557_v13  ;;  %13617 = vst [vmem:[#allocation35_spill] sm:$0xff] %v8571_v15  ;;  %v8702_v21 = vpack.i.bf16 %v770_v63, %v769_v59  ;;  %v801_v22 = vld [vmem:[#allocation2 + $0x61] sm:$0xff]  ;;  %v739_v31 = vld [vmem:[#allocation2 + $0x6a] sm:$0xff] }
  0x87   : > { %499 = vst.msk [vmem:[#allocation2 + $0xa7] sm:$0x2] %vm492_vm1, %v8554_v12  ;;  %500 = vst.msk [vmem:[#allocation2 + $0xbf] sm:$0x2] %vm492_vm1, %v8560_v14  ;;  %7073 = vrot.lane.b32.xlu0 %v7072_v33, %s8238_s30  ;;  %v8035_v24 = vld [vmem:[%s13387_s1 + $0x60] sm:$0xff]   ;;  %v8720_v33 = vld [vmem:[#allocation2 + $0x8] sm:$0xff] }
  0x88   : > { %516 = vst.msk [vmem:[#allocation2 + $0xb3] sm:$0x40] %vm509_vm2, %v8557_v13  ;;  %13618 = vst [vmem:[#allocation36_spill] sm:$0xff] %v8578_v16  ;;  %v8036_v25 = vld [vmem:[%s13387_s1 + $0x20] sm:$0xff]   ;;  %6561 = vmatprep.subr.bf16.mxu0 %v8035_v24  ;;  %v771_v35 = vld [vmem:[#allocation2 + $0x78] sm:$0xff]  ;;  %v1828_v24 = vpack.c.bf16 %v8622_v41, %v8645_v52 }
  0x89   : > { %474 = vst.msk [vmem:[#allocation2 + $0xc1] sm:$0xff] %vm459_vm0, %v8560_v14  ;;  %13619 = vst [vmem:[#allocation37_spill] sm:$0xff] %v8581_v17  ;;  %7103 = vrot.lane.b32.xlu1 %v7102_v45, %s8238_s30  ;;  %v8718_v28 = vld [vmem:[#allocation2] sm:$0xff]  ;;  %6562 = vmatpush3.bf16.msra.mxu0 %v8036_v25  ;;  %v8038_v38 = vld [vmem:[%s13387_s1 + $0x28] sm:$0xff]  }
  0x8a   : > { %475 = vst.msk [vmem:[#allocation2 + $0xc9] sm:$0xff] %vm459_vm0, %v8571_v15  ;;  %476 = vst.msk [vmem:[#allocation2 + $0xd9] sm:$0xff] %vm459_vm0, %v8578_v16  ;;  %v738_v29 = vld [vmem:[#allocation2 + $0x62] sm:$0xff]  ;;  %v8039_v40 = vld [vmem:[%s13387_s1 + $0x70] sm:$0xff]  }
  0x8b   : > { %517 = vst.msk [vmem:[#allocation2 + $0xcb] sm:$0x40] %vm509_vm2, %v8571_v15  ;;  %518 = vst.msk [vmem:[#allocation2 + $0xe3] sm:$0x40] %vm509_vm2, %v8581_v17  ;;  %7088 = vrot.lane.b32.xlu0 %v7087_v42, %s8239_s14  ;;  %v8732_v39 = vpack.i.bf16 %v739_v31, %v738_v29  ;;  %v8738_v45 = vld [vmem:[%s8459_s20 + $0xb0] sm:$0xff]  ;;  %v803_v56 = vld [vmem:[#allocation2 + $0x79] sm:$0xff] }
  0x8c   : > { %477 = vst.msk [vmem:[#allocation2 + $0xe1] sm:$0xff] %vm459_vm0, %v8581_v17  ;;  %13620 = vst [vmem:[#allocation38_spill] sm:$0xff] %v8648_v53  ;;  %v8040_v47 = vld [vmem:[%s13387_s1 + $0x30] sm:$0xff]   ;;  %v804_v57 = vld [vmem:[#allocation2 + $0x81] sm:$0xff] }
  0x8d   : > { %501 = vst.msk [vmem:[#allocation2 + $0xd7] sm:$0x2] %vm492_vm1, %v8578_v16  ;;  %7113 = vrot.lane.b32.xlu1 %v7067_v27, %s8237_s25  ;;  %13621 = vst [vmem:[#allocation39_spill] sm:$0xff] %v8651_v54  ;;  %v8037_v27 = vld [vmem:[%s13387_s1 + $0x68] sm:$0xff]   ;;  %v740_v58 = vld [vmem:[#allocation2 + $0x7a] sm:$0xff]  ;;  %v8771_v60 = vpack.i.bf16 %v804_v57, %v803_v56 }
  0x8e   : > { %2620 = vst.msk [vmem:[#allocation2 + $0x29] sm:$0x1] %vm2603_vm3, %v13411_v30  ;;  %2604 = vst.msk [vmem:[#allocation2 + $0x18] sm:$0x1] %vm2603_vm3, %v13411_v30  ;;  %6563 = vmatprep.subr.bf16.mxu0 %v8037_v27  ;;  %v8043_v59 = vld [vmem:[%s13387_s1 + $0x38] sm:$0xff]   ;;  %v8044_v62 = vld [vmem:[%s13387_s1 + $0x88] sm:$0xff]  }
  0x8f   : > { %2599 = vst.msk [vmem:[#allocation2 + $0x10] sm:$0x3] %vm2598_vm4, %v13411_v30  ;;  %7098 = vrot.lane.b32.xlu0 %v7097_v46, %s8238_s30  ;;  %13622 = vst [vmem:[#allocation40_spill] sm:$0xff] %v8684_v18  ;;  %6564 = vmatpush3.bf16.msra.mxu0 %v8038_v38  ;;  %v8777_v63 = vld [vmem:[%s8459_s20 + $0xc0] sm:$0xff]  ;;  %v8780_v20 = vld [vmem:[%s8459_s20 + $0xc8] sm:$0xff] }
  0x90   : > { %2621 = vst.msk [vmem:[#allocation2 + $0x41] sm:$0x1] %vm2603_vm3, %v13411_v30  ;;  %2622 = vst.msk [vmem:[#allocation2 + $0x59] sm:$0x1] %vm2603_vm3, %v13411_v30  ;;  %6565 = vmatprep.subr.bf16.mxu0 %v8039_v40  ;;  %v8803_v25 = vld [vmem:[%s8459_s20 + $0xd0] sm:$0xff]  ;;  %v8806_v27 = vld [vmem:[%s8459_s20 + $0xd8] sm:$0xff] }
  0x91   : > { %478 = vst.msk [vmem:[#allocation2 + $0xf1] sm:$0xff] %vm459_vm0, %v8648_v53  ;;  %479 = vst.msk [vmem:[#allocation2 + $0xf9] sm:$0xff] %vm459_vm0, %v8651_v54  ;;  %7123 = vrot.lane.b32.xlu1 %v7077_v23, %s8239_s14  ;;  %v802_v23 = vld [vmem:[#allocation2 + $0x69] sm:$0xff]  ;;  %v774_v31 = vld [vmem:[#allocation2 + $0x98] sm:$0xff] }
  0x92   : > { %502 = vst.msk [vmem:[#allocation2 + $0xef] sm:$0x2] %vm492_vm1, %v8648_v53  ;;  %13623 = vst [vmem:[#allocation41_spill] sm:$0xff] %v8687_v19  ;;  %v8713_v26 = vpack.i.bf16 %v802_v23, %v801_v22  ;;  %v8786_v22 = vld [vmem:[#allocation2 + $0x30] sm:$0xff]  ;;  %v8816_v41 = vld [vmem:[#allocation2 + $0x48] sm:$0xff] }
  0x93   : > { %7108 = vrot.lane.b32.xlu0 %v7107_v49, %s8237_s25  ;;  %519 = vst.msk [vmem:[#allocation2 + $0xfb] sm:$0x40] %vm509_vm2, %v8651_v54  ;;  %520 = vst.msk [vmem:[#allocation2 + $0x113] sm:$0x40] %vm509_vm2, %v8687_v19  ;;  %6566 = vmatpush3.bf16.msra.mxu0 %v8040_v47  ;;  %v773_v29 = vld [vmem:[#allocation2 + $0x90] sm:$0xff]  ;;  %v833_v52 = vld [vmem:[#allocation2 + $0x62] sm:$0xff] }
  0x94   : > { %480 = vst.msk [vmem:[#allocation2 + $0x109] sm:$0xff] %vm459_vm0, %v8684_v18  ;;  %481 = vst.msk [vmem:[#allocation2 + $0x111] sm:$0xff] %vm459_vm0, %v8687_v19  ;;  %v836_v38 = vld [vmem:[#allocation2 + $0x82] sm:$0xff]  ;;  %v8832_v47 = vpack.i.bf16 %v774_v31, %v773_v29  ;;  %v8861_v57 = vld [vmem:[%s8459_s20 + $0xf0] sm:$0xff] }
  0x95   : > { %7133 = vrot.lane.b32.xlu1 %v7087_v42, %s8238_s30  ;;  %503 = vst.msk [vmem:[#allocation2 + $0x107] sm:$0x2] %vm492_vm1, %v8684_v18  ;;  %v772_v42 = vld [vmem:[#allocation2 + $0x80] sm:$0xff]  ;;  %13624 = vst [vmem:[#allocation42_spill] sm:$0xff] %v8738_v45  ;;  %v775_v31 = vld [vmem:[#allocation2 + $0xa8] sm:$0xff] }
  0x96   : > { %2596 = vst.msk [vmem:[#allocation2] sm:$0xff] %vm459_vm0, %v13411_v30  ;;  %2597 = vst.msk [vmem:[#allocation2 + $0x8] sm:$0xff] %vm459_vm0, %v13411_v30  ;;  %v8757_v48 = vpack.i.bf16 %v772_v42, %v771_v35  ;;  %v8825_v40 = vld [vmem:[%s8459_s20 + $0xe0] sm:$0xff]  ;;  %v8828_v42 = vld [vmem:[%s8459_s20 + $0xe8] sm:$0xff] }
  0x97   : > { %7118 = vrot.lane.b32.xlu0 %v7117_v55, %s8239_s14  ;;  %482 = vst.msk [vmem:[#allocation2 + $0x121] sm:$0xff] %vm459_vm0, %v8738_v45  ;;  %13626 = vst [vmem:[#allocation44_spill] sm:$0xff] %v8777_v63  ;;  %v8854_v56 = vld [vmem:[#allocation2 + $0x60] sm:$0xff] }
  0x98   : > { %504 = vst.msk [vmem:[#allocation2 + $0x11f] sm:$0x2] %vm492_vm1, %v8738_v45  ;;  %13627 = vst [vmem:[#allocation45_spill] sm:$0xff] %v8780_v20 }
  0x99   : > { %7143 = vrot.lane.b32.xlu1 %v7097_v46, %s8237_s25  ;;  %v8741_v46 = vld [vmem:[%s8459_s20 + $0xb8] sm:$0xff]  ;;  %484 = vst.msk [vmem:[#allocation2 + $0x139] sm:$0xff] %vm459_vm0, %v8777_v63  ;;  %485 = vst.msk [vmem:[#allocation2 + $0x141] sm:$0xff] %vm459_vm0, %v8780_v20 }
  0x9a   : > { %13625 = vst [vmem:[#allocation43_spill] sm:$0xff] %v8741_v46  ;;  %483 = vst.msk [vmem:[#allocation2 + $0x129] sm:$0xff] %vm459_vm0, %v8741_v46 }
  0x9b   : > { %7128 = vrot.lane.b32.xlu0 %v7127_v61, %s8238_s30  ;;  %521 = vst.msk [vmem:[#allocation2 + $0x12b] sm:$0x40] %vm509_vm2, %v8741_v46  ;;  %522 = vst.msk [vmem:[#allocation2 + $0x143] sm:$0x40] %vm509_vm2, %v8780_v20  ;;  %v8933_v20 = vld [vmem:[#allocation2 + $0xc0] sm:$0xff] }
  0x9c   : > { %505 = vst.msk [vmem:[#allocation2 + $0x137] sm:$0x2] %vm492_vm1, %v8777_v63  ;;  %13628 = vst [vmem:[#allocation46_spill] sm:$0xff] %v8803_v25 }
  0x9d   : > { %7153 = vrot.lane.b32.xlu1 %v7107_v49, %s8239_s14  ;;  %v8041_v49 = vld [vmem:[%s13387_s1 + $0x78] sm:$0xff]   ;;  %2605 = vst.msk [vmem:[#allocation2 + $0x30] sm:$0x1] %vm2603_vm3, %v13411_v30  ;;  %13629 = vst [vmem:[#allocation47_spill] sm:$0xff] %v8806_v27 }
  0x9e   : > { %6567 = vmatprep.subr.bf16.mxu0 %v8041_v49  ;;  %486 = vst.msk [vmem:[#allocation2 + $0x151] sm:$0xff] %vm459_vm0, %v8803_v25  ;;  %487 = vst.msk [vmem:[#allocation2 + $0x159] sm:$0xff] %vm459_vm0, %v8806_v27  ;;  %v806_v49 = vld [vmem:[#allocation2 + $0x99] sm:$0xff]  ;;  %v817_v46 = vld [vmem:[#allocation2 + $0x121] sm:$0xff] }
  0x9f   : > { %7138 = vrot.lane.b32.xlu0 %v8702_v21, %s8237_s25  ;;  %6568 = vmatpush3.bf16.msra.mxu0 %v8043_v59  ;;  %506 = vst.msk [vmem:[#allocation2 + $0x14f] sm:$0x2] %vm492_vm1, %v8803_v25  ;;  %13630 = vst [vmem:[#allocation48_spill] sm:$0xff] %v8825_v40  ;;  %v844_v25 = vld [vmem:[#allocation2 + $0xe2] sm:$0xff] }
  0xa0   : > { %523 = vst.msk [vmem:[#allocation2 + $0x15b] sm:$0x40] %vm509_vm2, %v8806_v27  ;;  %13631 = vst [vmem:[#allocation49_spill] sm:$0xff] %v8828_v42  ;;  %v843_v27 = vld [vmem:[#allocation2 + $0xda] sm:$0xff] }
  0xa1   : > { %7163 = vrot.lane.b32.xlu1 %v7117_v55, %s8238_s30  ;;  %v8042_v55 = vld [vmem:[%s13387_s1 + $0x80] sm:$0xff]   ;;  %2606 = vst.msk [vmem:[#allocation2 + $0x48] sm:$0x1] %vm2603_vm3, %v13411_v30  ;;  %2607 = vst.msk [vmem:[#allocation2 + $0x60] sm:$0x1] %vm2603_vm3, %v13411_v30  ;;  %v818_v45 = vld [vmem:[#allocation2 + $0x129] sm:$0xff] }
  0xa2   : > { %6835 = vmatprep.subr.bf16.mxu1 %v8042_v55  ;;  %488 = vst.msk [vmem:[#allocation2 + $0x169] sm:$0xff] %vm459_vm0, %v8825_v40  ;;  %489 = vst.msk [vmem:[#allocation2 + $0x171] sm:$0xff] %vm459_vm0, %v8828_v42  ;;  %v8990_v16 = vld [vmem:[#allocation2 + $0x142] sm:$0xff] }
  0xa3   : > { %7148 = vrot.lane.b32.xlu0 %v8713_v26, %s8239_s14  ;;  %6836 = vmatpush3.bf16.msra.mxu1 %v8042_v55  ;;  %507 = vst.msk [vmem:[#allocation2 + $0x167] sm:$0x2] %vm492_vm1, %v8825_v40  ;;  %533 = vst.msk [vmem:[#allocation2 + $0x197] sm:$0x2] %vm492_vm1, %v8825_v40  ;;  %v835_v55 = vld [vmem:[#allocation2 + $0x7a] sm:$0xff] }
  0xa4   : > { %6837 = vmatprep.subr.bf16.mxu1 %v8044_v62  ;;  %524 = vst.msk [vmem:[#allocation2 + $0x173] sm:$0x40] %vm509_vm2, %v8828_v42  ;;  %534 = vst.msk [vmem:[#allocation2 + $0x1a3] sm:$0x40] %vm509_vm2, %v8828_v42 }
  0xa5   : > { %7173 = vrot.lane.b32.xlu1 %v7127_v61, %s8237_s25  ;;  %v741_v61 = vld [vmem:[#allocation2 + $0x82] sm:$0xff]  ;;  %531 = vst.msk [vmem:[#allocation2 + $0x199] sm:$0xff] %vm459_vm0, %v8825_v40  ;;  %532 = vst.msk [vmem:[#allocation2 + $0x1a1] sm:$0xff] %vm459_vm0, %v8828_v42  ;;  %v747_v42 = vld [vmem:[#allocation2 + $0xca] sm:$0xff] }
  0xa6   : > { %v8798_v23 = vpack.i.bf16 %v741_v61, %v740_v58  ;;  %2624 = vst.msk [vmem:[#allocation2 + $0x89] sm:$0x1] %vm2603_vm3, %v13411_v30  ;;  %13632 = vst [vmem:[#allocation50_spill] sm:$0xff] %v8861_v57  ;;  %v8864_v58 = vld [vmem:[%s8459_s20 + $0xf8] sm:$0xff]  ;;  %v749_v40 = vld [vmem:[#allocation2 + $0xe2] sm:$0xff]  ;;  %s8163_s20 = sshll.u32 %s8242_s23, 4  ;;  %s8164_s20 = int_to_ptr.vmem [resolvable:$false] %s8163_s20 }
  0xa7   : > { %7158 = vrot.lane.b32.xlu0 %v8732_v39, %s8238_s30  ;;  %6838 = vmatpush3.bf16.msra.mxu1 %v8044_v62  ;;  %13633 = vst [vmem:[#allocation51_spill] sm:$0xff] %v8864_v58  ;;  %v1834_v62 = vpack.c.bf16 %v836_v38, %v835_v55  ;;  %490 = vst.msk [vmem:[#allocation2 + $0x181] sm:$0xff] %vm459_vm0, %v8861_v57  ;;  %v743_v61 = vld [vmem:[#allocation2 + $0x9a] sm:$0xff]  ;;  %v840_v55 = vld [vmem:[#allocation2 + $0xb2] sm:$0xff]  ;;  %s8165_s13 = scalar_lea.vmem %s8164_s20, 8192 }
  0xa8   : > { %491 = vst.msk [vmem:[#allocation2 + $0x189] sm:$0xff] %vm459_vm0, %v8864_v58  ;;  %v838_v38 = vld [vmem:[#allocation2 + $0x9a] sm:$0xff] }
  0xa9   : > { %7183 = vrot.lane.b32.xlu1 %v8702_v21, %s8239_s14  ;;  %v834_v21 = vld [vmem:[#allocation2 + $0x6a] sm:$0xff]  ;;  %508 = vst.msk [vmem:[#allocation2 + $0x17f] sm:$0x2] %vm492_vm1, %v8861_v57 }
  0xaa   : > { %v1831_v35 = vpack.c.bf16 %v834_v21, %v833_v52  ;;  %2623 = vst.msk [vmem:[#allocation2 + $0x71] sm:$0x1] %vm2603_vm3, %v13411_v30  ;;  %6840 = vmatmul.mubr.msk.bf16.vlgmr.msra.gmra.mrb[0].mxu1 %vm459_vm0, %v1828_v24  ;;  %v8876_v24 = vld [vmem:[#allocation2 + $0x78] sm:$0xff]  ;;  %v776_v21 = vld [vmem:[#allocation2 + $0xb0] sm:$0xff]  ;;  %2625 = vst.msk [vmem:[#allocation2 + $0xa1] sm:$0x1] %vm2603_vm3, %v13411_v30 }
  0xab   : > { %7168 = vrot.lane.b32.xlu0 %v8757_v48, %s8237_s25  ;;  %525 = vst.msk [vmem:[#allocation2 + $0x18b] sm:$0x40] %vm509_vm2, %v8864_v58  ;;  %v8884_v52 = vld [vmem:[#allocation2 + $0x172] sm:$0xff]  ;;  %v744_v57 = vld [vmem:[#allocation2 + $0xaa] sm:$0xff] }
  0xac   : > { %6843 = vmatprep.mubr.msk.bf16.mxu1 %vm459_vm0, %v1831_v35  ;;  %2608 = vst.msk [vmem:[#allocation2 + $0x78] sm:$0x1] %vm2603_vm3, %v13411_v30  ;;  %v837_v35 = vld [vmem:[#allocation2 + $0x92] sm:$0xff]  ;;  %2634 = vst.msk [vmem:[#allocation2 + $0x179] sm:$0x1] %vm2603_vm3, %v13411_v30 }
  0xad   : > { %7193 = vrot.lane.b32.xlu1 %v8713_v26, %s8238_s30  ;;  %v805_v26 = vld [vmem:[#allocation2 + $0x91] sm:$0xff] }
  0xae   : > { %v7207_v59 = vpack.i.bf16 %v806_v49, %v805_v26  ;;  %v745_v26 = vld [vmem:[#allocation2 + $0xb2] sm:$0xff]  ;;  %v1837_v49 = vpack.c.bf16 %v838_v38, %v837_v35  ;;  %v807_v38 = vld [vmem:[#allocation2 + $0xa9] sm:$0xff] }
  0xaf   : > { %7178 = vrot.lane.b32.xlu0 %v8771_v60, %s8239_s14  ;;  %2626 = vst.msk [vmem:[#allocation2 + $0xb9] sm:$0x1] %vm2603_vm3, %v13411_v30  ;;  %v808_v58 = vld [vmem:[#allocation2 + $0xb1] sm:$0xff] }
  0xb1   : > { %7203 = vrot.lane.b32.xlu1 %v8732_v39, %s8237_s25  ;;  %v742_v39 = vld [vmem:[#allocation2 + $0x92] sm:$0xff] }
  0xb2   : > { %v7217_v29 = vpack.i.bf16 %v743_v61, %v742_v39  ;;  %6844 = vmatmul.mubr.msk.bf16.gmra.mrb[4].mxu1 %vm459_vm0, %v1834_v62  ;;  %v8892_v39 = vld [vmem:[#allocation2 + $0x180] sm:$0xff]  ;;  %v7227_v62 = vpack.i.bf16 %v776_v21, %v775_v31  ;;  %v8898_v61 = vld [vmem:[#allocation2 + $0x18a] sm:$0xff]  ;;  %v7237_v31 = vpack.i.bf16 %v808_v58, %v807_v38  ;;  %v13634_v38 = vmov 0.0  }
  0xb3   : > { %7188 = vrot.lane.b32.xlu0 %v8798_v23, %s8238_s30  ;;  %6847 = vmatprep.mubr.msk.bf16.mxu1 %vm459_vm0, %v1837_v49  ;;  %2619 = vst.msk [vmem:[#allocation2 + $0x180] sm:$0x1] %vm2603_vm3, %v13411_v30  ;;  %2635 = vst.msk [vmem:[#allocation2 + $0x191] sm:$0x1] %vm2603_vm3, %v13411_v30  ;;  %v777_v21 = vld [vmem:[#allocation2 + $0xc0] sm:$0xff]  ;;  %v778_v49 = vld [vmem:[#allocation2 + $0xc8] sm:$0xff] }
  0xb4   : > { %v8917_v58 = vld [vmem:[#allocation2 + $0xa8] sm:$0xff]  ;;  %2628 = vst.msk [vmem:[#allocation2 + $0xe9] sm:$0x1] %vm2603_vm3, %v13634_v38  ;;  %2611 = vst.msk [vmem:[#allocation2 + $0xc0] sm:$0x1] %vm2603_vm3, %v13634_v38 }
  0xb5   : > { %7213 = vrot.lane.b32.xlu1 %v8757_v48, %s8239_s14  ;;  %v839_v48 = vld [vmem:[#allocation2 + $0xaa] sm:$0xff]  ;;  %2610 = vst.msk [vmem:[#allocation2 + $0xa8] sm:$0x1] %vm2603_vm3, %v13634_v38 }
  0xb6   : > { %v1840_v35 = vpack.c.bf16 %v840_v55, %v839_v48  ;;  %v7247_v48 = vpack.i.bf16 %v745_v26, %v744_v57  ;;  %v810_v55 = vld [vmem:[#allocation2 + $0xc9] sm:$0xff]  ;;  %v1846_v26 = vpack.c.bf16 %v844_v25, %v843_v27  ;;  %v811_v27 = vld [vmem:[#allocation2 + $0xd9] sm:$0xff] }
  0xb7   : > { %7198 = vrot.lane.b32.xlu0 %v8832_v47, %s8237_s25  ;;  %v746_v57 = vld [vmem:[#allocation2 + $0xc2] sm:$0xff] }
  0xb9   : > { %7223 = vrot.lane.b32.xlu1 %v8771_v60, %s8238_s30  ;;  %v8904_v60 = vld [vmem:[#allocation2 + $0x90] sm:$0xff] }
  0xba   : > { %2609 = vst.msk [vmem:[#allocation2 + $0x90] sm:$0x1] %vm2603_vm3, %v13411_v30  ;;  %6848 = vmatmul.mubr.msk.bf16.gmra.mrb[8].mxu1 %vm459_vm0, %v1840_v35  ;;  %v7257_v30 = vpack.i.bf16 %v778_v49, %v777_v21  ;;  %v841_v35 = vld [vmem:[#allocation2 + $0xc2] sm:$0xff]  ;;  %v779_v49 = vld [vmem:[#allocation2 + $0xd8] sm:$0xff] }
  0xbb   : > { %7208 = vrot.lane.b32.xlu0 %v7207_v59, %s8239_s14 }
  0xbd   : > { %7233 = vrot.lane.b32.xlu1 %v8798_v23, %s8237_s25  ;;  %v809_v23 = vld [vmem:[#allocation2 + $0xc1] sm:$0xff] }
  0xbe   : > { %v7267_v21 = vpack.i.bf16 %v810_v55, %v809_v23  ;;  %v781_v23 = vld [vmem:[#allocation2 + $0xf0] sm:$0xff]  ;;  %v782_v55 = vld [vmem:[#allocation2 + $0xf8] sm:$0xff] }
  0xbf   : > { %7218 = vrot.lane.b32.xlu0 %v7217_v29, %s8238_s30 }
  0xc1   : > { %7243 = vrot.lane.b32.xlu1 %v8832_v47, %s8239_s14  ;;  %v842_v47 = vld [vmem:[#allocation2 + $0xca] sm:$0xff] }
  0xc2   : > { %2627 = vst.msk [vmem:[#allocation2 + $0xd1] sm:$0x1] %vm2603_vm3, %v13634_v38 }
  0xc3   : > { %7228 = vrot.lane.b32.xlu0 %v7227_v62, %s8237_s25 }
  0xc5   : > { %7253 = vrot.lane.b32.xlu1 %v7207_v59, %s8238_s30  ;;  %v1843_v59 = vpack.c.bf16 %v842_v47, %v841_v35  ;;  %v780_v35 = vld [vmem:[#allocation2 + $0xe0] sm:$0xff] }
  0xc6   : > { %v7287_v25 = vpack.i.bf16 %v780_v35, %v779_v49  ;;  %v812_v47 = vld [vmem:[#allocation2 + $0xe1] sm:$0xff]  ;;  %v8943_v35 = vld [vmem:[#allocation2 + $0xd8] sm:$0xff] }
  0xc7   : > { %7238 = vrot.lane.b32.xlu0 %v7237_v31, %s8239_s14  ;;  %6851 = vmatprep.mubr.msk.bf16.mxu1 %vm459_vm0, %v1843_v59  ;;  %v813_v59 = vld [vmem:[#allocation2 + $0xf1] sm:$0xff]  ;;  %v751_v49 = vld [vmem:[#allocation2 + $0xfa] sm:$0xff]  ;;  %2612 = vst.msk [vmem:[#allocation2 + $0xd8] sm:$0x1] %vm2603_vm3, %v13634_v38 }
  0xc8   : > { %6852 = vmatmul.mubr.msk.bf16.gmra.mrb[12].mxu1 %vm459_vm0, %v1846_v26  ;;  %v814_v26 = vld [vmem:[#allocation2 + $0xf9] sm:$0xff] }
  0xc9   : > { %7263 = vrot.lane.b32.xlu1 %v7217_v29, %s8237_s25  ;;  %v7277_v29 = vpack.i.bf16 %v747_v42, %v746_v57  ;;  %v748_v42 = vld [vmem:[#allocation2 + $0xda] sm:$0xff]  ;;  %v7317_v57 = vpack.i.bf16 %v782_v55, %v781_v23  ;;  %v7327_v23 = vpack.i.bf16 %v814_v26, %v813_v59  ;;  %v750_v55 = vld [vmem:[#allocation2 + $0xf2] sm:$0xff] }
  0xca   : > { %v816_v59 = vld [vmem:[#allocation2 + $0x111] sm:$0xff] }
  0xcb   : > { %7248 = vrot.lane.b32.xlu0 %v7247_v48, %s8238_s30  ;;  %v8961_v26 = vld [vmem:[#allocation2 + $0xf0] sm:$0xff] }
  0xcc   : > { %2613 = vst.msk [vmem:[#allocation2 + $0xf0] sm:$0x1] %vm2603_vm3, %v13634_v38 }
  0xcd   : > { %7273 = vrot.lane.b32.xlu1 %v7227_v62, %s8239_s14  ;;  %v7297_v62 = vpack.i.bf16 %v812_v47, %v811_v27  ;;  %v845_v27 = vld [vmem:[#allocation2 + $0xf2] sm:$0xff]  ;;  %v847_v47 = vld [vmem:[#allocation2 + $0x10a] sm:$0xff] }
  0xcf   : > { %7258 = vrot.lane.b32.xlu0 %v7257_v30, %s8237_s25 }
  0xd1   : > { %7283 = vrot.lane.b32.xlu1 %v7237_v31, %s8238_s30  ;;  %v7307_v31 = vpack.i.bf16 %v749_v40, %v748_v42  ;;  %v848_v40 = vld [vmem:[#allocation2 + $0x112] sm:$0xff] }
  0xd3   : > { %7268 = vrot.lane.b32.xlu0 %v7267_v21, %s8239_s14 }
  0xd5   : > { %7293 = vrot.lane.b32.xlu1 %v7247_v48, %s8237_s25  ;;  %v753_v48 = vld [vmem:[#allocation2 + $0x112] sm:$0xff] }
  0xd6   : > { %2630 = vst.msk [vmem:[#allocation2 + $0x119] sm:$0x1] %vm2603_vm3, %v13634_v38 }
  0xd7   : > { %7278 = vrot.lane.b32.xlu0 %v7277_v29, %s8238_s30 }
  0xd9   : > { %7303 = vrot.lane.b32.xlu1 %v7257_v30, %s8239_s14  ;;  %v846_v30 = vld [vmem:[#allocation2 + $0xfa] sm:$0xff] }
  0xda   : > { %v1849_v42 = vpack.c.bf16 %v846_v30, %v845_v27  ;;  %2629 = vst.msk [vmem:[#allocation2 + $0x101] sm:$0x1] %vm2603_vm3, %v13634_v38  ;;  %v783_v27 = vld [vmem:[#allocation2 + $0x108] sm:$0xff]  ;;  %v784_v30 = vld [vmem:[#allocation2 + $0x110] sm:$0xff] }
  0xdb   : > { %7288 = vrot.lane.b32.xlu0 %v7287_v25, %s8237_s25 }
  0xdc   : > { %6855 = vmatprep.mubr.msk.bf16.mxu1 %vm459_vm0, %v1849_v42 }
  0xdd   : > { %7313 = vrot.lane.b32.xlu1 %v7267_v21, %s8238_s30  ;;  %v1852_v21 = vpack.c.bf16 %v848_v40, %v847_v47  ;;  %v8959_v47 = vpack.i.bf16 %v784_v30, %v783_v27  ;;  %v815_v40 = vld [vmem:[#allocation2 + $0x109] sm:$0xff] }
  0xdf   : > { %7298 = vrot.lane.b32.xlu0 %v7297_v62, %s8239_s14  ;;  %6856 = vmatmul.mubr.msk.bf16.gmra.mrb[16].mxu1 %vm459_vm0, %v1852_v21 }
  0xe1   : > { %7323 = vrot.lane.b32.xlu1 %v7277_v29, %s8237_s25  ;;  %v7337_v29 = vpack.i.bf16 %v751_v49, %v750_v55  ;;  %v785_v55 = vld [vmem:[#allocation2 + $0x120] sm:$0xff] }
  0xe3   : > { %7308 = vrot.lane.b32.xlu0 %v7307_v31, %s8238_s30 }
  0xe5   : > { %7333 = vrot.lane.b32.xlu1 %v7287_v25, %s8239_s14  ;;  %v8968_v25 = vpack.i.bf16 %v816_v59, %v815_v40 }
  0xe7   : > { %7318 = vrot.lane.b32.xlu0 %v7317_v57, %s8237_s25 }
  0xe9   : > { %7343 = vrot.lane.b32.xlu1 %v7297_v62, %s8238_s30  ;;  %v752_v62 = vld [vmem:[#allocation2 + $0x10a] sm:$0xff] }
  0xea   : > { %v8973_v21 = vpack.i.bf16 %v753_v48, %v752_v62  ;;  %v8980_v62 = vpack.i.bf16 %v818_v45, %v817_v46  ;;  %v849_v45 = vld [vmem:[#allocation2 + $0x122] sm:$0xff] }
  0xeb   : > { %7328 = vrot.lane.b32.xlu0 %v7327_v23, %s8239_s14 }
  0xed   : > { %7353 = vrot.lane.b32.xlu1 %v7307_v31, %s8237_s25  ;;  %v786_v31 = vld [vmem:[#allocation2 + $0x128] sm:$0xff] }
  0xee   : > { %v8978_v48 = vpack.i.bf16 %v786_v31, %v785_v55  ;;  %v8992_v55 = vld [vmem:[#allocation2 + $0x108] sm:$0xff] }
  0xef   : > { %7338 = vrot.lane.b32.xlu0 %v7337_v29, %s8238_s30  ;;  %v7079_v49 = vpop.permute.xlu1 %7078  ;;  %2614 = vst.msk [vmem:[#allocation2 + $0x108] sm:$0x1] %vm2603_vm3, %v13634_v38 }
  0xf0   : > { %v7080_v53 = vunpack.i.l.bf16 %v7079_v49 }
  0xf1   : > { %7363 = vrot.lane.b32.xlu1 %v7317_v57, %s8239_s14  ;;  %v7081_v57 = vunpack.i.h.bf16 %v7079_v49 }
  0xf3   : > { %7348 = vrot.lane.b32.xlu0 %v8959_v47, %s8237_s25  ;;  %v7084_v63 = vpop.permute.xlu1 %7083 }
  0xf4   : > { %v7086_v19 = vunpack.i.h.bf16 %v7084_v63  ;;  %v7085_v40 = vunpack.i.l.bf16 %v7084_v63 }
  0xf5   : > { %v7069_v42 = vpop.permute.xlu0 %7068  ;;  %7373 = vrot.lane.b32.xlu1 %v7327_v23, %s8238_s30 }
  0xf6   : > { %v7071_v27 = vunpack.i.h.bf16 %v7069_v42  ;;  %v7070_v30 = vunpack.i.l.bf16 %v7069_v42  ;;  %v755_v42 = vld [vmem:[#allocation2 + $0x12a] sm:$0xff] }
  0xf7   : > { %7358 = vrot.lane.b32.xlu0 %v8968_v25, %s8239_s14  ;;  %v7094_v17 = vpop.permute.xlu1 %7093 }
  0xf8   : > { %v1727_v23 = vsel %vm459_vm0, %v8627_v43, %v7070_v30  ;;  %v1728_v49 = vsel %vm459_vm0, %v8629_v44, %v7071_v27  ;;  %v7096_v31 = vunpack.i.h.bf16 %v7094_v17  ;;  %v7095_v15 = vunpack.i.l.bf16 %v7094_v17  ;;  %v851_v43 = vld [vmem:[#allocation2 + $0x13a] sm:$0xff] }
  0xf9   : > { %v7074_v59 = vpop.permute.xlu0 %7073  ;;  %7383 = vrot.lane.b32.xlu1 %v7337_v29, %s8237_s25  ;;  %v1759_v17 = vsel %vm1661_vm5, %v1727_v23, %v7080_v53 }
  0xfa   : > { %v7076_v18 = vunpack.i.h.bf16 %v7074_v59  ;;  %v7075_v54 = vunpack.i.l.bf16 %v7074_v59 }
  0xfb   : > { %7368 = vrot.lane.b32.xlu0 %v8973_v21, %s8238_s30  ;;  %v7104_v29 = vpop.permute.xlu1 %7103 }
  0xfc   : > { %v1630_v63 = vsel %vm459_vm0, %v8720_v33, %v7076_v18  ;;  %v1629_v59 = vsel %vm459_vm0, %v8718_v28, %v7075_v54  ;;  %v850_v54 = vld [vmem:[#allocation2 + $0x12a] sm:$0xff]  ;;  %v852_v28 = vld [vmem:[#allocation2 + $0x142] sm:$0xff]  ;;  %v7106_v53 = vunpack.i.h.bf16 %v7104_v29 }
  0xfd   : > { %v7089_v46 = vpop.permute.xlu0 %7088  ;;  %v1662_v18 = vsel %vm1661_vm5, %v1629_v59, %v7085_v40  ;;  %v1663_v33 = vsel %vm1661_vm5, %v1630_v63, %v7086_v19  ;;  %v1855_v27 = vpack.c.bf16 %v850_v54, %v849_v45  ;;  %2631 = vst.msk [vmem:[#allocation2 + $0x131] sm:$0x1] %vm2603_vm3, %v13634_v38  ;;  %v1858_v14 = vpack.c.bf16 %v852_v28, %v851_v43  ;;  %v754_v54 = vld [vmem:[#allocation2 + $0x122] sm:$0xff] }
  0xfe   : > { %v7091_v30 = vunpack.i.h.bf16 %v7089_v46  ;;  %v7090_v44 = vunpack.i.l.bf16 %v7089_v46  ;;  %2632 = vst.msk [vmem:[#allocation2 + $0x149] sm:$0x1] %vm2603_vm3, %v13634_v38  ;;  %v1760_v19 = vsel %vm1661_vm5, %v1728_v49, %v7081_v57  ;;  %v1695_v40 = vsel %vm1694_vm6, %v1662_v18, %v7095_v15  ;;  %7393 = vrot.lane.b32.xlu1 %v8959_v47, %s8239_s14  ;;  %v787_v49 = vld [vmem:[#allocation2 + $0x138] sm:$0xff] }
  0xff   : > { %7378 = vrot.lane.b32.xlu0 %v8978_v48, %s8237_s25  ;;  %v1696_v63 = vsel %vm1694_vm6, %v1663_v33, %v7096_v31  ;;  %6859 = vmatprep.mubr.msk.bf16.mxu1 %vm459_vm0, %v1855_v27  ;;  %v9017_v15 = vpack.i.bf16 %v755_v42, %v754_v54  ;;  %v7105_v57 = vunpack.i.l.bf16 %v7104_v29  ;;  %v7114_v23 = vpop.permute.xlu1 %7113  ;;  %v788_v31 = vld [vmem:[#allocation2 + $0x140] sm:$0xff] }
 0x100   : > { %v1791_v59 = vsel %vm1694_vm6, %v1759_v17, %v7090_v44  ;;  %v1792_v45 = vsel %vm1694_vm6, %v1760_v19, %v7091_v30  ;;  %v1823_v46 = vpack.c.bf16 %v1696_v63, %v1695_v40  ;;  %6860 = vmatmul.mubr.msk.bf16.gmra.mrb[20].mxu1 %vm459_vm0, %v1858_v14  ;;  %v819_v44 = vld [vmem:[#allocation2 + $0x139] sm:$0xff]  ;;  %v820_v14 = vld [vmem:[#allocation2 + $0x141] sm:$0xff]  ;;  %v7116_v27 = vunpack.i.h.bf16 %v7114_v23 }
 0x101   : > { %v7099_v43 = vpop.permute.xlu0 %7098  ;;  %v1824_v28 = vpack.c.bf16 %v1792_v45, %v1791_v59  ;;  %v7115_v17 = vunpack.i.l.bf16 %v7114_v23  ;;  %v9023_v42 = vpack.i.bf16 %v788_v31, %v787_v49  ;;  %v1631_v40 = vsel %vm459_vm0, %v8606_v32, %v7105_v57  ;;  %v9031_v45 = vld [vmem:[#allocation2 + $0x120] sm:$0xff] }
 0x102   : > { %v7101_v18 = vunpack.i.h.bf16 %v7099_v43  ;;  %v7100_v33 = vunpack.i.l.bf16 %v7099_v43  ;;  %7403 = vrot.lane.b32.xlu1 %v8968_v25, %s8238_s30  ;;  %v1632_v63 = vsel %vm459_vm0, %v8609_v34, %v7106_v53  ;;  %v9029_v59 = vpack.i.bf16 %v820_v14, %v819_v44  ;;  %2615 = vst.msk [vmem:[#allocation2 + $0x120] sm:$0x1] %vm2603_vm3, %v13634_v38 }
 0x103   : > { %7388 = vrot.lane.b32.xlu0 %v8980_v62, %s8239_s14  ;;  %2065 = vmatprep.mubr.bf16.mxu0 %v1824_v28  ;;  %v7124_v29 = vpop.permute.xlu1 %7123  ;;  %v1664_v34 = vsel %vm1661_vm5, %v1631_v40, %v7115_v17  ;;  %v1665_v53 = vsel %vm1661_vm5, %v1632_v63, %v7116_v27  ;;  %v789_v17 = vld [vmem:[#allocation2 + $0x150] sm:$0xff] }
 0x104   : > { %2066 = vmatmul.mubr.bf16.vlgmr.msra.gmra.mrb[0].mxu0 %v1823_v46  ;;  %v1730_v25 = vsel %vm459_vm0, %v8615_v37, %v7101_v18  ;;  %v1729_v46 = vsel %vm459_vm0, %v8613_v36, %v7100_v33  ;;  %v7126_v43 = vunpack.i.h.bf16 %v7124_v29  ;;  %v7125_v28 = vunpack.i.l.bf16 %v7124_v29 }
 0x105   : > { %v7109_v30 = vpop.permute.xlu0 %7108 }
 0x106   : > { %v7111_v47 = vunpack.i.h.bf16 %v7109_v30  ;;  %v7110_v19 = vunpack.i.l.bf16 %v7109_v30  ;;  %7413 = vrot.lane.b32.xlu1 %v8973_v21, %s8237_s25  ;;  %v1697_v23 = vsel %vm1694_vm6, %v1664_v34, %v7125_v28  ;;  %v1698_v49 = vsel %vm1694_vm6, %v1665_v53, %v7126_v43  ;;  %v756_v30 = vld [vmem:[#allocation2 + $0x13a] sm:$0xff] }
 0x107   : > { %7398 = vrot.lane.b32.xlu0 %v9017_v15, %s8238_s30  ;;  %v7134_v31 = vpop.permute.xlu1 %7133  ;;  %v1826_v33 = vpack.c.bf16 %v1698_v49, %v1697_v23  ;;  %v9056_v27 = vpack.i.bf16 %v8990_v16, %v756_v30  ;;  %v577_v43 = vld [vmem:[#allocation2 + $0x38] sm:$0xff] }
 0x108   : > { %v1761_v36 = vsel %vm1661_vm5, %v1729_v46, %v7110_v19  ;;  %v1762_v37 = vsel %vm1661_vm5, %v1730_v25, %v7111_v47  ;;  %v7136_v40 = vunpack.i.h.bf16 %v7134_v31  ;;  %v7135_v63 = vunpack.i.l.bf16 %v7134_v31  ;;  %v790_v25 = vld [vmem:[#allocation2 + $0x158] sm:$0xff] }
 0x109   : > { %v7119_v54 = vpop.permute.xlu0 %7118  ;;  %v821_v46 = vld [vmem:[#allocation2 + $0x151] sm:$0xff]  ;;  %v9062_v34 = vpack.i.bf16 %v790_v25, %v789_v17 }
 0x10a   : > { %v7121_v32 = vunpack.i.h.bf16 %v7119_v54  ;;  %v7120_v57 = vunpack.i.l.bf16 %v7119_v54  ;;  %7423 = vrot.lane.b32.xlu1 %v8978_v48, %s8239_s14  ;;  %v822_v54 = vld [vmem:[#allocation2 + $0x159] sm:$0xff]  ;;  %v1634_v23 = vsel %vm459_vm0, %v577_v43, %v7136_v40  ;;  %v9077_v17 = vld [vmem:[#allocation2 + $0x16a] sm:$0xff] }
 0x10b   : > { %7408 = vrot.lane.b32.xlu0 %v9023_v42, %s8237_s25  ;;  %v7144_v29 = vpop.permute.xlu1 %7143  ;;  %v9064_v53 = vpack.i.bf16 %v822_v54, %v821_v46  ;;  %v9073_v31 = vld [vmem:[#allocation2 + $0x138] sm:$0xff]  ;;  %v1864_v40 = vpack.c.bf16 %v8884_v52, %v9077_v17 }
 0x10c   : > { %v1793_v18 = vsel %vm1694_vm6, %v1761_v36, %v7120_v57  ;;  %v1794_v21 = vsel %vm1694_vm6, %v1762_v37, %v7121_v32  ;;  %v7146_v48 = vunpack.i.h.bf16 %v7144_v29  ;;  %v7145_v32 = vunpack.i.l.bf16 %v7144_v29  ;;  %2616 = vst.msk [vmem:[#allocation2 + $0x138] sm:$0x1] %vm2603_vm3, %v13634_v38 }
 0x10d   : > { %v7129_v44 = vpop.permute.xlu0 %7128  ;;  %v1827_v14 = vpack.c.bf16 %v1794_v21, %v1793_v18  ;;  %v853_v18 = vld [vmem:[#allocation2 + $0x152] sm:$0xff] }
 0x10e   : > { %v7131_v47 = vunpack.i.h.bf16 %v7129_v44  ;;  %v7130_v19 = vunpack.i.l.bf16 %v7129_v44  ;;  %7433 = vrot.lane.b32.xlu1 %v8980_v62, %s8238_s30  ;;  %v1633_v62 = vsel %vm459_vm0, %v8786_v22, %v7135_v63 }
 0x10f   : > { %7418 = vrot.lane.b32.xlu0 %v9029_v59, %s8239_s14  ;;  %2073 = vmatprep.mubr.bf16.mxu0 %v1827_v14  ;;  %v7154_v49 = vpop.permute.xlu1 %7153  ;;  %v1666_v44 = vsel %vm1661_vm5, %v1633_v62, %v7145_v32  ;;  %v1667_v14 = vsel %vm1661_vm5, %v1634_v23, %v7146_v48  ;;  %v758_v48 = vld [vmem:[#allocation2 + $0x152] sm:$0xff]  ;;  %v791_v62 = vld [vmem:[#allocation2 + $0x168] sm:$0xff] }
 0x110   : > { %2074 = vmatmul.mubr.bf16.gmra.mrb[4].mxu0 %v1826_v33  ;;  %v1732_v36 = vsel %vm459_vm0, %v8642_v51, %v7131_v47  ;;  %v1731_v37 = vsel %vm459_vm0, %v8640_v50, %v7130_v19  ;;  %v7156_v33 = vunpack.i.h.bf16 %v7154_v49  ;;  %v7155_v30 = vunpack.i.l.bf16 %v7154_v49  ;;  %v759_v51 = vld [vmem:[#allocation2 + $0x15a] sm:$0xff]  ;;  %v792_v49 = vld [vmem:[#allocation2 + $0x170] sm:$0xff] }
 0x111   : > { %v7139_v28 = vpop.permute.xlu0 %7138  ;;  %v854_v50 = vld [vmem:[#allocation2 + $0x15a] sm:$0xff] }
 0x112   : > { %v7141_v57 = vunpack.i.h.bf16 %v7139_v28  ;;  %v7140_v16 = vunpack.i.l.bf16 %v7139_v28  ;;  %7443 = vrot.lane.b32.xlu1 %v9017_v15, %s8237_s25  ;;  %v1861_v19 = vpack.c.bf16 %v854_v50, %v853_v18  ;;  %2633 = vst.msk [vmem:[#allocation2 + $0x161] sm:$0x1] %vm2603_vm3, %v13634_v38  ;;  %v1699_v25 = vsel %vm1694_vm6, %v1666_v44, %v7155_v30  ;;  %v9103_v44 = vld [vmem:[#allocation2 + $0x169] sm:$0xff] }
 0x113   : > { %7428 = vrot.lane.b32.xlu0 %v9056_v27, %s8238_s30  ;;  %v1700_v46 = vsel %vm1694_vm6, %v1667_v14, %v7156_v33  ;;  %v7164_v54 = vpop.permute.xlu1 %7163  ;;  %v579_v33 = vld [vmem:[#allocation2 + $0x50] sm:$0xff] }
 0x114   : > { %v1763_v63 = vsel %vm1661_vm5, %v1731_v37, %v7140_v16  ;;  %v1764_v29 = vsel %vm1661_vm5, %v1732_v36, %v7141_v57  ;;  %v1829_v28 = vpack.c.bf16 %v1700_v46, %v1699_v25  ;;  %6863 = vmatprep.mubr.msk.bf16.mxu1 %vm459_vm0, %v1861_v19  ;;  %v9101_v57 = vpack.i.bf16 %v759_v51, %v758_v48  ;;  %v9105_v14 = vld [vmem:[#allocation2 + $0x171] sm:$0xff]  ;;  %v707_v50 = vld [vmem:[#allocation2 + $0x69] sm:$0xff] }
 0x115   : > { %v7149_v21 = vpop.permute.xlu0 %7148  ;;  %6864 = vmatmul.mubr.msk.bf16.gmra.mrb[24].mxu1 %vm459_vm0, %v1864_v40  ;;  %v7166_v16 = vunpack.i.h.bf16 %v7164_v54  ;;  %v7165_v36 = vunpack.i.l.bf16 %v7164_v54  ;;  %v9111_v40 = vpack.i.bf16 %v792_v49, %v791_v62  ;;  %v9118_v46 = vpack.i.bf16 %v9105_v14, %v9103_v44  ;;  %v9120_v54 = vld [vmem:[#allocation2 + $0x150] sm:$0xff] }
 0x116   : > { %v7151_v47 = vunpack.i.h.bf16 %v7149_v21  ;;  %v7150_v22 = vunpack.i.l.bf16 %v7149_v21  ;;  %7453 = vrot.lane.b32.xlu1 %v9023_v42, %s8239_s14  ;;  %v706_v42 = vld [vmem:[#allocation2 + $0x61] sm:$0xff]  ;;  %2617 = vst.msk [vmem:[#allocation2 + $0x150] sm:$0x1] %vm2603_vm3, %v13634_v38 }
 0x117   : > { %7438 = vrot.lane.b32.xlu0 %v9062_v34, %s8237_s25  ;;  %v7174_v37 = vpop.permute.xlu1 %7173 }
 0x118   : > { %v1795_v15 = vsel %vm1694_vm6, %v1763_v63, %v7150_v22  ;;  %v1796_v43 = vsel %vm1694_vm6, %v1764_v29, %v7151_v47  ;;  %v7176_v47 = vunpack.i.h.bf16 %v7174_v37  ;;  %v7175_v22 = vunpack.i.l.bf16 %v7174_v37 }
 0x119   : > { %v7159_v32 = vpop.permute.xlu0 %7158  ;;  %v1830_v23 = vpack.c.bf16 %v1796_v43, %v1795_v15  ;;  %v1636_v63 = vsel %vm459_vm0, %v579_v33, %v7166_v16  ;;  %v1635_v29 = vsel %vm459_vm0, %v8816_v41, %v7165_v36 }
 0x11a   : > { %v7161_v18 = vunpack.i.h.bf16 %v7159_v32  ;;  %v7160_v21 = vunpack.i.l.bf16 %v7159_v32  ;;  %7463 = vrot.lane.b32.xlu1 %v9029_v59, %s8238_s30  ;;  %v1668_v41 = vsel %vm1661_vm5, %v1635_v29, %v7175_v22  ;;  %v1669_v16 = vsel %vm1661_vm5, %v1636_v63, %v7176_v47  ;;  %v794_v29 = vld [vmem:[#allocation2 + $0x188] sm:$0xff] }
 0x11b   : > { %7448 = vrot.lane.b32.xlu0 %v9064_v53, %s8239_s14  ;;  %2081 = vmatprep.mubr.bf16.mxu0 %v1830_v23  ;;  %v7184_v25 = vpop.permute.xlu1 %7183  ;;  %v9144_v47 = vpack.i.bf16 %v8884_v52, %v9077_v17 }
 0x11c   : > { %2082 = vmatmul.mubr.bf16.gmra.mrb[8].mxu0 %v1829_v28  ;;  %v1734_v59 = vsel %vm459_vm0, %v707_v50, %v7161_v18  ;;  %v1733_v15 = vsel %vm459_vm0, %v706_v42, %v7160_v21  ;;  %v7186_v28 = vunpack.i.h.bf16 %v7184_v25  ;;  %v7185_v48 = vunpack.i.l.bf16 %v7184_v25  ;;  %v9146_v25 = vld [vmem:[#allocation2 + $0x181] sm:$0xff] }
 0x11d   : > { %v7169_v30 = vpop.permute.xlu0 %7168 }
 0x11e   : > { %v7171_v51 = vunpack.i.h.bf16 %v7169_v30  ;;  %v7170_v19 = vunpack.i.l.bf16 %v7169_v30  ;;  %7473 = vrot.lane.b32.xlu1 %v9056_v27, %s8237_s25  ;;  %v1701_v62 = vsel %vm1694_vm6, %v1668_v41, %v7185_v48  ;;  %v1702_v49 = vsel %vm1694_vm6, %v1669_v16, %v7186_v28 }
 0x11f   : > { %7458 = vrot.lane.b32.xlu0 %v9101_v57, %s8238_s30  ;;  %v7194_v18 = vpop.permute.xlu1 %7193  ;;  %v1832_v33 = vpack.c.bf16 %v1702_v49, %v1701_v62  ;;  %v9157_v41 = vpack.i.bf16 %v794_v29, %v8892_v39  ;;  %v9171_v39 = vld [vmem:[#allocation2 + $0x168] sm:$0xff] }
 0x120   : > { %v1765_v36 = vsel %vm1661_vm5, %v1733_v15, %v7170_v19  ;;  %v1766_v37 = vsel %vm1661_vm5, %v1734_v59, %v7171_v51  ;;  %v7195_v50 = vunpack.i.l.bf16 %v7194_v18  ;;  %v7196_v19 = vunpack.i.h.bf16 %v7194_v18  ;;  %v9148_v59 = vld [vmem:[#allocation2 + $0x189] sm:$0xff]  ;;  %v709_v15 = vld [vmem:[#allocation2 + $0x81] sm:$0xff]  ;;  %2618 = vst.msk [vmem:[#allocation2 + $0x168] sm:$0x1] %vm2603_vm3, %v13634_v38 }
 0x121   : > { %v7179_v43 = vpop.permute.xlu0 %7178  ;;  %v7507_v16 = vpack.i.bf16 %v9148_v59, %v9146_v25 }
 0x122   : > { %v7181_v32 = vunpack.i.h.bf16 %v7179_v43  ;;  %v7180_v23 = vunpack.i.l.bf16 %v7179_v43  ;;  %7483 = vrot.lane.b32.xlu1 %v9062_v34, %s8239_s14  ;;  %v708_v34 = vld [vmem:[#allocation2 + $0x79] sm:$0xff]  ;;  %v581_v43 = vld [vmem:[#allocation2 + $0x68] sm:$0xff]  ;;  %v1637_v52 = vsel %vm459_vm0, %v8854_v56, %v7195_v50 }
 0x123   : > { %7468 = vrot.lane.b32.xlu0 %v9111_v40, %s8237_s25  ;;  %v7204_v63 = vpop.permute.xlu1 %7203  ;;  %v1638_v49 = vsel %vm459_vm0, %v581_v43, %v7196_v19  ;;  %v860_v19 = vld [vmem:[#allocation2 + $0x1a2] sm:$0xff] }
 0x124   : > { %v1797_v21 = vsel %vm1694_vm6, %v1765_v36, %v7180_v23  ;;  %v1798_v27 = vsel %vm1694_vm6, %v1766_v37, %v7181_v32  ;;  %v7206_v48 = vunpack.i.h.bf16 %v7204_v63  ;;  %v7205_v32 = vunpack.i.l.bf16 %v7204_v63  ;;  %v762_v36 = vld [vmem:[#allocation2 + $0x182] sm:$0xff]  ;;  %v9161_v37 = vld [vmem:[#allocation2 + $0x198] sm:$0xff] }
 0x125   : > { %v7189_v30 = vpop.permute.xlu0 %7188  ;;  %v1833_v42 = vpack.c.bf16 %v1798_v27, %v1797_v21  ;;  %v9167_v21 = vld [vmem:[#allocation2 + $0x1a0] sm:$0xff] }
 0x126   : > { %v7191_v22 = vunpack.i.h.bf16 %v7189_v30  ;;  %v7190_v51 = vunpack.i.l.bf16 %v7189_v30  ;;  %7493 = vrot.lane.b32.xlu1 %v9064_v53, %s8238_s30  ;;  %v1670_v18 = vsel %vm1661_vm5, %v1637_v52, %v7205_v32  ;;  %v9169_v27 = vld [vmem:[#allocation2 + $0x199] sm:$0xff]  ;;  %v1671_v50 = vsel %vm1661_vm5, %v1638_v49, %v7206_v48  ;;  %v9174_v63 = vld [vmem:[#allocation2 + $0x1a1] sm:$0xff] }
 0x127   : > { %7478 = vrot.lane.b32.xlu0 %v9118_v46, %s8239_s14  ;;  %2089 = vmatprep.mubr.bf16.mxu0 %v1833_v42  ;;  %v7214_v56 = vpop.permute.xlu1 %7213  ;;  %2602 = vst.msk [vmem:[#allocation2 + $0x1a8] sm:$0x3] %vm2598_vm4, %v13634_v38 }
 0x128   : > { %2090 = vmatmul.mubr.bf16.gmra.mrb[12].mxu0 %v1832_v33  ;;  %v1736_v62 = vsel %vm459_vm0, %v709_v15, %v7191_v22  ;;  %v1735_v53 = vsel %vm459_vm0, %v708_v34, %v7190_v51  ;;  %v7216_v30 = vunpack.i.h.bf16 %v7214_v56  ;;  %v7215_v42 = vunpack.i.l.bf16 %v7214_v56  ;;  %v859_v51 = vld [vmem:[#allocation2 + $0x19a] sm:$0xff] }
 0x129   : > { %v7199_v28 = vpop.permute.xlu0 %7198  ;;  %v1867_v22 = vpack.c.bf16 %v8898_v61, %v762_v36  ;;  %v1870_v43 = vpack.c.bf16 %v860_v19, %v859_v51  ;;  %2600 = vst.msk [vmem:[#allocation2 + $0x198] sm:$0xff] %vm459_vm0, %v13634_v38  ;;  %2601 = vst.msk [vmem:[#allocation2 + $0x1a0] sm:$0xff] %vm459_vm0, %v13634_v38  ;;  %v710_v51 = vld [vmem:[#allocation2 + $0x91] sm:$0xff]  ;;  %v711_v19 = vld [vmem:[#allocation2 + $0x99] sm:$0xff] }
 0x12a   : > { %v7200_v23 = vunpack.i.l.bf16 %v7199_v28  ;;  %v7201_v17 = vunpack.i.h.bf16 %v7199_v28  ;;  %7503 = vrot.lane.b32.xlu1 %v9101_v57, %s8237_s25  ;;  %v1703_v48 = vsel %vm1694_vm6, %v1670_v18, %v7215_v42  ;;  %v1704_v57 = vsel %vm1694_vm6, %v1671_v50, %v7216_v30  ;;  %v583_v50 = vld [vmem:[#allocation2 + $0x80] sm:$0xff] }
 0x12b   : > { %7488 = vrot.lane.b32.xlu0 %v9144_v47, %s8238_s30  ;;  %6867 = vmatprep.mubr.msk.bf16.mxu1 %vm459_vm0, %v1867_v22  ;;  %v7224_v32 = vpop.permute.xlu1 %7223 }
 0x12c   : > { %v1767_v15 = vsel %vm1661_vm5, %v1735_v53, %v7200_v23  ;;  %v1768_v28 = vsel %vm1661_vm5, %v1736_v62, %v7201_v17  ;;  %v1835_v53 = vpack.c.bf16 %v1704_v57, %v1703_v48  ;;  %6868 = vmatmul.mubr.msk.bf16.gmra.mrb[28].mxu1 %vm459_vm0, %v1870_v43  ;;  %v7517_v17 = vpack.i.bf16 %v8898_v61, %v762_v36 }
 0x12d   : > { %v7209_v33 = vpop.permute.xlu0 %7208  ;;  %v7226_v62 = vunpack.i.h.bf16 %v7224_v32  ;;  %v7225_v18 = vunpack.i.l.bf16 %v7224_v32  ;;  %v7527_v61 = vpack.i.bf16 %v9167_v21, %v9161_v37 }
 0x12e   : > { %v7211_v29 = vunpack.i.h.bf16 %v7209_v33  ;;  %v7210_v34 = vunpack.i.l.bf16 %v7209_v33  ;;  %7513 = vrot.lane.b32.xlu1 %v9111_v40, %s8239_s14 }
 0x12f   : > { %7498 = vrot.lane.b32.xlu0 %v9157_v41, %s8237_s25  ;;  %v7234_v33 = vpop.permute.xlu1 %7233  ;;  %v1640_v36 = vsel %vm459_vm0, %v583_v50, %v7226_v62 }
 0x130   : > { %v1799_v23 = vsel %vm1694_vm6, %v1767_v15, %v7210_v34  ;;  %v1800_v52 = vsel %vm1694_vm6, %v1768_v28, %v7211_v29  ;;  %v7236_v29 = vunpack.i.h.bf16 %v7234_v33  ;;  %v7235_v34 = vunpack.i.l.bf16 %v7234_v33  ;;  %v3308_v5 = vld [vmem:[#allocation2 + $0x1a0] sm:$0xff] }
 0x131   : > { %v7219_v49 = vpop.permute.xlu0 %7218  ;;  %v1836_v56 = vpack.c.bf16 %v1800_v52, %v1799_v23  ;;  %v1639_v15 = vsel %vm459_vm0, %v8876_v24, %v7225_v18  ;;  %v7537_v28 = vpack.i.bf16 %v9174_v63, %v9169_v27 }
 0x132   : > { %v7221_v30 = vunpack.i.h.bf16 %v7219_v49  ;;  %v7220_v42 = vunpack.i.l.bf16 %v7219_v49  ;;  %7523 = vrot.lane.b32.xlu1 %v9118_v46, %s8238_s30  ;;  %v1672_v37 = vsel %vm1661_vm5, %v1639_v15, %v7235_v34  ;;  %v1673_v24 = vsel %vm1661_vm5, %v1640_v36, %v7236_v29  ;;  %v712_v34 = vld [vmem:[#allocation2 + $0xa9] sm:$0xff] }
 0x133   : > { %7508 = vrot.lane.b32.xlu0 %v7507_v16, %s8239_s14  ;;  %2097 = vmatprep.mubr.bf16.mxu0 %v1836_v56  ;;  %v7244_v43 = vpop.permute.xlu1 %7243 }
 0x134   : > { %2098 = vmatmul.mubr.bf16.gmra.mrb[16].mxu0 %v1835_v53  ;;  %v1738_v48 = vsel %vm459_vm0, %v711_v19, %v7221_v30  ;;  %v1737_v46 = vsel %vm459_vm0, %v710_v51, %v7220_v42  ;;  %v7246_v32 = vunpack.i.h.bf16 %v7244_v43  ;;  %v7245_v23 = vunpack.i.l.bf16 %v7244_v43  ;;  %v585_v19 = vld [vmem:[#allocation2 + $0x98] sm:$0xff] }
 0x135   : > { %v7229_v22 = vpop.permute.xlu0 %7228 }
 0x136   : > { %v7231_v40 = vunpack.i.h.bf16 %v7229_v22  ;;  %v7230_v16 = vunpack.i.l.bf16 %v7229_v22  ;;  %7533 = vrot.lane.b32.xlu1 %v9144_v47, %s8237_s25  ;;  %v1705_v63 = vsel %vm1694_vm6, %v1672_v37, %v7245_v23  ;;  %v1706_v49 = vsel %vm1694_vm6, %v1673_v24, %v7246_v32 }
 0x137   : > { %7518 = vrot.lane.b32.xlu0 %v7517_v17, %s8238_s30  ;;  %v7254_v56 = vpop.permute.xlu1 %7253  ;;  %v1838_v47 = vpack.c.bf16 %v1706_v49, %v1705_v63 }
 0x138   : > { %v1769_v21 = vsel %vm1661_vm5, %v1737_v46, %v7230_v16  ;;  %v1770_v27 = vsel %vm1661_vm5, %v1738_v48, %v7231_v40  ;;  %v7256_v30 = vunpack.i.h.bf16 %v7254_v56  ;;  %v7255_v42 = vunpack.i.l.bf16 %v7254_v56  ;;  %v713_v40 = vld [vmem:[#allocation2 + $0xb1] sm:$0xff] }
 0x139   : > { %v7239_v57 = vpop.permute.xlu0 %7238 }
 0x13a   : > { %v7241_v52 = vunpack.i.h.bf16 %v7239_v57  ;;  %v7240_v53 = vunpack.i.l.bf16 %v7239_v57  ;;  %7543 = vrot.lane.b32.xlu1 %v9157_v41, %s8239_s14  ;;  %v1642_v43 = vsel %vm459_vm0, %v585_v19, %v7256_v30  ;;  %v1641_v41 = vsel %vm459_vm0, %v8904_v60, %v7255_v42 }
 0x13b   : > { %7528 = vrot.lane.b32.xlu0 %v7527_v61, %s8237_s25  ;;  %v7264_v50 = vpop.permute.xlu1 %7263 }
 0x13c   : > { %v1801_v17 = vsel %vm1694_vm6, %v1769_v21, %v7240_v53  ;;  %v1802_v62 = vsel %vm1694_vm6, %v1770_v27, %v7241_v52  ;;  %v7266_v16 = vunpack.i.h.bf16 %v7264_v50  ;;  %v7265_v61 = vunpack.i.l.bf16 %v7264_v50 }
 0x13d   : > { %v7249_v18 = vpop.permute.xlu0 %7248  ;;  %v1839_v33 = vpack.c.bf16 %v1802_v62, %v1801_v17 }
 0x13e   : > { %v7251_v22 = vunpack.i.h.bf16 %v7249_v18  ;;  %v7250_v51 = vunpack.i.l.bf16 %v7249_v18  ;;  %v1674_v37 = vsel %vm1661_vm5, %v1641_v41, %v7265_v61  ;;  %v1675_v24 = vsel %vm1661_vm5, %v1642_v43, %v7266_v16 }
 0x13f   : > { %7538 = vrot.lane.b32.xlu0 %v7537_v28, %s8239_s14  ;;  %2105 = vmatprep.mubr.bf16.mxu0 %v1839_v33  ;;  %v7274_v28 = vpop.permute.xlu1 %7273 }
 0x140   : > { %2106 = vmatmul.mubr.bf16.gmra.mrb[20].mxu0 %v1838_v47  ;;  %v1740_v48 = vsel %vm459_vm0, %v713_v40, %v7251_v22  ;;  %v1739_v46 = vsel %vm459_vm0, %v712_v34, %v7250_v51  ;;  %v7276_v32 = vunpack.i.h.bf16 %v7274_v28  ;;  %v7275_v23 = vunpack.i.l.bf16 %v7274_v28  ;;  %v587_v51 = vld [vmem:[#allocation2 + $0xb0] sm:$0xff] }
 0x141   : > { %v7259_v29 = vpop.permute.xlu0 %7258  ;;  %v715_v34 = vld [vmem:[#allocation2 + $0xc9] sm:$0xff] }
 0x142   : > { %v7261_v36 = vunpack.i.h.bf16 %v7259_v29  ;;  %v7260_v15 = vunpack.i.l.bf16 %v7259_v29  ;;  %v1707_v60 = vsel %vm1694_vm6, %v1674_v37, %v7275_v23  ;;  %v1708_v63 = vsel %vm1694_vm6, %v1675_v24, %v7276_v32  ;;  %v714_v29 = vld [vmem:[#allocation2 + $0xc1] sm:$0xff] }
 0x143   : > { %v7284_v49 = vpop.permute.xlu1 %7283  ;;  %v1841_v62 = vpack.c.bf16 %v1708_v63, %v1707_v60 }
 0x144   : > { %v1771_v21 = vsel %vm1661_vm5, %v1739_v46, %v7260_v15  ;;  %v1772_v27 = vsel %vm1661_vm5, %v1740_v48, %v7261_v36  ;;  %v7286_v33 = vunpack.i.h.bf16 %v7284_v49  ;;  %v7285_v30 = vunpack.i.l.bf16 %v7284_v49 }
 0x145   : > { %v7269_v57 = vpop.permute.xlu0 %7268 }
 0x146   : > { %v7271_v52 = vunpack.i.h.bf16 %v7269_v57  ;;  %v7270_v53 = vunpack.i.l.bf16 %v7269_v57  ;;  %v1644_v15 = vsel %vm459_vm0, %v587_v51, %v7286_v33  ;;  %v1643_v43 = vsel %vm459_vm0, %v8917_v58, %v7285_v30  ;;  %v716_v51 = vld [vmem:[#allocation2 + $0xd9] sm:$0xff] }
 0x147   : > { %v7294_v42 = vpop.permute.xlu1 %7293 }
 0x148   : > { %v1803_v56 = vsel %vm1694_vm6, %v1771_v21, %v7270_v53  ;;  %v1804_v17 = vsel %vm1694_vm6, %v1772_v27, %v7271_v52  ;;  %v7296_v40 = vunpack.i.h.bf16 %v7294_v42  ;;  %v7295_v16 = vunpack.i.l.bf16 %v7294_v42 }
 0x149   : > { %v7279_v47 = vpop.permute.xlu0 %7278  ;;  %v1842_v18 = vpack.c.bf16 %v1804_v17, %v1803_v56 }
 0x14a   : > { %v7281_v50 = vunpack.i.h.bf16 %v7279_v47  ;;  %v7280_v22 = vunpack.i.l.bf16 %v7279_v47  ;;  %v1676_v53 = vsel %vm1661_vm5, %v1643_v43, %v7295_v16  ;;  %v1677_v37 = vsel %vm1661_vm5, %v1644_v15, %v7296_v40 }
 0x14b   : > { %2113 = vmatprep.mubr.bf16.mxu0 %v1842_v18  ;;  %v7304_v41 = vpop.permute.xlu1 %7303 }
 0x14c   : > { %2114 = vmatmul.mubr.bf16.gmra.mrb[24].mxu0 %v1841_v62  ;;  %v1742_v28 = vsel %vm459_vm0, %v715_v34, %v7281_v50  ;;  %v1741_v48 = vsel %vm459_vm0, %v714_v29, %v7280_v22  ;;  %v7306_v57 = vunpack.i.h.bf16 %v7304_v41  ;;  %v7305_v32 = vunpack.i.l.bf16 %v7304_v41  ;;  %v589_v50 = vld [vmem:[#allocation2 + $0xc8] sm:$0xff] }
 0x14d   : > { %v7289_v19 = vpop.permute.xlu0 %7288 }
 0x14e   : > { %v7291_v61 = vunpack.i.h.bf16 %v7289_v19  ;;  %v7290_v36 = vunpack.i.l.bf16 %v7289_v19  ;;  %v1709_v58 = vsel %vm1694_vm6, %v1676_v53, %v7305_v32  ;;  %v1710_v27 = vsel %vm1694_vm6, %v1677_v37, %v7306_v57  ;;  %v717_v19 = vld [vmem:[#allocation2 + $0xe1] sm:$0xff] }
 0x14f   : > { %v7314_v60 = vpop.permute.xlu1 %7313  ;;  %v1844_v56 = vpack.c.bf16 %v1710_v27, %v1709_v58 }
 0x150   : > { %v1773_v24 = vsel %vm1661_vm5, %v1741_v48, %v7290_v36  ;;  %v1774_v21 = vsel %vm1661_vm5, %v1742_v28, %v7291_v61  ;;  %v7316_v47 = vunpack.i.h.bf16 %v7314_v60  ;;  %v7315_v18 = vunpack.i.l.bf16 %v7314_v60 }
 0x151   : > { %v7299_v46 = vpop.permute.xlu0 %7298 }
 0x152   : > { %v7301_v23 = vunpack.i.h.bf16 %v7299_v46  ;;  %v7300_v52 = vunpack.i.l.bf16 %v7299_v46  ;;  %v1646_v61 = vsel %vm459_vm0, %v589_v50, %v7316_v47  ;;  %v1645_v36 = vsel %vm459_vm0, %v8933_v20, %v7315_v18  ;;  %v719_v50 = vld [vmem:[#allocation2 + $0xf9] sm:$0xff] }
 0x153   : > { %v7324_v33 = vpop.permute.xlu1 %7323 }
 0x154   : > { %v1805_v63 = vsel %vm1694_vm6, %v1773_v24, %v7300_v52  ;;  %v1806_v49 = vsel %vm1694_vm6, %v1774_v21, %v7301_v23  ;;  %v7326_v29 = vunpack.i.h.bf16 %v7324_v33  ;;  %v7325_v34 = vunpack.i.l.bf16 %v7324_v33  ;;  %v591_v33 = vld [vmem:[#allocation2 + $0xe0] sm:$0xff] }
 0x155   : > { %v7309_v17 = vpop.permute.xlu0 %7308  ;;  %v1845_v62 = vpack.c.bf16 %v1806_v49, %v1805_v63 }
 0x156   : > { %v7311_v30 = vunpack.i.h.bf16 %v7309_v17  ;;  %v7310_v42 = vunpack.i.l.bf16 %v7309_v17  ;;  %v1678_v23 = vsel %vm1661_vm5, %v1645_v36, %v7325_v34  ;;  %v1679_v52 = vsel %vm1661_vm5, %v1646_v61, %v7326_v29 }
 0x157   : > { %2121 = vmatprep.mubr.bf16.mxu0 %v1845_v62  ;;  %v7334_v15 = vpop.permute.xlu1 %7333 }
 0x158   : > { %2122 = vmatmul.mubr.bf16.gmra.mrb[28].mxu0 %v1844_v56  ;;  %v1744_v43 = vsel %vm459_vm0, %v717_v19, %v7311_v30  ;;  %v1743_v41 = vsel %vm459_vm0, %v716_v51, %v7310_v42  ;;  %v7336_v48 = vunpack.i.h.bf16 %v7334_v15  ;;  %v7335_v46 = vunpack.i.l.bf16 %v7334_v15  ;;  %v718_v42 = vld [vmem:[#allocation2 + $0xf1] sm:$0xff] }
 0x159   : > { %v7319_v22 = vpop.permute.xlu0 %7318 }
 0x15a   : > { %v7321_v40 = vunpack.i.h.bf16 %v7319_v22  ;;  %v7320_v16 = vunpack.i.l.bf16 %v7319_v22  ;;  %v1711_v20 = vsel %vm1694_vm6, %v1678_v23, %v7335_v46  ;;  %v1712_v24 = vsel %vm1694_vm6, %v1679_v52, %v7336_v48 }
 0x15b   : > { %v7344_v21 = vpop.permute.xlu1 %7343  ;;  %v1847_v60 = vpack.c.bf16 %v1712_v24, %v1711_v20 }
 0x15c   : > { %v1775_v53 = vsel %vm1661_vm5, %v1743_v41, %v7320_v16  ;;  %v1776_v37 = vsel %vm1661_vm5, %v1744_v43, %v7321_v40  ;;  %v7346_v56 = vunpack.i.h.bf16 %v7344_v21  ;;  %v7345_v17 = vunpack.i.l.bf16 %v7344_v21 }
 0x15d   : > { %v7329_v28 = vpop.permute.xlu0 %7328 }
 0x15e   : > { %v7331_v57 = vunpack.i.h.bf16 %v7329_v28  ;;  %v7330_v32 = vunpack.i.l.bf16 %v7329_v28  ;;  %v1648_v34 = vsel %vm459_vm0, %v591_v33, %v7346_v56  ;;  %v1647_v40 = vsel %vm459_vm0, %v8943_v35, %v7345_v17  ;;  %v593_v17 = vld [vmem:[#allocation2 + $0xf8] sm:$0xff] }
 0x15f   : > { %v7354_v62 = vpop.permute.xlu1 %7353 }
 0x160   : > { %v1807_v58 = vsel %vm1694_vm6, %v1775_v53, %v7330_v32  ;;  %v1808_v27 = vsel %vm1694_vm6, %v1776_v37, %v7331_v57  ;;  %v7356_v22 = vunpack.i.h.bf16 %v7354_v62  ;;  %v7355_v51 = vunpack.i.l.bf16 %v7354_v62 }
 0x161   : > { %v7339_v63 = vpop.permute.xlu0 %7338  ;;  %v1848_v49 = vpack.c.bf16 %v1808_v27, %v1807_v58 }
 0x162   : > { %v7341_v47 = vunpack.i.h.bf16 %v7339_v63  ;;  %v7340_v18 = vunpack.i.l.bf16 %v7339_v63  ;;  %v1680_v46 = vsel %vm1661_vm5, %v1647_v40, %v7355_v51  ;;  %v1681_v57 = vsel %vm1661_vm5, %v1648_v34, %v7356_v22 }
 0x163   : > { %2129 = vmatprep.mubr.bf16.mxu0 %v1848_v49  ;;  %v7364_v16 = vpop.permute.xlu1 %7363 }
 0x164   : > { %2130 = vmatmul.mubr.bf16.gmra.mrb[32].mxu0 %v1847_v60  ;;  %v1746_v61 = vsel %vm459_vm0, %v719_v50, %v7341_v47  ;;  %v1745_v36 = vsel %vm459_vm0, %v718_v42, %v7340_v18  ;;  %v7366_v43 = vunpack.i.h.bf16 %v7364_v16  ;;  %v7365_v41 = vunpack.i.l.bf16 %v7364_v16  ;;  %v720_v47 = vld [vmem:[#allocation2 + $0x109] sm:$0xff]  ;;  %v721_v18 = vld [vmem:[#allocation2 + $0x111] sm:$0xff] }
 0x165   : > { %v7349_v30 = vpop.permute.xlu0 %7348 }
 0x166   : > { %v7351_v19 = vunpack.i.h.bf16 %v7349_v30  ;;  %v7350_v29 = vunpack.i.l.bf16 %v7349_v30  ;;  %v1713_v35 = vsel %vm1694_vm6, %v1680_v46, %v7365_v41  ;;  %v1714_v52 = vsel %vm1694_vm6, %v1681_v57, %v7366_v43 }
 0x167   : > { %v7374_v53 = vpop.permute.xlu1 %7373  ;;  %v1850_v24 = vpack.c.bf16 %v1714_v52, %v1713_v35 }
 0x168   : > { %v1777_v32 = vsel %vm1661_vm5, %v1745_v36, %v7350_v29  ;;  %v1778_v23 = vsel %vm1661_vm5, %v1746_v61, %v7351_v19  ;;  %v7376_v27 = vunpack.i.h.bf16 %v7374_v53  ;;  %v7375_v60 = vunpack.i.l.bf16 %v7374_v53 }
 0x169   : > { %v7359_v15 = vpop.permute.xlu0 %7358 }
 0x16a   : > { %v7361_v28 = vunpack.i.h.bf16 %v7359_v15  ;;  %v7360_v48 = vunpack.i.l.bf16 %v7359_v15  ;;  %v1650_v22 = vsel %vm459_vm0, %v593_v17, %v7376_v27  ;;  %v1649_v51 = vsel %vm459_vm0, %v8961_v26, %v7375_v60  ;;  %v595_v27 = vld [vmem:[#allocation2 + $0x110] sm:$0xff] }
 0x16b   : > { %v7384_v63 = vpop.permute.xlu1 %7383 }
 0x16c   : > { %v1809_v37 = vsel %vm1694_vm6, %v1777_v32, %v7360_v48  ;;  %v1810_v20 = vsel %vm1694_vm6, %v1778_v23, %v7361_v28  ;;  %v7386_v33 = vunpack.i.h.bf16 %v7384_v63  ;;  %v7385_v30 = vunpack.i.l.bf16 %v7384_v63  ;;  %v722_v63 = vld [vmem:[#allocation2 + $0x121] sm:$0xff] }
 0x16d   : > { %v7369_v21 = vpop.permute.xlu0 %7368  ;;  %v1851_v58 = vpack.c.bf16 %v1810_v20, %v1809_v37 }
 0x16e   : > { %v7371_v49 = vunpack.i.h.bf16 %v7369_v21  ;;  %v7370_v56 = vunpack.i.l.bf16 %v7369_v21  ;;  %v1682_v43 = vsel %vm1661_vm5, %v1649_v51, %v7385_v30  ;;  %v1683_v41 = vsel %vm1661_vm5, %v1650_v22, %v7386_v33 }
 0x16f   : > { %2137 = vmatprep.mubr.bf16.mxu0 %v1851_v58 }
 0x170   : > { %2138 = vmatmul.mubr.bf16.gmra.mrb[36].mxu0 %v1850_v24  ;;  %v7394_v19 = vpop.permute.xlu1 %7393  ;;  %v1748_v29 = vsel %vm459_vm0, %v721_v18, %v7371_v49  ;;  %v1747_v34 = vsel %vm459_vm0, %v720_v47, %v7370_v56  ;;  %v723_v49 = vld [vmem:[#allocation2 + $0x129] sm:$0xff] }
 0x171   : > { %v7379_v62 = vpop.permute.xlu0 %7378  ;;  %v7396_v16 = vunpack.i.h.bf16 %v7394_v19  ;;  %v7395_v61 = vunpack.i.l.bf16 %v7394_v19 }
 0x172   : > { %v7381_v42 = vunpack.i.h.bf16 %v7379_v62  ;;  %v7380_v50 = vunpack.i.l.bf16 %v7379_v62 }
 0x173   : > { %v1715_v26 = vsel %vm1694_vm6, %v1682_v43, %v7395_v61  ;;  %v1716_v46 = vsel %vm1694_vm6, %v1683_v41, %v7396_v16 }
 0x174   : > { %v1779_v28 = vsel %vm1661_vm5, %v1747_v34, %v7380_v50  ;;  %v1780_v48 = vsel %vm1661_vm5, %v1748_v29, %v7381_v42  ;;  %v7404_v57 = vpop.permute.xlu1 %7403  ;;  %v1853_v35 = vpack.c.bf16 %v1716_v46, %v1715_v26 }
 0x175   : > { %v7389_v40 = vpop.permute.xlu0 %7388  ;;  %v7406_v37 = vunpack.i.h.bf16 %v7404_v57  ;;  %v7405_v20 = vunpack.i.l.bf16 %v7404_v57 }
 0x176   : > { %v7391_v36 = vunpack.i.h.bf16 %v7389_v40  ;;  %v7390_v15 = vunpack.i.l.bf16 %v7389_v40 }
 0x177   : > { %v1652_v18 = vsel %vm459_vm0, %v595_v27, %v7406_v37  ;;  %v1651_v33 = vsel %vm459_vm0, %v8992_v55, %v7405_v20  ;;  %v724_v27 = vld [vmem:[#allocation2 + $0x139] sm:$0xff] }
 0x178   : > { %v1811_v32 = vsel %vm1694_vm6, %v1779_v28, %v7390_v15  ;;  %v1812_v23 = vsel %vm1694_vm6, %v1780_v48, %v7391_v36  ;;  %v7414_v24 = vpop.permute.xlu1 %7413 }
 0x179   : > { %v7399_v52 = vpop.permute.xlu0 %7398  ;;  %v1854_v53 = vpack.c.bf16 %v1812_v23, %v1811_v32  ;;  %v7416_v56 = vunpack.i.h.bf16 %v7414_v24  ;;  %v7415_v17 = vunpack.i.l.bf16 %v7414_v24  ;;  %v597_v24 = vld [vmem:[#allocation2 + $0x128] sm:$0xff] }
 0x17a   : > { %v7401_v21 = vunpack.i.h.bf16 %v7399_v52  ;;  %v7400_v58 = vunpack.i.l.bf16 %v7399_v52 }
 0x17b   : > { %2145 = vmatprep.mubr.bf16.mxu0 %v1854_v53  ;;  %v1684_v40 = vsel %vm1661_vm5, %v1651_v33, %v7415_v17  ;;  %v1685_v16 = vsel %vm1661_vm5, %v1652_v18, %v7416_v56 }
 0x17c   : > { %2146 = vmatmul.mubr.bf16.gmra.mrb[40].mxu0 %v1853_v35  ;;  %v7424_v30 = vpop.permute.xlu1 %7423  ;;  %v1750_v42 = vsel %vm459_vm0, %v723_v49, %v7401_v21  ;;  %v1749_v50 = vsel %vm459_vm0, %v722_v63, %v7400_v58 }
 0x17d   : > { %v7409_v60 = vpop.permute.xlu0 %7408  ;;  %v7426_v51 = vunpack.i.h.bf16 %v7424_v30  ;;  %v7425_v19 = vunpack.i.l.bf16 %v7424_v30  ;;  %v9305_v57 = vpop.f32.mrb[0].mxu1 }
 0x17e   : > { %v7411_v62 = vunpack.i.h.bf16 %v7409_v60  ;;  %v7410_v47 = vunpack.i.l.bf16 %v7409_v60  ;;  %v9307_v32 = vpop.f32.mrb[1].mxu1  ;;  %v725_v60 = vld [vmem:[#allocation2 + $0x141] sm:$0xff] }
 0x17f   : > { %v1717_v55 = vsel %vm1694_vm6, %v1684_v40, %v7425_v19  ;;  %v1718_v15 = vsel %vm1694_vm6, %v1685_v16, %v7426_v51  ;;  %v9309_v53 = vpop.f32.mrb[2].mxu1 }
 0x180   : > { %v1781_v61 = vsel %vm1661_vm5, %v1749_v50, %v7410_v47  ;;  %v1782_v36 = vsel %vm1661_vm5, %v1750_v42, %v7411_v62  ;;  %v7434_v43 = vpop.permute.xlu1 %7433  ;;  %v1856_v48 = vpack.c.bf16 %v1718_v15, %v1717_v55  ;;  %v9311_v58 = vpop.f32.mrb[3].mxu1 }
 0x181   : > { %v7419_v22 = vpop.permute.xlu0 %7418  ;;  %v7436_v23 = vunpack.i.h.bf16 %v7434_v43  ;;  %v7435_v35 = vunpack.i.l.bf16 %v7434_v43 }
 0x182   : > { %v7421_v29 = vunpack.i.h.bf16 %v7419_v22  ;;  %v7420_v34 = vunpack.i.l.bf16 %v7419_v22 }
 0x183   : > { %v1654_v62 = vsel %vm459_vm0, %v597_v24, %v7436_v23  ;;  %v1653_v47 = vsel %vm459_vm0, %v9031_v45, %v7435_v35 }
 0x184   : > { %v1813_v41 = vsel %vm1694_vm6, %v1781_v61, %v7420_v34  ;;  %v1814_v28 = vsel %vm1694_vm6, %v1782_v36, %v7421_v29  ;;  %v7444_v52 = vpop.permute.xlu1 %7443 }
 0x185   : > { %v7429_v26 = vpop.permute.xlu0 %7428  ;;  %v1857_v46 = vpack.c.bf16 %v1814_v28, %v1813_v41  ;;  %v7446_v63 = vunpack.i.h.bf16 %v7444_v52  ;;  %v7445_v49 = vunpack.i.l.bf16 %v7444_v52  ;;  %v9320_v40 = vpop.f32.mrb[4].mxu1 }
 0x186   : > { %v7431_v37 = vunpack.i.h.bf16 %v7429_v26  ;;  %v7430_v20 = vunpack.i.l.bf16 %v7429_v26  ;;  %v9326_v55 = vpop.f32.mrb[5].mxu1 }
 0x187   : > { %2153 = vmatprep.mubr.bf16.mxu0 %v1857_v46  ;;  %v1686_v29 = vsel %vm1661_vm5, %v1653_v47, %v7445_v49  ;;  %v1687_v34 = vsel %vm1661_vm5, %v1654_v62, %v7446_v63  ;;  %v727_v63 = vld [vmem:[#allocation2 + $0x159] sm:$0xff] }
 0x188   : > { %2154 = vmatmul.mubr.bf16.gmra.mrb[44].mxu0 %v1856_v48  ;;  %v7454_v18 = vpop.permute.xlu1 %7453  ;;  %v1752_v33 = vsel %vm459_vm0, %v725_v60, %v7431_v37  ;;  %v1751_v30 = vsel %vm459_vm0, %v724_v27, %v7430_v20  ;;  %v9330_v48 = vpop.f32.mrb[6].mxu1  ;;  %v726_v60 = vld [vmem:[#allocation2 + $0x151] sm:$0xff] }
 0x189   : > { %v7439_v21 = vpop.permute.xlu0 %7438  ;;  %v7456_v50 = vunpack.i.h.bf16 %v7454_v18  ;;  %v7455_v22 = vunpack.i.l.bf16 %v7454_v18  ;;  %v9332_v23 = vpop.f32.mrb[7].mxu1 }
 0x18a   : > { %v7441_v56 = vunpack.i.h.bf16 %v7439_v21  ;;  %v7440_v17 = vunpack.i.l.bf16 %v7439_v21  ;;  %v599_v21 = vld [vmem:[#allocation2 + $0x140] sm:$0xff] }
 0x18b   : > { %v1719_v61 = vsel %vm1694_vm6, %v1686_v29, %v7455_v22  ;;  %v1720_v36 = vsel %vm1694_vm6, %v1687_v34, %v7456_v50 }
 0x18c   : > { %v1783_v16 = vsel %vm1661_vm5, %v1751_v30, %v7440_v17  ;;  %v1784_v45 = vsel %vm1661_vm5, %v1752_v33, %v7441_v56  ;;  %v7464_v15 = vpop.permute.xlu1 %7463  ;;  %v1859_v28 = vpack.c.bf16 %v1720_v36, %v1719_v61 }
 0x18d   : > { %v7449_v42 = vpop.permute.xlu0 %7448  ;;  %v7466_v35 = vunpack.i.h.bf16 %v7464_v15  ;;  %v7465_v52 = vunpack.i.l.bf16 %v7464_v15  ;;  %v9334_v17 = vpop.f32.mrb[8].mxu1 }
 0x18e   : > { %v7451_v51 = vunpack.i.h.bf16 %v7449_v42  ;;  %v7450_v19 = vunpack.i.l.bf16 %v7449_v42  ;;  %v9336_v18 = vpop.f32.mrb[9].mxu1 }
 0x18f   : > { %v1656_v33 = vsel %vm459_vm0, %v599_v21, %v7466_v35  ;;  %v1655_v30 = vsel %vm459_vm0, %v9073_v31, %v7465_v52  ;;  %v9341_v50 = vpop.f32.mrb[10].mxu1 }
 0x190   : > { %v1815_v43 = vsel %vm1694_vm6, %v1783_v16, %v7450_v19  ;;  %v1816_v41 = vsel %vm1694_vm6, %v1784_v45, %v7451_v51  ;;  %v7474_v37 = vpop.permute.xlu1 %7473  ;;  %v9345_v16 = vpop.f32.mrb[11].mxu1 }
 0x191   : > { %v7459_v26 = vpop.permute.xlu0 %7458  ;;  %v1860_v46 = vpack.c.bf16 %v1816_v41, %v1815_v43  ;;  %v7476_v49 = vunpack.i.h.bf16 %v7474_v37  ;;  %v7475_v56 = vunpack.i.l.bf16 %v7474_v37 }
 0x192   : > { %v7461_v20 = vunpack.i.h.bf16 %v7459_v26  ;;  %v7460_v24 = vunpack.i.l.bf16 %v7459_v26 }
 0x193   : > { %2161 = vmatprep.mubr.bf16.mxu0 %v1860_v46  ;;  %v1688_v36 = vsel %vm1661_vm5, %v1655_v30, %v7475_v56  ;;  %v1689_v15 = vsel %vm1661_vm5, %v1656_v33, %v7476_v49  ;;  %v601_v49 = vld [vmem:[#allocation2 + $0x158] sm:$0xff] }
 0x194   : > { %2162 = vmatmul.mubr.bf16.gmra.mrb[48].mxu0 %v1859_v28  ;;  %v7484_v42 = vpop.permute.xlu1 %7483  ;;  %v1754_v22 = vsel %vm459_vm0, %v727_v63, %v7461_v20  ;;  %v1753_v51 = vsel %vm459_vm0, %v726_v60, %v7460_v24 }
 0x195   : > { %v7469_v27 = vpop.permute.xlu0 %7468  ;;  %v7486_v29 = vunpack.i.h.bf16 %v7484_v42  ;;  %v7485_v34 = vunpack.i.l.bf16 %v7484_v42 }
 0x196   : > { %v7471_v62 = vunpack.i.h.bf16 %v7469_v27  ;;  %v7470_v47 = vunpack.i.l.bf16 %v7469_v27 }
 0x197   : > { %v1721_v41 = vsel %vm1694_vm6, %v1688_v36, %v7485_v34  ;;  %v1722_v28 = vsel %vm1694_vm6, %v1689_v15, %v7486_v29 }
 0x198   : > { %v1785_v31 = vsel %vm1661_vm5, %v1753_v51, %v7470_v47  ;;  %v1786_v43 = vsel %vm1661_vm5, %v1754_v22, %v7471_v62  ;;  %v7494_v26 = vpop.permute.xlu1 %7493  ;;  %v1862_v52 = vpack.c.bf16 %v1722_v28, %v1721_v41 }
 0x199   : > { %v7479_v19 = vpop.permute.xlu0 %7478  ;;  %v7496_v24 = vunpack.i.h.bf16 %v7494_v26  ;;  %v7495_v21 = vunpack.i.l.bf16 %v7494_v26 }
 0x19a   : > { %v7481_v45 = vunpack.i.h.bf16 %v7479_v19  ;;  %v7480_v61 = vunpack.i.l.bf16 %v7479_v19 }
 0x19b   : > { %v1658_v42 = vsel %vm459_vm0, %v601_v49, %v7496_v24  ;;  %v1657_v22 = vsel %vm459_vm0, %v9120_v54, %v7495_v21  ;;  %v9358_v19 = vpop.f32.mrb[12].mxu1 }
 0x19c   : > { %v1817_v46 = vsel %vm1694_vm6, %v1785_v31, %v7480_v61  ;;  %v1818_v35 = vsel %vm1694_vm6, %v1786_v43, %v7481_v45  ;;  %v7504_v27 = vpop.permute.xlu1 %7503  ;;  %v9364_v15 = vpop.f32.mrb[13].mxu1 }
 0x19d   : > { %v7489_v37 = vpop.permute.xlu0 %7488  ;;  %v1863_v20 = vpack.c.bf16 %v1818_v35, %v1817_v46  ;;  %v7506_v62 = vunpack.i.h.bf16 %v7504_v27  ;;  %v7505_v47 = vunpack.i.l.bf16 %v7504_v27  ;;  %v9368_v28 = vpop.f32.mrb[14].mxu1 }
 0x19e   : > { %v7491_v60 = vunpack.i.h.bf16 %v7489_v37  ;;  %v7490_v63 = vunpack.i.l.bf16 %v7489_v37  ;;  %v9374_v35 = vpop.f32.mrb[15].mxu1 }
 0x19f   : > { %2169 = vmatprep.mubr.bf16.mxu0 %v1863_v20  ;;  %v1690_v41 = vsel %vm1661_vm5, %v1657_v22, %v7505_v47  ;;  %v1691_v54 = vsel %vm1661_vm5, %v1658_v42, %v7506_v62  ;;  %v603_v47 = vld [vmem:[#allocation2 + $0x170] sm:$0xff] }
 0x1a0   : > { %2170 = vmatmul.mubr.bf16.gmra.mrb[52].mxu0 %v1862_v52  ;;  %v7514_v51 = vpop.permute.xlu1 %7513  ;;  %v1756_v29 = vsel %vm459_vm0, %v9105_v14, %v7491_v60  ;;  %v1755_v34 = vsel %vm459_vm0, %v9103_v44, %v7490_v63 }
 0x1a1   : > { %v7499_v56 = vpop.permute.xlu0 %7498  ;;  %v7516_v61 = vunpack.i.h.bf16 %v7514_v51  ;;  %v7515_v36 = vunpack.i.l.bf16 %v7514_v51 }
 0x1a2   : > { %v7501_v33 = vunpack.i.h.bf16 %v7499_v56  ;;  %v7500_v30 = vunpack.i.l.bf16 %v7499_v56 }
 0x1a3   : > { %v1723_v46 = vsel %vm1694_vm6, %v1690_v41, %v7515_v36  ;;  %v1724_v44 = vsel %vm1694_vm6, %v1691_v54, %v7516_v61 }
 0x1a4   : > { %v1787_v26 = vsel %vm1661_vm5, %v1755_v34, %v7500_v30  ;;  %v1788_v14 = vsel %vm1661_vm5, %v1756_v29, %v7501_v33  ;;  %v7524_v52 = vpop.permute.xlu1 %7523  ;;  %v1865_v24 = vpack.c.bf16 %v1724_v44, %v1723_v46 }
 0x1a5   : > { %v7509_v45 = vpop.permute.xlu0 %7508  ;;  %v7526_v60 = vunpack.i.h.bf16 %v7524_v52  ;;  %v7525_v63 = vunpack.i.l.bf16 %v7524_v52 }
 0x1a6   : > { %v7511_v31 = vunpack.i.h.bf16 %v7509_v45  ;;  %v7510_v43 = vunpack.i.l.bf16 %v7509_v45 }
 0x1a7   : > { %v1660_v29 = vsel %vm459_vm0, %v603_v47, %v7526_v60  ;;  %v1659_v34 = vsel %vm459_vm0, %v9171_v39, %v7525_v63 }
 0x1a8   : > { %v1819_v37 = vsel %vm1694_vm6, %v1787_v26, %v7510_v43  ;;  %v1820_v20 = vsel %vm1694_vm6, %v1788_v14, %v7511_v31  ;;  %v7534_v49 = vpop.permute.xlu1 %7533 }
 0x1a9   : > { %v7519_v21 = vpop.permute.xlu0 %7518  ;;  %v1866_v27 = vpack.c.bf16 %v1820_v20, %v1819_v37  ;;  %v7536_v30 = vunpack.i.h.bf16 %v7534_v49  ;;  %v7535_v42 = vunpack.i.l.bf16 %v7534_v49 }
 0x1aa   : > { %v7521_v56 = vunpack.i.h.bf16 %v7519_v21  ;;  %v7520_v62 = vunpack.i.l.bf16 %v7519_v21 }
 0x1ab   : > { %2177 = vmatprep.mubr.bf16.mxu0 %v1866_v27  ;;  %v1692_v14 = vsel %vm1661_vm5, %v1659_v34, %v7535_v42  ;;  %v1693_v46 = vsel %vm1661_vm5, %v1660_v29, %v7536_v30  ;;  %v9412_v42 = vld [vmem:[%s13388_s2] ss:$0 sm:$0xff] }
 0x1ac   : > { %2178 = vmatmul.mubr.bf16.gmra.mrb[56].mxu0 %v1865_v24  ;;  %v7544_v45 = vpop.permute.xlu1 %7543  ;;  %v1758_v61 = vsel %vm459_vm0, %v9148_v59, %v7521_v56  ;;  %v1757_v36 = vsel %vm459_vm0, %v9146_v25, %v7520_v62 }
 0x1ad   : > { %v7529_v33 = vpop.permute.xlu0 %7528  ;;  %v7546_v43 = vunpack.i.h.bf16 %v7544_v45  ;;  %v7545_v41 = vunpack.i.l.bf16 %v7544_v45 }
 0x1ae   : > { %v7531_v22 = vunpack.i.h.bf16 %v7529_v33  ;;  %v7530_v51 = vunpack.i.l.bf16 %v7529_v33 }
 0x1af   : > { %v1725_v52 = vsel %vm1694_vm6, %v1692_v14, %v7545_v41  ;;  %v1726_v59 = vsel %vm1694_vm6, %v1693_v46, %v7546_v43 }
 0x1b0   : > { %v1789_v44 = vsel %vm1661_vm5, %v1757_v36, %v7530_v51  ;;  %v1790_v39 = vsel %vm1661_vm5, %v1758_v61, %v7531_v22  ;;  %v1868_v20 = vpack.c.bf16 %v1726_v59, %v1725_v52 }
 0x1b1   : > { %v7539_v31 = vpop.permute.xlu0 %7538 }
 0x1b2   : > { %v7541_v54 = vunpack.i.h.bf16 %v7539_v31  ;;  %v7540_v26 = vunpack.i.l.bf16 %v7539_v31  ;;  %v9393_v21 = vpop.f32.mrb[16].mxu1 }
 0x1b3   : > { %v9395_v27 = vpop.f32.mrb[17].mxu1 }
 0x1b4   : > { %v1821_v37 = vsel %vm1694_vm6, %v1789_v44, %v7540_v26  ;;  %v1822_v25 = vsel %vm1694_vm6, %v1790_v39, %v7541_v54  ;;  %v9397_v60 = vpop.f32.mrb[18].mxu1 }
 0x1b5   : > { %v1869_v24 = vpack.c.bf16 %v1822_v25, %v1821_v37  ;;  %v9399_v63 = vpop.f32.mrb[19].mxu1 }
 0x1b7   : > { %2185 = vmatprep.mubr.bf16.mxu0 %v1869_v24 }
 0x1b8   : > { %2186 = vmatmul.mubr.bf16.gmra.mrb[60].mxu0 %v1868_v20 }
 0x1d3   : > { %v9401_v49 = vpop.f32.mrb[20].mxu1 }
 0x1d4   : > { %v9403_v56 = vpop.f32.mrb[21].mxu1 }
 0x1d5   : > { %v9405_v62 = vpop.f32.mrb[22].mxu1 }
 0x1d6   : > { %v9407_v33 = vpop.f32.mrb[23].mxu1 }
 0x1d7   : > { %v6569_v47 = vpop.f32.mrb[0].mxu0 }
 0x1d8   : > { %v6570_v30 = vpop.f32.mrb[1].mxu0 }
 0x1d9   : > { %v6571_v22 = vadd.f32 %v6570_v30, %v6569_v47  ;;  %v6572_v51 = vpop.f32.mrb[2].mxu0 }
 0x1da   : > { %v6573_v29 = vpop.f32.mrb[3].mxu0 }
 0x1db   : > { %v6574_v34 = vadd.f32 %v6573_v29, %v6572_v51  ;;  %v2068_v45 = vadd.f32 %v6571_v22, %v9412_v42 }
 0x1dd   : > { %v9416_v61 = vadd.f32 %v9307_v32, %v2068_v45  ;;  %v2071_v36 = vadd.f32 %v6574_v34, %v9412_v42 }
 0x1df   : > { %v9420_v31 = vadd.f32 %v9311_v58, %v2071_v36 }
 0x1e3   : > { %v6575_v43 = vpop.f32.mrb[4].mxu0 }
 0x1e4   : > { %v6576_v41 = vpop.f32.mrb[5].mxu0 }
 0x1e5   : > { %v6577_v54 = vadd.f32 %v6576_v41, %v6575_v43  ;;  %v6578_v26 = vpop.f32.mrb[6].mxu0 }
 0x1e6   : > { %v6579_v14 = vpop.f32.mrb[7].mxu0 }
 0x1e7   : > { %v2076_v46 = vadd.f32 %v6577_v54, %v9412_v42  ;;  %v6580_v44 = vadd.f32 %v6579_v14, %v6578_v26 }
 0x1e8   : > { %v9430_v59 = vpop.f32.mrb[24].mxu1 }
 0x1e9   : > { %v9424_v39 = vadd.f32 %v9305_v57, %v2076_v46  ;;  %v2079_v52 = vadd.f32 %v6580_v44, %v9412_v42  ;;  %v9432_v58 = vpop.f32.mrb[25].mxu1 }
 0x1ea   : > { %v9434_v37 = vpop.f32.mrb[26].mxu1 }
 0x1eb   : > { %v9428_v32 = vadd.f32 %v9309_v53, %v2079_v52  ;;  %v9436_v20 = vpop.f32.mrb[27].mxu1 }
 0x1ed   : > { %v2360_v12 = vsel %vm459_vm0, %v9428_v32, 0.0 }
 0x1ef   : > { %v6581_v25 = vpop.f32.mrb[8].mxu0 }
 0x1f0   : > { %v6582_v24 = vpop.f32.mrb[9].mxu0 }
 0x1f1   : > { %v6583_v47 = vadd.f32 %v6582_v24, %v6581_v25  ;;  %v6584_v30 = vpop.f32.mrb[10].mxu0 }
 0x1f2   : > { %v6585_v22 = vpop.f32.mrb[11].mxu0 }
 0x1f3   : > { %v6586_v57 = vadd.f32 %v6585_v22, %v6584_v30  ;;  %v2084_v51 = vadd.f32 %v6583_v47, %v9412_v42 }
 0x1f5   : > { %v9440_v29 = vadd.f32 %v9326_v55, %v2084_v51  ;;  %v2087_v53 = vadd.f32 %v6586_v57, %v9412_v42 }
 0x1f7   : > { %v9444_v34 = vadd.f32 %v9332_v23, %v2087_v53 }
 0x1fb   : > { %v6587_v45 = vpop.f32.mrb[12].mxu0 }
 0x1fc   : > { %v6588_v36 = vpop.f32.mrb[13].mxu0 }
 0x1fd   : > { %v6589_v43 = vadd.f32 %v6588_v36, %v6587_v45  ;;  %v6590_v41 = vpop.f32.mrb[14].mxu0 }
 0x1fe   : > { %v6591_v54 = vpop.f32.mrb[15].mxu0 }
 0x1ff   : > { %v2092_v26 = vadd.f32 %v6589_v43, %v9412_v42  ;;  %v6592_v14 = vadd.f32 %v6591_v54, %v6590_v41  ;;  %v9454_v52 = vpop.f32.mrb[28].mxu1  ;;  %v2426_v54 = vmul.f32 %v9420_v31, %v9420_v31 }
 0x200   : > { %v9456_v23 = vpop.f32.mrb[29].mxu1 }
 0x201   : > { %v9448_v46 = vadd.f32 %v9320_v40, %v2092_v26  ;;  %v2095_v44 = vadd.f32 %v6592_v14, %v9412_v42  ;;  %v9458_v25 = vpop.f32.mrb[30].mxu1 }
 0x202   : > { %v9460_v24 = vpop.f32.mrb[31].mxu1 }
 0x203   : > { %v9452_v55 = vadd.f32 %v9330_v48, %v2095_v44  ;;  %v2425_v44 = vmul.f32 %v9416_v61, %v9416_v61  ;;  %v2366_v10 = vsel %vm459_vm0, %v9448_v46, 0.0 }
 0x207   : > { %v6593_v47 = vpop.f32.mrb[16].mxu0 }
 0x208   : > { %v6594_v30 = vpop.f32.mrb[17].mxu0 }
 0x209   : > { %v6595_v22 = vadd.f32 %v6594_v30, %v6593_v47  ;;  %v6596_v57 = vpop.f32.mrb[18].mxu0  ;;  %v2427_v30 = vmul.f32 %v9424_v39, %v9424_v39 }
 0x20a   : > { %v6597_v51 = vpop.f32.mrb[19].mxu0 }
 0x20b   : > { %v6598_v40 = vadd.f32 %v6597_v51, %v6596_v57  ;;  %v2100_v53 = vadd.f32 %v6595_v22, %v9412_v42  ;;  %v2355_v57 = vsel %vm459_vm0, %v9416_v61, 0.0  ;;  %v2458_v51 = vsel %vm459_vm0, %v2426_v54, 0.0 }
 0x20c   : > { %v2460_v13 = vsel %vm459_vm0, %v2427_v30, 0.0 }
 0x20d   : > { %v9464_v45 = vadd.f32 %v9336_v18, %v2100_v53  ;;  %v2103_v48 = vadd.f32 %v6598_v40, %v9412_v42  ;;  %v2356_v18 = vsel %vm459_vm0, %v9420_v31, 0.0  ;;  %v2358_v40 = vsel %vm459_vm0, %v9424_v39, 0.0 }
 0x20f   : > { %v9468_v36 = vadd.f32 %v9345_v16, %v2103_v48 }
 0x213   : > { %v6599_v43 = vpop.f32.mrb[20].mxu0 }
 0x214   : > { %v6600_v41 = vpop.f32.mrb[21].mxu0 }
 0x215   : > { %v6601_v26 = vadd.f32 %v6600_v41, %v6599_v43  ;;  %v6602_v14 = vpop.f32.mrb[22].mxu0  ;;  %v2357_v43 = vadd.f32 %v2356_v18, %v2355_v57  ;;  %v2457_v41 = vsel %vm459_vm0, %v2425_v44, 0.0  ;;  %v2362_v44 = vsel %vm459_vm0, %v9440_v29, 0.0 }
 0x216   : > { %v6603_v47 = vpop.f32.mrb[23].mxu0  ;;  %v2459_v54 = vadd.f32 %v2458_v51, %v2457_v41  ;;  %v2430_v51 = vmul.f32 %v9444_v34, %v9444_v34 }
 0x217   : > { %v2108_v16 = vadd.f32 %v6601_v26, %v9412_v42  ;;  %v6604_v22 = vadd.f32 %v6603_v47, %v6602_v14  ;;  %v2428_v26 = vmul.f32 %v9428_v32, %v9428_v32  ;;  %v2359_v47 = vadd.f32 %v2358_v40, %v2357_v43 }
 0x219   : > { %v9485_v53 = vadd.f32 %v9334_v17, %v2108_v16  ;;  %v2111_v48 = vadd.f32 %v6604_v22, %v9412_v42  ;;  %v2429_v17 = vmul.f32 %v9440_v29, %v9440_v29  ;;  %v2461_v16 = vadd.f32 %v2460_v13, %v2459_v54 }
 0x21a   : > { %v2462_v18 = vsel %vm459_vm0, %v2428_v26, 0.0  ;;  %v2361_v22 = vadd.f32 %v2360_v12, %v2359_v47  ;;  %v2364_v13 = vsel %vm459_vm0, %v9444_v34, 0.0  ;;  %v2431_v54 = vmul.f32 %v9448_v46, %v9448_v46 }
 0x21b   : > { %v9493_v14 = vadd.f32 %v9341_v50, %v2111_v48  ;;  %v2464_v50 = vsel %vm459_vm0, %v2429_v17, 0.0  ;;  %v2463_v41 = vadd.f32 %v2462_v18, %v2461_v16  ;;  %v2466_v17 = vsel %vm459_vm0, %v2430_v51, 0.0 }
 0x21c   : > { %v2363_v43 = vadd.f32 %v2362_v44, %v2361_v22  ;;  %v2468_v18 = vsel %vm459_vm0, %v2431_v54, 0.0  ;;  %v2432_v22 = vmul.f32 %v9452_v55, %v9452_v55  ;;  %v2368_v51 = vsel %vm459_vm0, %v9452_v55, 0.0 }
 0x21d   : > { %v2465_v47 = vadd.f32 %v2464_v50, %v2463_v41 }
 0x21e   : > { %v2365_v44 = vadd.f32 %v2364_v13, %v2363_v43  ;;  %v2470_v43 = vsel %vm459_vm0, %v2432_v22, 0.0 }
 0x21f   : > { %v6605_v30 = vpop.f32.mrb[24].mxu0 }
 0x220   : > { %v6606_v57 = vpop.f32.mrb[25].mxu0  ;;  %v2367_v50 = vadd.f32 %v2366_v10, %v2365_v44  ;;  %v2434_v10 = vmul.f32 %v9468_v36, %v9468_v36  ;;  %v2372_v44 = vsel %vm459_vm0, %v9468_v36, 0.0 }
 0x221   : > { %v6607_v40 = vadd.f32 %v6606_v57, %v6605_v30  ;;  %v6608_v48 = vpop.f32.mrb[26].mxu0  ;;  %v2467_v57 = vadd.f32 %v2466_v17, %v2465_v47 }
 0x222   : > { %v6609_v11 = vpop.f32.mrb[27].mxu0  ;;  %v2369_v13 = vadd.f32 %v2368_v51, %v2367_v50  ;;  %v2474_v51 = vsel %vm459_vm0, %v2434_v10, 0.0  ;;  %v2376_v10 = vsel %vm459_vm0, %v9493_v14, 0.0 }
 0x223   : > { %v6610_v26 = vadd.f32 %v6609_v11, %v6608_v48  ;;  %v2116_v12 = vadd.f32 %v6607_v40, %v9412_v42  ;;  %v2469_v40 = vadd.f32 %v2468_v18, %v2467_v57  ;;  %v2370_v48 = vsel %vm459_vm0, %v9464_v45, 0.0 }
 0x224   : > { %v2371_v47 = vadd.f32 %v2370_v48, %v2369_v13  ;;  %v2435_v18 = vmul.f32 %v9485_v53, %v9485_v53  ;;  %v2436_v13 = vmul.f32 %v9493_v14, %v9493_v14 }
 0x225   : > { %v9514_v30 = vadd.f32 %v9364_v15, %v2116_v12  ;;  %v2119_v16 = vadd.f32 %v6610_v26, %v9412_v42  ;;  %v2433_v15 = vmul.f32 %v9464_v45, %v9464_v45  ;;  %v2471_v17 = vadd.f32 %v2470_v43, %v2469_v40 }
 0x226   : > { %v2373_v48 = vadd.f32 %v2372_v44, %v2371_v47  ;;  %v2476_v43 = vsel %vm459_vm0, %v2435_v18, 0.0 }
 0x227   : > { %v9521_v11 = vadd.f32 %v9374_v35, %v2119_v16  ;;  %v2472_v35 = vsel %vm459_vm0, %v2433_v15, 0.0  ;;  %v2374_v15 = vsel %vm459_vm0, %v9485_v53, 0.0  ;;  %v2378_v47 = vsel %vm459_vm0, %v9514_v30, 0.0 }
 0x228   : > { %v2473_v50 = vadd.f32 %v2472_v35, %v2471_v17  ;;  %v2478_v17 = vsel %vm459_vm0, %v2436_v13, 0.0 }
 0x22a   : > { %v2475_v35 = vadd.f32 %v2474_v51, %v2473_v50 }
 0x22b   : > { %v6611_v41 = vpop.f32.mrb[28].mxu0 }
 0x22c   : > { %v6612_v54 = vpop.f32.mrb[29].mxu0 }
 0x22d   : > { %v6613_v26 = vadd.f32 %v6612_v54, %v6611_v41  ;;  %v6614_v12 = vpop.f32.mrb[30].mxu0 }
 0x22e   : > { %v6615_v16 = vpop.f32.mrb[31].mxu0 }
 0x22f   : > { %v2124_v22 = vadd.f32 %v6613_v26, %v9412_v42  ;;  %v6616_v57 = vadd.f32 %v6615_v16, %v6614_v12  ;;  %v2375_v26 = vadd.f32 %v2374_v15, %v2373_v48  ;;  %v2477_v12 = vadd.f32 %v2476_v43, %v2475_v35 }
 0x230   : > { %v2380_v48 = vsel %vm459_vm0, %v9521_v11, 0.0 }
 0x231   : > { %v9542_v41 = vadd.f32 %v9358_v19, %v2124_v22  ;;  %v2127_v40 = vadd.f32 %v6616_v57, %v9412_v42  ;;  %v2437_v19 = vmul.f32 %v9514_v30, %v9514_v30  ;;  %v2377_v44 = vadd.f32 %v2376_v10, %v2375_v26 }
 0x232   : > { %v2438_v22 = vmul.f32 %v9521_v11, %v9521_v11  ;;  %v2479_v15 = vadd.f32 %v2478_v17, %v2477_v12 }
 0x233   : > { %v9549_v54 = vadd.f32 %v9368_v28, %v2127_v40  ;;  %v2480_v28 = vsel %vm459_vm0, %v2437_v19, 0.0  ;;  %v2379_v51 = vadd.f32 %v2378_v47, %v2377_v44  ;;  %v2439_v43 = vmul.f32 %v9542_v41, %v9542_v41 }
 0x234   : > { %v2481_v26 = vadd.f32 %v2480_v28, %v2479_v15  ;;  %v2482_v10 = vsel %vm459_vm0, %v2438_v22, 0.0  ;;  %v2382_v19 = vsel %vm459_vm0, %v9542_v41, 0.0 }
 0x235   : > { %v2381_v47 = vadd.f32 %v2380_v48, %v2379_v51  ;;  %v2484_v17 = vsel %vm459_vm0, %v2439_v43, 0.0  ;;  %v2440_v44 = vmul.f32 %v9549_v54, %v9549_v54  ;;  %v2384_v22 = vsel %vm459_vm0, %v9549_v54, 0.0 }
 0x236   : > { %v2483_v28 = vadd.f32 %v2482_v10, %v2481_v26 }
 0x237   : > { %v6617_v16 = vpop.f32.mrb[32].mxu0  ;;  %v2486_v15 = vsel %vm459_vm0, %v2440_v44, 0.0 }
 0x238   : > { %v6618_v18 = vpop.f32.mrb[33].mxu0 }
 0x239   : > { %v6619_v57 = vadd.f32 %v6618_v18, %v6617_v16  ;;  %v6620_v50 = vpop.f32.mrb[34].mxu0 }
 0x23a   : > { %v6621_v40 = vpop.f32.mrb[35].mxu0 }
 0x23b   : > { %v6622_v13 = vadd.f32 %v6621_v40, %v6620_v50  ;;  %v2132_v35 = vadd.f32 %v6619_v57, %v9412_v42  ;;  %v2383_v57 = vadd.f32 %v2382_v19, %v2381_v47  ;;  %v2485_v50 = vadd.f32 %v2484_v17, %v2483_v28 }
 0x23d   : > { %v9570_v16 = vadd.f32 %v9395_v27, %v2132_v35  ;;  %v2135_v12 = vadd.f32 %v6622_v13, %v9412_v42  ;;  %v2385_v48 = vadd.f32 %v2384_v22, %v2383_v57  ;;  %v2487_v19 = vadd.f32 %v2486_v15, %v2485_v50 }
 0x23f   : > { %v9577_v18 = vadd.f32 %v9399_v63, %v2135_v12  ;;  %v2441_v27 = vmul.f32 %v9570_v16, %v9570_v16  ;;  %v2386_v51 = vsel %vm459_vm0, %v9570_v16, 0.0 }
 0x240   : > { %v2387_v10 = vadd.f32 %v2386_v51, %v2385_v48 }
 0x241   : > { %v2488_v63 = vsel %vm459_vm0, %v2441_v27, 0.0  ;;  %v2442_v13 = vmul.f32 %v9577_v18, %v9577_v18  ;;  %v2388_v47 = vsel %vm459_vm0, %v9577_v18, 0.0 }
 0x242   : > { %v2489_v44 = vadd.f32 %v2488_v63, %v2487_v19  ;;  %v2389_v9 = vadd.f32 %v2388_v47, %v2387_v10 }
 0x243   : > { %v6623_v40 = vpop.f32.mrb[36].mxu0  ;;  %v2490_v57 = vsel %vm459_vm0, %v2442_v13, 0.0 }
 0x244   : > { %v6624_v43 = vpop.f32.mrb[37].mxu0 }
 0x245   : > { %v6625_v35 = vadd.f32 %v6624_v43, %v6623_v40  ;;  %v6626_v26 = vpop.f32.mrb[38].mxu0  ;;  %v2491_v40 = vadd.f32 %v2490_v57, %v2489_v44 }
 0x246   : > { %v6627_v12 = vpop.f32.mrb[39].mxu0 }
 0x247   : > { %v2140_v17 = vadd.f32 %v6625_v35, %v9412_v42  ;;  %v6628_v28 = vadd.f32 %v6627_v12, %v6626_v26 }
 0x249   : > { %v9594_v22 = vadd.f32 %v9393_v21, %v2140_v17  ;;  %v2143_v27 = vadd.f32 %v6628_v28, %v9412_v42 }
 0x24b   : > { %v2390_v51 = vsel %vm459_vm0, %v9594_v22, 0.0  ;;  %v2443_v50 = vmul.f32 %v9594_v22, %v9594_v22  ;;  %v9602_v15 = vadd.f32 %v9397_v60, %v2143_v27 }
 0x24c   : > { %v2391_v48 = vadd.f32 %v2390_v51, %v2389_v9 }
 0x24d   : > { %v2492_v43 = vsel %vm459_vm0, %v2443_v50, 0.0  ;;  %v2444_v21 = vmul.f32 %v9602_v15, %v9602_v15  ;;  %v2392_v63 = vsel %vm459_vm0, %v9602_v15, 0.0 }
 0x24e   : > { %v2393_v13 = vadd.f32 %v2392_v63, %v2391_v48  ;;  %v2493_v35 = vadd.f32 %v2492_v43, %v2491_v40 }
 0x24f   : > { %v6629_v26 = vpop.f32.mrb[40].mxu0  ;;  %v2494_v10 = vsel %vm459_vm0, %v2444_v21, 0.0 }
 0x250   : > { %v6630_v19 = vpop.f32.mrb[41].mxu0  ;;  %v2495_v12 = vadd.f32 %v2494_v10, %v2493_v35 }
 0x251   : > { %v6631_v47 = vadd.f32 %v6630_v19, %v6629_v26  ;;  %v6632_v60 = vpop.f32.mrb[42].mxu0 }
 0x252   : > { %v6633_v17 = vpop.f32.mrb[43].mxu0 }
 0x253   : > { %v6634_v28 = vadd.f32 %v6633_v17, %v6632_v60  ;;  %v2148_v9 = vadd.f32 %v6631_v47, %v9412_v42 }
 0x255   : > { %v9612_v44 = vadd.f32 %v9403_v56, %v2148_v9  ;;  %v2151_v57 = vadd.f32 %v6634_v28, %v9412_v42 }
 0x257   : > { %v2394_v27 = vsel %vm459_vm0, %v9612_v44, 0.0  ;;  %v2445_v51 = vmul.f32 %v9612_v44, %v9612_v44  ;;  %v9620_v50 = vadd.f32 %v9407_v33, %v2151_v57 }
 0x258   : > { %v2395_v40 = vadd.f32 %v2394_v27, %v2393_v13 }
 0x259   : > { %v2496_v48 = vsel %vm459_vm0, %v2445_v51, 0.0  ;;  %v2396_v43 = vsel %vm459_vm0, %v9620_v50, 0.0  ;;  %v2446_v56 = vmul.f32 %v9620_v50, %v9620_v50 }
 0x25a   : > { %v2497_v21 = vadd.f32 %v2496_v48, %v2495_v12  ;;  %v2397_v63 = vadd.f32 %v2396_v43, %v2395_v40 }
 0x25b   : > { %v2498_v35 = vsel %vm459_vm0, %v2446_v56, 0.0  ;;  %v6635_v26 = vpop.f32.mrb[44].mxu0 }
 0x25c   : > { %v2499_v10 = vadd.f32 %v2498_v35, %v2497_v21  ;;  %v6636_v19 = vpop.f32.mrb[45].mxu0 }
 0x25d   : > { %v6637_v47 = vadd.f32 %v6636_v19, %v6635_v26  ;;  %v6638_v60 = vpop.f32.mrb[46].mxu0 }
 0x25e   : > { %v6639_v33 = vpop.f32.mrb[47].mxu0 }
 0x25f   : > { %v2156_v13 = vadd.f32 %v6637_v47, %v9412_v42  ;;  %v6640_v17 = vadd.f32 %v6639_v33, %v6638_v60 }
 0x261   : > { %v9630_v28 = vadd.f32 %v9401_v49, %v2156_v13  ;;  %v2159_v9 = vadd.f32 %v6640_v17, %v9412_v42 }
 0x263   : > { %v2398_v12 = vsel %vm459_vm0, %v9630_v28, 0.0  ;;  %v2447_v57 = vmul.f32 %v9630_v28, %v9630_v28  ;;  %v9638_v27 = vadd.f32 %v9405_v62, %v2159_v9 }
 0x264   : > { %v2399_v51 = vadd.f32 %v2398_v12, %v2397_v63 }
 0x265   : > { %v2500_v40 = vsel %vm459_vm0, %v2447_v57, 0.0  ;;  %v2448_v48 = vmul.f32 %v9638_v27, %v9638_v27  ;;  %v2400_v49 = vsel %vm459_vm0, %v9638_v27, 0.0 }
 0x266   : > { %v2401_v43 = vadd.f32 %v2400_v49, %v2399_v51  ;;  %v2501_v56 = vadd.f32 %v2500_v40, %v2499_v10 }
 0x267   : > { %v6641_v21 = vpop.f32.mrb[48].mxu0  ;;  %v2502_v35 = vsel %vm459_vm0, %v2448_v48, 0.0 }
 0x268   : > { %v6642_v26 = vpop.f32.mrb[49].mxu0  ;;  %v2503_v19 = vadd.f32 %v2502_v35, %v2501_v56 }
 0x269   : > { %v6643_v47 = vadd.f32 %v6642_v26, %v6641_v21  ;;  %v6644_v60 = vpop.f32.mrb[50].mxu0 }
 0x26a   : > { %v6645_v62 = vpop.f32.mrb[51].mxu0 }
 0x26b   : > { %v6646_v33 = vadd.f32 %v6645_v62, %v6644_v60  ;;  %v2164_v63 = vadd.f32 %v6643_v47, %v9412_v42 }
 0x26d   : > { %v9648_v13 = vadd.f32 %v9432_v58, %v2164_v63  ;;  %v2167_v17 = vadd.f32 %v6646_v33, %v9412_v42 }
 0x26f   : > { %v2402_v9 = vsel %vm459_vm0, %v9648_v13, 0.0  ;;  %v2449_v10 = vmul.f32 %v9648_v13, %v9648_v13  ;;  %v9656_v12 = vadd.f32 %v9436_v20, %v2167_v17 }
 0x270   : > { %v2403_v57 = vadd.f32 %v2402_v9, %v2401_v43 }
 0x271   : > { %v2504_v51 = vsel %vm459_vm0, %v2449_v10, 0.0  ;;  %v2404_v40 = vsel %vm459_vm0, %v9656_v12, 0.0  ;;  %v2450_v58 = vmul.f32 %v9656_v12, %v9656_v12 }
 0x272   : > { %v2505_v48 = vadd.f32 %v2504_v51, %v2503_v19  ;;  %v2405_v49 = vadd.f32 %v2404_v40, %v2403_v57 }
 0x273   : > { %v2506_v56 = vsel %vm459_vm0, %v2450_v58, 0.0  ;;  %v6647_v21 = vpop.f32.mrb[52].mxu0 }
 0x274   : > { %v2507_v35 = vadd.f32 %v2506_v56, %v2505_v48  ;;  %v6648_v26 = vpop.f32.mrb[53].mxu0 }
 0x275   : > { %v6649_v47 = vadd.f32 %v6648_v26, %v6647_v21  ;;  %v6650_v60 = vpop.f32.mrb[54].mxu0 }
 0x276   : > { %v6651_v20 = vpop.f32.mrb[55].mxu0 }
 0x277   : > { %v2172_v43 = vadd.f32 %v6649_v47, %v9412_v42  ;;  %v6652_v62 = vadd.f32 %v6651_v20, %v6650_v60 }
 0x279   : > { %v9666_v33 = vadd.f32 %v9430_v59, %v2172_v43  ;;  %v2175_v63 = vadd.f32 %v6652_v62, %v9412_v42 }
 0x27b   : > { %v2406_v19 = vsel %vm459_vm0, %v9666_v33, 0.0  ;;  %v2451_v17 = vmul.f32 %v9666_v33, %v9666_v33  ;;  %v9674_v9 = vadd.f32 %v9434_v37, %v2175_v63 }
 0x27c   : > { %v2407_v10 = vadd.f32 %v2406_v19, %v2405_v49 }
 0x27d   : > { %v2508_v57 = vsel %vm459_vm0, %v2451_v17, 0.0  ;;  %v2452_v51 = vmul.f32 %v9674_v9, %v9674_v9  ;;  %v2408_v59 = vsel %vm459_vm0, %v9674_v9, 0.0 }
 0x27e   : > { %v2409_v40 = vadd.f32 %v2408_v59, %v2407_v10  ;;  %v2509_v58 = vadd.f32 %v2508_v57, %v2507_v35 }
 0x27f   : > { %v6653_v48 = vpop.f32.mrb[56].mxu0  ;;  %v2510_v56 = vsel %vm459_vm0, %v2452_v51, 0.0 }
 0x280   : > { %v6654_v21 = vpop.f32.mrb[57].mxu0  ;;  %v2511_v26 = vadd.f32 %v2510_v56, %v2509_v58 }
 0x281   : > { %v6655_v47 = vadd.f32 %v6654_v21, %v6653_v48  ;;  %v6656_v60 = vpop.f32.mrb[58].mxu0 }
 0x282   : > { %v6657_v37 = vpop.f32.mrb[59].mxu0 }
 0x283   : > { %v6658_v20 = vadd.f32 %v6657_v37, %v6656_v60  ;;  %v2180_v49 = vadd.f32 %v6655_v47, %v9412_v42 }
 0x285   : > { %v9684_v43 = vadd.f32 %v9456_v23, %v2180_v49  ;;  %v2183_v62 = vadd.f32 %v6658_v20, %v9412_v42 }
 0x287   : > { %v2410_v63 = vsel %vm459_vm0, %v9684_v43, 0.0  ;;  %v2453_v35 = vmul.f32 %v9684_v43, %v9684_v43  ;;  %v9692_v19 = vadd.f32 %v9460_v24, %v2183_v62 }
 0x288   : > { %v2411_v17 = vadd.f32 %v2410_v63, %v2409_v40 }
 0x289   : > { %v2512_v10 = vsel %vm459_vm0, %v2453_v35, 0.0  ;;  %v2412_v57 = vsel %vm459_vm0, %v9692_v19, 0.0  ;;  %v2454_v23 = vmul.f32 %v9692_v19, %v9692_v19 }
 0x28a   : > { %v2513_v51 = vadd.f32 %v2512_v10, %v2511_v26  ;;  %v2413_v59 = vadd.f32 %v2412_v57, %v2411_v17 }
 0x28b   : > { %v2514_v58 = vsel %vm459_vm0, %v2454_v23, 0.0  ;;  %v6659_v48 = vpop.f32.mrb[60].mxu0 }
 0x28c   : > { %v2515_v56 = vadd.f32 %v2514_v58, %v2513_v51  ;;  %v6660_v21 = vpop.f32.mrb[61].mxu0 }
 0x28d   : > { %v6661_v47 = vadd.f32 %v6660_v21, %v6659_v48  ;;  %v6662_v60 = vpop.f32.mrb[62].mxu0 }
 0x28e   : > { %v6663_v24 = vpop.f32.mrb[63].mxu0 }
 0x28f   : > { %v2188_v40 = vadd.f32 %v6661_v47, %v9412_v42  ;;  %v6664_v37 = vadd.f32 %v6663_v24, %v6662_v60 }
 0x291   : > { %v9702_v20 = vadd.f32 %v9454_v52, %v2188_v40  ;;  %v2191_v49 = vadd.f32 %v6664_v37, %v9412_v42 }
 0x293   : > { %v2414_v26 = vsel %vm459_vm0, %v9702_v20, 0.0  ;;  %v2455_v62 = vmul.f32 %v9702_v20, %v9702_v20  ;;  %v9710_v63 = vadd.f32 %v9458_v25, %v2191_v49 }
 0x294   : > { %v2415_v35 = vadd.f32 %v2414_v26, %v2413_v59 }
 0x295   : > { %v2516_v17 = vsel %vm459_vm0, %v2455_v62, 0.0  ;;  %v2416_v10 = vsel %vm459_vm0, %v9710_v63, 0.0  ;;  %v2456_v52 = vmul.f32 %v9710_v63, %v9710_v63 }
 0x296   : > { %v2517_v57 = vadd.f32 %v2516_v17, %v2515_v56  ;;  %v2417_v42 = vadd.f32 %v2416_v10, %v2415_v35 }
 0x297   : > { %v2518_v23 = vsel %vm459_vm0, %v2456_v52, 0.0 }
 0x298   : > { %v2418_v51 = vrot.slane %v2417_v42, 4  ;;  %v2519_v58 = vadd.f32 %v2518_v23, %v2517_v57 }
 0x29a   : > { %v2419_v48 = vadd.f32 %v2418_v51, %v2417_v42  ;;  %v2520_v21 = vrot.slane %v2519_v58, 4 }
 0x29c   : > { %v2420_v47 = vrot.slane %v2419_v48, 2  ;;  %v2521_v25 = vadd.f32 %v2520_v21, %v2519_v58 }
 0x29e   : > { %v2421_v60 = vadd.f32 %v2420_v47, %v2419_v48  ;;  %v2522_v59 = vrot.slane %v2521_v25, 2 }
 0x2a0   : > { %v2422_v24 = vrot.slane %v2421_v60, 1  ;;  %v2523_v40 = vadd.f32 %v2522_v59, %v2521_v25 }
 0x2a2   : > { %v2423_v37 = vadd.f32 %v2422_v24, %v2421_v60  ;;  %v2524_v49 = vrot.slane %v2523_v40, 1 }
 0x2a4   : > { %v9718_v26 = vmul.f32 0.00390625, %v2423_v37  ;;  %v2525_v62 = vadd.f32 %v2524_v49, %v2523_v40 }
 0x2a6   : > { %v2526_v8 = vmul.f32 0.00390625, %v2525_v62  ;;  %v2527_v56 = vmul.f32 %v9718_v26, %v9718_v26  ;;  %v2548_v10 = vsub.f32 %v9594_v22, %v9718_v26  ;;  %v2549_v52 = vsub.f32 %v9602_v15, %v9718_v26 }
 0x2a7   : > { %v2550_v57 = vsub.f32 %v9612_v44, %v9718_v26  ;;  %v2551_v42 = vsub.f32 %v9620_v50, %v9718_v26  ;;  %v2552_v23 = vsub.f32 %v9630_v28, %v9718_v26  ;;  %v2553_v51 = vsub.f32 %v9638_v27, %v9718_v26 }
 0x2a8   : > { %v2528_v35 = vsub.f32 %v2526_v8, %v2527_v56  ;;  %v2554_v8 = vsub.f32 %v9648_v13, %v9718_v26  ;;  %v2555_v22 = vsub.f32 %v9656_v12, %v9718_v26  ;;  %v2556_v15 = vsub.f32 %v9666_v33, %v9718_v26 }
 0x2a9   : > { %v2557_v58 = vsub.f32 %v9674_v9, %v9718_v26  ;;  %v2558_v48 = vsub.f32 %v9684_v43, %v9718_v26  ;;  %v2559_v21 = vsub.f32 %v9692_v19, %v9718_v26  ;;  %v2530_v24 = vsub.f32 %v9416_v61, %v9718_v26 }
 0x2aa   : > { %v2529_v17 = vmax.f32 %v2528_v35, 0.0  ;;  %v2531_v40 = vsub.f32 %v9420_v31, %v9718_v26  ;;  %v2532_v37 = vsub.f32 %v9424_v39, %v9718_v26  ;;  %v2533_v49 = vsub.f32 %v9428_v32, %v9718_v26 }
 0x2ab   : > { %v2534_v62 = vsub.f32 %v9440_v29, %v9718_v26  ;;  %v2535_v56 = vsub.f32 %v9444_v34, %v9718_v26  ;;  %v2536_v35 = vsub.f32 %v9448_v46, %v9718_v26  ;;  %v2537_v61 = vsub.f32 %v9452_v55, %v9718_v26 }
 0x2ac   : > { %v2562_v60 = vadd.f32 1e-05, %v2529_v17  ;;  %v2538_v31 = vsub.f32 %v9464_v45, %v9718_v26  ;;  %v2539_v39 = vsub.f32 %v9468_v36, %v9718_v26  ;;  %v2540_v32 = vsub.f32 %v9485_v53, %v9718_v26 }
 0x2ad   : > { %v2541_v29 = vsub.f32 %v9493_v14, %v9718_v26  ;;  %v2542_v34 = vsub.f32 %v9514_v30, %v9718_v26  ;;  %v2543_v46 = vsub.f32 %v9521_v11, %v9718_v26  ;;  %v2544_v55 = vsub.f32 %v9542_v41, %v9718_v26 }
 0x2ae   : > { %8063 = vrsqrt.f32 %v2562_v60  ;;  %v2545_v45 = vsub.f32 %v9549_v54, %v9718_v26  ;;  %v2546_v36 = vsub.f32 %v9570_v16, %v9718_v26  ;;  %v2547_v53 = vsub.f32 %v9577_v18, %v9718_v26 }
 0x2af   : > { %v13665_v33 = vsub.f32 %v9702_v20, %v9718_v26  ;;  %v13669_v43 = vlaneseq }
 0x2b1   : > { %v9943_v19 = vshrl.u32 %v13669_v43, 7 }
 0x2b3   : > { %13670 = vst [vmem:[#allocation84_spill] sm:$0xff] %v9943_v19  ;;  %v13435_v20 = vsub.s32 0, %v9943_v19 }
 0x2b8   : > { %v8064_v17 = vpop.eup %8063 }
 0x2b9   : > { %v9786_v14 = vmul.f32 %v8064_v17, %v2530_v24  ;;  %v9788_v60 = vmul.f32 %v8064_v17, %v2531_v40  ;;  %v9790_v30 = vmul.f32 %v8064_v17, %v2532_v37  ;;  %v9792_v11 = vmul.f32 %v8064_v17, %v2533_v49 }
 0x2ba   : > { %v9794_v59 = vmul.f32 %v8064_v17, %v2534_v62  ;;  %v9796_v41 = vmul.f32 %v8064_v17, %v2535_v56  ;;  %v9798_v25 = vmul.f32 %v8064_v17, %v2536_v35  ;;  %v9800_v54 = vmul.f32 %v8064_v17, %v2537_v61 }
 0x2bb   : > { %13635 = vst [vmem:[#allocation52_spill] sm:$0xff] %v9786_v14  ;;  %13636 = vst [vmem:[#allocation53_spill] sm:$0xff] %v9788_v60  ;;  %v9802_v16 = vmul.f32 %v8064_v17, %v2538_v31  ;;  %v9804_v47 = vmul.f32 %v8064_v17, %v2539_v39  ;;  %v9806_v18 = vmul.f32 %v8064_v17, %v2540_v32 }
 0x2bc   : > { %13637 = vst [vmem:[#allocation54_spill] sm:$0xff] %v9790_v30  ;;  %13638 = vst [vmem:[#allocation55_spill] sm:$0xff] %v9792_v11  ;;  %v9808_v24 = vmul.f32 %v8064_v17, %v2541_v29  ;;  %v9818_v40 = vmul.f32 %v8064_v17, %v2542_v34  ;;  %v9820_v37 = vmul.f32 %v8064_v17, %v2543_v46  ;;  %v2777_v29 = vld [vmem:[#allocation2 + $0x1] sm:$0xff]  ;;  %v2778_v34 = vld [vmem:[#allocation2 + $0x9] sm:$0xff] }
 0x2bd   : > { %13639 = vst [vmem:[#allocation56_spill] sm:$0xff] %v9794_v59  ;;  %13640 = vst [vmem:[#allocation57_spill] sm:$0xff] %v9796_v41  ;;  %v9822_v49 = vmul.f32 %v8064_v17, %v2544_v55  ;;  %v9824_v62 = vmul.f32 %v8064_v17, %v2545_v45  ;;  %v9834_v56 = vmul.f32 %v8064_v17, %v2546_v36 }
 0x2be   : > { %13641 = vst [vmem:[#allocation58_spill] sm:$0xff] %v9798_v25  ;;  %13642 = vst [vmem:[#allocation59_spill] sm:$0xff] %v9800_v54  ;;  %v9836_v35 = vmul.f32 %v8064_v17, %v2547_v53  ;;  %v9838_v61 = vmul.f32 %v8064_v17, %v2548_v10  ;;  %v9840_v31 = vmul.f32 %v8064_v17, %v2549_v52  ;;  %v2877_v53 = vld [vmem:[#allocation2 + $0x2] sm:$0xff] }
 0x2bf   : > { %13643 = vst [vmem:[#allocation60_spill] sm:$0xff] %v9802_v16  ;;  %13644 = vst [vmem:[#allocation61_spill] sm:$0xff] %v9804_v47  ;;  %v9853_v39 = vmul.f32 %v8064_v17, %v2550_v57  ;;  %v9858_v10 = vmul.f32 %v8064_v17, %v2551_v42  ;;  %v9863_v52 = vmul.f32 %v8064_v17, %v2552_v23  ;;  %v2811_v23 = vsub.s32 1, %v9943_v19 }
 0x2c0   : > { %13645 = vst [vmem:[#allocation62_spill] sm:$0xff] %v9806_v18  ;;  %13646 = vst [vmem:[#allocation63_spill] sm:$0xff] %v9808_v24  ;;  %v9868_v32 = vmul.f32 %v8064_v17, %v2553_v51  ;;  %v9881_v44 = vmul.f32 %v8064_v17, %v2554_v8  ;;  %v9886_v50 = vmul.f32 %v8064_v17, %v2555_v22  ;;  %v2677_v51 = vld [vmem:[#allocation2] sm:$0xff]  ;;  %v2678_v8 = vld [vmem:[#allocation2 + $0x8] sm:$0xff] }
 0x2c1   : > { %2636 = vst.msk [vmem:[#allocation2 + $0x19] sm:$0xff] %vm459_vm0, %v9786_v14  ;;  %2637 = vst.msk [vmem:[#allocation2 + $0x21] sm:$0xff] %vm459_vm0, %v9788_v60  ;;  %v9891_v28 = vmul.f32 %v8064_v17, %v2556_v15  ;;  %v9896_v27 = vmul.f32 %v8064_v17, %v2557_v58  ;;  %v9909_v13 = vmul.f32 %v8064_v17, %v2558_v48  ;;  %v2911_v58 = vsub.s32 2, %v9943_v19  ;;  %v9969_v48 = vld [vmem:[%s13390_s4] ss:$0 sm:$0xff] }
 0x2c2   : > { %2638 = vst.msk [vmem:[#allocation2 + $0x31] sm:$0xff] %vm459_vm0, %v9790_v30  ;;  %2639 = vst.msk [vmem:[#allocation2 + $0x39] sm:$0xff] %vm459_vm0, %v9792_v11  ;;  %v9914_v12 = vmul.f32 %v8064_v17, %v2559_v21  ;;  %v9919_v9 = vmul.f32 %v8064_v17, %v13665_v33  ;;  %v13667_v57 = vsub.f32 %v9710_v63, %v9718_v26  ;;  %v2668_v63 = vld [vmem:[%s13389_s3] sm:$0xff]  ;;  %v2878_v33 = vld [vmem:[#allocation2 + $0xa] sm:$0xff] }
 0x2c3   : > { %13647 = vst [vmem:[#allocation64_spill] sm:$0xff] %v9818_v40  ;;  %13648 = vst [vmem:[#allocation65_spill] sm:$0xff] %v9820_v37  ;;  %v9959_v26 = vrot.slane %v2668_v63, %v13435_v20  ;;  %v9963_v15 = vrot.slane %v2668_v63, %v2811_v23  ;;  %v9974_v55 = vrot.slane %v2668_v63, %v2911_v58  ;;  %v3111_v58 = vsub.s32 4, %v9943_v19 }
 0x2c4   : > { %13649 = vst [vmem:[#allocation66_spill] sm:$0xff] %v9822_v49  ;;  %13650 = vst [vmem:[#allocation67_spill] sm:$0xff] %v9824_v62  ;;  %v9924_v42 = vmul.f32 %v8064_v17, %v13667_v57  ;;  %v3011_v57 = vsub.s32 3, %v9943_v19 }
 0x2c5   : > { %2640 = vst.msk [vmem:[#allocation2 + $0x49] sm:$0xff] %vm459_vm0, %v9794_v59  ;;  %2641 = vst.msk [vmem:[#allocation2 + $0x51] sm:$0xff] %vm459_vm0, %v9796_v41  ;;  %v2713_v22 = vmul.f32 %v9959_v26, %v2677_v51  ;;  %v2714_v21 = vmul.f32 %v9959_v26, %v2678_v8  ;;  %v2813_v17 = vmul.f32 %v9963_v15, %v2777_v29  ;;  %v3311_v51 = vsub.s32 6, %v9943_v19 }
 0x2c6   : > { %2642 = vst.msk [vmem:[#allocation2 + $0x61] sm:$0xff] %vm459_vm0, %v9798_v25  ;;  %2643 = vst.msk [vmem:[#allocation2 + $0x69] sm:$0xff] %vm459_vm0, %v9800_v54  ;;  %v2814_v36 = vmul.f32 %v9963_v15, %v2778_v34  ;;  %v2913_v23 = vmul.f32 %v9974_v55, %v2877_v53  ;;  %v3411_v8 = vsub.s32 7, %v9943_v19  ;;  %v2914_v29 = vmul.f32 %v9974_v55, %v2878_v33  ;;  %v3307_v34 = vld [vmem:[#allocation2 + $0x198] sm:$0xff] }
 0x2c7   : > { %13651 = vst [vmem:[#allocation68_spill] sm:$0xff] %v9834_v56  ;;  %13652 = vst [vmem:[#allocation69_spill] sm:$0xff] %v9836_v35  ;;  %v2745_v46 = vadd.f32 %v9969_v48, %v2713_v22  ;;  %v2746_v45 = vadd.f32 %v9969_v48, %v2714_v21  ;;  %v3211_v21 = vsub.s32 5, %v9943_v19  ;;  %v9985_v6 = vrot.slane %v2668_v63, %v3011_v57 }
 0x2c8   : > { %13653 = vst [vmem:[#allocation70_spill] sm:$0xff] %v9838_v61  ;;  %13654 = vst [vmem:[#allocation71_spill] sm:$0xff] %v9840_v31  ;;  %v2679_v20 = vld [vmem:[#allocation2 + $0x18] sm:$0xff]  ;;  %v2680_v7 = vld [vmem:[#allocation2 + $0x20] sm:$0xff]  ;;  %v9995_v33 = vrot.slane %v2668_v63, %v3411_v8 }
 0x2c9   : > { %2644 = vst.msk [vmem:[#allocation2 + $0x79] sm:$0xff] %vm459_vm0, %v9802_v16  ;;  %2645 = vst.msk [vmem:[#allocation2 + $0x81] sm:$0xff] %vm459_vm0, %v9804_v47  ;;  %v2845_v43 = vadd.f32 %v2813_v17, %v2745_v46  ;;  %v2846_v22 = vadd.f32 %v2814_v36, %v2746_v45  ;;  %v3407_v46 = vld [vmem:[#allocation2 + $0x199] sm:$0xff]  ;;  %v9989_v53 = vld [vmem:[#allocation2 + $0x30] sm:$0xff]  ;;  %v9993_v45 = vrot.slane %v2668_v63, %v3311_v51 }
 0x2ca   : > { %2646 = vst.msk [vmem:[#allocation2 + $0x91] sm:$0xff] %vm459_vm0, %v9806_v18  ;;  %2647 = vst.msk [vmem:[#allocation2 + $0x99] sm:$0xff] %vm459_vm0, %v9808_v24  ;;  %v9991_v4 = vld [vmem:[#allocation2 + $0x38] sm:$0xff]  ;;  %v3408_v36 = vld [vmem:[#allocation2 + $0x1a1] sm:$0xff]  ;;  %v10008_v2 = vrot.slane %v2668_v63, %v3211_v21  ;;  %v10024_v60 = vmul.f32 %v9995_v33, %v3407_v46  ;;  %v2717_v30 = vmul.f32 %v9959_v26, %v9989_v53 }
 0x2cb   : > { %13655 = vst [vmem:[#allocation72_spill] sm:$0xff] %v9853_v39  ;;  %13656 = vst [vmem:[#allocation73_spill] sm:$0xff] %v9858_v10  ;;  %v9987_v17 = vadd.f32 %v2913_v23, %v2845_v43  ;;  %v9997_v1 = vadd.f32 %v2914_v29, %v2846_v22  ;;  %v2715_v43 = vmul.f32 %v9959_v26, %v2679_v20 }
 0x2cc   : > { %13657 = vst [vmem:[#allocation74_spill] sm:$0xff] %v9863_v52  ;;  %13658 = vst [vmem:[#allocation75_spill] sm:$0xff] %v9868_v32  ;;  %v9999_v0 = vld [vmem:[#allocation2 + $0x48] sm:$0xff]  ;;  %v10001_v3 = vld [vmem:[#allocation2 + $0x50] sm:$0xff]  ;;  %v10006_v23 = vrot.slane %v2668_v63, %v3111_v58  ;;  %v2716_v22 = vmul.f32 %v9959_v26, %v2680_v7  ;;  %v10018_v29 = vmul.f32 %v9993_v45, %v3307_v34 }
 0x2cd   : > { %2648 = vst.msk [vmem:[#allocation2 + $0xa9] sm:$0xff] %vm459_vm0, %v9818_v40  ;;  %2649 = vst.msk [vmem:[#allocation2 + $0xb1] sm:$0xff] %vm459_vm0, %v9820_v37  ;;  %v10003_v57 = vld [vmem:[#allocation2 + $0x60] sm:$0xff]  ;;  %v10010_v19 = vld [vmem:[#allocation2 + $0x68] sm:$0xff]  ;;  %v10021_v38 = vmul.f32 %v9993_v45, %v3308_v5  ;;  %v10037_v34 = vmul.f32 %v9985_v6, %v2679_v20  ;;  %v10040_v5 = vmul.f32 %v9995_v33, %v3408_v36 }
 0x2ce   : > { %2650 = vst.msk [vmem:[#allocation2 + $0xc1] sm:$0xff] %vm459_vm0, %v9822_v49  ;;  %2651 = vst.msk [vmem:[#allocation2 + $0xc9] sm:$0xff] %vm459_vm0, %v9824_v62  ;;  %v10055_v20 = vmul.f32 %v9985_v6, %v2680_v7  ;;  %v10085_v49 = vadd.f32 %v9969_v48, %v2716_v22  ;;  %v10100_v16 = vadd.f32 %v9969_v48, %v2717_v30 }
 0x2cf   : > { %13659 = vst [vmem:[#allocation76_spill] sm:$0xff] %v9881_v44  ;;  %13660 = vst [vmem:[#allocation77_spill] sm:$0xff] %v9886_v50 }
 0x2d0   : > { %13661 = vst [vmem:[#allocation78_spill] sm:$0xff] %v9891_v28  ;;  %13662 = vst [vmem:[#allocation79_spill] sm:$0xff] %v9896_v27  ;;  %v10012_v51 = vld [vmem:[#allocation2 + $0x78] sm:$0xff]  ;;  %v10014_v8 = vld [vmem:[#allocation2 + $0x80] sm:$0xff] }
 0x2d1   : > { %2652 = vst.msk [vmem:[#allocation2 + $0xd9] sm:$0xff] %vm459_vm0, %v9834_v56  ;;  %2653 = vst.msk [vmem:[#allocation2 + $0xe1] sm:$0xff] %vm459_vm0, %v9836_v35  ;;  %v10026_v58 = vld [vmem:[#allocation2 + $0x90] sm:$0xff]  ;;  %v10028_v63 = vld [vmem:[#allocation2 + $0x98] sm:$0xff] }
 0x2d2   : > { %2654 = vst.msk [vmem:[#allocation2 + $0xf1] sm:$0xff] %vm459_vm0, %v9838_v61  ;;  %2655 = vst.msk [vmem:[#allocation2 + $0xf9] sm:$0xff] %vm459_vm0, %v9840_v31  ;;  %v2725_v35 = vmul.f32 %v9959_v26, %v10026_v58  ;;  %v2726_v56 = vmul.f32 %v9959_v26, %v10028_v63 }
 0x2d3   : > { %13663 = vst [vmem:[#allocation80_spill] sm:$0xff] %v9909_v13  ;;  %13664 = vst [vmem:[#allocation81_spill] sm:$0xff] %v9914_v12 }
 0x2d4   : > { %13666 = vst [vmem:[#allocation82_spill] sm:$0xff] %v9919_v9  ;;  %13668 = vst [vmem:[#allocation83_spill] sm:$0xff] %v9924_v42  ;;  %v10030_v21 = vld [vmem:[#allocation2 + $0xa8] sm:$0xff]  ;;  %v10042_v46 = vld [vmem:[#allocation2 + $0xb0] sm:$0xff] }
 0x2d5   : > { %2656 = vst.msk [vmem:[#allocation2 + $0x109] sm:$0xff] %vm459_vm0, %v9853_v39  ;;  %2657 = vst.msk [vmem:[#allocation2 + $0x111] sm:$0xff] %vm459_vm0, %v9858_v10  ;;  %v2724_v10 = vmul.f32 %v9959_v26, %v10014_v8  ;;  %v10070_v39 = vadd.f32 %v9969_v48, %v2715_v43  ;;  %v2727_v62 = vmul.f32 %v9959_v26, %v10030_v21 }
 0x2d6   : > { %2658 = vst.msk [vmem:[#allocation2 + $0x121] sm:$0xff] %vm459_vm0, %v9863_v52  ;;  %2659 = vst.msk [vmem:[#allocation2 + $0x129] sm:$0xff] %vm459_vm0, %v9868_v32  ;;  %v2722_v32 = vmul.f32 %v9959_v26, %v10010_v19  ;;  %v2723_v52 = vmul.f32 %v9959_v26, %v10012_v51  ;;  %v2728_v24 = vmul.f32 %v9959_v26, %v10042_v46 }
 0x2d7   : > { %2660 = vst.msk [vmem:[#allocation2 + $0x139] sm:$0xff] %vm459_vm0, %v9881_v44  ;;  %2661 = vst.msk [vmem:[#allocation2 + $0x141] sm:$0xff] %vm459_vm0, %v9886_v50 }
 0x2d8   : > { %2662 = vst.msk [vmem:[#allocation2 + $0x151] sm:$0xff] %vm459_vm0, %v9891_v28  ;;  %2663 = vst.msk [vmem:[#allocation2 + $0x159] sm:$0xff] %vm459_vm0, %v9896_v27  ;;  %v2720_v27 = vmul.f32 %v9959_v26, %v10001_v3  ;;  %v2721_v28 = vmul.f32 %v9959_v26, %v10003_v57  ;;  %v10057_v36 = vld [vmem:[#allocation2 + $0xd8] sm:$0xff]  ;;  %v10059_v50 = vld [vmem:[#allocation2 + $0xe0] sm:$0xff] }
 0x2d9   : > { %2664 = vst.msk [vmem:[#allocation2 + $0x169] sm:$0xff] %vm459_vm0, %v9909_v13  ;;  %2665 = vst.msk [vmem:[#allocation2 + $0x171] sm:$0xff] %vm459_vm0, %v9914_v12  ;;  %v10046_v12 = vld [vmem:[#allocation2 + $0xc8] sm:$0xff]  ;;  %v2719_v13 = vmul.f32 %v9959_v26, %v9999_v0  ;;  %v10061_v44 = vld [vmem:[#allocation2 + $0xf0] sm:$0xff]  ;;  %v2731_v41 = vmul.f32 %v9959_v26, %v10057_v36  ;;  %v2732_v59 = vmul.f32 %v9959_v26, %v10059_v50 }
 0x2da   : > { %2666 = vst.msk [vmem:[#allocation2 + $0x181] sm:$0xff] %vm459_vm0, %v9919_v9  ;;  %2667 = vst.msk [vmem:[#allocation2 + $0x189] sm:$0xff] %vm459_vm0, %v9924_v42  ;;  %v2718_v42 = vmul.f32 %v9959_v26, %v9991_v4  ;;  %v10044_v9 = vld [vmem:[#allocation2 + $0xc0] sm:$0xff]  ;;  %v10072_v7 = vld [vmem:[#allocation2 + $0xf8] sm:$0xff]  ;;  %v2730_v47 = vmul.f32 %v9959_v26, %v10046_v12  ;;  %v2733_v11 = vmul.f32 %v9959_v26, %v10061_v44 }
 0x2db   : > { %13671 = vst [vmem:[#allocation85_spill] sm:$0xff] %v9974_v55  ;;  %13672 = vst [vmem:[#allocation86_spill] sm:$0xff] %v9985_v6  ;;  %v2729_v18 = vmul.f32 %v9959_v26, %v10044_v9 }
 0x2dc   : > { %13673 = vst [vmem:[#allocation87_spill] sm:$0xff] %v9987_v17  ;;  %13674 = vst [vmem:[#allocation88_spill] sm:$0xff] %v9989_v53  ;;  %v10074_v31 = vld [vmem:[#allocation2 + $0x108] sm:$0xff]  ;;  %v10076_v61 = vld [vmem:[#allocation2 + $0x110] sm:$0xff]  ;;  %v10115_v14 = vadd.f32 %v9969_v48, %v2718_v42 }
 0x2dd   : > { %13675 = vst [vmem:[#allocation89_spill] sm:$0xff] %v9991_v4  ;;  %13676 = vst [vmem:[#allocation90_spill] sm:$0xff] %v9993_v45  ;;  %v10087_v43 = vld [vmem:[#allocation2 + $0x120] sm:$0xff]  ;;  %v10089_v37 = vld [vmem:[#allocation2 + $0x128] sm:$0xff] }
 0x2de   : > { %13677 = vst [vmem:[#allocation91_spill] sm:$0xff] %v9995_v33  ;;  %13678 = vst [vmem:[#allocation92_spill] sm:$0xff] %v9997_v1  ;;  %v10091_v40 = vld [vmem:[#allocation2 + $0x138] sm:$0xff]  ;;  %v10102_v22 = vld [vmem:[#allocation2 + $0x140] sm:$0xff]  ;;  %v10128_v33 = vadd.f32 %v9969_v48, %v2719_v13  ;;  %v2737_v42 = vmul.f32 %v9959_v26, %v10087_v43  ;;  %v2738_v45 = vmul.f32 %v9959_v26, %v10089_v37 }
 0x2df   : > { %13679 = vst [vmem:[#allocation93_spill] sm:$0xff] %v9999_v0  ;;  %13680 = vst [vmem:[#allocation94_spill] sm:$0xff] %v10001_v3  ;;  %v10104_v54 = vld [vmem:[#allocation2 + $0x150] sm:$0xff]  ;;  %v10106_v25 = vld [vmem:[#allocation2 + $0x158] sm:$0xff] }
 0x2e0   : > { %13681 = vst [vmem:[#allocation95_spill] sm:$0xff] %v10003_v57  ;;  %13682 = vst [vmem:[#allocation96_spill] sm:$0xff] %v10006_v23  ;;  %v10117_v30 = vld [vmem:[#allocation2 + $0x168] sm:$0xff]  ;;  %v10137_v23 = vadd.f32 %v9969_v48, %v2720_v27  ;;  %v2741_v1 = vmul.f32 %v9959_v26, %v10104_v54  ;;  %v2742_v13 = vmul.f32 %v9959_v26, %v10106_v25  ;;  %v10277_v57 = vld [vmem:[#allocation2 + $0x111] sm:$0xff] }
 0x2e1   : > { %13683 = vst [vmem:[#allocation97_spill] sm:$0xff] %v10008_v2  ;;  %13684 = vst [vmem:[#allocation98_spill] sm:$0xff] %v10010_v19  ;;  %v2739_v2 = vmul.f32 %v9959_v26, %v10091_v40  ;;  %v2743_v17 = vmul.f32 %v9959_v26, %v10117_v30  ;;  %v10153_v27 = vadd.f32 %v9969_v48, %v2722_v32  ;;  %v10174_v32 = vld [vmem:[#allocation2 + $0x31] sm:$0xff]  ;;  %v10281_v3 = vld [vmem:[#allocation2 + $0x129] sm:$0xff] }
 0x2e2   : > { %13685 = vst [vmem:[#allocation99_spill] sm:$0xff] %v10012_v51  ;;  %13686 = vst [vmem:[#allocation100_spill] sm:$0xff] %v10014_v8  ;;  %v10263_v8 = vld [vmem:[#allocation2 + $0xf1] sm:$0xff]  ;;  %v10265_v51 = vld [vmem:[#allocation2 + $0xf9] sm:$0xff] }
 0x2e3   : > { %13687 = vst [vmem:[#allocation101_spill] sm:$0xff] %v10018_v29  ;;  %13688 = vst [vmem:[#allocation102_spill] sm:$0xff] %v10021_v38  ;;  %v2735_v38 = vmul.f32 %v9959_v26, %v10074_v31  ;;  %v2736_v29 = vmul.f32 %v9959_v26, %v10076_v61  ;;  %v10291_v4 = vld [vmem:[#allocation2 + $0x139] sm:$0xff]  ;;  %v10295_v6 = vld [vmem:[#allocation2 + $0x151] sm:$0xff] }
 0x2e4   : > { %13689 = vst [vmem:[#allocation103_spill] sm:$0xff] %v10024_v60  ;;  %13690 = vst [vmem:[#allocation104_spill] sm:$0xff] %v10026_v58  ;;  %v2734_v60 = vmul.f32 %v9959_v26, %v10072_v7  ;;  %v2817_v58 = vmul.f32 %v9963_v15, %v10174_v32  ;;  %v10305_v55 = vld [vmem:[#allocation2 + $0x159] sm:$0xff] }
 0x2e5   : > { %13691 = vst [vmem:[#allocation105_spill] sm:$0xff] %v10028_v63  ;;  %13692 = vst [vmem:[#allocation106_spill] sm:$0xff] %v10030_v21  ;;  %v10253_v63 = vld [vmem:[#allocation2 + $0xd9] sm:$0xff] }
 0x2e6   : > { %13693 = vst [vmem:[#allocation107_spill] sm:$0xff] %v10037_v34  ;;  %13694 = vst [vmem:[#allocation108_spill] sm:$0xff] %v10040_v5  ;;  %v10119_v5 = vld [vmem:[#allocation2 + $0x170] sm:$0xff]  ;;  %v10146_v34 = vadd.f32 %v9969_v48, %v2721_v28  ;;  %v10165_v28 = vadd.f32 %v9969_v48, %v2726_v56  ;;  %v10186_v56 = vadd.f32 %v9969_v48, %v2731_v41  ;;  %v10206_v41 = vld [vmem:[#allocation2 + $0x61] sm:$0xff] }
 0x2e7   : > { %13695 = vst [vmem:[#allocation109_spill] sm:$0xff] %v10042_v46  ;;  %13696 = vst [vmem:[#allocation110_spill] sm:$0xff] %v10044_v9  ;;  %v10244_v9 = vld [vmem:[#allocation2 + $0xb1] sm:$0xff]  ;;  %v10246_v46 = vld [vmem:[#allocation2 + $0xc1] sm:$0xff] }
 0x2e8   : > { %13697 = vst [vmem:[#allocation111_spill] sm:$0xff] %v10046_v12  ;;  %13698 = vst [vmem:[#allocation112_spill] sm:$0xff] %v10055_v20  ;;  %v2740_v20 = vmul.f32 %v9959_v26, %v10102_v22 }
 0x2e9   : > { %13699 = vst [vmem:[#allocation113_spill] sm:$0xff] %v10057_v36  ;;  %13700 = vst [vmem:[#allocation114_spill] sm:$0xff] %v10059_v50  ;;  %v10226_v50 = vld [vmem:[#allocation2 + $0x91] sm:$0xff]  ;;  %v10228_v36 = vld [vmem:[#allocation2 + $0x99] sm:$0xff] }
 0x2ea   : > { %13701 = vst [vmem:[#allocation115_spill] sm:$0xff] %v10061_v44  ;;  %13702 = vst [vmem:[#allocation116_spill] sm:$0xff] %v10072_v7  ;;  %v10210_v7 = vld [vmem:[#allocation2 + $0x79] sm:$0xff]  ;;  %v10213_v44 = vadd.f32 %v9969_v48, %v2736_v29  ;;  %v10231_v12 = vadd.f32 %v9969_v48, %v2740_v20  ;;  %v10234_v29 = vadd.f32 %v9969_v48, %v2741_v1  ;;  %v10251_v20 = vld [vmem:[#allocation2 + $0xc9] sm:$0xff] }
 0x2eb   : > { %13703 = vst [vmem:[#allocation117_spill] sm:$0xff] %v10074_v31  ;;  %13704 = vst [vmem:[#allocation118_spill] sm:$0xff] %v10076_v61  ;;  %v10195_v61 = vadd.f32 %v9969_v48, %v2732_v59  ;;  %v10208_v31 = vld [vmem:[#allocation2 + $0x69] sm:$0xff]  ;;  %v10216_v59 = vadd.f32 %v9969_v48, %v2737_v42  ;;  %v10237_v42 = vadd.f32 %v9969_v48, %v2742_v13  ;;  %v10255_v1 = vld [vmem:[#allocation2 + $0xe1] sm:$0xff] }
 0x2ec   : > { %13705 = vst [vmem:[#allocation119_spill] sm:$0xff] %v10087_v43  ;;  %13706 = vst [vmem:[#allocation120_spill] sm:$0xff] %v10089_v37  ;;  %v10170_v37 = vld [vmem:[#allocation2 + $0x19] sm:$0xff]  ;;  %v10192_v43 = vld [vmem:[#allocation2 + $0x51] sm:$0xff]  ;;  %v2822_v0 = vmul.f32 %v9963_v15, %v10208_v31  ;;  %v2826_v53 = vmul.f32 %v9963_v15, %v10228_v36 }
 0x2ed   : > { %13707 = vst [vmem:[#allocation121_spill] sm:$0xff] %v10091_v40  ;;  %13708 = vst [vmem:[#allocation122_spill] sm:$0xff] %v10102_v22  ;;  %v2744_v40 = vmul.f32 %v9959_v26, %v10119_v5  ;;  %v10156_v22 = vadd.f32 %v9969_v48, %v2723_v52  ;;  %v10172_v26 = vld [vmem:[#allocation2 + $0x21] sm:$0xff]  ;;  %v10177_v52 = vadd.f32 %v9969_v48, %v2728_v24 }
 0x2ee   : > { %13709 = vst [vmem:[#allocation123_spill] sm:$0xff] %v10104_v54  ;;  %13710 = vst [vmem:[#allocation124_spill] sm:$0xff] %v10106_v25  ;;  %v10159_v54 = vadd.f32 %v9969_v48, %v2724_v10  ;;  %v10162_v25 = vadd.f32 %v9969_v48, %v2725_v35  ;;  %v10180_v10 = vadd.f32 %v9969_v48, %v2729_v18 }
 0x2ef   : > { %13711 = vst [vmem:[#allocation125_spill] sm:$0xff] %v10117_v30  ;;  %13712 = vst [vmem:[#allocation126_spill] sm:$0xff] %v10119_v5  ;;  %v10168_v30 = vadd.f32 %v9969_v48, %v2727_v62  ;;  %v10183_v35 = vadd.f32 %v9969_v48, %v2730_v47  ;;  %v10188_v62 = vld [vmem:[#allocation2 + $0x39] sm:$0xff]  ;;  %v10190_v5 = vld [vmem:[#allocation2 + $0x49] sm:$0xff]  ;;  %v10198_v24 = vadd.f32 %v9969_v48, %v2733_v11 }
 0x2f0   : > { %13713 = vst [vmem:[#allocation127_spill] sm:$0xff] %v10170_v37  ;;  %13714 = vst [vmem:[#allocation128_spill] sm:$0xff] %v10172_v26  ;;  %v10201_v18 = vadd.f32 %v9969_v48, %v2734_v60  ;;  %v10204_v47 = vadd.f32 %v9969_v48, %v2735_v38  ;;  %v10219_v11 = vadd.f32 %v9969_v48, %v2738_v45  ;;  %v10224_v38 = vld [vmem:[#allocation2 + $0x81] sm:$0xff] }
 0x2f1   : > { %13715 = vst [vmem:[#allocation129_spill] sm:$0xff] %v10174_v32  ;;  %13716 = vst [vmem:[#allocation130_spill] sm:$0xff] %v10188_v62  ;;  %v10222_v60 = vadd.f32 %v9969_v48, %v2739_v2  ;;  %v10240_v45 = vadd.f32 %v9969_v48, %v2743_v17  ;;  %v10242_v2 = vld [vmem:[#allocation2 + $0xa9] sm:$0xff]  ;;  %v10249_v21 = vadd.f32 %v9969_v48, %v2744_v40  ;;  %v10279_v32 = vld [vmem:[#allocation2 + $0x121] sm:$0xff] }
 0x2f2   : > { %13717 = vst [vmem:[#allocation131_spill] sm:$0xff] %v10190_v5  ;;  %13718 = vst [vmem:[#allocation132_spill] sm:$0xff] %v10192_v43  ;;  %v2815_v13 = vmul.f32 %v9963_v15, %v10170_v37  ;;  %v2816_v17 = vmul.f32 %v9963_v15, %v10172_v26  ;;  %v10267_v40 = vld [vmem:[#allocation2 + $0x109] sm:$0xff]  ;;  %v2818_v48 = vmul.f32 %v9963_v15, %v10188_v62 }
 0x2f3   : > { %13719 = vst [vmem:[#allocation133_spill] sm:$0xff] %v10206_v41  ;;  %13720 = vst [vmem:[#allocation134_spill] sm:$0xff] %v10208_v31  ;;  %v2819_v19 = vmul.f32 %v9963_v15, %v10190_v5  ;;  %v2820_v37 = vmul.f32 %v9963_v15, %v10192_v43  ;;  %v2821_v26 = vmul.f32 %v9963_v15, %v10206_v41  ;;  %v10293_v41 = vld [vmem:[#allocation2 + $0x141] sm:$0xff] }
 0x2f4   : > { %13721 = vst [vmem:[#allocation135_spill] sm:$0xff] %v10210_v7  ;;  %13722 = vst [vmem:[#allocation136_spill] sm:$0xff] %v10224_v38  ;;  %v2823_v62 = vmul.f32 %v9963_v15, %v10210_v7  ;;  %v2824_v5 = vmul.f32 %v9963_v15, %v10224_v38  ;;  %v2825_v43 = vmul.f32 %v9963_v15, %v10226_v50 }
 0x2f5   : > { %13723 = vst [vmem:[#allocation137_spill] sm:$0xff] %v10226_v50  ;;  %13724 = vst [vmem:[#allocation138_spill] sm:$0xff] %v10228_v36  ;;  %v2827_v31 = vmul.f32 %v9963_v15, %v10242_v2  ;;  %v2828_v7 = vmul.f32 %v9963_v15, %v10244_v9  ;;  %v2829_v38 = vmul.f32 %v9963_v15, %v10246_v46  ;;  %v10307_v50 = vld [vmem:[#allocation2 + $0x169] sm:$0xff] }
 0x2f6   : > { %13725 = vst [vmem:[#allocation139_spill] sm:$0xff] %v10234_v29  ;;  %13726 = vst [vmem:[#allocation140_spill] sm:$0xff] %v10237_v42  ;;  %v2831_v36 = vmul.f32 %v9963_v15, %v10253_v63  ;;  %v2835_v42 = vmul.f32 %v9963_v15, %v10267_v40  ;;  %v2836_v29 = vmul.f32 %v9963_v15, %v10277_v57 }
 0x2f7   : > { %13727 = vst [vmem:[#allocation141_spill] sm:$0xff] %v10240_v45  ;;  %13728 = vst [vmem:[#allocation142_spill] sm:$0xff] %v10242_v2  ;;  %v2830_v45 = vmul.f32 %v9963_v15, %v10251_v20  ;;  %v2832_v2 = vmul.f32 %v9963_v15, %v10255_v1 }
 0x2f8   : > { %13729 = vst [vmem:[#allocation143_spill] sm:$0xff] %v10244_v9  ;;  %13730 = vst [vmem:[#allocation144_spill] sm:$0xff] %v10246_v46  ;;  %v2833_v9 = vmul.f32 %v9963_v15, %v10263_v8  ;;  %v2834_v46 = vmul.f32 %v9963_v15, %v10265_v51 }
 0x2f9   : > { %13731 = vst [vmem:[#allocation145_spill] sm:$0xff] %v10249_v21  ;;  %13732 = vst [vmem:[#allocation146_spill] sm:$0xff] %v10251_v20  ;;  %v10309_v21 = vld [vmem:[#allocation2 + $0x171] sm:$0xff]  ;;  %v2837_v20 = vmul.f32 %v9963_v15, %v10279_v32 }
 0x2fa   : > { %13733 = vst [vmem:[#allocation147_spill] sm:$0xff] %v10253_v63  ;;  %13734 = vst [vmem:[#allocation148_spill] sm:$0xff] %v10255_v1  ;;  %v2838_v63 = vmul.f32 %v9963_v15, %v10281_v3  ;;  %v2839_v1 = vmul.f32 %v9963_v15, %v10291_v4 }
 0x2fb   : > { %13735 = vst [vmem:[#allocation149_spill] sm:$0xff] %v10263_v8  ;;  %13736 = vst [vmem:[#allocation150_spill] sm:$0xff] %v10265_v51  ;;  %v2840_v8 = vmul.f32 %v9963_v15, %v10293_v41  ;;  %v2841_v51 = vmul.f32 %v9963_v15, %v10295_v6 }
 0x2fc   : > { %13737 = vst [vmem:[#allocation151_spill] sm:$0xff] %v10267_v40  ;;  %13738 = vst [vmem:[#allocation152_spill] sm:$0xff] %v10277_v57  ;;  %v2842_v40 = vmul.f32 %v9963_v15, %v10305_v55  ;;  %v2843_v57 = vmul.f32 %v9963_v15, %v10307_v50 }
 0x2fd   : > { %13739 = vst [vmem:[#allocation153_spill] sm:$0xff] %v10279_v32  ;;  %13740 = vst [vmem:[#allocation154_spill] sm:$0xff] %v10281_v3  ;;  %v2844_v32 = vmul.f32 %v9963_v15, %v10309_v21  ;;  %v10342_v3 = vadd.f32 %v2815_v13, %v10070_v39  ;;  %v10360_v15 = vadd.f32 %v2821_v26, %v10146_v34  ;;  %v10400_v34 = vld [vmem:[#allocation2 + $0x4a] sm:$0xff] }
 0x2fe   : > { %13741 = vst [vmem:[#allocation155_spill] sm:$0xff] %v10291_v4  ;;  %13742 = vst [vmem:[#allocation156_spill] sm:$0xff] %v10293_v41  ;;  %v10345_v4 = vadd.f32 %v2816_v17, %v10085_v49  ;;  %v10348_v41 = vadd.f32 %v2817_v58, %v10100_v16  ;;  %v10363_v39 = vadd.f32 %v2822_v0, %v10153_v27  ;;  %v10384_v0 = vld [vmem:[#allocation2 + $0x32] sm:$0xff]  ;;  %v10418_v27 = vld [vmem:[#allocation2 + $0x6a] sm:$0xff] }
 0x2ff   : > { %13743 = vst [vmem:[#allocation157_spill] sm:$0xff] %v10295_v6  ;;  %13744 = vst [vmem:[#allocation158_spill] sm:$0xff] %v10305_v55  ;;  %v10351_v6 = vadd.f32 %v2818_v48, %v10115_v14  ;;  %v10354_v55 = vadd.f32 %v2819_v19, %v10128_v33  ;;  %v10366_v49 = vadd.f32 %v2823_v62, %v10156_v22  ;;  %v10380_v33 = vld [vmem:[#allocation2 + $0x1a] sm:$0xff] }
 0x300   : > { %13745 = vst [vmem:[#allocation159_spill] sm:$0xff] %v10307_v50  ;;  %13746 = vst [vmem:[#allocation160_spill] sm:$0xff] %v10309_v21  ;;  %v10357_v50 = vadd.f32 %v2820_v37, %v10137_v23  ;;  %v10369_v16 = vadd.f32 %v2824_v5, %v10159_v54  ;;  %v10372_v14 = vadd.f32 %v2825_v43, %v10162_v25  ;;  %v10382_v23 = vld [vmem:[#allocation2 + $0x22] sm:$0xff]  ;;  %v10402_v5 = vld [vmem:[#allocation2 + $0x52] sm:$0xff] }
 0x301   : > { %v10375_v19 = vadd.f32 %v2826_v53, %v10165_v28  ;;  %v10378_v37 = vadd.f32 %v2827_v31, %v10168_v30  ;;  %13747 = vst [vmem:[#allocation161_spill] sm:$0xff] %v10380_v33  ;;  %13748 = vst [vmem:[#allocation162_spill] sm:$0xff] %v10382_v23  ;;  %v10387_v58 = vadd.f32 %v2828_v7, %v10177_v52  ;;  %v10398_v31 = vld [vmem:[#allocation2 + $0x3a] sm:$0xff]  ;;  %v10434_v52 = vld [vmem:[#allocation2 + $0x82] sm:$0xff] }
 0x302   : > { %13749 = vst [vmem:[#allocation163_spill] sm:$0xff] %v10384_v0  ;;  %v10390_v54 = vadd.f32 %v2829_v38, %v10180_v10  ;;  %v10393_v25 = vadd.f32 %v2830_v45, %v10183_v35  ;;  %v10396_v53 = vadd.f32 %v2831_v36, %v10186_v56  ;;  %13750 = vst [vmem:[#allocation164_spill] sm:$0xff] %v10398_v31  ;;  %v10416_v36 = vld [vmem:[#allocation2 + $0x62] sm:$0xff]  ;;  %v10420_v28 = vld [vmem:[#allocation2 + $0x7a] sm:$0xff] }
 0x303   : > { %13751 = vst [vmem:[#allocation165_spill] sm:$0xff] %v10400_v34  ;;  %13752 = vst [vmem:[#allocation166_spill] sm:$0xff] %v10402_v5  ;;  %v10405_v43 = vadd.f32 %v2832_v2, %v10195_v61  ;;  %v10408_v7 = vadd.f32 %v2833_v9, %v10198_v24  ;;  %v10411_v22 = vadd.f32 %v2834_v46, %v10201_v18  ;;  %v10436_v10 = vld [vmem:[#allocation2 + $0x92] sm:$0xff]  ;;  %v10438_v35 = vld [vmem:[#allocation2 + $0x9a] sm:$0xff] }
 0x304   : > { %v10414_v30 = vadd.f32 %v2835_v42, %v10204_v47  ;;  %13753 = vst [vmem:[#allocation167_spill] sm:$0xff] %v10416_v36  ;;  %13754 = vst [vmem:[#allocation168_spill] sm:$0xff] %v10418_v27  ;;  %v10423_v26 = vadd.f32 %v2836_v29, %v10213_v44  ;;  %v10426_v61 = vadd.f32 %v2837_v20, %v10216_v59  ;;  %v13759_v44 = vld [vmem:[#allocation139_spill] sm:$0xff]  ;;  %v13761_v24 = vld [vmem:[#allocation140_spill] sm:$0xff] }
 0x305   : > { %13755 = vst [vmem:[#allocation169_spill] sm:$0xff] %v10420_v28  ;;  %v10429_v9 = vadd.f32 %v2838_v63, %v10219_v11  ;;  %v10432_v46 = vadd.f32 %v2839_v1, %v10222_v60  ;;  %13756 = vst [vmem:[#allocation170_spill] sm:$0xff] %v10434_v52  ;;  %v10441_v56 = vadd.f32 %v2840_v8, %v10231_v12  ;;  %v13763_v63 = vld [vmem:[#allocation141_spill] sm:$0xff]  ;;  %v10452_v59 = vld [vmem:[#allocation2 + $0xaa] sm:$0xff] }
 0x306   : > { %13757 = vst [vmem:[#allocation171_spill] sm:$0xff] %v10436_v10  ;;  %13758 = vst [vmem:[#allocation172_spill] sm:$0xff] %v10438_v35  ;;  %v10444_v62 = vadd.f32 %v2841_v51, %v13759_v44  ;;  %v10447_v18 = vadd.f32 %v2842_v40, %v13761_v24  ;;  %v10450_v47 = vadd.f32 %v2843_v57, %v13763_v63  ;;  %v10454_v11 = vld [vmem:[#allocation2 + $0xb2] sm:$0xff]  ;;  %v10456_v60 = vld [vmem:[#allocation2 + $0xc2] sm:$0xff] }
 0x307   : > { %13765 = vst [vmem:[#allocation173_spill] sm:$0xff] %v10452_v59  ;;  %13766 = vst [vmem:[#allocation174_spill] sm:$0xff] %v10454_v11  ;;  %v13768_v38 = vld [vmem:[#allocation145_spill] sm:$0xff]  ;;  %v10461_v12 = vld [vmem:[#allocation2 + $0xca] sm:$0xff] }
 0x308   : > { %13760 = vst [vmem:[#allocation139_spill] sm:$0xff] %v10444_v62  ;;  %13762 = vst [vmem:[#allocation140_spill] sm:$0xff] %v10447_v18  ;;  %v10459_v29 = vadd.f32 %v2844_v32, %v13768_v38  ;;  %v10463_v8 = vld [vmem:[#allocation2 + $0xda] sm:$0xff]  ;;  %v10465_v51 = vld [vmem:[#allocation2 + $0xe2] sm:$0xff] }
 0x309   : > { %13764 = vst [vmem:[#allocation141_spill] sm:$0xff] %v10450_v47  ;;  %13767 = vst [vmem:[#allocation175_spill] sm:$0xff] %v10456_v60  ;;  %v13773_v42 = vld [vmem:[#allocation85_spill] sm:$0xff]  ;;  %v10473_v20 = vld [vmem:[#allocation2 + $0xf2] sm:$0xff] }
 0x30a   : > { %13769 = vst [vmem:[#allocation145_spill] sm:$0xff] %v10459_v29  ;;  %13770 = vst [vmem:[#allocation176_spill] sm:$0xff] %v10461_v12  ;;  %v2915_v45 = vmul.f32 %v13773_v42, %v10380_v33  ;;  %v2916_v57 = vmul.f32 %v13773_v42, %v10382_v23  ;;  %v2917_v2 = vmul.f32 %v13773_v42, %v10384_v0  ;;  %v10475_v1 = vld [vmem:[#allocation2 + $0xfa] sm:$0xff]  ;;  %v10477_v32 = vld [vmem:[#allocation2 + $0x10a] sm:$0xff] }
 0x30b   : > { %13771 = vst [vmem:[#allocation177_spill] sm:$0xff] %v10463_v8  ;;  %13772 = vst [vmem:[#allocation178_spill] sm:$0xff] %v10465_v51  ;;  %v2918_v13 = vmul.f32 %v13773_v42, %v10398_v31  ;;  %v2919_v17 = vmul.f32 %v13773_v42, %v10400_v34  ;;  %v2920_v40 = vmul.f32 %v13773_v42, %v10402_v5  ;;  %v10487_v44 = vld [vmem:[#allocation2 + $0x112] sm:$0xff]  ;;  %v10489_v24 = vld [vmem:[#allocation2 + $0x122] sm:$0xff] }
 0x30c   : > { %13774 = vst [vmem:[#allocation85_spill] sm:$0xff] %v10473_v20  ;;  %13775 = vst [vmem:[#allocation179_spill] sm:$0xff] %v10475_v1  ;;  %v2921_v48 = vmul.f32 %v13773_v42, %v10416_v36  ;;  %v10491_v63 = vld [vmem:[#allocation2 + $0x12a] sm:$0xff]  ;;  %v2922_v38 = vmul.f32 %v13773_v42, %v10418_v27  ;;  %v2923_v31 = vmul.f32 %v13773_v42, %v10420_v28  ;;  %v10501_v0 = vld [vmem:[#allocation2 + $0x13a] sm:$0xff] }
 0x30d   : > { %13776 = vst [vmem:[#allocation180_spill] sm:$0xff] %v10477_v32  ;;  %13777 = vst [vmem:[#allocation181_spill] sm:$0xff] %v10487_v44  ;;  %v2924_v34 = vmul.f32 %v13773_v42, %v10434_v52  ;;  %v2925_v5 = vmul.f32 %v13773_v42, %v10436_v10  ;;  %v10503_v36 = vld [vmem:[#allocation2 + $0x142] sm:$0xff]  ;;  %v10505_v23 = vld [vmem:[#allocation2 + $0x152] sm:$0xff]  ;;  %v2926_v33 = vmul.f32 %v13773_v42, %v10438_v35 }
 0x30e   : > { %13778 = vst [vmem:[#allocation182_spill] sm:$0xff] %v10489_v24  ;;  %13779 = vst [vmem:[#allocation183_spill] sm:$0xff] %v10491_v63  ;;  %v2927_v27 = vmul.f32 %v13773_v42, %v10452_v59  ;;  %v2928_v28 = vmul.f32 %v13773_v42, %v10454_v11  ;;  %v2929_v52 = vmul.f32 %v13773_v42, %v10456_v60  ;;  %v10515_v21 = vld [vmem:[#allocation2 + $0x15a] sm:$0xff]  ;;  %v10517_v10 = vld [vmem:[#allocation2 + $0x16a] sm:$0xff] }
 0x30f   : > { %13780 = vst [vmem:[#allocation184_spill] sm:$0xff] %v10501_v0  ;;  %13781 = vst [vmem:[#allocation185_spill] sm:$0xff] %v10503_v36  ;;  %v10519_v29 = vld [vmem:[#allocation2 + $0x172] sm:$0xff]  ;;  %v2930_v47 = vmul.f32 %v13773_v42, %v10461_v12  ;;  %v2931_v35 = vmul.f32 %v13773_v42, %v10463_v8  ;;  %v2932_v59 = vmul.f32 %v13773_v42, %v10465_v51 }
 0x310   : > { %13782 = vst [vmem:[#allocation186_spill] sm:$0xff] %v10505_v23  ;;  %13783 = vst [vmem:[#allocation187_spill] sm:$0xff] %v10515_v21  ;;  %v2933_v11 = vmul.f32 %v13773_v42, %v10473_v20  ;;  %v2934_v60 = vmul.f32 %v13773_v42, %v10475_v1  ;;  %v2935_v18 = vmul.f32 %v13773_v42, %v10477_v32 }
 0x311   : > { %13784 = vst [vmem:[#allocation188_spill] sm:$0xff] %v10517_v10  ;;  %13785 = vst [vmem:[#allocation189_spill] sm:$0xff] %v10519_v29  ;;  %v2936_v62 = vmul.f32 %v13773_v42, %v10487_v44  ;;  %v2937_v12 = vmul.f32 %v13773_v42, %v10489_v24  ;;  %v2938_v8 = vmul.f32 %v13773_v42, %v10491_v63 }
 0x312   : > { %v2939_v51 = vmul.f32 %v13773_v42, %v10501_v0  ;;  %v2940_v20 = vmul.f32 %v13773_v42, %v10503_v36  ;;  %v2941_v1 = vmul.f32 %v13773_v42, %v10505_v23  ;;  %v2942_v32 = vmul.f32 %v13773_v42, %v10515_v21 }
 0x313   : > { %v2943_v44 = vmul.f32 %v13773_v42, %v10517_v10  ;;  %v2944_v24 = vmul.f32 %v13773_v42, %v10519_v29  ;;  %v10552_v63 = vadd.f32 %v2915_v45, %v10342_v3  ;;  %v10555_v0 = vadd.f32 %v2916_v57, %v10345_v4  ;;  %v13807_v57 = vld [vmem:[#allocation104_spill] sm:$0xff]  ;;  %v13824_v29 = vld [vmem:[#allocation122_spill] sm:$0xff] }
 0x314   : > { %v10558_v36 = vadd.f32 %v2917_v2, %v10348_v41  ;;  %v10561_v23 = vadd.f32 %v2918_v13, %v10351_v6  ;;  %v10564_v21 = vadd.f32 %v2919_v17, %v10354_v55  ;;  %v10567_v10 = vadd.f32 %v2920_v40, %v10357_v50  ;;  %v13810_v17 = vld [vmem:[#allocation109_spill] sm:$0xff] }
 0x315   : > { %v10570_v42 = vadd.f32 %v2921_v48, %v10360_v15  ;;  %v10573_v3 = vadd.f32 %v2922_v38, %v10363_v39  ;;  %v10576_v4 = vadd.f32 %v2923_v31, %v10366_v49  ;;  %v10579_v41 = vadd.f32 %v2924_v34, %v10369_v16  ;;  %v13790_v34 = vld [vmem:[#allocation139_spill] sm:$0xff]  ;;  %v13811_v48 = vld [vmem:[#allocation110_spill] sm:$0xff] }
 0x316   : > { %v10582_v6 = vadd.f32 %v2925_v5, %v10372_v14  ;;  %v10585_v55 = vadd.f32 %v2926_v33, %v10375_v19  ;;  %v10588_v50 = vadd.f32 %v2927_v27, %v10378_v37  ;;  %v10591_v15 = vadd.f32 %v2928_v28, %v10387_v58  ;;  %v13796_v27 = vld [vmem:[#allocation145_spill] sm:$0xff] }
 0x317   : > { %v10594_v39 = vadd.f32 %v2929_v52, %v10390_v54  ;;  %v10597_v49 = vadd.f32 %v2930_v47, %v10393_v25  ;;  %v10600_v16 = vadd.f32 %v2931_v35, %v10396_v53  ;;  %v10603_v14 = vadd.f32 %v2932_v59, %v10405_v43  ;;  %v13792_v43 = vld [vmem:[#allocation140_spill] sm:$0xff]  ;;  %v13801_v35 = vld [vmem:[#allocation93_spill] sm:$0xff]  ;;  %v13803_v47 = vld [vmem:[#allocation95_spill] sm:$0xff] }
 0x318   : > { %v10606_v19 = vadd.f32 %v2933_v11, %v10408_v7  ;;  %v10609_v37 = vadd.f32 %v2934_v60, %v10411_v22  ;;  %v10612_v33 = vadd.f32 %v2935_v18, %v10414_v30  ;;  %v10615_v58 = vadd.f32 %v2936_v62, %v10423_v26  ;;  %v13794_v22 = vld [vmem:[#allocation141_spill] sm:$0xff]  ;;  %v13798_v26 = vld [vmem:[#allocation88_spill] sm:$0xff]  ;;  %v13802_v62 = vld [vmem:[#allocation94_spill] sm:$0xff] }
 0x319   : > { %v10618_v54 = vadd.f32 %v2937_v12, %v10426_v61  ;;  %v10621_v25 = vadd.f32 %v2938_v8, %v10429_v9  ;;  %v10624_v53 = vadd.f32 %v2939_v51, %v10432_v46  ;;  %v10627_v31 = vadd.f32 %v2940_v20, %v10441_v56  ;;  %v13799_v61 = vld [vmem:[#allocation86_spill] sm:$0xff]  ;;  %v13800_v46 = vld [vmem:[#allocation89_spill] sm:$0xff]  ;;  %v13805_v12 = vld [vmem:[#allocation99_spill] sm:$0xff] }
 0x31a   : > { %v10630_v5 = vadd.f32 %v2941_v1, %v13790_v34  ;;  %v10633_v7 = vadd.f32 %v2942_v32, %v13792_v43  ;;  %v10636_v30 = vadd.f32 %v2943_v44, %v13794_v22  ;;  %v10639_v28 = vadd.f32 %v2944_v24, %v13796_v27  ;;  %v13804_v11 = vld [vmem:[#allocation98_spill] sm:$0xff]  ;;  %v13806_v51 = vld [vmem:[#allocation100_spill] sm:$0xff]  ;;  %v13808_v20 = vld [vmem:[#allocation105_spill] sm:$0xff] }
 0x31b   : > { %13786 = vst [vmem:[#allocation190_spill] sm:$0xff] %v10618_v54  ;;  %13787 = vst [vmem:[#allocation191_spill] sm:$0xff] %v10621_v25  ;;  %v3015_v9 = vmul.f32 %v13799_v61, %v13798_v26  ;;  %v3016_v52 = vmul.f32 %v13799_v61, %v13800_v46  ;;  %v3017_v56 = vmul.f32 %v13799_v61, %v13801_v35  ;;  %v13809_v32 = vld [vmem:[#allocation106_spill] sm:$0xff]  ;;  %v13812_v24 = vld [vmem:[#allocation111_spill] sm:$0xff] }
 0x31c   : > { %13788 = vst [vmem:[#allocation192_spill] sm:$0xff] %v10624_v53  ;;  %13789 = vst [vmem:[#allocation193_spill] sm:$0xff] %v10627_v31  ;;  %v3018_v18 = vmul.f32 %v13799_v61, %v13802_v62  ;;  %v3019_v59 = vmul.f32 %v13799_v61, %v13803_v47  ;;  %v3020_v60 = vmul.f32 %v13799_v61, %v13804_v11  ;;  %v13813_v34 = vld [vmem:[#allocation113_spill] sm:$0xff]  ;;  %v10673_v27 = vld [vmem:[#allocation2 + $0x188] sm:$0xff] }
 0x31d   : > { %13791 = vst [vmem:[#allocation139_spill] sm:$0xff] %v10630_v5  ;;  %13793 = vst [vmem:[#allocation140_spill] sm:$0xff] %v10633_v7  ;;  %v3021_v8 = vmul.f32 %v13799_v61, %v13805_v12  ;;  %v3022_v45 = vmul.f32 %v13799_v61, %v13806_v51  ;;  %v3023_v2 = vmul.f32 %v13799_v61, %v13807_v57  ;;  %v10671_v22 = vld [vmem:[#allocation2 + $0x180] sm:$0xff]  ;;  %v13817_v35 = vld [vmem:[#allocation115_spill] sm:$0xff] }
 0x31e   : > { %13795 = vst [vmem:[#allocation141_spill] sm:$0xff] %v10636_v30  ;;  %13797 = vst [vmem:[#allocation145_spill] sm:$0xff] %v10639_v28  ;;  %v3024_v1 = vmul.f32 %v13799_v61, %v13808_v20  ;;  %v3025_v13 = vmul.f32 %v13799_v61, %v13809_v32  ;;  %v3026_v40 = vmul.f32 %v13799_v61, %v13810_v17  ;;  %v13816_v26 = vld [vmem:[#allocation114_spill] sm:$0xff]  ;;  %v13818_v47 = vld [vmem:[#allocation116_spill] sm:$0xff] }
 0x31f   : > { %v3027_v44 = vmul.f32 %v13799_v61, %v13811_v48  ;;  %v3028_v38 = vmul.f32 %v13799_v61, %v13812_v24  ;;  %v3029_v43 = vmul.f32 %v13799_v61, %v13813_v34  ;;  %13814 = vst [vmem:[#allocation88_spill] sm:$0xff] %v10671_v22  ;;  %13815 = vst [vmem:[#allocation86_spill] sm:$0xff] %v10673_v27  ;;  %v13819_v12 = vld [vmem:[#allocation117_spill] sm:$0xff]  ;;  %v13820_v57 = vld [vmem:[#allocation118_spill] sm:$0xff] }
 0x320   : > { %v3030_v46 = vmul.f32 %v13799_v61, %v13816_v26  ;;  %v3031_v62 = vmul.f32 %v13799_v61, %v13817_v35  ;;  %v3032_v11 = vmul.f32 %v13799_v61, %v13818_v47  ;;  %v3033_v51 = vmul.f32 %v13799_v61, %v13819_v12  ;;  %v13821_v32 = vld [vmem:[#allocation119_spill] sm:$0xff]  ;;  %v13822_v48 = vld [vmem:[#allocation120_spill] sm:$0xff]  ;;  %v13823_v34 = vld [vmem:[#allocation121_spill] sm:$0xff] }
 0x321   : > { %v3034_v20 = vmul.f32 %v13799_v61, %v13820_v57  ;;  %v3035_v17 = vmul.f32 %v13799_v61, %v13821_v32  ;;  %v3036_v24 = vmul.f32 %v13799_v61, %v13822_v48  ;;  %v3037_v26 = vmul.f32 %v13799_v61, %v13823_v34  ;;  %v13825_v28 = vld [vmem:[#allocation123_spill] sm:$0xff]  ;;  %v13826_v30 = vld [vmem:[#allocation124_spill] sm:$0xff]  ;;  %v13827_v7 = vld [vmem:[#allocation125_spill] sm:$0xff] }
 0x322   : > { %v3038_v35 = vmul.f32 %v13799_v61, %v13824_v29  ;;  %v3039_v47 = vmul.f32 %v13799_v61, %v13825_v28  ;;  %v3040_v12 = vmul.f32 %v13799_v61, %v13826_v30  ;;  %v3041_v57 = vmul.f32 %v13799_v61, %v13827_v7  ;;  %v13828_v5 = vld [vmem:[#allocation126_spill] sm:$0xff]  ;;  %v13829_v31 = vld [vmem:[#allocation87_spill] sm:$0xff]  ;;  %v13831_v28 = vld [vmem:[#allocation92_spill] sm:$0xff] }
 0x323   : > { %v3042_v32 = vmul.f32 %v13799_v61, %v13828_v5  ;;  %v3043_v48 = vmul.f32 %v13799_v61, %v10671_v22  ;;  %v3044_v34 = vmul.f32 %v13799_v61, %v10673_v27  ;;  %v13830_v29 = vld [vmem:[#allocation107_spill] sm:$0xff]  ;;  %v13832_v25 = vld [vmem:[#allocation112_spill] sm:$0xff]  ;;  %v10714_v30 = vadd.f32 %v3015_v9, %v10552_v63 }
 0x324   : > { %v10707_v53 = vadd.f32 %v13830_v29, %v13829_v31  ;;  %v10711_v54 = vadd.f32 %v13832_v25, %v13831_v28  ;;  %v10717_v7 = vadd.f32 %v3016_v52, %v10555_v0  ;;  %v10720_v5 = vadd.f32 %v3017_v56, %v10558_v36  ;;  %v13860_v29 = vld [vmem:[#allocation137_spill] sm:$0xff] }
 0x325   : > { %v10723_v22 = vadd.f32 %v3018_v18, %v10561_v23  ;;  %v10726_v61 = vadd.f32 %v3019_v59, %v10564_v21  ;;  %v10729_v31 = vadd.f32 %v3020_v60, %v10567_v10  ;;  %v10732_v25 = vadd.f32 %v3021_v8, %v10570_v42 }
 0x326   : > { %v10735_v63 = vadd.f32 %v3022_v45, %v10573_v3  ;;  %v10738_v0 = vadd.f32 %v3023_v2, %v10576_v4  ;;  %v10741_v36 = vadd.f32 %v3024_v1, %v10579_v41  ;;  %v10744_v23 = vadd.f32 %v3025_v13, %v10582_v6  ;;  %v13847_v45 = vld [vmem:[#allocation145_spill] sm:$0xff]  ;;  %v13849_v1 = vld [vmem:[#allocation127_spill] sm:$0xff]  ;;  %v13850_v13 = vld [vmem:[#allocation96_spill] sm:$0xff] }
 0x327   : > { %v10747_v21 = vadd.f32 %v3026_v40, %v10585_v55  ;;  %v10750_v10 = vadd.f32 %v3027_v44, %v10588_v50  ;;  %v10753_v42 = vadd.f32 %v3028_v38, %v10591_v15  ;;  %v10756_v3 = vadd.f32 %v3029_v43, %v10594_v39  ;;  %v13851_v44 = vld [vmem:[#allocation128_spill] sm:$0xff]  ;;  %v13852_v43 = vld [vmem:[#allocation129_spill] sm:$0xff] }
 0x328   : > { %v10759_v4 = vadd.f32 %v3030_v46, %v10597_v49  ;;  %v10762_v41 = vadd.f32 %v3031_v62, %v10600_v16  ;;  %v10765_v6 = vadd.f32 %v3032_v11, %v10603_v14  ;;  %v10768_v55 = vadd.f32 %v3033_v51, %v10606_v19  ;;  %v13833_v49 = vld [vmem:[#allocation190_spill] sm:$0xff]  ;;  %v13835_v16 = vld [vmem:[#allocation191_spill] sm:$0xff]  ;;  %v13837_v14 = vld [vmem:[#allocation192_spill] sm:$0xff] }
 0x329   : > { %v10771_v50 = vadd.f32 %v3034_v20, %v10609_v37  ;;  %v10774_v15 = vadd.f32 %v3035_v17, %v10612_v33  ;;  %v10777_v39 = vadd.f32 %v3036_v24, %v10615_v58  ;;  %v10780_v9 = vadd.f32 %v3037_v26, %v13833_v49  ;;  %v13839_v19 = vld [vmem:[#allocation193_spill] sm:$0xff]  ;;  %v13841_v37 = vld [vmem:[#allocation139_spill] sm:$0xff]  ;;  %v13843_v33 = vld [vmem:[#allocation140_spill] sm:$0xff] }
 0x32a   : > { %v10783_v52 = vadd.f32 %v3038_v35, %v13835_v16  ;;  %v10786_v56 = vadd.f32 %v3039_v47, %v13837_v14  ;;  %v10789_v18 = vadd.f32 %v3040_v12, %v13839_v19  ;;  %v10792_v59 = vadd.f32 %v3041_v57, %v13841_v37  ;;  %v13845_v58 = vld [vmem:[#allocation141_spill] sm:$0xff]  ;;  %v13853_v62 = vld [vmem:[#allocation130_spill] sm:$0xff]  ;;  %v13854_v51 = vld [vmem:[#allocation131_spill] sm:$0xff] }
 0x32b   : > { %13834 = vst [vmem:[#allocation89_spill] sm:$0xff] %v10780_v9  ;;  %v10795_v60 = vadd.f32 %v3042_v32, %v13843_v33  ;;  %v10798_v8 = vadd.f32 %v3043_v48, %v13845_v58  ;;  %v10801_v2 = vadd.f32 %v3044_v34, %v13847_v45  ;;  %v3113_v40 = vmul.f32 %v13850_v13, %v13849_v1  ;;  %v13855_v17 = vld [vmem:[#allocation132_spill] sm:$0xff]  ;;  %v13856_v26 = vld [vmem:[#allocation133_spill] sm:$0xff]  ;;  %v13857_v47 = vld [vmem:[#allocation134_spill] sm:$0xff] }
 0x32c   : > { %13836 = vst [vmem:[#allocation93_spill] sm:$0xff] %v10783_v52  ;;  %13838 = vst [vmem:[#allocation94_spill] sm:$0xff] %v10786_v56  ;;  %v3114_v38 = vmul.f32 %v13850_v13, %v13851_v44  ;;  %v3115_v46 = vmul.f32 %v13850_v13, %v13852_v43  ;;  %v3116_v11 = vmul.f32 %v13850_v13, %v13853_v62  ;;  %v13858_v57 = vld [vmem:[#allocation135_spill] sm:$0xff]  ;;  %v13859_v48 = vld [vmem:[#allocation136_spill] sm:$0xff] }
 0x32d   : > { %13840 = vst [vmem:[#allocation95_spill] sm:$0xff] %v10789_v18  ;;  %13842 = vst [vmem:[#allocation98_spill] sm:$0xff] %v10792_v59  ;;  %v3117_v20 = vmul.f32 %v13850_v13, %v13854_v51  ;;  %v3118_v24 = vmul.f32 %v13850_v13, %v13855_v17  ;;  %v3119_v35 = vmul.f32 %v13850_v13, %v13856_v26  ;;  %v13861_v49 = vld [vmem:[#allocation138_spill] sm:$0xff]  ;;  %v13863_v37 = vld [vmem:[#allocation143_spill] sm:$0xff] }
 0x32e   : > { %13844 = vst [vmem:[#allocation99_spill] sm:$0xff] %v10795_v60  ;;  %13846 = vst [vmem:[#allocation100_spill] sm:$0xff] %v10798_v8  ;;  %v3120_v12 = vmul.f32 %v13850_v13, %v13857_v47  ;;  %v3121_v32 = vmul.f32 %v13850_v13, %v13858_v57  ;;  %v3122_v34 = vmul.f32 %v13850_v13, %v13859_v48  ;;  %v13862_v14 = vld [vmem:[#allocation142_spill] sm:$0xff]  ;;  %v13864_v58 = vld [vmem:[#allocation144_spill] sm:$0xff] }
 0x32f   : > { %13848 = vst [vmem:[#allocation104_spill] sm:$0xff] %v10801_v2  ;;  %v3123_v28 = vmul.f32 %v13850_v13, %v13860_v29  ;;  %v3124_v16 = vmul.f32 %v13850_v13, %v13861_v49  ;;  %v3125_v19 = vmul.f32 %v13850_v13, %v13862_v14  ;;  %v3126_v33 = vmul.f32 %v13850_v13, %v13863_v37  ;;  %v13865_v1 = vld [vmem:[#allocation146_spill] sm:$0xff]  ;;  %v13866_v43 = vld [vmem:[#allocation147_spill] sm:$0xff]  ;;  %v13869_v26 = vld [vmem:[#allocation148_spill] sm:$0xff] }
 0x330   : > { %v3127_v45 = vmul.f32 %v13850_v13, %v13864_v58  ;;  %v3128_v44 = vmul.f32 %v13850_v13, %v13865_v1  ;;  %v3129_v62 = vmul.f32 %v13850_v13, %v13866_v43  ;;  %v10837_v51 = vld [vmem:[#allocation2 + $0x181] sm:$0xff]  ;;  %v10839_v17 = vld [vmem:[#allocation2 + $0x189] sm:$0xff]  ;;  %v3130_v47 = vmul.f32 %v13850_v13, %v13869_v26  ;;  %v13873_v58 = vld [vmem:[#allocation152_spill] sm:$0xff] }
 0x331   : > { %13867 = vst [vmem:[#allocation105_spill] sm:$0xff] %v10837_v51  ;;  %13868 = vst [vmem:[#allocation106_spill] sm:$0xff] %v10839_v17  ;;  %v13870_v57 = vld [vmem:[#allocation149_spill] sm:$0xff]  ;;  %v13871_v29 = vld [vmem:[#allocation150_spill] sm:$0xff]  ;;  %v3134_v1 = vmul.f32 %v13850_v13, %v13873_v58 }
 0x332   : > { %v3131_v48 = vmul.f32 %v13850_v13, %v13870_v57  ;;  %v3132_v49 = vmul.f32 %v13850_v13, %v13871_v29  ;;  %v13872_v14 = vld [vmem:[#allocation151_spill] sm:$0xff]  ;;  %v13874_v43 = vld [vmem:[#allocation153_spill] sm:$0xff]  ;;  %v13875_v2 = vld [vmem:[#allocation154_spill] sm:$0xff] }
 0x333   : > { %v3133_v37 = vmul.f32 %v13850_v13, %v13872_v14  ;;  %v3135_v27 = vmul.f32 %v13850_v13, %v13874_v43  ;;  %v3136_v8 = vmul.f32 %v13850_v13, %v13875_v2  ;;  %v13876_v60 = vld [vmem:[#allocation155_spill] sm:$0xff]  ;;  %v13877_v59 = vld [vmem:[#allocation156_spill] sm:$0xff]  ;;  %v13878_v18 = vld [vmem:[#allocation157_spill] sm:$0xff]  ;;  %v3143_v2 = vmul.f32 %v13850_v13, %v10837_v51 }
 0x334   : > { %v3137_v26 = vmul.f32 %v13850_v13, %v13876_v60  ;;  %v3138_v57 = vmul.f32 %v13850_v13, %v13877_v59  ;;  %v3139_v29 = vmul.f32 %v13850_v13, %v13878_v18  ;;  %v13879_v56 = vld [vmem:[#allocation158_spill] sm:$0xff]  ;;  %v13880_v52 = vld [vmem:[#allocation159_spill] sm:$0xff]  ;;  %v13881_v9 = vld [vmem:[#allocation160_spill] sm:$0xff]  ;;  %v3144_v60 = vmul.f32 %v13850_v13, %v10839_v17 }
 0x335   : > { %v3140_v14 = vmul.f32 %v13850_v13, %v13879_v56  ;;  %v3141_v58 = vmul.f32 %v13850_v13, %v13880_v52  ;;  %v3142_v43 = vmul.f32 %v13850_v13, %v13881_v9  ;;  %v10872_v59 = vadd.f32 %v3113_v40, %v10707_v53 }
 0x336   : > { %v10875_v18 = vadd.f32 %v3114_v38, %v10711_v54  ;;  %v10878_v56 = vadd.f32 %v3115_v46, %v10714_v30  ;;  %v10881_v52 = vadd.f32 %v3116_v11, %v10717_v7  ;;  %v10884_v9 = vadd.f32 %v3117_v20, %v10720_v5 }
 0x337   : > { %v10887_v51 = vadd.f32 %v3118_v24, %v10723_v22  ;;  %v10890_v13 = vadd.f32 %v3119_v35, %v10726_v61  ;;  %v10893_v53 = vadd.f32 %v3120_v12, %v10729_v31  ;;  %v10896_v54 = vadd.f32 %v3121_v32, %v10732_v25  ;;  %v13896_v24 = vld [vmem:[#allocation104_spill] sm:$0xff]  ;;  %v13898_v12 = vld [vmem:[#allocation161_spill] sm:$0xff] }
 0x338   : > { %v10899_v30 = vadd.f32 %v3122_v34, %v10735_v63  ;;  %v10902_v7 = vadd.f32 %v3123_v28, %v10738_v0  ;;  %v10905_v5 = vadd.f32 %v3124_v16, %v10741_v36  ;;  %v10908_v22 = vadd.f32 %v3125_v19, %v10744_v23  ;;  %v13899_v32 = vld [vmem:[#allocation97_spill] sm:$0xff]  ;;  %v13900_v28 = vld [vmem:[#allocation162_spill] sm:$0xff]  ;;  %v13901_v19 = vld [vmem:[#allocation163_spill] sm:$0xff] }
 0x339   : > { %v10911_v61 = vadd.f32 %v3126_v33, %v10747_v21  ;;  %v10914_v31 = vadd.f32 %v3127_v45, %v10750_v10  ;;  %v10917_v25 = vadd.f32 %v3128_v44, %v10753_v42  ;;  %v10920_v63 = vadd.f32 %v3129_v62, %v10756_v3  ;;  %v13902_v45 = vld [vmem:[#allocation164_spill] sm:$0xff]  ;;  %v13903_v62 = vld [vmem:[#allocation165_spill] sm:$0xff] }
 0x33a   : > { %v10923_v0 = vadd.f32 %v3130_v47, %v10759_v4  ;;  %v10926_v36 = vadd.f32 %v3131_v48, %v10762_v41  ;;  %v10929_v23 = vadd.f32 %v3132_v49, %v10765_v6  ;;  %v10932_v21 = vadd.f32 %v3133_v37, %v10768_v55  ;;  %v13882_v4 = vld [vmem:[#allocation89_spill] sm:$0xff]  ;;  %v13886_v6 = vld [vmem:[#allocation94_spill] sm:$0xff]  ;;  %v13888_v55 = vld [vmem:[#allocation95_spill] sm:$0xff] }
 0x33b   : > { %v10935_v10 = vadd.f32 %v3134_v1, %v10771_v50  ;;  %v10938_v42 = vadd.f32 %v3135_v27, %v10774_v15  ;;  %v10941_v3 = vadd.f32 %v3136_v8, %v10777_v39  ;;  %v10944_v40 = vadd.f32 %v3137_v26, %v13882_v4  ;;  %v13884_v41 = vld [vmem:[#allocation93_spill] sm:$0xff]  ;;  %v13890_v50 = vld [vmem:[#allocation98_spill] sm:$0xff]  ;;  %v13892_v27 = vld [vmem:[#allocation99_spill] sm:$0xff] }
 0x33c   : > { %v10947_v38 = vadd.f32 %v3138_v57, %v13884_v41  ;;  %v10950_v46 = vadd.f32 %v3139_v29, %v13886_v6  ;;  %v10953_v11 = vadd.f32 %v3140_v14, %v13888_v55  ;;  %v10956_v20 = vadd.f32 %v3141_v58, %v13890_v50  ;;  %v13894_v39 = vld [vmem:[#allocation100_spill] sm:$0xff]  ;;  %v13904_v48 = vld [vmem:[#allocation166_spill] sm:$0xff]  ;;  %v13905_v37 = vld [vmem:[#allocation167_spill] sm:$0xff] }
 0x33d   : > { %13883 = vst [vmem:[#allocation109_spill] sm:$0xff] %v10944_v40  ;;  %v10959_v15 = vadd.f32 %v3142_v43, %v13892_v27  ;;  %v10962_v8 = vadd.f32 %v3143_v2, %v13894_v39  ;;  %v10965_v35 = vadd.f32 %v3144_v60, %v13896_v24  ;;  %v3213_v34 = vmul.f32 %v13899_v32, %v13898_v12  ;;  %v13906_v26 = vld [vmem:[#allocation168_spill] sm:$0xff]  ;;  %v13907_v29 = vld [vmem:[#allocation169_spill] sm:$0xff]  ;;  %v13908_v58 = vld [vmem:[#allocation170_spill] sm:$0xff] }
 0x33e   : > { %13885 = vst [vmem:[#allocation110_spill] sm:$0xff] %v10947_v38  ;;  %13887 = vst [vmem:[#allocation111_spill] sm:$0xff] %v10950_v46  ;;  %v3214_v16 = vmul.f32 %v13899_v32, %v13900_v28  ;;  %v3215_v33 = vmul.f32 %v13899_v32, %v13901_v19  ;;  %v3216_v44 = vmul.f32 %v13899_v32, %v13902_v45  ;;  %v13909_v2 = vld [vmem:[#allocation171_spill] sm:$0xff]  ;;  %v13910_v4 = vld [vmem:[#allocation172_spill] sm:$0xff] }
 0x33f   : > { %13889 = vst [vmem:[#allocation113_spill] sm:$0xff] %v10953_v11  ;;  %13891 = vst [vmem:[#allocation114_spill] sm:$0xff] %v10956_v20  ;;  %v3217_v47 = vmul.f32 %v13899_v32, %v13903_v62  ;;  %v3218_v49 = vmul.f32 %v13899_v32, %v13904_v48  ;;  %v3219_v1 = vmul.f32 %v13899_v32, %v13905_v37  ;;  %v13911_v6 = vld [vmem:[#allocation173_spill] sm:$0xff]  ;;  %v13912_v50 = vld [vmem:[#allocation174_spill] sm:$0xff] }
 0x340   : > { %13893 = vst [vmem:[#allocation115_spill] sm:$0xff] %v10959_v15  ;;  %13895 = vst [vmem:[#allocation116_spill] sm:$0xff] %v10962_v8  ;;  %v3220_v57 = vmul.f32 %v13899_v32, %v13906_v26  ;;  %v3221_v14 = vmul.f32 %v13899_v32, %v13907_v29  ;;  %v3222_v43 = vmul.f32 %v13899_v32, %v13908_v58  ;;  %v13913_v39 = vld [vmem:[#allocation175_spill] sm:$0xff]  ;;  %v13914_v12 = vld [vmem:[#allocation176_spill] sm:$0xff] }
 0x341   : > { %13897 = vst [vmem:[#allocation117_spill] sm:$0xff] %v10965_v35  ;;  %v3223_v60 = vmul.f32 %v13899_v32, %v13909_v2  ;;  %v3224_v41 = vmul.f32 %v13899_v32, %v13910_v4  ;;  %v3225_v55 = vmul.f32 %v13899_v32, %v13911_v6  ;;  %v3226_v27 = vmul.f32 %v13899_v32, %v13912_v50  ;;  %v13915_v19 = vld [vmem:[#allocation177_spill] sm:$0xff]  ;;  %v11003_v48 = vld [vmem:[#allocation2 + $0x18a] sm:$0xff]  ;;  %v13921_v6 = vld [vmem:[#allocation180_spill] sm:$0xff] }
 0x342   : > { %v3227_v24 = vmul.f32 %v13899_v32, %v13913_v39  ;;  %v3228_v28 = vmul.f32 %v13899_v32, %v13914_v12  ;;  %v3229_v45 = vmul.f32 %v13899_v32, %v13915_v19  ;;  %v11001_v62 = vld [vmem:[#allocation2 + $0x182] sm:$0xff]  ;;  %13917 = vst [vmem:[#allocation119_spill] sm:$0xff] %v11003_v48  ;;  %v13920_v2 = vld [vmem:[#allocation179_spill] sm:$0xff]  ;;  %v3233_v50 = vmul.f32 %v13899_v32, %v13921_v6  ;;  %v13925_v15 = vld [vmem:[#allocation184_spill] sm:$0xff] }
 0x343   : > { %13916 = vst [vmem:[#allocation118_spill] sm:$0xff] %v11001_v62  ;;  %v13918_v37 = vld [vmem:[#allocation178_spill] sm:$0xff]  ;;  %v13919_v29 = vld [vmem:[#allocation85_spill] sm:$0xff]  ;;  %v3232_v4 = vmul.f32 %v13899_v32, %v13920_v2  ;;  %v13924_v35 = vld [vmem:[#allocation183_spill] sm:$0xff] }
 0x344   : > { %v3230_v26 = vmul.f32 %v13899_v32, %v13918_v37  ;;  %v3231_v58 = vmul.f32 %v13899_v32, %v13919_v29  ;;  %v13922_v39 = vld [vmem:[#allocation181_spill] sm:$0xff]  ;;  %v13923_v19 = vld [vmem:[#allocation182_spill] sm:$0xff]  ;;  %v3236_v8 = vmul.f32 %v13899_v32, %v13924_v35  ;;  %v3237_v37 = vmul.f32 %v13899_v32, %v13925_v15  ;;  %v13928_v46 = vld [vmem:[#allocation187_spill] sm:$0xff] }
 0x345   : > { %v3234_v12 = vmul.f32 %v13899_v32, %v13922_v39  ;;  %v3235_v17 = vmul.f32 %v13899_v32, %v13923_v19  ;;  %v13926_v20 = vld [vmem:[#allocation185_spill] sm:$0xff]  ;;  %v13927_v11 = vld [vmem:[#allocation186_spill] sm:$0xff]  ;;  %v3240_v6 = vmul.f32 %v13899_v32, %v13928_v46  ;;  %v13929_v38 = vld [vmem:[#allocation188_spill] sm:$0xff]  ;;  %v3243_v35 = vmul.f32 %v13899_v32, %v11001_v62 }
 0x346   : > { %v3238_v29 = vmul.f32 %v13899_v32, %v13926_v20  ;;  %v3239_v2 = vmul.f32 %v13899_v32, %v13927_v11  ;;  %v3241_v39 = vmul.f32 %v13899_v32, %v13929_v38  ;;  %v13930_v40 = vld [vmem:[#allocation189_spill] sm:$0xff]  ;;  %v3244_v15 = vmul.f32 %v13899_v32, %v11003_v48 }
 0x347   : > { %v3242_v19 = vmul.f32 %v13899_v32, %v13930_v40  ;;  %v11036_v20 = vadd.f32 %v3213_v34, %v10872_v59  ;;  %v11039_v11 = vadd.f32 %v3214_v16, %v10875_v18  ;;  %v11042_v46 = vadd.f32 %v3215_v33, %v10878_v56  ;;  %v3279_v16 = vld [vmem:[#allocation2 + $0x48] sm:$0xff]  ;;  %v3299_v48 = vld [vmem:[#allocation2 + $0x138] sm:$0xff] }
 0x348   : > { %v11045_v38 = vadd.f32 %v3216_v44, %v10881_v52  ;;  %v11048_v40 = vadd.f32 %v3217_v47, %v10884_v9  ;;  %v11051_v62 = vadd.f32 %v3218_v49, %v10887_v51  ;;  %v11054_v32 = vadd.f32 %v3219_v1, %v10890_v13  ;;  %v3277_v13 = vld [vmem:[#allocation2 + $0x30] sm:$0xff]  ;;  %v3282_v44 = vld [vmem:[#allocation2 + $0x68] sm:$0xff]  ;;  %v3283_v47 = vld [vmem:[#allocation2 + $0x78] sm:$0xff] }
 0x349   : > { %v11057_v59 = vadd.f32 %v3220_v57, %v10893_v53  ;;  %v11060_v18 = vadd.f32 %v3221_v14, %v10896_v54  ;;  %v11063_v56 = vadd.f32 %v3222_v43, %v10899_v30  ;;  %v11066_v52 = vadd.f32 %v3223_v60, %v10902_v7  ;;  %v3278_v7 = vld [vmem:[#allocation2 + $0x38] sm:$0xff]  ;;  %v3285_v57 = vld [vmem:[#allocation2 + $0x90] sm:$0xff] }
 0x34a   : > { %v11069_v9 = vadd.f32 %v3224_v41, %v10905_v5  ;;  %v11072_v51 = vadd.f32 %v3225_v55, %v10908_v22  ;;  %v11075_v34 = vadd.f32 %v3226_v27, %v10911_v61  ;;  %v11078_v53 = vadd.f32 %v3227_v24, %v10914_v31  ;;  %v3280_v5 = vld [vmem:[#allocation2 + $0x50] sm:$0xff]  ;;  %v3286_v14 = vld [vmem:[#allocation2 + $0x98] sm:$0xff]  ;;  %v3289_v27 = vld [vmem:[#allocation2 + $0xc0] sm:$0xff] }
 0x34b   : > { %v11081_v54 = vadd.f32 %v3228_v28, %v10917_v25  ;;  %v11084_v30 = vadd.f32 %v3229_v45, %v10920_v63  ;;  %v11087_v33 = vadd.f32 %v3230_v26, %v10923_v0  ;;  %v11090_v22 = vadd.f32 %v3231_v58, %v10926_v36  ;;  %v3281_v25 = vld [vmem:[#allocation2 + $0x60] sm:$0xff]  ;;  %v13936_v60 = vld [vmem:[#allocation111_spill] sm:$0xff]  ;;  %v13944_v45 = vld [vmem:[#allocation116_spill] sm:$0xff] }
 0x34c   : > { %v11093_v61 = vadd.f32 %v3232_v4, %v10929_v23  ;;  %v11096_v31 = vadd.f32 %v3233_v50, %v10932_v21  ;;  %v11099_v63 = vadd.f32 %v3234_v12, %v10935_v10  ;;  %v11102_v49 = vadd.f32 %v3235_v17, %v10938_v42  ;;  %v13932_v36 = vld [vmem:[#allocation109_spill] sm:$0xff]  ;;  %v13934_v21 = vld [vmem:[#allocation110_spill] sm:$0xff]  ;;  %v13942_v24 = vld [vmem:[#allocation115_spill] sm:$0xff] }
 0x34d   : > { %v11105_v0 = vadd.f32 %v3236_v8, %v10941_v3  ;;  %v11108_v1 = vadd.f32 %v3237_v37, %v13932_v36  ;;  %v3284_v23 = vld [vmem:[#allocation2 + $0x80] sm:$0xff]  ;;  %v11111_v43 = vadd.f32 %v3238_v29, %v13934_v21  ;;  %v11114_v41 = vadd.f32 %v3239_v2, %v13936_v60  ;;  %v3287_v3 = vld [vmem:[#allocation2 + $0xa8] sm:$0xff]  ;;  %v3288_v8 = vld [vmem:[#allocation2 + $0xb0] sm:$0xff] }
 0x34e   : > { %v13938_v10 = vld [vmem:[#allocation113_spill] sm:$0xff]  ;;  %v13940_v17 = vld [vmem:[#allocation114_spill] sm:$0xff]  ;;  %v11123_v28 = vadd.f32 %v3242_v19, %v13942_v24  ;;  %v11126_v26 = vadd.f32 %v3243_v35, %v13944_v45 }
 0x34f   : > { %13931 = vst [vmem:[#allocation120_spill] sm:$0xff] %v11105_v0  ;;  %13933 = vst [vmem:[#allocation121_spill] sm:$0xff] %v11108_v1  ;;  %v11117_v55 = vadd.f32 %v3240_v6, %v13938_v10  ;;  %v11120_v42 = vadd.f32 %v3241_v39, %v13940_v17  ;;  %v13946_v58 = vld [vmem:[#allocation117_spill] sm:$0xff]  ;;  %v3290_v50 = vld [vmem:[#allocation2 + $0xc8] sm:$0xff] }
 0x350   : > { %13935 = vst [vmem:[#allocation122_spill] sm:$0xff] %v11111_v43  ;;  %13937 = vst [vmem:[#allocation123_spill] sm:$0xff] %v11114_v41  ;;  %v11129_v4 = vadd.f32 %v3244_v15, %v13946_v58  ;;  %v3291_v12 = vld [vmem:[#allocation2 + $0xd8] sm:$0xff]  ;;  %v3292_v37 = vld [vmem:[#allocation2 + $0xe0] sm:$0xff] }
 0x351   : > { %13939 = vst [vmem:[#allocation124_spill] sm:$0xff] %v11117_v55  ;;  %13941 = vst [vmem:[#allocation125_spill] sm:$0xff] %v11120_v42  ;;  %v13948_v29 = vld [vmem:[#allocation90_spill] sm:$0xff]  ;;  %v3293_v6 = vld [vmem:[#allocation2 + $0xf0] sm:$0xff] }
 0x352   : > { %13943 = vst [vmem:[#allocation126_spill] sm:$0xff] %v11123_v28  ;;  %13945 = vst [vmem:[#allocation87_spill] sm:$0xff] %v11126_v26  ;;  %v3313_v2 = vmul.f32 %v13948_v29, %v3277_v13  ;;  %v3294_v39 = vld [vmem:[#allocation2 + $0xf8] sm:$0xff]  ;;  %v3295_v36 = vld [vmem:[#allocation2 + $0x108] sm:$0xff]  ;;  %v3314_v21 = vmul.f32 %v13948_v29, %v3278_v7  ;;  %v3315_v60 = vmul.f32 %v13948_v29, %v3279_v16 }
 0x353   : > { %13947 = vst [vmem:[#allocation107_spill] sm:$0xff] %v11129_v4  ;;  %v3316_v19 = vmul.f32 %v13948_v29, %v3280_v5  ;;  %v3317_v35 = vmul.f32 %v13948_v29, %v3281_v25  ;;  %v3296_v10 = vld [vmem:[#allocation2 + $0x110] sm:$0xff]  ;;  %v3297_v17 = vld [vmem:[#allocation2 + $0x120] sm:$0xff]  ;;  %v3298_v15 = vld [vmem:[#allocation2 + $0x128] sm:$0xff]  ;;  %v3318_v24 = vmul.f32 %v13948_v29, %v3282_v44  ;;  %v3319_v45 = vmul.f32 %v13948_v29, %v3283_v47 }
 0x354   : > { %v3320_v13 = vmul.f32 %v13948_v29, %v3284_v23  ;;  %v3321_v58 = vmul.f32 %v13948_v29, %v3285_v57  ;;  %v3300_v4 = vld [vmem:[#allocation2 + $0x140] sm:$0xff]  ;;  %v3301_v7 = vld [vmem:[#allocation2 + $0x150] sm:$0xff]  ;;  %v3322_v16 = vmul.f32 %v13948_v29, %v3286_v14  ;;  %v3323_v5 = vmul.f32 %v13948_v29, %v3287_v3  ;;  %v3302_v28 = vld [vmem:[#allocation2 + $0x158] sm:$0xff] }
 0x355   : > { %v3324_v25 = vmul.f32 %v13948_v29, %v3288_v8  ;;  %v3325_v26 = vmul.f32 %v13948_v29, %v3289_v27  ;;  %v3303_v42 = vld [vmem:[#allocation2 + $0x168] sm:$0xff]  ;;  %v3304_v44 = vld [vmem:[#allocation2 + $0x170] sm:$0xff]  ;;  %v3326_v47 = vmul.f32 %v13948_v29, %v3290_v50  ;;  %v3327_v23 = vmul.f32 %v13948_v29, %v3291_v12  ;;  %v3378_v0 = vld [vmem:[#allocation2 + $0x39] sm:$0xff] }
 0x356   : > { %v3328_v57 = vmul.f32 %v13948_v29, %v3292_v37  ;;  %v3329_v55 = vmul.f32 %v13948_v29, %v3293_v6  ;;  %v3330_v41 = vmul.f32 %v13948_v29, %v3294_v39  ;;  %v3331_v14 = vmul.f32 %v13948_v29, %v3295_v36  ;;  %v13949_v1 = vld [vmem:[#allocation88_spill] sm:$0xff] }
 0x357   : > { %v3332_v3 = vmul.f32 %v13948_v29, %v3296_v10  ;;  %v3333_v8 = vmul.f32 %v13948_v29, %v3297_v17  ;;  %v3334_v27 = vmul.f32 %v13948_v29, %v3298_v15  ;;  %v3335_v43 = vmul.f32 %v13948_v29, %v3299_v48  ;;  %v13950_v10 = vld [vmem:[#allocation86_spill] sm:$0xff] }
 0x358   : > { %v3336_v50 = vmul.f32 %v13948_v29, %v3300_v4  ;;  %v3337_v12 = vmul.f32 %v13948_v29, %v3301_v7  ;;  %v3338_v37 = vmul.f32 %v13948_v29, %v3302_v28  ;;  %v3339_v6 = vmul.f32 %v13948_v29, %v3303_v42 }
 0x359   : > { %v3340_v39 = vmul.f32 %v13948_v29, %v3304_v44  ;;  %v3341_v36 = vmul.f32 %v13948_v29, %v13949_v1  ;;  %v3342_v17 = vmul.f32 %v13948_v29, %v13950_v10  ;;  %v3345_v15 = vadd.f32 %v3313_v2, %v11036_v20  ;;  %v3377_v1 = vld [vmem:[#allocation2 + $0x31] sm:$0xff]  ;;  %v3379_v29 = vld [vmem:[#allocation2 + $0x49] sm:$0xff] }
 0x35a   : > { %v3346_v48 = vadd.f32 %v3314_v21, %v11039_v11  ;;  %v3347_v4 = vadd.f32 %v3315_v60, %v11042_v46  ;;  %v3348_v7 = vadd.f32 %v3316_v19, %v11045_v38  ;;  %v11168_v28 = vadd.f32 %v3317_v35, %v11048_v40  ;;  %v3478_v19 = vld [vmem:[#allocation2 + $0x3a] sm:$0xff]  ;;  %v3479_v35 = vld [vmem:[#allocation2 + $0x4a] sm:$0xff] }
 0x35b   : > { %v11171_v42 = vadd.f32 %v3318_v24, %v11051_v62  ;;  %v11174_v44 = vadd.f32 %v3319_v45, %v11054_v32  ;;  %v11177_v20 = vadd.f32 %v3320_v13, %v11057_v59  ;;  %v11180_v11 = vadd.f32 %v3321_v58, %v11060_v18  ;;  %v11203_v18 = vld [vmem:[%s13389_s3 + $0x8] ss:$0 sm:$0xff] }
 0x35c   : > { %v11183_v46 = vadd.f32 %v3322_v16, %v11063_v56  ;;  %v11186_v38 = vadd.f32 %v3323_v5, %v11066_v52  ;;  %v11189_v62 = vadd.f32 %v3324_v25, %v11069_v9  ;;  %v11192_v40 = vadd.f32 %v3325_v26, %v11072_v51  ;;  %v3380_v52 = vld [vmem:[#allocation2 + $0x51] sm:$0xff]  ;;  %v3382_v16 = vld [vmem:[#allocation2 + $0x69] sm:$0xff] }
 0x35d   : > { %v11195_v32 = vadd.f32 %v3326_v47, %v11075_v34  ;;  %v11198_v59 = vadd.f32 %v3327_v23, %v11078_v53  ;;  %v11206_v56 = vadd.f32 %v3328_v57, %v11081_v54  ;;  %v13951_v9 = vld [vmem:[#allocation91_spill] sm:$0xff]  ;;  %v11212_v34 = vadd.f32 %v3329_v55, %v11084_v30  ;;  %v13956_v57 = vld [vmem:[#allocation124_spill] sm:$0xff] }
 0x35e   : > { %v3413_v2 = vmul.f32 %v13951_v9, %v3377_v1  ;;  %v3414_v51 = vmul.f32 %v13951_v9, %v3378_v0  ;;  %v3415_v26 = vmul.f32 %v13951_v9, %v3379_v29  ;;  %v11215_v53 = vadd.f32 %v3330_v41, %v11087_v33  ;;  %v3477_v54 = vld [vmem:[#allocation2 + $0x32] sm:$0xff]  ;;  %v3381_v0 = vld [vmem:[#allocation2 + $0x61] sm:$0xff] }
 0x35f   : > { %v11218_v21 = vadd.f32 %v3331_v14, %v11090_v22  ;;  %v11221_v60 = vadd.f32 %v3332_v3, %v11093_v61  ;;  %v11224_v24 = vadd.f32 %v3333_v8, %v11096_v31  ;;  %v11227_v55 = vadd.f32 %v3334_v27, %v11099_v63  ;;  %v13952_v22 = vld [vmem:[#allocation120_spill] sm:$0xff]  ;;  %v13953_v61 = vld [vmem:[#allocation121_spill] sm:$0xff]  ;;  %v13954_v63 = vld [vmem:[#allocation122_spill] sm:$0xff] }
 0x360   : > { %v3445_v45 = vadd.f32 %v3413_v2, %v3345_v15  ;;  %v3446_v13 = vadd.f32 %v3414_v51, %v3346_v48  ;;  %v3447_v30 = vadd.f32 %v3415_v26, %v3347_v4  ;;  %v11230_v33 = vadd.f32 %v3335_v43, %v11102_v49  ;;  %v13955_v49 = vld [vmem:[#allocation123_spill] sm:$0xff]  ;;  %v3383_v3 = vld [vmem:[#allocation2 + $0x79] sm:$0xff]  ;;  %v3481_v15 = vld [vmem:[#allocation2 + $0x62] sm:$0xff] }
 0x361   : > { %v11233_v41 = vadd.f32 %v3336_v50, %v13952_v22  ;;  %v11236_v58 = vadd.f32 %v3337_v12, %v13953_v61  ;;  %v3416_v31 = vmul.f32 %v13951_v9, %v3380_v52  ;;  %v3513_v5 = vmul.f32 %v11203_v18, %v3477_v54  ;;  %v3480_v27 = vld [vmem:[#allocation2 + $0x52] sm:$0xff]  ;;  %v3384_v50 = vld [vmem:[#allocation2 + $0x81] sm:$0xff] }
 0x362   : > { %v3514_v25 = vmul.f32 %v11203_v18, %v3478_v19  ;;  %v3515_v47 = vmul.f32 %v11203_v18, %v3479_v35  ;;  %v11243_v23 = vadd.f32 %v3338_v37, %v13954_v63  ;;  %v11246_v43 = vadd.f32 %v3339_v6, %v13955_v49  ;;  %v3385_v12 = vld [vmem:[#allocation2 + $0x91] sm:$0xff]  ;;  %v13959_v1 = vld [vmem:[#allocation125_spill] sm:$0xff]  ;;  %v13960_v29 = vld [vmem:[#allocation126_spill] sm:$0xff] }
 0x363   : > { %v11249_v14 = vadd.f32 %v3340_v39, %v13956_v57  ;;  %v3417_v8 = vmul.f32 %v13951_v9, %v3381_v0  ;;  %v3448_v10 = vadd.f32 %v3416_v31, %v3348_v7  ;;  %v11252_v48 = vadd.f32 %v3513_v5, %v3445_v45  ;;  %v13962_v52 = vld [vmem:[#allocation87_spill] sm:$0xff]  ;;  %v13963_v2 = vld [vmem:[#allocation101_spill] sm:$0xff]  ;;  %v13966_v54 = vld [vmem:[#allocation102_spill] sm:$0xff] }
 0x364   : > { %v11254_v4 = vadd.f32 %v3514_v25, %v3446_v13  ;;  %v11256_v37 = vadd.f32 %v3515_v47, %v3447_v30  ;;  %v11259_v6 = vadd.f32 %v3341_v36, %v13959_v1  ;;  %v11262_v39 = vadd.f32 %v3342_v17, %v13960_v29  ;;  %v13965_v7 = vld [vmem:[#allocation107_spill] sm:$0xff]  ;;  %v3386_v35 = vld [vmem:[#allocation2 + $0x99] sm:$0xff]  ;;  %v3389_v30 = vld [vmem:[#allocation2 + $0xc1] sm:$0xff] }
 0x365   : > { %v11266_v51 = vadd.f32 %v13963_v2, %v13962_v52  ;;  %v3418_v26 = vmul.f32 %v13951_v9, %v3382_v16  ;;  %v11271_v19 = vadd.f32 %v13966_v54, %v13965_v7  ;;  %v3387_v0 = vld [vmem:[#allocation2 + $0xa9] sm:$0xff]  ;;  %v3388_v45 = vld [vmem:[#allocation2 + $0xb1] sm:$0xff]  ;;  %v3419_v13 = vmul.f32 %v13951_v9, %v3383_v3  ;;  %v3391_v47 = vld [vmem:[#allocation2 + $0xd9] sm:$0xff] }
 0x366   : > { %13957 = vst [vmem:[#allocation92_spill] sm:$0xff] %v11254_v4  ;;  %13958 = vst [vmem:[#allocation112_spill] sm:$0xff] %v11256_v37  ;;  %v3449_v36 = vadd.f32 %v3417_v8, %v11168_v28  ;;  %v3516_v17 = vmul.f32 %v11203_v18, %v3480_v27  ;;  %v3420_v22 = vmul.f32 %v13951_v9, %v3384_v50  ;;  %v3482_v31 = vld [vmem:[#allocation2 + $0x6a] sm:$0xff]  ;;  %v3392_v63 = vld [vmem:[#allocation2 + $0xe1] sm:$0xff]  ;;  %v3577_v28 = vsel %vm459_vm0, %v11252_v48, 0.0 }
 0x367   : > { %13961 = vst [vmem:[#allocation190_spill] sm:$0xff] %v11262_v39  ;;  %13964 = vst [vmem:[#allocation191_spill] sm:$0xff] %v11266_v51  ;;  %v3421_v61 = vmul.f32 %v13951_v9, %v3385_v12  ;;  %v3450_v16 = vadd.f32 %v3418_v26, %v11171_v42  ;;  %v3517_v5 = vmul.f32 %v11203_v18, %v3481_v15  ;;  %v3390_v25 = vld [vmem:[#allocation2 + $0xc9] sm:$0xff]  ;;  %v3578_v57 = vsel %vm459_vm0, %v11254_v4, 0.0  ;;  %v3483_v50 = vld [vmem:[#allocation2 + $0x7a] sm:$0xff] }
 0x368   : > { %13967 = vst [vmem:[#allocation192_spill] sm:$0xff] %v11271_v19  ;;  %v11280_v49 = vadd.f32 %v3516_v17, %v3448_v10  ;;  %v3580_v3 = vsel %vm459_vm0, %v11256_v37, 0.0  ;;  %v3422_v8 = vmul.f32 %v13951_v9, %v3386_v35  ;;  %v3423_v42 = vmul.f32 %v13951_v9, %v3387_v0  ;;  %v8045_v10 = vld [vmem:[%s13391_s5 + $0x80] sm:$0xff]   ;;  %v8046_v15 = vld [vmem:[%s13391_s5 + $0x88] sm:$0xff]   ;;  %v3393_v1 = vld [vmem:[#allocation2 + $0xf1] sm:$0xff] }
 0x369   : > { %v11291_v27 = vmul.f32 %v13951_v9, %v3388_v45  ;;  %v3579_v12 = vadd.f32 %v3578_v57, %v3577_v28  ;;  %v3394_v29 = vld [vmem:[#allocation2 + $0xf9] sm:$0xff]  ;;  %v3395_v52 = vld [vmem:[#allocation2 + $0x109] sm:$0xff]  ;;  %v11300_v2 = vmul.f32 %v13951_v9, %v3389_v30  ;;  %v3451_v26 = vadd.f32 %v3419_v13, %v11174_v44  ;;  %6871 = vmatprep.subr.bf16.mxu0 %v8045_v10  ;;  %v3396_v30 = vld [vmem:[#allocation2 + $0x111] sm:$0xff] }
 0x36a   : > { %v3518_v7 = vmul.f32 %v11203_v18, %v3482_v31  ;;  %v11304_v54 = vadd.f32 %v3517_v5, %v3449_v36  ;;  %v11307_v35 = vmul.f32 %v13951_v9, %v3390_v25  ;;  %v11310_v0 = vmul.f32 %v13951_v9, %v3391_v47  ;;  %v3484_v17 = vld [vmem:[#allocation2 + $0x82] sm:$0xff]  ;;  %6872 = vmatpush3.bf16.msra.mxu0 %v8045_v10 }
 0x36b   : > { %v11313_v45 = vmul.f32 %v13951_v9, %v3392_v63  ;;  %v3581_v28 = vadd.f32 %v3580_v3, %v3579_v12  ;;  %v3397_v57 = vld [vmem:[#allocation2 + $0x121] sm:$0xff]  ;;  %v3398_v19 = vld [vmem:[#allocation2 + $0x129] sm:$0xff]  ;;  %v3452_v44 = vadd.f32 %v3420_v22, %v11177_v20  ;;  %v3519_v13 = vmul.f32 %v11203_v18, %v3483_v50  ;;  %v3485_v63 = vld [vmem:[#allocation2 + $0x92] sm:$0xff]  ;;  %6873 = vmatprep.subr.bf16.mxu0 %v8046_v15 }
 0x36c   : > { %v11317_v36 = vadd.f32 %v3518_v7, %v3450_v16  ;;  %v3582_v31 = vsel %vm459_vm0, %v11280_v49, 0.0  ;;  %v11322_v5 = vmul.f32 %v13951_v9, %v3393_v1  ;;  %v11325_v25 = vmul.f32 %v13951_v9, %v3394_v29  ;;  %v3399_v20 = vld [vmem:[#allocation2 + $0x139] sm:$0xff]  ;;  %v3400_v22 = vld [vmem:[#allocation2 + $0x141] sm:$0xff]  ;;  %v3401_v1 = vld [vmem:[#allocation2 + $0x151] sm:$0xff] }
 0x36d   : > { %v11328_v47 = vmul.f32 %v13951_v9, %v3395_v52  ;;  %v3583_v3 = vadd.f32 %v3582_v31, %v3581_v28  ;;  %v3453_v16 = vadd.f32 %v3421_v61, %v11180_v11  ;;  %v3520_v50 = vmul.f32 %v11203_v18, %v3484_v17  ;;  %v3486_v28 = vld [vmem:[#allocation2 + $0x9a] sm:$0xff]  ;;  %v3403_v61 = vld [vmem:[#allocation2 + $0x169] sm:$0xff] }
 0x36e   : > { %v11332_v12 = vadd.f32 %v3519_v13, %v3451_v26  ;;  %v3584_v10 = vsel %vm459_vm0, %v11304_v54, 0.0  ;;  %v11337_v29 = vmul.f32 %v13951_v9, %v3396_v30  ;;  %v11340_v52 = vmul.f32 %v13951_v9, %v3397_v57  ;;  %v3402_v11 = vld [vmem:[#allocation2 + $0x159] sm:$0xff]  ;;  %v3487_v17 = vld [vmem:[#allocation2 + $0xaa] sm:$0xff]  ;;  %6874 = vmatpush3.bf16.msra.mxu0 %v8046_v15 }
 0x36f   : > { %v11343_v7 = vmul.f32 %v13951_v9, %v3398_v19  ;;  %v3585_v31 = vadd.f32 %v3584_v10, %v3583_v3  ;;  %v3454_v26 = vadd.f32 %v3422_v8, %v11183_v46  ;;  %v3521_v13 = vmul.f32 %v11203_v18, %v3485_v63  ;;  %v3404_v57 = vld [vmem:[#allocation2 + $0x171] sm:$0xff] }
 0x370   : > { %v11347_v51 = vadd.f32 %v3520_v50, %v3452_v44  ;;  %v3586_v30 = vsel %vm459_vm0, %v11317_v36, 0.0  ;;  %v11352_v39 = vmul.f32 %v13951_v9, %v3399_v20  ;;  %v11355_v19 = vmul.f32 %v13951_v9, %v3400_v22  ;;  %v3488_v8 = vld [vmem:[#allocation2 + $0xb2] sm:$0xff] }
 0x371   : > { %v3455_v3 = vadd.f32 %v3423_v42, %v11186_v38  ;;  %v3587_v10 = vadd.f32 %v3586_v30, %v3585_v31  ;;  %v11359_v46 = vmul.f32 %v13951_v9, %v3401_v1  ;;  %v3522_v44 = vmul.f32 %v11203_v18, %v3486_v28  ;;  %v3490_v30 = vld [vmem:[#allocation2 + $0xca] sm:$0xff] }
 0x372   : > { %v11362_v63 = vadd.f32 %v3521_v13, %v3453_v16  ;;  %v3588_v15 = vsel %vm459_vm0, %v11332_v12, 0.0  ;;  %v11367_v20 = vmul.f32 %v13951_v9, %v3402_v11  ;;  %v11370_v22 = vmul.f32 %v13951_v9, %v3403_v61  ;;  %v3489_v16 = vld [vmem:[#allocation2 + $0xc2] sm:$0xff] }
 0x373   : > { %v3523_v38 = vmul.f32 %v11203_v18, %v3487_v17  ;;  %v3589_v42 = vadd.f32 %v3588_v15, %v3587_v10  ;;  %v11374_v50 = vmul.f32 %v13951_v9, %v3404_v57  ;;  %v3456_v1 = vadd.f32 %v11291_v27, %v11189_v62  ;;  %v13968_v10 = vld [vmem:[#allocation105_spill] sm:$0xff] }
 0x374   : > { %v11378_v28 = vadd.f32 %v3522_v44, %v3454_v26  ;;  %v3590_v31 = vsel %vm459_vm0, %v11347_v51, 0.0  ;;  %v3457_v11 = vadd.f32 %v11300_v2, %v11192_v40  ;;  %v3524_v61 = vmul.f32 %v11203_v18, %v3488_v8  ;;  %v13969_v2 = vld [vmem:[#allocation106_spill] sm:$0xff] }
 0x375   : > { %v11385_v13 = vadd.f32 %v3523_v38, %v3455_v3  ;;  %v3591_v17 = vadd.f32 %v3590_v31, %v3589_v42  ;;  %v3592_v57 = vsel %vm459_vm0, %v11362_v63, 0.0  ;;  %v3647_v62 = vmul.f32 %v11252_v48, %v11252_v48 }
 0x376   : > { %v3648_v27 = vmul.f32 %v11254_v4, %v11254_v4  ;;  %v3649_v26 = vmul.f32 %v11256_v37, %v11256_v37  ;;  %v11397_v40 = vmul.f32 %v13951_v9, %v13968_v10  ;;  %v11401_v3 = vmul.f32 %v13951_v9, %v13969_v2  ;;  %v3491_v10 = vld [vmem:[#allocation2 + $0xda] sm:$0xff] }
 0x377   : > { %v3525_v8 = vmul.f32 %v11203_v18, %v3489_v16  ;;  %v3593_v44 = vadd.f32 %v3592_v57, %v3591_v17  ;;  %v3458_v15 = vadd.f32 %v11307_v35, %v11195_v32  ;;  %v3459_v38 = vadd.f32 %v11310_v0, %v11198_v59  ;;  %v3492_v17 = vld [vmem:[#allocation2 + $0xe2] sm:$0xff]  ;;  %v3493_v57 = vld [vmem:[#allocation2 + $0xf2] sm:$0xff] }
 0x378   : > { %v11408_v42 = vadd.f32 %v3524_v61, %v3456_v1  ;;  %v3594_v31 = vsel %vm459_vm0, %v11378_v28, 0.0  ;;  %v3526_v4 = vmul.f32 %v11203_v18, %v3490_v30  ;;  %v3596_v16 = vsel %vm459_vm0, %v11385_v13, 0.0 }
 0x379   : > { %v11413_v37 = vadd.f32 %v3525_v8, %v3457_v11  ;;  %v3595_v9 = vadd.f32 %v3594_v31, %v3593_v44  ;;  %v3650_v32 = vmul.f32 %v11280_v49, %v11280_v49  ;;  %v3679_v59 = vsel %vm459_vm0, %v3647_v62, 0.0 }
 0x37a   : > { %v3680_v35 = vsel %vm459_vm0, %v3648_v27, 0.0  ;;  %v3682_v0 = vsel %vm459_vm0, %v3649_v26, 0.0  ;;  %v3460_v1 = vadd.f32 %v11313_v45, %v11206_v56  ;;  %v3461_v11 = vadd.f32 %v11322_v5, %v11212_v34  ;;  %v3494_v5 = vld [vmem:[#allocation2 + $0xfa] sm:$0xff] }
 0x37b   : > { %v3597_v61 = vadd.f32 %v3596_v16, %v3595_v9  ;;  %v3681_v30 = vadd.f32 %v3680_v35, %v3679_v59  ;;  %v3527_v2 = vmul.f32 %v11203_v18, %v3491_v10  ;;  %v11427_v8 = vadd.f32 %v3526_v4, %v3458_v15  ;;  %v3495_v16 = vld [vmem:[#allocation2 + $0x10a] sm:$0xff] }
 0x37c   : > { %v3598_v62 = vsel %vm459_vm0, %v11408_v42, 0.0  ;;  %v3651_v27 = vmul.f32 %v11304_v54, %v11304_v54  ;;  %v3462_v26 = vadd.f32 %v11325_v25, %v11215_v53  ;;  %v3528_v56 = vmul.f32 %v11203_v18, %v3492_v17 }
 0x37d   : > { %v3599_v45 = vadd.f32 %v3598_v62, %v3597_v61  ;;  %v3683_v34 = vadd.f32 %v3682_v0, %v3681_v30  ;;  %v11436_v44 = vadd.f32 %v3527_v2, %v3459_v38  ;;  %v3600_v4 = vsel %vm459_vm0, %v11413_v37, 0.0  ;;  %v3496_v61 = vld [vmem:[#allocation2 + $0x112] sm:$0xff] }
 0x37e   : > { %v3652_v15 = vmul.f32 %v11317_v36, %v11317_v36  ;;  %v3684_v31 = vsel %vm459_vm0, %v3650_v32, 0.0  ;;  %v3463_v10 = vadd.f32 %v11328_v47, %v11218_v21  ;;  %v3529_v53 = vmul.f32 %v11203_v18, %v3493_v57 }
 0x37f   : > { %v3601_v25 = vadd.f32 %v3600_v4, %v3599_v45  ;;  %v3685_v9 = vadd.f32 %v3684_v31, %v3683_v34  ;;  %v11446_v17 = vadd.f32 %v3528_v56, %v3460_v1  ;;  %v3602_v38 = vsel %vm459_vm0, %v11427_v8, 0.0  ;;  %v3497_v56 = vld [vmem:[#allocation2 + $0x122] sm:$0xff]  ;;  %v3498_v31 = vld [vmem:[#allocation2 + $0x12a] sm:$0xff] }
 0x380   : > { %v3653_v59 = vmul.f32 %v11332_v12, %v11332_v12  ;;  %v3686_v35 = vsel %vm459_vm0, %v3651_v27, 0.0  ;;  %v3464_v32 = vadd.f32 %v11337_v29, %v11221_v60  ;;  %v3530_v21 = vmul.f32 %v11203_v18, %v3494_v5 }
 0x381   : > { %v3603_v47 = vadd.f32 %v3602_v38, %v3601_v25  ;;  %v3687_v0 = vadd.f32 %v3686_v35, %v3685_v9  ;;  %v11456_v30 = vadd.f32 %v3529_v53, %v3461_v11  ;;  %v3604_v1 = vsel %vm459_vm0, %v11436_v44, 0.0 }
 0x382   : > { %v3654_v57 = vmul.f32 %v11347_v51, %v11347_v51  ;;  %v3688_v2 = vsel %vm459_vm0, %v3652_v15, 0.0  ;;  %v3465_v62 = vadd.f32 %v11340_v52, %v11224_v24  ;;  %v3531_v60 = vmul.f32 %v11203_v18, %v3495_v16 }
 0x383   : > { %v3605_v29 = vadd.f32 %v3604_v1, %v3603_v47  ;;  %v3689_v27 = vadd.f32 %v3688_v2, %v3687_v0  ;;  %v11466_v45 = vadd.f32 %v3530_v21, %v3462_v26  ;;  %v3606_v11 = vsel %vm459_vm0, %v11446_v17, 0.0  ;;  %v3500_v1 = vld [vmem:[#allocation2 + $0x142] sm:$0xff] }
 0x384   : > { %v3655_v34 = vmul.f32 %v11362_v63, %v11362_v63  ;;  %v3690_v5 = vsel %vm459_vm0, %v3653_v59, 0.0  ;;  %v3466_v4 = vadd.f32 %v11343_v7, %v11227_v55  ;;  %v3532_v24 = vmul.f32 %v11203_v18, %v3496_v61  ;;  %v3499_v59 = vld [vmem:[#allocation2 + $0x13a] sm:$0xff] }
 0x385   : > { %v3607_v52 = vadd.f32 %v3606_v11, %v3605_v29  ;;  %v3691_v15 = vadd.f32 %v3690_v5, %v3689_v27  ;;  %v11476_v53 = vadd.f32 %v3531_v60, %v3463_v10  ;;  %v3608_v26 = vsel %vm459_vm0, %v11456_v30, 0.0 }
 0x386   : > { %v3656_v25 = vmul.f32 %v11378_v28, %v11378_v28  ;;  %v3692_v9 = vsel %vm459_vm0, %v3654_v57, 0.0  ;;  %v3467_v16 = vadd.f32 %v11352_v39, %v11230_v33  ;;  %v3533_v55 = vmul.f32 %v11203_v18, %v3497_v56  ;;  %v3501_v56 = vld [vmem:[#allocation2 + $0x152] sm:$0xff] }
 0x387   : > { %v3609_v7 = vadd.f32 %v3608_v26, %v3607_v52  ;;  %v3693_v38 = vadd.f32 %v3692_v9, %v3691_v15  ;;  %v11486_v35 = vadd.f32 %v3532_v24, %v3464_v32  ;;  %v3610_v10 = vsel %vm459_vm0, %v11466_v45, 0.0  ;;  %v3502_v15 = vld [vmem:[#allocation2 + $0x15a] sm:$0xff] }
 0x388   : > { %v3657_v21 = vmul.f32 %v11385_v13, %v11385_v13  ;;  %v3694_v47 = vsel %vm459_vm0, %v3655_v34, 0.0  ;;  %v3468_v0 = vadd.f32 %v11355_v19, %v11233_v41  ;;  %v3534_v33 = vmul.f32 %v11203_v18, %v3498_v31 }
 0x389   : > { %v3611_v39 = vadd.f32 %v3610_v10, %v3609_v7  ;;  %v3695_v61 = vadd.f32 %v3694_v47, %v3693_v38  ;;  %v11496_v57 = vadd.f32 %v3533_v55, %v3465_v62  ;;  %v3612_v32 = vsel %vm459_vm0, %v11476_v53, 0.0  ;;  %v3503_v7 = vld [vmem:[#allocation2 + $0x16a] sm:$0xff] }
 0x38a   : > { %v3658_v2 = vmul.f32 %v11408_v42, %v11408_v42  ;;  %v3696_v60 = vsel %vm459_vm0, %v3656_v25, 0.0  ;;  %v3469_v29 = vadd.f32 %v11359_v46, %v11236_v58  ;;  %v3535_v41 = vmul.f32 %v11203_v18, %v3499_v59 }
 0x38b   : > { %v3613_v19 = vadd.f32 %v3612_v32, %v3611_v39  ;;  %v3697_v27 = vadd.f32 %v3696_v60, %v3695_v61  ;;  %v11506_v11 = vadd.f32 %v3534_v33, %v3466_v4  ;;  %v3614_v62 = vsel %vm459_vm0, %v11486_v35, 0.0  ;;  %v3504_v33 = vld [vmem:[#allocation2 + $0x172] sm:$0xff] }
 0x38c   : > { %v3659_v34 = vmul.f32 %v11413_v37, %v11413_v37  ;;  %v3698_v5 = vsel %vm459_vm0, %v3657_v21, 0.0  ;;  %v3470_v24 = vadd.f32 %v11367_v20, %v11243_v23  ;;  %v3536_v58 = vmul.f32 %v11203_v18, %v3500_v1 }
 0x38d   : > { %v3615_v46 = vadd.f32 %v3614_v62, %v3613_v19  ;;  %v3699_v52 = vadd.f32 %v3698_v5, %v3697_v27  ;;  %v11516_v31 = vadd.f32 %v3535_v41, %v3467_v16  ;;  %v3616_v4 = vsel %vm459_vm0, %v11496_v57, 0.0  ;;  %v13970_v27 = vld [vmem:[#allocation190_spill] sm:$0xff] }
 0x38e   : > { %v3660_v26 = vmul.f32 %v11427_v8, %v11427_v8  ;;  %v3700_v25 = vsel %vm459_vm0, %v3658_v2, 0.0  ;;  %v3471_v9 = vadd.f32 %v11370_v22, %v11246_v43  ;;  %v3537_v23 = vmul.f32 %v11203_v18, %v3501_v56 }
 0x38f   : > { %v3617_v20 = vadd.f32 %v3616_v4, %v3615_v46  ;;  %v3701_v55 = vadd.f32 %v3700_v25, %v3699_v52  ;;  %v11526_v38 = vadd.f32 %v3536_v58, %v3468_v0  ;;  %v3618_v16 = vsel %vm459_vm0, %v11506_v11, 0.0  ;;  %v13971_v52 = vld [vmem:[#allocation191_spill] sm:$0xff] }
 0x390   : > { %v3661_v59 = vmul.f32 %v11436_v44, %v11436_v44  ;;  %v3702_v10 = vsel %vm459_vm0, %v3659_v34, 0.0  ;;  %v3472_v21 = vadd.f32 %v11374_v50, %v11249_v14  ;;  %v3538_v43 = vmul.f32 %v11203_v18, %v3502_v15  ;;  %v3507_v34 = vld [vmem:[#allocation2 + $0x19a] sm:$0xff]  ;;  %v13972_v15 = vld [vmem:[#allocation103_spill] sm:$0xff] }
 0x391   : > { %v3619_v22 = vadd.f32 %v3618_v16, %v3617_v20  ;;  %v3703_v47 = vadd.f32 %v3702_v10, %v3701_v55  ;;  %v11536_v39 = vadd.f32 %v3537_v23, %v3469_v29  ;;  %v3620_v0 = vsel %vm459_vm0, %v11516_v31, 0.0  ;;  %v3508_v20 = vld [vmem:[#allocation2 + $0x1a2] sm:$0xff] }
 0x392   : > { %v3662_v61 = vmul.f32 %v11446_v17, %v11446_v17  ;;  %v3704_v1 = vsel %vm459_vm0, %v3660_v26, 0.0  ;;  %v3473_v32 = vadd.f32 %v11397_v40, %v11259_v6  ;;  %v3539_v14 = vmul.f32 %v11203_v18, %v3503_v7  ;;  %v13973_v26 = vld [vmem:[#allocation118_spill] sm:$0xff] }
 0x393   : > { %v3621_v50 = vadd.f32 %v3620_v0, %v3619_v22  ;;  %v3705_v2 = vadd.f32 %v3704_v1, %v3703_v47  ;;  %v11546_v60 = vadd.f32 %v3538_v43, %v3470_v24  ;;  %v3622_v29 = vsel %vm459_vm0, %v11526_v38, 0.0  ;;  %v13975_v1 = vld [vmem:[#allocation192_spill] sm:$0xff] }
 0x394   : > { %v3663_v41 = vmul.f32 %v11456_v30, %v11456_v30  ;;  %v3706_v19 = vsel %vm459_vm0, %v3661_v59, 0.0  ;;  %v3474_v56 = vadd.f32 %v11401_v3, %v13970_v27  ;;  %v3540_v62 = vmul.f32 %v11203_v18, %v3504_v33  ;;  %v13974_v59 = vld [vmem:[#allocation119_spill] sm:$0xff] }
 0x395   : > { %v3623_v6 = vadd.f32 %v3622_v29, %v3621_v50  ;;  %v3707_v40 = vadd.f32 %v3706_v19, %v3705_v2  ;;  %v11556_v5 = vadd.f32 %v3539_v14, %v3471_v9  ;;  %v3624_v24 = vsel %vm459_vm0, %v11536_v39, 0.0  ;;  %v13976_v14 = vld [vmem:[#allocation108_spill] sm:$0xff] }
 0x396   : > { %v3664_v58 = vmul.f32 %v11466_v45, %v11466_v45  ;;  %v3708_v46 = vsel %vm459_vm0, %v3662_v61, 0.0  ;;  %v3475_v4 = vadd.f32 %v13972_v15, %v13971_v52  ;;  %v3541_v3 = vmul.f32 %v11203_v18, %v13973_v26 }
 0x397   : > { %v3625_v25 = vadd.f32 %v3624_v24, %v3623_v6  ;;  %v3709_v23 = vadd.f32 %v3708_v46, %v3707_v40  ;;  %v11567_v55 = vadd.f32 %v3540_v62, %v3472_v21  ;;  %v3626_v9 = vsel %vm459_vm0, %v11546_v60, 0.0 }
 0x398   : > { %v3665_v7 = vmul.f32 %v11476_v53, %v11476_v53  ;;  %v3710_v16 = vsel %vm459_vm0, %v3663_v41, 0.0  ;;  %v3542_v10 = vmul.f32 %v11203_v18, %v13974_v59  ;;  %v3543_v43 = vmul.f32 %v11203_v18, %v3507_v34 }
 0x399   : > { %v3627_v22 = vadd.f32 %v3626_v9, %v3625_v25  ;;  %v3711_v47 = vadd.f32 %v3710_v16, %v3709_v23  ;;  %v11577_v33 = vadd.f32 %v3541_v3, %v3473_v32  ;;  %v3628_v21 = vsel %vm459_vm0, %v11556_v5, 0.0 }
 0x39a   : > { %v3666_v0 = vmul.f32 %v11486_v35, %v11486_v35  ;;  %v3712_v61 = vsel %vm459_vm0, %v3664_v58, 0.0  ;;  %v3476_v50 = vadd.f32 %v13976_v14, %v13975_v1  ;;  %v3544_v2 = vmul.f32 %v11203_v18, %v3508_v20 }
 0x39b   : > { %v3629_v29 = vadd.f32 %v3628_v21, %v3627_v22  ;;  %v3713_v41 = vadd.f32 %v3712_v61, %v3711_v47  ;;  %v11587_v19 = vadd.f32 %v3542_v10, %v3474_v56  ;;  %v3630_v32 = vsel %vm459_vm0, %v11567_v55, 0.0 }
 0x39c   : > { %v3667_v27 = vmul.f32 %v11496_v57, %v11496_v57  ;;  %v3714_v62 = vsel %vm459_vm0, %v3665_v7, 0.0  ;;  %v11594_v34 = vadd.f32 %v3543_v43, %v3475_v4  ;;  %v3632_v24 = vsel %vm459_vm0, %v11577_v33, 0.0 }
 0x39d   : > { %v3631_v6 = vadd.f32 %v3630_v32, %v3629_v29  ;;  %v3715_v40 = vadd.f32 %v3714_v62, %v3713_v41  ;;  %v3668_v18 = vmul.f32 %v11506_v11, %v11506_v11  ;;  %v3716_v56 = vsel %vm459_vm0, %v3666_v0, 0.0 }
 0x39e   : > { %v11601_v52 = vadd.f32 %v3544_v2, %v3476_v50  ;;  %v3634_v15 = vsel %vm459_vm0, %v11587_v19, 0.0  ;;  %v3669_v26 = vmul.f32 %v11516_v31, %v11516_v31  ;;  %v3718_v4 = vsel %vm459_vm0, %v3667_v27, 0.0 }
 0x39f   : > { %v3633_v58 = vadd.f32 %v3632_v24, %v3631_v6  ;;  %v3717_v46 = vadd.f32 %v3716_v56, %v3715_v40  ;;  %v3636_v23 = vsel %vm459_vm0, %v11594_v34, 0.0  ;;  %v3670_v20 = vmul.f32 %v11526_v38, %v11526_v38 }
 0x3a0   : > { %v3720_v9 = vsel %vm459_vm0, %v3668_v18, 0.0  ;;  %v3638_v59 = vsel %vm459_vm0, %v11601_v52, 0.0  ;;  %v3671_v10 = vmul.f32 %v11536_v39, %v11536_v39  ;;  %v3722_v43 = vsel %vm459_vm0, %v3669_v26, 0.0 }
 0x3a1   : > { %v3635_v3 = vadd.f32 %v3634_v15, %v3633_v58  ;;  %v3719_v25 = vadd.f32 %v3718_v4, %v3717_v46  ;;  %v3672_v21 = vmul.f32 %v11546_v60, %v11546_v60  ;;  %v3724_v0 = vsel %vm459_vm0, %v3670_v20, 0.0 }
 0x3a2   : > { %v3673_v14 = vmul.f32 %v11556_v5, %v11556_v5  ;;  %v3726_v50 = vsel %vm459_vm0, %v3671_v10, 0.0  ;;  %v3674_v29 = vmul.f32 %v11567_v55, %v11567_v55  ;;  %v3675_v62 = vmul.f32 %v11577_v33, %v11577_v33 }
 0x3a3   : > { %v3637_v7 = vadd.f32 %v3636_v23, %v3635_v3  ;;  %v3721_v16 = vadd.f32 %v3720_v9, %v3719_v25  ;;  %v3728_v41 = vsel %vm459_vm0, %v3672_v21, 0.0  ;;  %v3676_v24 = vmul.f32 %v11587_v19, %v11587_v19 }
 0x3a4   : > { %v3730_v6 = vsel %vm459_vm0, %v3673_v14, 0.0  ;;  %v3732_v18 = vsel %vm459_vm0, %v3674_v29, 0.0  ;;  %v3677_v46 = vmul.f32 %v11594_v34, %v11594_v34  ;;  %v3734_v15 = vsel %vm459_vm0, %v3675_v62, 0.0 }
 0x3a5   : > { %v3639_v22 = vadd.f32 %v3638_v59, %v3637_v7  ;;  %v3723_v47 = vadd.f32 %v3722_v43, %v3721_v16  ;;  %v3678_v4 = vmul.f32 %v11601_v52, %v11601_v52  ;;  %v3736_v3 = vsel %vm459_vm0, %v3676_v24, 0.0 }
 0x3a6   : > { %v3738_v20 = vsel %vm459_vm0, %v3677_v46, 0.0 }
 0x3a7   : > { %v3640_v61 = vrot.slane %v3639_v22, 4  ;;  %v3725_v1 = vadd.f32 %v3724_v0, %v3723_v47  ;;  %v3740_v7 = vsel %vm459_vm0, %v3678_v4, 0.0 }
 0x3a9   : > { %v3727_v2 = vadd.f32 %v3726_v50, %v3725_v1  ;;  %v3641_v32 = vadd.f32 %v3640_v61, %v3639_v22 }
 0x3ab   : > { %v3729_v27 = vadd.f32 %v3728_v41, %v3727_v2  ;;  %v3642_v56 = vrot.slane %v3641_v32, 2 }
 0x3ad   : > { %v3731_v40 = vadd.f32 %v3730_v6, %v3729_v27  ;;  %v3643_v25 = vadd.f32 %v3642_v56, %v3641_v32  ;;  %v13977_v27 = vld [vmem:[#allocation112_spill] sm:$0xff] }
 0x3af   : > { %v3733_v58 = vadd.f32 %v3732_v18, %v3731_v40  ;;  %v3644_v16 = vrot.slane %v3643_v25, 1 }
 0x3b1   : > { %v3735_v26 = vadd.f32 %v3734_v15, %v3733_v58  ;;  %v3645_v43 = vadd.f32 %v3644_v16, %v3643_v25 }
 0x3b3   : > { %v3737_v23 = vadd.f32 %v3736_v3, %v3735_v26  ;;  %v11641_v21 = vmul.f32 0.00390625, %v3645_v43  ;;  %v13978_v26 = vld [vmem:[#allocation92_spill] sm:$0xff] }
 0x3b5   : > { %v3739_v9 = vadd.f32 %v3738_v20, %v3737_v23  ;;  %v3749_v14 = vmul.f32 %v11641_v21, %v11641_v21  ;;  %v3752_v32 = vsub.f32 %v11252_v48, %v11641_v21  ;;  %v3754_v62 = vsub.f32 %v13977_v27, %v11641_v21  ;;  %v8049_v23 = vld [vmem:[%s13391_s5 + $0x48] sm:$0xff]   ;;  %v8052_v27 = vld [vmem:[%s13391_s5 + $0x10] sm:$0xff]  }
 0x3b6   : > { %v3755_v6 = vsub.f32 %v11280_v49, %v11641_v21  ;;  %v3756_v40 = vsub.f32 %v11304_v54, %v11641_v21  ;;  %v3757_v24 = vsub.f32 %v11317_v36, %v11641_v21  ;;  %v3758_v18 = vsub.f32 %v11332_v12, %v11641_v21  ;;  %v8050_v20 = vld [vmem:[%s13391_s5 + $0x8] sm:$0xff]  }
 0x3b7   : > { %v3741_v59 = vadd.f32 %v3740_v7, %v3739_v9  ;;  %v3759_v56 = vsub.f32 %v11347_v51, %v11641_v21  ;;  %v3760_v48 = vsub.f32 %v11362_v63, %v11641_v21  ;;  %v3761_v58 = vsub.f32 %v11378_v28, %v11641_v21 }
 0x3b8   : > { %v3762_v49 = vsub.f32 %v11385_v13, %v11641_v21  ;;  %v3763_v54 = vsub.f32 %v11408_v42, %v11641_v21  ;;  %v3764_v36 = vsub.f32 %v11413_v37, %v11641_v21  ;;  %v3765_v12 = vsub.f32 %v11427_v8, %v11641_v21 }
 0x3b9   : > { %v3742_v10 = vrot.slane %v3741_v59, 4  ;;  %v3766_v51 = vsub.f32 %v11436_v44, %v11641_v21  ;;  %v3767_v63 = vsub.f32 %v11446_v17, %v11641_v21  ;;  %v3768_v28 = vsub.f32 %v11456_v30, %v11641_v21 }
 0x3ba   : > { %v3769_v13 = vsub.f32 %v11466_v45, %v11641_v21  ;;  %v3770_v42 = vsub.f32 %v11476_v53, %v11641_v21  ;;  %v3771_v37 = vsub.f32 %v11486_v35, %v11641_v21  ;;  %v3772_v8 = vsub.f32 %v11496_v57, %v11641_v21  ;;  %v8047_v53 = vld [vmem:[%s13391_s5 + $0x40] sm:$0xff]  }
 0x3bb   : > { %v3743_v22 = vadd.f32 %v3742_v10, %v3741_v59  ;;  %v3773_v44 = vsub.f32 %v11506_v11, %v11641_v21  ;;  %v3774_v17 = vsub.f32 %v11516_v31, %v11641_v21  ;;  %v3775_v30 = vsub.f32 %v11526_v38, %v11641_v21  ;;  %v8048_v35 = vld [vmem:[%s13391_s5] sm:$0xff]   ;;  %6683 = vmatprep.subr.bf16.mxu1 %v8047_v53 }
 0x3bc   : > { %v3776_v45 = vsub.f32 %v11536_v39, %v11641_v21  ;;  %v3777_v57 = vsub.f32 %v11546_v60, %v11641_v21  ;;  %v3778_v11 = vsub.f32 %v11556_v5, %v11641_v21  ;;  %v3779_v31 = vsub.f32 %v11567_v55, %v11641_v21  ;;  %6684 = vmatpush3.bf16.msra.mxu1 %v8048_v35  ;;  %v13987_v53 = vld [vmem:[#allocation62_spill] sm:$0xff] }
 0x3bd   : > { %v3744_v47 = vrot.slane %v3743_v22, 2  ;;  %v3780_v38 = vsub.f32 %v11577_v33, %v11641_v21  ;;  %v3781_v46 = vsub.f32 %v11587_v19, %v11641_v21  ;;  %v3782_v15 = vsub.f32 %v11594_v34, %v11641_v21  ;;  %6685 = vmatprep.subr.bf16.mxu1 %v8049_v23  ;;  %v13994_v23 = vld [vmem:[#allocation69_spill] sm:$0xff] }
 0x3be   : > { %v3783_v60 = vsub.f32 %v11601_v52, %v11641_v21  ;;  %v3753_v5 = vsub.f32 %v13978_v26, %v11641_v21  ;;  %v14010_v21 = vld [vmem:[#allocation53_spill] sm:$0xff] }
 0x3bf   : > { %v3745_v0 = vadd.f32 %v3744_v47, %v3743_v22 }
 0x3c0   : > { %6686 = vmatpush3.bf16.msra.mxu1 %v8050_v20 }
 0x3c1   : > { %v3746_v61 = vrot.slane %v3745_v0, 1 }
 0x3c3   : > { %v3747_v1 = vadd.f32 %v3746_v61, %v3745_v0 }
 0x3c5   : > { %v3748_v50 = vmul.f32 0.00390625, %v3747_v1 }
 0x3c7   : > { %v3750_v2 = vsub.f32 %v3748_v50, %v3749_v14 }
 0x3c9   : > { %v3751_v29 = vmax.f32 %v3750_v2, 0.0 }
 0x3cb   : > { %v3784_v41 = vadd.f32 1e-05, %v3751_v29 }
 0x3cd   : > { %8065 = vrsqrt.f32 %v3784_v41 }
 0x3d7   : > { %v11707_v39 = vpop.eup %8065 }
 0x3d8   : > { %v3786_v55 = vmul.f32 %v11707_v39, %v3752_v32  ;;  %v11719_v4 = vmul.f32 %v11707_v39, %v3754_v62  ;;  %v3789_v33 = vmul.f32 %v11707_v39, %v3755_v6  ;;  %v3790_v3 = vmul.f32 %v11707_v39, %v3756_v40  ;;  %v8051_v32 = vld [vmem:[%s13391_s5 + $0x50] sm:$0xff]  }
 0x3d9   : > { %v3791_v19 = vmul.f32 %v11707_v39, %v3757_v24  ;;  %v3792_v34 = vmul.f32 %v11707_v39, %v3758_v18  ;;  %v3793_v52 = vmul.f32 %v11707_v39, %v3759_v56  ;;  %v3794_v25 = vmul.f32 %v11707_v39, %v3760_v48  ;;  %6687 = vmatprep.subr.bf16.mxu1 %v8051_v32  ;;  %v14002_v32 = vld [vmem:[#allocation77_spill] sm:$0xff] }
 0x3da   : > { %v3795_v9 = vmul.f32 %v11707_v39, %v3761_v58  ;;  %v3796_v7 = vmul.f32 %v11707_v39, %v3762_v49  ;;  %v3797_v16 = vmul.f32 %v11707_v39, %v3763_v54  ;;  %v3798_v59 = vmul.f32 %v11707_v39, %v3764_v36  ;;  %v13979_v58 = vld [vmem:[#allocation52_spill] sm:$0xff]  ;;  %v13980_v54 = vld [vmem:[#allocation55_spill] sm:$0xff]  ;;  %6688 = vmatpush3.bf16.msra.mxu1 %v8052_v27 }
 0x3db   : > { %v3799_v10 = vmul.f32 %v11707_v39, %v3765_v12  ;;  %v3800_v43 = vmul.f32 %v11707_v39, %v3766_v51  ;;  %v3801_v22 = vmul.f32 %v11707_v39, %v3767_v63  ;;  %v3802_v47 = vmul.f32 %v11707_v39, %v3768_v28  ;;  %v13981_v12 = vld [vmem:[#allocation56_spill] sm:$0xff]  ;;  %v13982_v63 = vld [vmem:[#allocation57_spill] sm:$0xff] }
 0x3dc   : > { %v3803_v0 = vmul.f32 %v11707_v39, %v3769_v13  ;;  %v3804_v61 = vmul.f32 %v11707_v39, %v3770_v42  ;;  %v3805_v1 = vmul.f32 %v11707_v39, %v3771_v37  ;;  %v3806_v14 = vmul.f32 %v11707_v39, %v3772_v8  ;;  %v13983_v13 = vld [vmem:[#allocation58_spill] sm:$0xff]  ;;  %v13984_v37 = vld [vmem:[#allocation59_spill] sm:$0xff] }
 0x3dd   : > { %v3807_v50 = vmul.f32 %v11707_v39, %v3773_v44  ;;  %v3808_v2 = vmul.f32 %v11707_v39, %v3774_v17  ;;  %v11748_v29 = vmul.f32 %v11707_v39, %v3775_v30  ;;  %v11751_v41 = vmul.f32 %v11707_v39, %v3776_v45  ;;  %v13985_v44 = vld [vmem:[#allocation60_spill] sm:$0xff]  ;;  %v13986_v30 = vld [vmem:[#allocation61_spill] sm:$0xff] }
 0x3de   : > { %v11760_v62 = vmul.f32 %v11707_v39, %v3777_v57  ;;  %v11763_v6 = vmul.f32 %v11707_v39, %v3778_v11  ;;  %v11766_v40 = vmul.f32 %v11707_v39, %v3779_v31  ;;  %v11769_v24 = vmul.f32 %v11707_v39, %v3780_v38  ;;  %v8053_v57 = vld [vmem:[%s13391_s5 + $0x58] sm:$0xff]   ;;  %v13988_v31 = vld [vmem:[#allocation63_spill] sm:$0xff] }
 0x3df   : > { %v11772_v18 = vmul.f32 %v11707_v39, %v3781_v46  ;;  %v11775_v56 = vmul.f32 %v11707_v39, %v3782_v15  ;;  %v11778_v48 = vmul.f32 %v11707_v39, %v3783_v60  ;;  %v3818_v49 = vmax.f32 %v13979_v58, %v3786_v55  ;;  %v8054_v11 = vld [vmem:[%s13391_s5 + $0x18] sm:$0xff]   ;;  %6689 = vmatprep.subr.bf16.mxu1 %v8053_v57  ;;  %v14003_v58 = vld [vmem:[#allocation78_spill] sm:$0xff] }
 0x3e0   : > { %v3821_v36 = vmax.f32 %v13980_v54, %v3789_v33  ;;  %v3822_v51 = vmax.f32 %v13981_v12, %v3790_v3  ;;  %v3823_v28 = vmax.f32 %v13982_v63, %v3791_v19  ;;  %v3824_v42 = vmax.f32 %v13983_v13, %v3792_v34  ;;  %v13989_v46 = vld [vmem:[#allocation64_spill] sm:$0xff]  ;;  %v13990_v60 = vld [vmem:[#allocation65_spill] sm:$0xff]  ;;  %v13991_v33 = vld [vmem:[#allocation66_spill] sm:$0xff]  ;;  %6690 = vmatpush3.bf16.msra.mxu1 %v8054_v11 }
 0x3e1   : > { %v3825_v8 = vmax.f32 %v13984_v37, %v3793_v52  ;;  %v3826_v17 = vmax.f32 %v13985_v44, %v3794_v25  ;;  %v3827_v45 = vmax.f32 %v13986_v30, %v3795_v9  ;;  %v3828_v35 = vmax.f32 %v13987_v53, %v3796_v7  ;;  %3850 = vst.msk [vmem:[#allocation2 + $0x19] sm:$0xff] %vm459_vm0, %v3818_v49  ;;  %v13992_v19 = vld [vmem:[#allocation67_spill] sm:$0xff]  ;;  %v13993_v52 = vld [vmem:[#allocation68_spill] sm:$0xff]  ;;  %v13995_v9 = vld [vmem:[#allocation70_spill] sm:$0xff] }
 0x3e2   : > { %3882 = vst.msk [vmem:[#allocation2 + $0x17] sm:$0x2] %vm492_vm1, %v3818_v49  ;;  %v3829_v38 = vmax.f32 %v13988_v31, %v3797_v16  ;;  %v3830_v15 = vmax.f32 %v13989_v46, %v3798_v59  ;;  %v3831_v55 = vmax.f32 %v13990_v60, %v3799_v10  ;;  %v3832_v3 = vmax.f32 %v13991_v33, %v3800_v43  ;;  %v13996_v16 = vld [vmem:[#allocation71_spill] sm:$0xff]  ;;  %v13997_v10 = vld [vmem:[#allocation72_spill] sm:$0xff]  ;;  %v14006_v12 = vld [vmem:[#allocation81_spill] sm:$0xff] }
 0x3e3   : > { %3853 = vst.msk [vmem:[#allocation2 + $0x39] sm:$0xff] %vm459_vm0, %v3821_v36  ;;  %3854 = vst.msk [vmem:[#allocation2 + $0x49] sm:$0xff] %vm459_vm0, %v3822_v51  ;;  %v3833_v34 = vmax.f32 %v13992_v19, %v3801_v22  ;;  %v3834_v25 = vmax.f32 %v13993_v52, %v3802_v47  ;;  %v3835_v20 = vmax.f32 %v13994_v23, %v3803_v0  ;;  %v13998_v22 = vld [vmem:[#allocation73_spill] sm:$0xff]  ;;  %v13999_v0 = vld [vmem:[#allocation74_spill] sm:$0xff] }
 0x3e4   : > { %3855 = vst.msk [vmem:[#allocation2 + $0x51] sm:$0xff] %vm459_vm0, %v3823_v28  ;;  %3856 = vst.msk [vmem:[#allocation2 + $0x61] sm:$0xff] %vm459_vm0, %v3824_v42  ;;  %v3836_v7 = vmax.f32 %v13995_v9, %v3804_v61  ;;  %v3837_v59 = vmax.f32 %v13996_v16, %v3805_v1  ;;  %v3838_v43 = vmax.f32 %v13997_v10, %v3806_v14  ;;  %v14000_v1 = vld [vmem:[#allocation75_spill] sm:$0xff]  ;;  %v14005_v54 = vld [vmem:[#allocation80_spill] sm:$0xff] }
 0x3e5   : > { %3884 = vst.msk [vmem:[#allocation2 + $0x47] sm:$0x2] %vm492_vm1, %v3822_v51  ;;  %3885 = vst.msk [vmem:[#allocation2 + $0x5f] sm:$0x2] %vm492_vm1, %v3824_v42  ;;  %v3839_v47 = vmax.f32 %v13998_v22, %v3807_v50  ;;  %v3840_v61 = vmax.f32 %v13999_v0, %v3808_v2  ;;  %v3841_v14 = vmax.f32 %v14000_v1, %v11748_v29  ;;  %v14001_v50 = vld [vmem:[#allocation76_spill] sm:$0xff]  ;;  %v8055_v29 = vld [vmem:[%s13391_s5 + $0x60] sm:$0xff]  }
 0x3e6   : > { %3899 = vst.msk [vmem:[#allocation2 + $0x3b] sm:$0x40] %vm509_vm2, %v3821_v36  ;;  %3900 = vst.msk [vmem:[#allocation2 + $0x53] sm:$0x40] %vm509_vm2, %v3823_v28  ;;  %v3842_v2 = vmax.f32 %v14001_v50, %v11751_v41  ;;  %v3843_v27 = vmax.f32 %v14002_v32, %v11760_v62  ;;  %v3844_v49 = vmax.f32 %v14003_v58, %v11763_v6  ;;  %v8056_v41 = vld [vmem:[%s13391_s5 + $0x20] sm:$0xff]   ;;  %v14004_v62 = vld [vmem:[#allocation79_spill] sm:$0xff]  ;;  %6691 = vmatprep.subr.bf16.mxu1 %v8055_v29 }
 0x3e7   : > { %3915 = vst.msk [vmem:[#allocation2 + $0x9] sm:$0xff] %vm459_vm0, %v3821_v36  ;;  %3857 = vst.msk [vmem:[#allocation2 + $0x69] sm:$0xff] %vm459_vm0, %v3825_v8  ;;  %v3845_v6 = vmax.f32 %v14004_v62, %v11766_v40  ;;  %v3847_v51 = vmax.f32 %v14006_v12, %v11772_v18  ;;  %v14007_v63 = vld [vmem:[#allocation82_spill] sm:$0xff]  ;;  %v14008_v40 = vld [vmem:[#allocation83_spill] sm:$0xff]  ;;  %6692 = vmatpush3.bf16.msra.mxu1 %v8056_v41 }
 0x3e8   : > { %3917 = vst.msk [vmem:[#allocation2 + $0xb] sm:$0x40] %vm509_vm2, %v3821_v36  ;;  %3901 = vst.msk [vmem:[#allocation2 + $0x6b] sm:$0x40] %vm509_vm2, %v3825_v8  ;;  %v3846_v36 = vmax.f32 %v14005_v54, %v11769_v24  ;;  %v3848_v28 = vmax.f32 %v14007_v63, %v11775_v56  ;;  %v3849_v24 = vmax.f32 %v14008_v40, %v11778_v48  ;;  %v14009_v18 = vld [vmem:[#allocation54_spill] sm:$0xff]  ;;  %v12014_v12 = vld [vmem:[#allocation2 + $0x19] sm:$0xff] }
 0x3e9   : > { %3858 = vst.msk [vmem:[#allocation2 + $0x79] sm:$0xff] %vm459_vm0, %v3826_v17  ;;  %3859 = vst.msk [vmem:[#allocation2 + $0x81] sm:$0xff] %vm459_vm0, %v3827_v45  ;;  %v3820_v56 = vmax.f32 %v14009_v18, %v11719_v4  ;;  %v3787_v48 = vmul.f32 %v11707_v39, %v3753_v5  ;;  %v11946_v52 = vld [vmem:[#allocation2 + $0x18] sm:$0xff] }
 0x3ea   : > { %3860 = vst.msk [vmem:[#allocation2 + $0x91] sm:$0xff] %vm459_vm0, %v3828_v35  ;;  %3861 = vst.msk [vmem:[#allocation2 + $0x99] sm:$0xff] %vm459_vm0, %v3829_v38 }
 0x3eb   : > { %3886 = vst.msk [vmem:[#allocation2 + $0x77] sm:$0x2] %vm492_vm1, %v3826_v17  ;;  %3887 = vst.msk [vmem:[#allocation2 + $0x8f] sm:$0x2] %vm492_vm1, %v3828_v35  ;;  %v3819_v39 = vmax.f32 %v14010_v21, %v3787_v48  ;;  %v11910_v5 = vld [vmem:[#allocation2 + $0x4a] sm:$0xff] }
 0x3ec   : > { %3902 = vst.msk [vmem:[#allocation2 + $0x83] sm:$0x40] %vm509_vm2, %v3827_v45  ;;  %3903 = vst.msk [vmem:[#allocation2 + $0x9b] sm:$0x40] %vm509_vm2, %v3829_v38 }
 0x3ed   : > { %3862 = vst.msk [vmem:[#allocation2 + $0xa9] sm:$0xff] %vm459_vm0, %v3830_v15  ;;  %3863 = vst.msk [vmem:[#allocation2 + $0xb1] sm:$0xff] %vm459_vm0, %v3831_v55  ;;  %v11912_v4 = vld [vmem:[#allocation2 + $0x52] sm:$0xff]  ;;  %v11914_v13 = vld [vmem:[#allocation2 + $0x3a] sm:$0xff] }
 0x3ee   : > { %3864 = vst.msk [vmem:[#allocation2 + $0xc1] sm:$0xff] %vm459_vm0, %v3832_v3  ;;  %3865 = vst.msk [vmem:[#allocation2 + $0xc9] sm:$0xff] %vm459_vm0, %v3833_v34  ;;  %v3992_v26 = vld [vmem:[#allocation2 + $0x9] sm:$0xff]  ;;  %v5212_v45 = vpack.c.bf16 %v11912_v4, %v11910_v5 }
 0x3ef   : > { %3888 = vst.msk [vmem:[#allocation2 + $0xa7] sm:$0x2] %vm492_vm1, %v3830_v15  ;;  %3889 = vst.msk [vmem:[#allocation2 + $0xbf] sm:$0x2] %vm492_vm1, %v3832_v3  ;;  %v11920_v8 = vld [vmem:[#allocation2 + $0x62] sm:$0xff]  ;;  %v11928_v53 = vld [vmem:[#allocation2 + $0x6a] sm:$0xff] }
 0x3f0   : > { %3904 = vst.msk [vmem:[#allocation2 + $0xb3] sm:$0x40] %vm509_vm2, %v3831_v55  ;;  %3905 = vst.msk [vmem:[#allocation2 + $0xcb] sm:$0x40] %vm509_vm2, %v3833_v34  ;;  %v4024_v11 = vld [vmem:[#allocation2 + $0xa] sm:$0xff]  ;;  %v5215_v55 = vpack.c.bf16 %v11928_v53, %v11920_v8 }
 0x3f1   : > { %3866 = vst.msk [vmem:[#allocation2 + $0xd9] sm:$0xff] %vm459_vm0, %v3834_v25  ;;  %3867 = vst.msk [vmem:[#allocation2 + $0xe1] sm:$0xff] %vm459_vm0, %v3835_v20  ;;  %v11970_v22 = vld [vmem:[#allocation2 + $0x92] sm:$0xff] }
 0x3f2   : > { %3868 = vst.msk [vmem:[#allocation2 + $0xf1] sm:$0xff] %vm459_vm0, %v3836_v7  ;;  %3869 = vst.msk [vmem:[#allocation2 + $0xf9] sm:$0xff] %vm459_vm0, %v3837_v59 }
 0x3f3   : > { %3890 = vst.msk [vmem:[#allocation2 + $0xd7] sm:$0x2] %vm492_vm1, %v3834_v25  ;;  %3891 = vst.msk [vmem:[#allocation2 + $0xef] sm:$0x2] %vm492_vm1, %v3836_v7  ;;  %v11958_v7 = vld [vmem:[#allocation2 + $0x7a] sm:$0xff]  ;;  %v11960_v16 = vld [vmem:[#allocation2 + $0x82] sm:$0xff] }
 0x3f4   : > { %3906 = vst.msk [vmem:[#allocation2 + $0xe3] sm:$0x40] %vm509_vm2, %v3835_v20  ;;  %3907 = vst.msk [vmem:[#allocation2 + $0xfb] sm:$0x40] %vm509_vm2, %v3837_v59  ;;  %v11983_v50 = vld [vmem:[#allocation2 + $0x9a] sm:$0xff]  ;;  %v12034_v48 = vld [vmem:[#allocation2 + $0xaa] sm:$0xff] }
 0x3f5   : > { %3870 = vst.msk [vmem:[#allocation2 + $0x109] sm:$0xff] %vm459_vm0, %v3838_v43  ;;  %3871 = vst.msk [vmem:[#allocation2 + $0x111] sm:$0xff] %vm459_vm0, %v3839_v47  ;;  %v11916_v42 = vld [vmem:[#allocation2 + $0xc2] sm:$0xff]  ;;  %v5221_v40 = vpack.c.bf16 %v11983_v50, %v11970_v22 }
 0x3f6   : > { %3872 = vst.msk [vmem:[#allocation2 + $0x121] sm:$0xff] %vm459_vm0, %v3840_v61  ;;  %3873 = vst.msk [vmem:[#allocation2 + $0x129] sm:$0xff] %vm459_vm0, %v3841_v14 }
 0x3f7   : > { %3892 = vst.msk [vmem:[#allocation2 + $0x107] sm:$0x2] %vm492_vm1, %v3838_v43  ;;  %3893 = vst.msk [vmem:[#allocation2 + $0x11f] sm:$0x2] %vm492_vm1, %v3840_v61  ;;  %v11918_v37 = vld [vmem:[#allocation2 + $0xca] sm:$0xff]  ;;  %v11968_v43 = vld [vmem:[#allocation2 + $0x39] sm:$0xff] }
 0x3f8   : > { %3908 = vst.msk [vmem:[#allocation2 + $0x113] sm:$0x40] %vm509_vm2, %v3839_v47  ;;  %3909 = vst.msk [vmem:[#allocation2 + $0x12b] sm:$0x40] %vm509_vm2, %v3841_v14  ;;  %v11924_v44 = vpack.i.bf16 %v11918_v37, %v11916_v42  ;;  %v11931_v31 = vld [vmem:[#allocation2 + $0xda] sm:$0xff]  ;;  %v12036_v21 = vld [vmem:[#allocation2 + $0xb2] sm:$0xff] }
 0x3f9   : > { %3874 = vst.msk [vmem:[#allocation2 + $0x139] sm:$0xff] %vm459_vm0, %v3842_v2  ;;  %3875 = vst.msk [vmem:[#allocation2 + $0x141] sm:$0xff] %vm459_vm0, %v3843_v27  ;;  %v11939_v3 = vld [vmem:[#allocation2 + $0xf2] sm:$0xff] }
 0x3fa   : > { %3876 = vst.msk [vmem:[#allocation2 + $0x151] sm:$0xff] %vm459_vm0, %v3844_v49  ;;  %3877 = vst.msk [vmem:[#allocation2 + $0x159] sm:$0xff] %vm459_vm0, %v3845_v6 }
 0x3fb   : > { %3894 = vst.msk [vmem:[#allocation2 + $0x137] sm:$0x2] %vm492_vm1, %v3842_v2  ;;  %3895 = vst.msk [vmem:[#allocation2 + $0x14f] sm:$0x2] %vm492_vm1, %v3844_v49  ;;  %v11937_v33 = vld [vmem:[#allocation2 + $0xe2] sm:$0xff]  ;;  %v11948_v25 = vld [vmem:[#allocation2 + $0xfa] sm:$0xff] }
 0x3fc   : > { %3910 = vst.msk [vmem:[#allocation2 + $0x143] sm:$0x40] %vm509_vm2, %v3843_v27  ;;  %3921 = vst.msk [vmem:[#allocation2 + $0x1a3] sm:$0x40] %vm509_vm2, %v3847_v51  ;;  %v11952_v23 = vpack.i.bf16 %v11937_v33, %v11931_v31  ;;  %v11962_v59 = vld [vmem:[#allocation2 + $0x10a] sm:$0xff]  ;;  %v11966_v10 = vpack.i.bf16 %v11948_v25, %v11939_v3 }
 0x3fd   : > { %3878 = vst.msk [vmem:[#allocation2 + $0x169] sm:$0xff] %vm459_vm0, %v3846_v36  ;;  %3879 = vst.msk [vmem:[#allocation2 + $0x171] sm:$0xff] %vm459_vm0, %v3847_v51  ;;  %v11974_v0 = vld [vmem:[#allocation2 + $0x122] sm:$0xff] }
 0x3fe   : > { %3880 = vst.msk [vmem:[#allocation2 + $0x181] sm:$0xff] %vm459_vm0, %v3848_v28  ;;  %3918 = vst.msk [vmem:[#allocation2 + $0x199] sm:$0xff] %vm459_vm0, %v3846_v36 }
 0x3ff   : > { %3896 = vst.msk [vmem:[#allocation2 + $0x167] sm:$0x2] %vm492_vm1, %v3846_v36  ;;  %3897 = vst.msk [vmem:[#allocation2 + $0x17f] sm:$0x2] %vm492_vm1, %v3848_v28  ;;  %v11972_v47 = vld [vmem:[#allocation2 + $0x112] sm:$0xff]  ;;  %v11976_v61 = vld [vmem:[#allocation2 + $0x12a] sm:$0xff] }
 0x400   : > { %3911 = vst.msk [vmem:[#allocation2 + $0x15b] sm:$0x40] %vm509_vm2, %v3845_v6  ;;  %3912 = vst.msk [vmem:[#allocation2 + $0x173] sm:$0x40] %vm509_vm2, %v3847_v51  ;;  %v11985_v2 = vld [vmem:[#allocation2 + $0x13a] sm:$0xff]  ;;  %v11989_v32 = vpack.i.bf16 %v11972_v47, %v11962_v59  ;;  %v11993_v27 = vpack.i.bf16 %v11976_v61, %v11974_v0 }
 0x401   : > { %3919 = vst.msk [vmem:[#allocation2 + $0x1a1] sm:$0xff] %vm459_vm0, %v3847_v51  ;;  %3881 = vst.msk [vmem:[#allocation2 + $0x189] sm:$0xff] %vm459_vm0, %v3849_v24  ;;  %v11997_v49 = vld [vmem:[#allocation2 + $0x152] sm:$0xff] }
 0x402   : > { %3920 = vst.msk [vmem:[#allocation2 + $0x197] sm:$0x2] %vm492_vm1, %v3846_v36  ;;  %3883 = vst.msk [vmem:[#allocation2 + $0x2f] sm:$0x2] %vm492_vm1, %v3820_v56  ;;  %v5218_v36 = vpack.c.bf16 %v11960_v16, %v11958_v7 }
 0x403   : > { %3913 = vst.msk [vmem:[#allocation2 + $0x18b] sm:$0x40] %vm509_vm2, %v3849_v24  ;;  %3898 = vst.msk [vmem:[#allocation2 + $0x23] sm:$0x40] %vm509_vm2, %v3819_v39  ;;  %v11995_v58 = vld [vmem:[#allocation2 + $0x142] sm:$0xff] }
 0x404   : > { %3914 = vst.msk [vmem:[#allocation2 + $0x1] sm:$0xff] %vm459_vm0, %v3820_v56  ;;  %3852 = vst.msk [vmem:[#allocation2 + $0x31] sm:$0xff] %vm459_vm0, %v3820_v56  ;;  %v12004_v62 = vld [vmem:[#allocation2 + $0x16a] sm:$0xff]  ;;  %v12008_v6 = vpack.i.bf16 %v11995_v58, %v11985_v2 }
 0x405   : > { %3916 = vst.msk [vmem:[#allocation2 - $0x1] sm:$0x2] %vm492_vm1, %v3820_v56 }
 0x406   : > { %3851 = vst.msk [vmem:[#allocation2 + $0x21] sm:$0xff] %vm459_vm0, %v3819_v39  ;;  %v12038_v39 = vld [vmem:[#allocation2 + $0x48] sm:$0xff] }
 0x407   : > { %v11999_v29 = vld [vmem:[#allocation2 + $0x15a] sm:$0xff]  ;;  %v12018_v63 = vld [vmem:[#allocation2 + $0x172] sm:$0xff] }
 0x408   : > { %v7937_v54 = vpack.i.bf16 %v11999_v29, %v11997_v49  ;;  %v7967_v24 = vpack.i.bf16 %v12018_v63, %v12004_v62 }
 0x40b   : > { %v3991_v17 = vld [vmem:[#allocation2 + $0x1] sm:$0xff]  ;;  %v4215_v30 = vld [vmem:[#allocation2 + $0x32] sm:$0xff] }
 0x40c   : > { %v7552_v35 = vpack.i.bf16 %v3992_v26, %v3991_v17  ;;  %v5209_v57 = vpack.c.bf16 %v11914_v13, %v4215_v30  ;;  %v4023_v15 = vld [vmem:[#allocation2 + $0x2] sm:$0xff]  ;;  %v11942_v19 = vld [vmem:[#allocation2 + $0x30] sm:$0xff]  ;;  %v11944_v34 = vld [vmem:[#allocation2 + $0x38] sm:$0xff]  ;;  %v7577_v56 = vpack.i.bf16 %v11914_v13, %v4215_v30  ;;  %v5224_v17 = vpack.c.bf16 %v12036_v21, %v12034_v48 }
 0x40d   : > { %v4119_v38 = vld [vmem:[#allocation2 + $0x1a] sm:$0xff]  ;;  %v4120_v46 = vld [vmem:[#allocation2 + $0x22] sm:$0xff]  ;;  %v7562_v20 = vpack.i.bf16 %v4024_v11, %v4023_v15  ;;  %v7557_v1 = vpack.i.bf16 %v11944_v34, %v11942_v19  ;;  %v11981_v14 = vld [vmem:[#allocation2 + $0x31] sm:$0xff]  ;;  %v5227_v13 = vpack.c.bf16 %v11918_v37, %v11916_v42  ;;  %v5230_v15 = vpack.c.bf16 %v11937_v33, %v11931_v31 }
 0x40e   : > { %7553 = vrot.lane.b32.xlu1 %v7552_v35, %s8238_s30  ;;  %6875 = vmatprep.mubr.msk.bf16.mxu0 %vm459_vm0, %v5209_v57  ;;  %v7547_v60 = vpack.i.bf16 %v4120_v46, %v4119_v38  ;;  %v11956_v9 = vld [vmem:[#allocation2 + $0x20] sm:$0xff]  ;;  %v7567_v28 = vpack.i.bf16 %v11968_v43, %v11981_v14  ;;  %v12040_v26 = vld [vmem:[#allocation2 + $0x50] sm:$0xff]  ;;  %v8057_v30 = vld [vmem:[%s13391_s5 + $0x68] sm:$0xff]  }
 0x40f   : > { %6876 = vmatmul.mubr.msk.bf16.vlgmr.msra.gmra.mrb[64].mxu0 %vm459_vm0, %v5212_v45  ;;  %v7572_v41 = vpack.i.bf16 %v11956_v9, %v11946_v52  ;;  %v12016_v51 = vld [vmem:[#allocation2 + $0x21] sm:$0xff]  ;;  %v7587_v45 = vpack.i.bf16 %v12040_v26, %v12038_v39  ;;  %v12057_v57 = vld [vmem:[#allocation2 + $0x49] sm:$0xff]  ;;  %v12059_v11 = vld [vmem:[#allocation2 + $0x51] sm:$0xff]  ;;  %6693 = vmatprep.subr.bf16.mxu1 %v8057_v30 }
 0x410   : > { %7548 = vrot.lane.b32.xlu0 %v7547_v60, %s8238_s30  ;;  %6879 = vmatprep.mubr.msk.bf16.mxu0 %vm459_vm0, %v5215_v55  ;;  %v7582_v18 = vpack.i.bf16 %v12016_v51, %v12014_v12  ;;  %v8058_v35 = vld [vmem:[%s13391_s5 + $0x28] sm:$0xff]   ;;  %v8059_v38 = vld [vmem:[%s13391_s5 + $0x70] sm:$0xff]   ;;  %v7597_v42 = vpack.i.bf16 %v12059_v11, %v12057_v57  ;;  %v8061_v46 = vld [vmem:[%s13391_s5 + $0x78] sm:$0xff]   ;;  %v5233_v55 = vpack.c.bf16 %v11948_v25, %v11939_v3 }
 0x411   : > { %6694 = vmatpush3.bf16.msra.mxu1 %v8058_v35  ;;  %v8060_v37 = vld [vmem:[%s13391_s5 + $0x30] sm:$0xff]   ;;  %v12102_v3 = vld [vmem:[#allocation2 + $0x61] sm:$0xff]  ;;  %v4160_v30 = vld [vmem:[#allocation2 + $0x98] sm:$0xff] }
 0x412   : > { %7563 = vrot.lane.b32.xlu1 %v7562_v20, %s8237_s25  ;;  %6695 = vmatprep.subr.bf16.mxu1 %v8059_v38  ;;  %v8062_v20 = vld [vmem:[%s13391_s5 + $0x38] sm:$0xff]   ;;  %v12104_v25 = vld [vmem:[#allocation2 + $0x69] sm:$0xff] }
 0x413   : > { %v12151_v38 = vld [vmem:[#allocation2 + $0x91] sm:$0xff] }
 0x414   : > { %7558 = vrot.lane.b32.xlu0 %v7557_v1, %s8237_s25 }
 0x415   : > { %6696 = vmatpush3.bf16.msra.mxu1 %v8060_v37  ;;  %v4161_v37 = vld [vmem:[#allocation2 + $0xa8] sm:$0xff] }
 0x416   : > { %7573 = vrot.lane.b32.xlu1 %v7572_v41, %s8239_s14  ;;  %v12089_v41 = vld [vmem:[#allocation2 + $0x68] sm:$0xff]  ;;  %6697 = vmatprep.subr.bf16.mxu1 %v8061_v46  ;;  %v4162_v46 = vld [vmem:[#allocation2 + $0xb0] sm:$0xff] }
 0x417   : > { %6880 = vmatmul.mubr.msk.bf16.gmra.mrb[68].mxu0 %vm459_vm0, %v5218_v36  ;;  %v12109_v36 = vld [vmem:[%s13391_s5 + $0x80] sm:$0xff]  }
 0x418   : > { %7568 = vrot.lane.b32.xlu0 %v7567_v28, %s8239_s14  ;;  %6883 = vmatprep.mubr.msk.bf16.mxu0 %vm459_vm0, %v5221_v40  ;;  %v7627_v40 = vpack.i.bf16 %v12104_v25, %v12102_v3 }
 0x419   : > { %6698 = vmatpush3.bf16.msra.mxu1 %v8062_v20 }
 0x41a   : > { %7583 = vrot.lane.b32.xlu1 %v7582_v18, %s8238_s30  ;;  %6983 = vmatprep.subr.bf16.mxu1 %v12109_v36  ;;  %v5239_v18 = vpack.c.bf16 %v11976_v61, %v11974_v0  ;;  %v5245_v0 = vpack.c.bf16 %v11999_v29, %v11997_v49  ;;  %v12133_v61 = vld [vmem:[#allocation2 + $0x79] sm:$0xff] }
 0x41c   : > { %7578 = vrot.lane.b32.xlu0 %v7577_v56, %s8238_s30 }
 0x41e   : > { %7593 = vrot.lane.b32.xlu1 %v7547_v60, %s8237_s25  ;;  %v7607_v60 = vpack.i.bf16 %v11912_v4, %v11910_v5  ;;  %v12093_v5 = vld [vmem:[#allocation2 + $0x182] sm:$0xff]  ;;  %v12095_v4 = vld [vmem:[#allocation2 + $0x18a] sm:$0xff] }
 0x41f   : > { %6884 = vmatmul.mubr.msk.bf16.gmra.mrb[72].mxu0 %vm459_vm0, %v5224_v17  ;;  %v5251_v31 = vpack.c.bf16 %v12095_v4, %v12093_v5  ;;  %v5242_v17 = vpack.c.bf16 %v11995_v58, %v11985_v2  ;;  %v5248_v2 = vpack.c.bf16 %v12018_v63, %v12004_v62  ;;  %v7667_v58 = vpack.i.bf16 %v11960_v16, %v11958_v7 }
 0x420   : > { %7588 = vrot.lane.b32.xlu0 %v7587_v45, %s8237_s25  ;;  %6887 = vmatprep.mubr.msk.bf16.mxu0 %vm459_vm0, %v5227_v13  ;;  %v4159_v13 = vld [vmem:[#allocation2 + $0x90] sm:$0xff]  ;;  %v7697_v16 = vpack.i.bf16 %v11983_v50, %v11970_v22  ;;  %v7727_v22 = vpack.i.bf16 %v12036_v21, %v12034_v48  ;;  %v4163_v50 = vld [vmem:[#allocation2 + $0xc0] sm:$0xff]  ;;  %v4165_v48 = vld [vmem:[#allocation2 + $0xd8] sm:$0xff] }
 0x421   : > { %v7677_v35 = vpack.i.bf16 %v4160_v30, %v4159_v13  ;;  %v4166_v21 = vld [vmem:[#allocation2 + $0xe0] sm:$0xff] }
 0x422   : > { %7603 = vrot.lane.b32.xlu1 %v7557_v1, %s8239_s14  ;;  %v12087_v1 = vld [vmem:[#allocation2 + $0x60] sm:$0xff] }
 0x423   : > { %v7617_v33 = vpack.i.bf16 %v12089_v41, %v12087_v1  ;;  %v4200_v13 = vld [vmem:[#allocation2 + $0xf9] sm:$0xff] }
 0x424   : > { %7598 = vrot.lane.b32.xlu0 %v7597_v42, %s8239_s14 }
 0x426   : > { %7613 = vrot.lane.b32.xlu1 %v7567_v28, %s8238_s30  ;;  %v5236_v28 = vpack.c.bf16 %v11972_v47, %v11962_v59  ;;  %v4157_v59 = vld [vmem:[#allocation2 + $0x78] sm:$0xff]  ;;  %v4158_v47 = vld [vmem:[#allocation2 + $0x80] sm:$0xff] }
 0x427   : > { %6888 = vmatmul.mubr.msk.bf16.gmra.mrb[76].mxu0 %vm459_vm0, %v5230_v15  ;;  %v7707_v15 = vpack.i.bf16 %v4162_v46, %v4161_v37  ;;  %v4202_v37 = vld [vmem:[#allocation2 + $0x111] sm:$0xff] }
 0x428   : > { %7608 = vrot.lane.b32.xlu0 %v7607_v60, %s8238_s30  ;;  %6891 = vmatprep.mubr.msk.bf16.mxu0 %vm459_vm0, %v5233_v55  ;;  %v4194_v55 = vld [vmem:[#allocation2 + $0xb1] sm:$0xff] }
 0x42a   : > { %7623 = vrot.lane.b32.xlu1 %v7577_v56, %s8237_s25  ;;  %v7637_v56 = vpack.i.bf16 %v11928_v53, %v11920_v8  ;;  %v12135_v8 = vld [vmem:[#allocation2 + $0x81] sm:$0xff] }
 0x42b   : > { %v7657_v53 = vpack.i.bf16 %v12135_v8, %v12133_v61 }
 0x42c   : > { %7618 = vrot.lane.b32.xlu0 %v7617_v33, %s8237_s25 }
 0x42e   : > { %7633 = vrot.lane.b32.xlu1 %v7587_v45, %s8239_s14  ;;  %v7647_v45 = vpack.i.bf16 %v4158_v47, %v4157_v59  ;;  %v7767_v59 = vpack.i.bf16 %v4166_v21, %v4165_v48  ;;  %v4197_v47 = vld [vmem:[#allocation2 + $0xd9] sm:$0xff]  ;;  %v3960_v21 = vld [vmem:[#allocation2 + $0x8] sm:$0xff] }
 0x42f   : > { %6892 = vmatmul.mubr.msk.bf16.gmra.mrb[80].mxu0 %vm459_vm0, %v5236_v28  ;;  %v3959_v48 = vld [vmem:[#allocation2] sm:$0xff] }
 0x430   : > { %7628 = vrot.lane.b32.xlu0 %v7627_v40, %s8239_s14  ;;  %6895 = vmatprep.mubr.msk.bf16.mxu0 %vm459_vm0, %v5239_v18  ;;  %v4196_v18 = vld [vmem:[#allocation2 + $0xc9] sm:$0xff] }
 0x432   : > { %7643 = vrot.lane.b32.xlu1 %v7597_v42, %s8238_s30  ;;  %v12153_v42 = vld [vmem:[#allocation2 + $0x99] sm:$0xff] }
 0x433   : > { %v7687_v7 = vpack.i.bf16 %v12153_v42, %v12151_v38 }
 0x434   : > { %7638 = vrot.lane.b32.xlu0 %v7637_v56, %s8238_s30 }
 0x436   : > { %7653 = vrot.lane.b32.xlu1 %v7607_v60, %s8237_s25  ;;  %v4193_v60 = vld [vmem:[#allocation2 + $0xa9] sm:$0xff] }
 0x437   : > { %6896 = vmatmul.mubr.msk.bf16.gmra.mrb[84].mxu0 %vm459_vm0, %v5242_v17  ;;  %v7717_v20 = vpack.i.bf16 %v4194_v55, %v4193_v60  ;;  %v4198_v17 = vld [vmem:[#allocation2 + $0xe1] sm:$0xff] }
 0x438   : > { %7648 = vrot.lane.b32.xlu0 %v7647_v45, %s8237_s25  ;;  %6899 = vmatprep.mubr.msk.bf16.mxu0 %vm459_vm0, %v5245_v0  ;;  %v4167_v0 = vld [vmem:[#allocation2 + $0xf0] sm:$0xff] }
 0x43a   : > { %7663 = vrot.lane.b32.xlu1 %v7617_v33, %s8239_s14  ;;  %v4164_v33 = vld [vmem:[#allocation2 + $0xc8] sm:$0xff] }
 0x43b   : > { %v7737_v28 = vpack.i.bf16 %v4164_v33, %v4163_v50  ;;  %v4171_v50 = vld [vmem:[#allocation2 + $0x120] sm:$0xff]  ;;  %v4172_v33 = vld [vmem:[#allocation2 + $0x128] sm:$0xff] }
 0x43c   : > { %7658 = vrot.lane.b32.xlu0 %v7657_v53, %s8239_s14 }
 0x43e   : > { %7673 = vrot.lane.b32.xlu1 %v7627_v40, %s8238_s30  ;;  %v4195_v40 = vld [vmem:[#allocation2 + $0xc1] sm:$0xff] }
 0x43f   : > { %6900 = vmatmul.mubr.msk.bf16.gmra.mrb[88].mxu0 %vm459_vm0, %v5248_v2 }
 0x440   : > { %7668 = vrot.lane.b32.xlu0 %v7667_v58, %s8238_s30 }
 0x442   : > { %7683 = vrot.lane.b32.xlu1 %v7637_v56, %s8237_s25  ;;  %v7747_v56 = vpack.i.bf16 %v4196_v18, %v4195_v40 }
 0x444   : > { %7678 = vrot.lane.b32.xlu0 %v7677_v35, %s8237_s25 }
 0x446   : > { %7693 = vrot.lane.b32.xlu1 %v7647_v45, %s8239_s14  ;;  %v7777_v45 = vpack.i.bf16 %v4198_v17, %v4197_v47 }
 0x448   : > { %7688 = vrot.lane.b32.xlu0 %v7687_v7, %s8239_s14 }
 0x44a   : > { %7703 = vrot.lane.b32.xlu1 %v7657_v53, %s8238_s30  ;;  %v4168_v53 = vld [vmem:[#allocation2 + $0xf8] sm:$0xff] }
 0x44b   : > { %v7797_v2 = vpack.i.bf16 %v4168_v53, %v4167_v0 }
 0x44c   : > { %7698 = vrot.lane.b32.xlu0 %v7697_v16, %s8238_s30 }
 0x44e   : > { %7713 = vrot.lane.b32.xlu1 %v7667_v58, %s8237_s25  ;;  %v4199_v58 = vld [vmem:[#allocation2 + $0xf1] sm:$0xff] }
 0x44f   : > { %v7807_v30 = vpack.i.bf16 %v4200_v13, %v4199_v58 }
 0x450   : > { %7708 = vrot.lane.b32.xlu0 %v7707_v15, %s8237_s25 }
 0x452   : > { %7723 = vrot.lane.b32.xlu1 %v7677_v35, %s8239_s14  ;;  %v4169_v35 = vld [vmem:[#allocation2 + $0x108] sm:$0xff] }
 0x454   : > { %7718 = vrot.lane.b32.xlu0 %v7717_v20, %s8239_s14 }
 0x456   : > { %7733 = vrot.lane.b32.xlu1 %v7687_v7, %s8238_s30  ;;  %v4170_v7 = vld [vmem:[#allocation2 + $0x110] sm:$0xff] }
 0x458   : > { %7728 = vrot.lane.b32.xlu0 %v7727_v22, %s8238_s30 }
 0x45a   : > { %7743 = vrot.lane.b32.xlu1 %v7697_v16, %s8237_s25  ;;  %v7827_v16 = vpack.i.bf16 %v4170_v7, %v4169_v35 }
 0x45c   : > { %7738 = vrot.lane.b32.xlu0 %v7737_v28, %s8237_s25 }
 0x45e   : > { %7753 = vrot.lane.b32.xlu1 %v7707_v15, %s8239_s14 }
 0x460   : > { %7748 = vrot.lane.b32.xlu0 %v7747_v56, %s8239_s14 }
 0x462   : > { %7763 = vrot.lane.b32.xlu1 %v7717_v20, %s8238_s30 }
 0x464   : > { %7758 = vrot.lane.b32.xlu0 %v11924_v44, %s8238_s30 }
 0x466   : > { %7773 = vrot.lane.b32.xlu1 %v7727_v22, %s8237_s25 }
 0x468   : > { %7768 = vrot.lane.b32.xlu0 %v7767_v59, %s8237_s25 }
 0x46a   : > { %7783 = vrot.lane.b32.xlu1 %v7737_v28, %s8239_s14 }
 0x46c   : > { %7778 = vrot.lane.b32.xlu0 %v7777_v45, %s8239_s14 }
 0x46e   : > { %7793 = vrot.lane.b32.xlu1 %v7747_v56, %s8238_s30 }
 0x470   : > { %7788 = vrot.lane.b32.xlu0 %v11952_v23, %s8238_s30 }
 0x472   : > { %7803 = vrot.lane.b32.xlu1 %v11924_v44, %s8237_s25  ;;  %v4201_v44 = vld [vmem:[#allocation2 + $0x109] sm:$0xff] }
 0x473   : > { %v7837_v60 = vpack.i.bf16 %v4202_v37, %v4201_v44 }
 0x474   : > { %7798 = vrot.lane.b32.xlu0 %v7797_v2, %s8237_s25 }
 0x476   : > { %7813 = vrot.lane.b32.xlu1 %v7767_v59, %s8239_s14 }
 0x478   : > { %7808 = vrot.lane.b32.xlu0 %v7807_v30, %s8239_s14 }
 0x47a   : > { %7823 = vrot.lane.b32.xlu1 %v7777_v45, %s8238_s30  ;;  %v12202_v45 = vpack.i.bf16 %v4172_v33, %v4171_v50 }
 0x47c   : > { %7818 = vrot.lane.b32.xlu0 %v11966_v10, %s8238_s30 }
 0x47e   : > { %7833 = vrot.lane.b32.xlu1 %v11952_v23, %s8237_s25 }
 0x480   : > { %7828 = vrot.lane.b32.xlu0 %v7827_v16, %s8237_s25  ;;  %v7554_v46 = vpop.permute.xlu1 %7553 }
 0x481   : > { %v7556_v20 = vunpack.i.h.bf16 %v7554_v46  ;;  %v7555_v22 = vunpack.i.l.bf16 %v7554_v46 }
 0x482   : > { %v7549_v15 = vpop.permute.xlu0 %7548  ;;  %7843 = vrot.lane.b32.xlu1 %v7797_v2, %s8239_s14 }
 0x483   : > { %v7551_v28 = vunpack.i.h.bf16 %v7549_v15  ;;  %v7550_v40 = vunpack.i.l.bf16 %v7549_v15  ;;  %v5015_v0 = vsel %vm459_vm0, %v3959_v48, %v7555_v22  ;;  %v5016_v53 = vsel %vm459_vm0, %v3960_v21, %v7556_v20  ;;  %v12216_v20 = vld [vmem:[#allocation2 + $0x121] sm:$0xff] }
 0x484   : > { %7838 = vrot.lane.b32.xlu0 %v7837_v60, %s8239_s14  ;;  %v7564_v55 = vpop.permute.xlu1 %7563 }
 0x485   : > { %v7566_v18 = vunpack.i.h.bf16 %v7564_v55  ;;  %v7565_v23 = vunpack.i.l.bf16 %v7564_v55  ;;  %v5112_v13 = vsel %vm459_vm0, %v12016_v51, %v7551_v28  ;;  %v12218_v51 = vld [vmem:[#allocation2 + $0x129] sm:$0xff] }
 0x486   : > { %v7559_v56 = vpop.permute.xlu0 %7558  ;;  %7853 = vrot.lane.b32.xlu1 %v7807_v30, %s8238_s30  ;;  %v5111_v30 = vsel %vm459_vm0, %v12014_v12, %v7550_v40 }
 0x487   : > { %v7561_v59 = vunpack.i.h.bf16 %v7559_v56  ;;  %v7560_v47 = vunpack.i.l.bf16 %v7559_v56  ;;  %v5047_v35 = vsel %vm1661_vm5, %v5015_v0, %v7565_v23  ;;  %v5048_v7 = vsel %vm1661_vm5, %v5016_v53, %v7566_v18 }
 0x488   : > { %7848 = vrot.lane.b32.xlu0 %v11989_v32, %s8238_s30  ;;  %v7574_v17 = vpop.permute.xlu1 %7573  ;;  %v12228_v18 = vpack.i.bf16 %v12218_v51, %v12216_v20 }
 0x489   : > { %v7576_v2 = vunpack.i.h.bf16 %v7574_v17  ;;  %v7575_v58 = vunpack.i.l.bf16 %v7574_v17  ;;  %v5143_v12 = vsel %vm1661_vm5, %v5111_v30, %v7560_v47  ;;  %v5144_v22 = vsel %vm1661_vm5, %v5112_v13, %v7561_v59  ;;  %v4173_v47 = vld [vmem:[#allocation2 + $0x138] sm:$0xff]  ;;  %v4174_v17 = vld [vmem:[#allocation2 + $0x140] sm:$0xff] }
 0x48a   : > { %v7569_v44 = vpop.permute.xlu0 %7568  ;;  %7863 = vrot.lane.b32.xlu1 %v11966_v10, %s8237_s25 }
 0x48b   : > { %v7571_v37 = vunpack.i.h.bf16 %v7569_v44  ;;  %v7570_v46 = vunpack.i.l.bf16 %v7569_v44  ;;  %v5080_v15 = vsel %vm1694_vm6, %v5048_v7, %v7576_v2  ;;  %v5079_v55 = vsel %vm1694_vm6, %v5047_v35, %v7575_v58 }
 0x48c   : > { %7858 = vrot.lane.b32.xlu0 %v12202_v45, %s8237_s25  ;;  %v7584_v50 = vpop.permute.xlu1 %7583  ;;  %v5207_v33 = vpack.c.bf16 %v5080_v15, %v5079_v55  ;;  %v12242_v44 = vpack.i.bf16 %v4174_v17, %v4173_v47 }
 0x48d   : > { %v5175_v10 = vsel %vm1694_vm6, %v5143_v12, %v7570_v46  ;;  %v5176_v28 = vsel %vm1694_vm6, %v5144_v22, %v7571_v37  ;;  %v7585_v56 = vunpack.i.l.bf16 %v7584_v50  ;;  %v7586_v59 = vunpack.i.h.bf16 %v7584_v50 }
 0x48e   : > { %v7579_v40 = vpop.permute.xlu0 %7578  ;;  %v5208_v23 = vpack.c.bf16 %v5176_v28, %v5175_v10  ;;  %7873 = vrot.lane.b32.xlu1 %v7827_v16, %s8239_s14  ;;  %v8074_v16 = vld [vmem:[%s13391_s5 + $0x88] sm:$0xff]  }
 0x48f   : > { %v7581_v21 = vunpack.i.h.bf16 %v7579_v40  ;;  %v7580_v0 = vunpack.i.l.bf16 %v7579_v40  ;;  %v5017_v13 = vsel %vm459_vm0, %v11946_v52, %v7585_v56 }
 0x490   : > { %7868 = vrot.lane.b32.xlu0 %v12228_v18, %s8239_s14  ;;  %5449 = vmatprep.mubr.bf16.mxu1 %v5208_v23  ;;  %v7594_v48 = vpop.permute.xlu1 %7593 }
 0x491   : > { %5450 = vmatmul.mubr.bf16.vlgmr.msra.gmra.mrb[32].mxu1 %v5207_v33  ;;  %v7596_v2 = vunpack.i.h.bf16 %v7594_v48  ;;  %v7595_v58 = vunpack.i.l.bf16 %v7594_v48  ;;  %v5113_v15 = vsel %vm459_vm0, %v11981_v14, %v7580_v0  ;;  %v12256_v33 = vld [vmem:[#allocation2 + $0x141] sm:$0xff] }
 0x492   : > { %v7589_v53 = vpop.permute.xlu0 %7588  ;;  %7883 = vrot.lane.b32.xlu1 %v7837_v60, %s8238_s30  ;;  %6985 = vmatpush3.bf16.msra.mxu1 %v12109_v36  ;;  %v5114_v60 = vsel %vm459_vm0, %v11968_v43, %v7581_v21  ;;  %v5018_v36 = vsel %vm459_vm0, %v11956_v9, %v7586_v59  ;;  %v12254_v43 = vld [vmem:[#allocation2 + $0x139] sm:$0xff] }
 0x493   : > { %6984 = vmatprep.subr.bf16.mxu1 %v8074_v16  ;;  %v7591_v30 = vunpack.i.h.bf16 %v7589_v53  ;;  %v7590_v35 = vunpack.i.l.bf16 %v7589_v53  ;;  %v5049_v52 = vsel %vm1661_vm5, %v5017_v13, %v7595_v58  ;;  %v5050_v55 = vsel %vm1661_vm5, %v5018_v36, %v7596_v2  ;;  %v4175_v53 = vld [vmem:[#allocation2 + $0x150] sm:$0xff]  ;;  %v4176_v2 = vld [vmem:[#allocation2 + $0x158] sm:$0xff] }
 0x494   : > { %7878 = vrot.lane.b32.xlu0 %v11993_v27, %s8238_s30  ;;  %v7604_v7 = vpop.permute.xlu1 %7603  ;;  %v7897_v21 = vpack.i.bf16 %v12256_v33, %v12254_v43  ;;  %v12275_v36 = vpack.i.bf16 %v4176_v2, %v4175_v53  ;;  %v4177_v53 = vld [vmem:[#allocation2 + $0x168] sm:$0xff]  ;;  %v4178_v2 = vld [vmem:[#allocation2 + $0x170] sm:$0xff] }
 0x495   : > { %v7606_v37 = vunpack.i.h.bf16 %v7604_v7  ;;  %v7605_v46 = vunpack.i.l.bf16 %v7604_v7  ;;  %v5145_v14 = vsel %vm1661_vm5, %v5113_v15, %v7590_v35  ;;  %v5146_v28 = vsel %vm1661_vm5, %v5114_v60, %v7591_v30 }
 0x496   : > { %v7599_v12 = vpop.permute.xlu0 %7598  ;;  %7893 = vrot.lane.b32.xlu1 %v11989_v32, %s8237_s25  ;;  %6986 = vmatpush3.bf16.msra.mxu1 %v8074_v16 }
 0x497   : > { %v7601_v22 = vunpack.i.h.bf16 %v7599_v12  ;;  %v7600_v50 = vunpack.i.l.bf16 %v7599_v12  ;;  %v5081_v9 = vsel %vm1694_vm6, %v5049_v52, %v7605_v46  ;;  %v5082_v10 = vsel %vm1694_vm6, %v5050_v55, %v7606_v37 }
 0x498   : > { %7888 = vrot.lane.b32.xlu0 %v12242_v44, %s8237_s25  ;;  %v7614_v40 = vpop.permute.xlu1 %7613  ;;  %v5210_v56 = vpack.c.bf16 %v5082_v10, %v5081_v9  ;;  %v12289_v10 = vld [vmem:[#allocation2 + $0x151] sm:$0xff] }
 0x499   : > { %v5177_v32 = vsel %vm1694_vm6, %v5145_v14, %v7600_v50  ;;  %v5178_v23 = vsel %vm1694_vm6, %v5146_v28, %v7601_v22  ;;  %v7616_v17 = vunpack.i.h.bf16 %v7614_v40  ;;  %v7615_v0 = vunpack.i.l.bf16 %v7614_v40 }
 0x49a   : > { %v7609_v48 = vpop.permute.xlu0 %7608  ;;  %v5211_v59 = vpack.c.bf16 %v5178_v23, %v5177_v32  ;;  %7903 = vrot.lane.b32.xlu1 %v12202_v45, %s8239_s14 }
 0x49b   : > { %v7611_v58 = vunpack.i.h.bf16 %v7609_v48  ;;  %v7610_v16 = vunpack.i.l.bf16 %v7609_v48  ;;  %v5020_v37 = vsel %vm459_vm0, %v11944_v34, %v7616_v17  ;;  %v5019_v46 = vsel %vm459_vm0, %v11942_v19, %v7615_v0  ;;  %v12291_v19 = vld [vmem:[#allocation2 + $0x159] sm:$0xff] }
 0x49c   : > { %7898 = vrot.lane.b32.xlu0 %v7897_v21, %s8239_s14  ;;  %5457 = vmatprep.mubr.bf16.mxu1 %v5211_v59  ;;  %v7624_v47 = vpop.permute.xlu1 %7623  ;;  %v12303_v48 = vpack.i.bf16 %v12291_v19, %v12289_v10 }
 0x49d   : > { %5458 = vmatmul.mubr.bf16.gmra.mrb[36].mxu1 %v5210_v56  ;;  %v7626_v30 = vunpack.i.h.bf16 %v7624_v47  ;;  %v7625_v35 = vunpack.i.l.bf16 %v7624_v47  ;;  %v5116_v55 = vsel %vm459_vm0, %v12059_v11, %v7611_v58 }
 0x49e   : > { %v7619_v13 = vpop.permute.xlu0 %7618  ;;  %7913 = vrot.lane.b32.xlu1 %v12228_v18, %s8238_s30  ;;  %v5115_v18 = vsel %vm459_vm0, %v12057_v57, %v7610_v16 }
 0x49f   : > { %v7621_v7 = vunpack.i.h.bf16 %v7619_v13  ;;  %v7620_v60 = vunpack.i.l.bf16 %v7619_v13  ;;  %v5051_v12 = vsel %vm1661_vm5, %v5019_v46, %v7625_v35  ;;  %v5052_v22 = vsel %vm1661_vm5, %v5020_v37, %v7626_v30 }
 0x4a0   : > { %7908 = vrot.lane.b32.xlu0 %v12008_v6, %s8238_s30  ;;  %v7634_v45 = vpop.permute.xlu1 %7633 }
 0x4a1   : > { %v7636_v15 = vunpack.i.h.bf16 %v7634_v45  ;;  %v7635_v52 = vunpack.i.l.bf16 %v7634_v45  ;;  %v5147_v57 = vsel %vm1661_vm5, %v5115_v18, %v7620_v60  ;;  %v5148_v28 = vsel %vm1661_vm5, %v5116_v55, %v7621_v7 }
 0x4a2   : > { %v7629_v50 = vpop.permute.xlu0 %7628  ;;  %7923 = vrot.lane.b32.xlu1 %v11993_v27, %s8237_s25  ;;  %v12314_v45 = vpack.i.bf16 %v4178_v2, %v4177_v53 }
 0x4a3   : > { %v7631_v34 = vunpack.i.h.bf16 %v7629_v50  ;;  %v7630_v9 = vunpack.i.l.bf16 %v7629_v50  ;;  %v5083_v14 = vsel %vm1694_vm6, %v5051_v12, %v7635_v52  ;;  %v5084_v11 = vsel %vm1694_vm6, %v5052_v22, %v7636_v15  ;;  %v12328_v12 = vld [vmem:[#allocation2 + $0x169] sm:$0xff] }
 0x4a4   : > { %7918 = vrot.lane.b32.xlu0 %v12275_v36, %s8237_s25  ;;  %v7644_v40 = vpop.permute.xlu1 %7643  ;;  %v5213_v23 = vpack.c.bf16 %v5084_v11, %v5083_v14 }
 0x4a5   : > { %v5179_v27 = vsel %vm1694_vm6, %v5147_v57, %v7630_v9  ;;  %v5180_v32 = vsel %vm1694_vm6, %v5148_v28, %v7631_v34  ;;  %v7646_v17 = vunpack.i.h.bf16 %v7644_v40  ;;  %v7645_v0 = vunpack.i.l.bf16 %v7644_v40 }
 0x4a6   : > { %v7639_v56 = vpop.permute.xlu0 %7638  ;;  %7933 = vrot.lane.b32.xlu1 %v12242_v44, %s8239_s14  ;;  %v5214_v59 = vpack.c.bf16 %v5180_v32, %v5179_v27  ;;  %v4179_v27 = vld [vmem:[#allocation2 + $0x180] sm:$0xff] }
 0x4a7   : > { %v7641_v58 = vunpack.i.h.bf16 %v7639_v56  ;;  %v7640_v16 = vunpack.i.l.bf16 %v7639_v56  ;;  %v5022_v37 = vsel %vm459_vm0, %v12040_v26, %v7646_v17  ;;  %v5021_v46 = vsel %vm459_vm0, %v12038_v39, %v7645_v0  ;;  %v12330_v39 = vld [vmem:[#allocation2 + $0x171] sm:$0xff]  ;;  %v4180_v56 = vld [vmem:[#allocation2 + $0x188] sm:$0xff] }
 0x4a8   : > { %7928 = vrot.lane.b32.xlu0 %v12303_v48, %s8239_s14  ;;  %5465 = vmatprep.mubr.bf16.mxu1 %v5214_v59  ;;  %v7654_v47 = vpop.permute.xlu1 %7653  ;;  %v12342_v57 = vpack.i.bf16 %v12330_v39, %v12328_v12  ;;  %v4051_v59 = vld [vmem:[#allocation2 + $0x152] sm:$0xff] }
 0x4a9   : > { %5466 = vmatmul.mubr.bf16.gmra.mrb[40].mxu1 %v5213_v23  ;;  %v7656_v30 = vunpack.i.h.bf16 %v7654_v47  ;;  %v7655_v35 = vunpack.i.l.bf16 %v7654_v47  ;;  %v5117_v55 = vsel %vm459_vm0, %v12102_v3, %v7640_v16  ;;  %v4052_v47 = vld [vmem:[#allocation2 + $0x15a] sm:$0xff] }
 0x4aa   : > { %v7649_v13 = vpop.permute.xlu0 %7648  ;;  %7943 = vrot.lane.b32.xlu1 %v7897_v21, %s8238_s30  ;;  %v5118_v21 = vsel %vm459_vm0, %v12104_v25, %v7641_v58 }
 0x4ab   : > { %v7651_v7 = vunpack.i.h.bf16 %v7649_v13  ;;  %v7650_v44 = vunpack.i.l.bf16 %v7649_v13  ;;  %v5053_v49 = vsel %vm1661_vm5, %v5021_v46, %v7655_v35  ;;  %v5054_v29 = vsel %vm1661_vm5, %v5022_v37, %v7656_v30 }
 0x4ac   : > { %7938 = vrot.lane.b32.xlu0 %v7937_v54, %s8238_s30  ;;  %v7664_v60 = vpop.permute.xlu1 %7663  ;;  %v12354_v30 = vpack.i.bf16 %v4180_v56, %v4179_v27  ;;  %v7982_v35 = vpack.i.bf16 %v4052_v47, %v4051_v59  ;;  %v3969_v56 = vld [vmem:[#allocation2 + $0x78] sm:$0xff]  ;;  %v3970_v59 = vld [vmem:[#allocation2 + $0x80] sm:$0xff] }
 0x4ad   : > { %v7666_v15 = vunpack.i.h.bf16 %v7664_v60  ;;  %v7665_v52 = vunpack.i.l.bf16 %v7664_v60  ;;  %v5149_v3 = vsel %vm1661_vm5, %v5117_v55, %v7650_v44  ;;  %v5150_v50 = vsel %vm1661_vm5, %v5118_v21, %v7651_v7 }
 0x4ae   : > { %v7659_v54 = vpop.permute.xlu0 %7658  ;;  %7953 = vrot.lane.b32.xlu1 %v12008_v6, %s8237_s25 }
 0x4af   : > { %v7661_v26 = vunpack.i.h.bf16 %v7659_v54  ;;  %v7660_v18 = vunpack.i.l.bf16 %v7659_v54  ;;  %v5085_v22 = vsel %vm1694_vm6, %v5053_v49, %v7665_v52  ;;  %v5086_v25 = vsel %vm1694_vm6, %v5054_v29, %v7666_v15  ;;  %v12367_v52 = vld [vmem:[#allocation2 + $0x181] sm:$0xff] }
 0x4b0   : > { %7948 = vrot.lane.b32.xlu0 %v12314_v45, %s8237_s25  ;;  %v7674_v34 = vpop.permute.xlu1 %7673  ;;  %v5216_v14 = vpack.c.bf16 %v5086_v25, %v5085_v22 }
 0x4b1   : > { %v5181_v6 = vsel %vm1694_vm6, %v5149_v3, %v7660_v18  ;;  %v5182_v9 = vsel %vm1694_vm6, %v5150_v50, %v7661_v26  ;;  %v7676_v32 = vunpack.i.h.bf16 %v7674_v34  ;;  %v7675_v23 = vunpack.i.l.bf16 %v7674_v34  ;;  %v4181_v50 = vld [vmem:[#allocation2 + $0x198] sm:$0xff] }
 0x4b2   : > { %v7669_v11 = vpop.permute.xlu0 %7668  ;;  %7963 = vrot.lane.b32.xlu1 %v12275_v36, %s8239_s14  ;;  %v5217_v28 = vpack.c.bf16 %v5182_v9, %v5181_v6  ;;  %v7997_v9 = vpack.i.bf16 %v12095_v4, %v12093_v5 }
 0x4b3   : > { %v7671_v17 = vunpack.i.h.bf16 %v7669_v11  ;;  %v7670_v0 = vunpack.i.l.bf16 %v7669_v11  ;;  %v5024_v7 = vsel %vm459_vm0, %v12089_v41, %v7676_v32  ;;  %v5023_v44 = vsel %vm459_vm0, %v12087_v1, %v7675_v23  ;;  %v12369_v1 = vld [vmem:[#allocation2 + $0x189] sm:$0xff] }
 0x4b4   : > { %7958 = vrot.lane.b32.xlu0 %v12342_v57, %s8239_s14  ;;  %5473 = vmatprep.mubr.bf16.mxu1 %v5217_v28  ;;  %v7684_v40 = vpop.permute.xlu1 %7683  ;;  %v7987_v22 = vpack.i.bf16 %v12369_v1, %v12367_v52  ;;  %v4053_v11 = vld [vmem:[#allocation2 + $0x16a] sm:$0xff]  ;;  %v4054_v28 = vld [vmem:[#allocation2 + $0x172] sm:$0xff] }
 0x4b5   : > { %5474 = vmatmul.mubr.bf16.gmra.mrb[44].mxu1 %v5216_v14  ;;  %v7686_v2 = vunpack.i.h.bf16 %v7684_v40  ;;  %v7685_v58 = vunpack.i.l.bf16 %v7684_v40  ;;  %v5119_v46 = vsel %vm459_vm0, %v12133_v61, %v7670_v0  ;;  %v4182_v14 = vld [vmem:[#allocation2 + $0x1a0] sm:$0xff] }
 0x4b6   : > { %v7679_v53 = vpop.permute.xlu0 %7678  ;;  %7973 = vrot.lane.b32.xlu1 %v12303_v48, %s8238_s30  ;;  %v5120_v48 = vsel %vm459_vm0, %v12135_v8, %v7671_v17 }
 0x4b7   : > { %v7681_v36 = vunpack.i.h.bf16 %v7679_v53  ;;  %v7680_v16 = vunpack.i.l.bf16 %v7679_v53  ;;  %v5055_v62 = vsel %vm1661_vm5, %v5023_v44, %v7685_v58  ;;  %v5056_v63 = vsel %vm1661_vm5, %v5024_v7, %v7686_v2 }
 0x4b8   : > { %7968 = vrot.lane.b32.xlu0 %v7967_v24, %s8238_s30  ;;  %v7694_v13 = vpop.permute.xlu1 %7693  ;;  %v8007_v53 = vpack.i.bf16 %v4182_v14, %v4181_v50  ;;  %v8012_v2 = vpack.i.bf16 %v4054_v28, %v4053_v11  ;;  %v4099_v28 = vld [vmem:[#allocation2 + $0xa9] sm:$0xff] }
 0x4b9   : > { %v7696_v60 = vunpack.i.h.bf16 %v7694_v13  ;;  %v7695_v37 = vunpack.i.l.bf16 %v7694_v13  ;;  %v5151_v55 = vsel %vm1661_vm5, %v5119_v46, %v7680_v16  ;;  %v5152_v61 = vsel %vm1661_vm5, %v5120_v48, %v7681_v36  ;;  %v4213_v46 = vld [vmem:[#allocation2 + $0x199] sm:$0xff] }
 0x4ba   : > { %v7689_v24 = vpop.permute.xlu0 %7688  ;;  %7983 = vrot.lane.b32.xlu1 %v7982_v35, %s8237_s25 }
 0x4bb   : > { %v7691_v15 = vunpack.i.h.bf16 %v7689_v24  ;;  %v7690_v41 = vunpack.i.l.bf16 %v7689_v24  ;;  %v5087_v21 = vsel %vm1694_vm6, %v5055_v62, %v7695_v37  ;;  %v5088_v8 = vsel %vm1694_vm6, %v5056_v63, %v7696_v60  ;;  %v4214_v62 = vld [vmem:[#allocation2 + $0x1a1] sm:$0xff] }
 0x4bc   : > { %7978 = vrot.lane.b32.xlu0 %v12354_v30, %s8237_s25  ;;  %v7704_v49 = vpop.permute.xlu1 %7703  ;;  %v5219_v26 = vpack.c.bf16 %v5088_v8, %v5087_v21 }
 0x4bd   : > { %v5183_v29 = vsel %vm1694_vm6, %v5151_v55, %v7690_v41  ;;  %v5184_v54 = vsel %vm1694_vm6, %v5152_v61, %v7691_v15  ;;  %v7706_v34 = vunpack.i.h.bf16 %v7704_v49  ;;  %v7705_v6 = vunpack.i.l.bf16 %v7704_v49 }
 0x4be   : > { %v7699_v18 = vpop.permute.xlu0 %7698  ;;  %7993 = vrot.lane.b32.xlu1 %v12314_v45, %s8239_s14  ;;  %v5220_v25 = vpack.c.bf16 %v5184_v54, %v5183_v29  ;;  %v8017_v61 = vpack.i.bf16 %v4214_v62, %v4213_v46 }
 0x4bf   : > { %v7701_v40 = vunpack.i.h.bf16 %v7699_v18  ;;  %v7700_v27 = vunpack.i.l.bf16 %v7699_v18  ;;  %v5026_v58 = vsel %vm459_vm0, %v3970_v59, %v7706_v34  ;;  %v5025_v36 = vsel %vm459_vm0, %v3969_v56, %v7705_v6  ;;  %v3971_v34 = vld [vmem:[#allocation2 + $0x90] sm:$0xff]  ;;  %v3972_v6 = vld [vmem:[#allocation2 + $0x98] sm:$0xff] }
 0x4c0   : > { %7988 = vrot.lane.b32.xlu0 %v7987_v22, %s8239_s14  ;;  %5481 = vmatprep.mubr.bf16.mxu1 %v5220_v25  ;;  %v7714_v3 = vpop.permute.xlu1 %7713 }
 0x4c1   : > { %5482 = vmatmul.mubr.bf16.gmra.mrb[48].mxu1 %v5219_v26  ;;  %v7716_v23 = vunpack.i.h.bf16 %v7714_v3  ;;  %v7715_v45 = vunpack.i.l.bf16 %v7714_v3  ;;  %v5122_v35 = vsel %vm459_vm0, %v12153_v42, %v7701_v40 }
 0x4c2   : > { %v7709_v32 = vpop.permute.xlu0 %7708  ;;  %8003 = vrot.lane.b32.xlu1 %v12342_v57, %s8238_s30  ;;  %v5121_v57 = vsel %vm459_vm0, %v12151_v38, %v7700_v27 }
 0x4c3   : > { %v7711_v47 = vunpack.i.h.bf16 %v7709_v32  ;;  %v7710_v17 = vunpack.i.l.bf16 %v7709_v32  ;;  %v5057_v7 = vsel %vm1661_vm5, %v5025_v36, %v7715_v45  ;;  %v5058_v44 = vsel %vm1661_vm5, %v5026_v58, %v7716_v23 }
 0x4c4   : > { %7998 = vrot.lane.b32.xlu0 %v7997_v9, %s8238_s30  ;;  %v7724_v0 = vpop.permute.xlu1 %7723 }
 0x4c5   : > { %v7726_v16 = vunpack.i.h.bf16 %v7724_v0  ;;  %v7725_v13 = vunpack.i.l.bf16 %v7724_v0  ;;  %v5153_v42 = vsel %vm1661_vm5, %v5121_v57, %v7710_v17  ;;  %v5154_v15 = vsel %vm1661_vm5, %v5122_v35, %v7711_v47 }
 0x4c6   : > { %v7719_v60 = vpop.permute.xlu0 %7718  ;;  %8013 = vrot.lane.b32.xlu1 %v8012_v2, %s8237_s25 }
 0x4c7   : > { %v7721_v37 = vunpack.i.h.bf16 %v7719_v60  ;;  %v7720_v48 = vunpack.i.l.bf16 %v7719_v60  ;;  %v5089_v63 = vsel %vm1694_vm6, %v5057_v7, %v7725_v13  ;;  %v5090_v24 = vsel %vm1694_vm6, %v5058_v44, %v7726_v16 }
 0x4c8   : > { %8008 = vrot.lane.b32.xlu0 %v8007_v53, %s8237_s25  ;;  %v7734_v38 = vpop.permute.xlu1 %7733  ;;  %v5222_v8 = vpack.c.bf16 %v5090_v24, %v5089_v63  ;;  %s417_s25 = sand.u32 1, %s8221_s18  }
 0x4c9   : > { %v5185_v41 = vsel %vm1694_vm6, %v5153_v42, %v7720_v48  ;;  %v5186_v21 = vsel %vm1694_vm6, %v5154_v15, %v7721_v37  ;;  %v7736_v54 = vunpack.i.h.bf16 %v7734_v38  ;;  %v7735_v26 = vunpack.i.l.bf16 %v7734_v38  ;;  %v3973_v38 = vld [vmem:[#allocation2 + $0xa8] sm:$0xff]  ;;  %s6470_s30 = sshll.u32 %s417_s25, 8  ;;  %s13345_s12 = scalar_lea.sflag [#allocation5], %s417_s25 }
 0x4ca   : > { %v7729_v55 = vpop.permute.xlu0 %7728  ;;  %8023 = vrot.lane.b32.xlu1 %v12354_v30, %s8239_s14  ;;  %v5223_v49 = vpack.c.bf16 %v5186_v21, %v5185_v41  ;;  %v4100_v30 = vld [vmem:[#allocation2 + $0xb1] sm:$0xff] }
 0x4cb   : > { %v7731_v18 = vunpack.i.h.bf16 %v7729_v55  ;;  %v7730_v22 = vunpack.i.l.bf16 %v7729_v55  ;;  %v5028_v40 = vsel %vm459_vm0, %v3972_v6, %v7736_v54  ;;  %v5027_v27 = vsel %vm459_vm0, %v3971_v34, %v7735_v26  ;;  %v3974_v41 = vld [vmem:[#allocation2 + $0xb0] sm:$0xff] }
 0x4cc   : > { %8018 = vrot.lane.b32.xlu0 %v8017_v61, %s8239_s14  ;;  %5489 = vmatprep.mubr.bf16.mxu1 %v5223_v49  ;;  %v7744_v29 = vpop.permute.xlu1 %7743  ;;  %v4101_v61 = vld [vmem:[#allocation2 + $0xc1] sm:$0xff]  ;;  %v4102_v49 = vld [vmem:[#allocation2 + $0xc9] sm:$0xff]  ;;  %s13252_s14 = scalar_lea.vmem [#allocation9], %s6470_s30 }
 0x4cd   : > { %5490 = vmatmul.mubr.bf16.gmra.mrb[52].mxu1 %v5222_v8  ;;  %v7746_v3 = vunpack.i.h.bf16 %v7744_v29  ;;  %v7745_v50 = vunpack.i.l.bf16 %v7744_v29  ;;  %v5124_v45 = vsel %vm459_vm0, %v4100_v30, %v7731_v18  ;;  %v5123_v56 = vsel %vm459_vm0, %v4099_v28, %v7730_v22  ;;  %s6367_s24 = sshll.u32 %s13252_s14, 4  ;;  %s13313_s24 = int_to_ptr.vmem [resolvable:$true] %s6367_s24 }
 0x4ce   : > { %v7739_v25 = vpop.permute.xlu0 %7738  ;;  %s8159_s17 = scalar_lea.vmem %s13313_s24, 4096  ;;  %p8166_p13 = scmp.lt.s32.totalorder %s13313_s24, %s8164_s20 }
 0x4cf   : > { %v7741_v9 = vunpack.i.h.bf16 %v7739_v25  ;;  %v7740_v14 = vunpack.i.l.bf16 %v7739_v25  ;;  %v5059_v59 = vsel %vm1661_vm5, %v5027_v27, %v7745_v50  ;;  %v5060_v47 = vsel %vm1661_vm5, %v5028_v40, %v7746_v3  ;;  %p8160_p12 = scmp.ne.s32.totalorder %s13313_s24, %s8159_s17  ;;  %p8167_p1 = scmp.lt.s32.totalorder %s8165_s13, %s8159_s17 }
 0x4d0   : > { %v7754_v11 = vpop.permute.xlu1 %7753 }
 0x4d1   : > { %v7756_v32 = vunpack.i.h.bf16 %v7754_v11  ;;  %v7755_v23 = vunpack.i.l.bf16 %v7754_v11  ;;  %v5155_v36 = vsel %vm1661_vm5, %v5123_v56, %v7740_v14  ;;  %v5156_v16 = vsel %vm1661_vm5, %v5124_v45, %v7741_v9  ;;  %p8161_p8 = pnand %p8160_p12, %p14047_p7  ;;  %p8168_p6 = por %p8167_p1, %p8166_p13 }
 0x4d2   : > { %v7749_v17 = vpop.permute.xlu0 %7748 }
 0x4d3   : > { %v7751_v0 = vunpack.i.h.bf16 %v7749_v17  ;;  %v7750_v53 = vunpack.i.l.bf16 %v7749_v17  ;;  %v5091_v2 = vsel %vm1694_vm6, %v5059_v59, %v7755_v23  ;;  %v5092_v58 = vsel %vm1694_vm6, %v5060_v47, %v7756_v32  ;;  %p8162_p11 = pneg %p8161_p8 }
 0x4d4   : > { %v7764_v13 = vpop.permute.xlu1 %7763  ;;  %v5225_v7 = vpack.c.bf16 %v5092_v58, %v5091_v2 }
 0x4d5   : > { %v5187_v35 = vsel %vm1694_vm6, %v5155_v36, %v7750_v53  ;;  %v5188_v57 = vsel %vm1694_vm6, %v5156_v16, %v7751_v0  ;;  %v7766_v48 = vunpack.i.h.bf16 %v7764_v13  ;;  %v7765_v46 = vunpack.i.l.bf16 %v7764_v13  ;;  %p8169_p9 = pnand %p8168_p6, %p8162_p11 }
 0x4d6   : > { %v7759_v44 = vpop.permute.xlu0 %7758  ;;  %v5226_v60 = vpack.c.bf16 %v5188_v57, %v5187_v35 }
 0x4d7   : > { %v7761_v62 = vunpack.i.h.bf16 %v7759_v44  ;;  %v7760_v63 = vunpack.i.l.bf16 %v7759_v44  ;;  %v5030_v29 = vsel %vm459_vm0, %v3974_v41, %v7766_v48  ;;  %v5029_v54 = vsel %vm459_vm0, %v3973_v38, %v7765_v46  ;;  %v3976_v44 = vld [vmem:[#allocation2 + $0xc8] sm:$0xff]  ;;  %v4103_v46 = vld [vmem:[#allocation2 + $0xd9] sm:$0xff] }
 0x4d8   : > { %5497 = vmatprep.mubr.bf16.mxu1 %v5226_v60  ;;  %v7774_v37 = vpop.permute.xlu1 %7773 }
 0x4d9   : > { %5498 = vmatmul.mubr.bf16.gmra.mrb[56].mxu1 %v5225_v7  ;;  %v7776_v42 = vunpack.i.h.bf16 %v7774_v37  ;;  %v7775_v15 = vunpack.i.l.bf16 %v7774_v37  ;;  %v5126_v22 = vsel %vm459_vm0, %v4102_v49, %v7761_v62  ;;  %v5125_v25 = vsel %vm459_vm0, %v4101_v61, %v7760_v63  ;;  %v3975_v7 = vld [vmem:[#allocation2 + $0xc0] sm:$0xff] }
 0x4da   : > { %v7769_v24 = vpop.permute.xlu0 %7768  ;;  %v4104_v62 = vld [vmem:[#allocation2 + $0xe1] sm:$0xff] }
 0x4db   : > { %v7771_v21 = vunpack.i.h.bf16 %v7769_v24  ;;  %v7770_v8 = vunpack.i.l.bf16 %v7769_v24  ;;  %v5061_v3 = vsel %vm1661_vm5, %v5029_v54, %v7775_v15  ;;  %v5062_v50 = vsel %vm1661_vm5, %v5030_v29, %v7776_v42 }
 0x4dc   : > { %v7784_v55 = vpop.permute.xlu1 %7783 }
 0x4dd   : > { %v7786_v26 = vunpack.i.h.bf16 %v7784_v55  ;;  %v7785_v18 = vunpack.i.l.bf16 %v7784_v55  ;;  %v5157_v28 = vsel %vm1661_vm5, %v5125_v25, %v7770_v8  ;;  %v5158_v30 = vsel %vm1661_vm5, %v5126_v22, %v7771_v21 }
 0x4de   : > { %v7779_v34 = vpop.permute.xlu0 %7778 }
 0x4df   : > { %v7781_v6 = vunpack.i.h.bf16 %v7779_v34  ;;  %v7780_v9 = vunpack.i.l.bf16 %v7779_v34  ;;  %v5093_v14 = vsel %vm1694_vm6, %v5061_v3, %v7785_v18  ;;  %v5094_v11 = vsel %vm1694_vm6, %v5062_v50, %v7786_v26 }
 0x4e0   : > { %v7794_v40 = vpop.permute.xlu1 %7793  ;;  %v5228_v23 = vpack.c.bf16 %v5094_v11, %v5093_v14 }
 0x4e1   : > { %v5189_v27 = vsel %vm1694_vm6, %v5157_v28, %v7780_v9  ;;  %v5190_v32 = vsel %vm1694_vm6, %v5158_v30, %v7781_v6  ;;  %v7796_v53 = vunpack.i.h.bf16 %v7794_v40  ;;  %v7795_v2 = vunpack.i.l.bf16 %v7794_v40 }
 0x4e2   : > { %v7789_v45 = vpop.permute.xlu0 %7788  ;;  %v5229_v56 = vpack.c.bf16 %v5190_v32, %v5189_v27  ;;  %v12432_v59 = vpop.f32.mrb[64].mxu0 }
 0x4e3   : > { %v12434_v47 = vpop.f32.mrb[65].mxu0  ;;  %v7791_v36 = vunpack.i.h.bf16 %v7789_v45  ;;  %v7790_v16 = vunpack.i.l.bf16 %v7789_v45  ;;  %v5032_v63 = vsel %vm459_vm0, %v3976_v44, %v7796_v53  ;;  %v5031_v24 = vsel %vm459_vm0, %v3975_v7, %v7795_v2  ;;  %v4105_v44 = vld [vmem:[#allocation2 + $0xf1] sm:$0xff] }
 0x4e4   : > { %5505 = vmatprep.mubr.bf16.mxu1 %v5229_v56  ;;  %v12436_v17 = vpop.f32.mrb[66].mxu0  ;;  %v7804_v0 = vpop.permute.xlu1 %7803 }
 0x4e5   : > { %5506 = vmatmul.mubr.bf16.gmra.mrb[60].mxu1 %v5228_v23  ;;  %v12438_v58 = vpop.f32.mrb[67].mxu0  ;;  %v7806_v35 = vunpack.i.h.bf16 %v7804_v0  ;;  %v7805_v57 = vunpack.i.l.bf16 %v7804_v0  ;;  %v5128_v38 = vsel %vm459_vm0, %v4104_v62, %v7791_v36  ;;  %v5127_v41 = vsel %vm459_vm0, %v4103_v46, %v7790_v16  ;;  %v3977_v36 = vld [vmem:[#allocation2 + $0xd8] sm:$0xff]  ;;  %v3978_v16 = vld [vmem:[#allocation2 + $0xe0] sm:$0xff] }
 0x4e6   : > { %v7799_v13 = vpop.permute.xlu0 %7798 }
 0x4e7   : > { %v7801_v60 = vunpack.i.h.bf16 %v7799_v13  ;;  %v7800_v37 = vunpack.i.l.bf16 %v7799_v13  ;;  %v5063_v21 = vsel %vm1661_vm5, %v5031_v24, %v7805_v57  ;;  %v5064_v8 = vsel %vm1661_vm5, %v5032_v63, %v7806_v35 }
 0x4e8   : > { %v7814_v48 = vpop.permute.xlu1 %7813 }
 0x4e9   : > { %v7816_v42 = vunpack.i.h.bf16 %v7814_v48  ;;  %v7815_v15 = vunpack.i.l.bf16 %v7814_v48  ;;  %v5159_v22 = vsel %vm1661_vm5, %v5127_v41, %v7800_v37  ;;  %v5160_v25 = vsel %vm1661_vm5, %v5128_v38, %v7801_v60  ;;  %v4106_v60 = vld [vmem:[#allocation2 + $0xf9] sm:$0xff] }
 0x4ea   : > { %v7809_v55 = vpop.permute.xlu0 %7808  ;;  %v12446_v61 = vpop.f32.mrb[68].mxu0 }
 0x4eb   : > { %v7811_v49 = vunpack.i.h.bf16 %v7809_v55  ;;  %v7810_v29 = vunpack.i.l.bf16 %v7809_v55  ;;  %v12448_v54 = vpop.f32.mrb[69].mxu0  ;;  %v5095_v26 = vsel %vm1694_vm6, %v5063_v21, %v7815_v15  ;;  %v5096_v18 = vsel %vm1694_vm6, %v5064_v8, %v7816_v42 }
 0x4ec   : > { %v12454_v3 = vpop.f32.mrb[70].mxu0  ;;  %v7824_v50 = vpop.permute.xlu1 %7823  ;;  %v5231_v14 = vpack.c.bf16 %v5096_v18, %v5095_v26 }
 0x4ed   : > { %v12456_v34 = vpop.f32.mrb[71].mxu0  ;;  %v5191_v6 = vsel %vm1694_vm6, %v5159_v22, %v7810_v29  ;;  %v5192_v9 = vsel %vm1694_vm6, %v5160_v25, %v7811_v49  ;;  %v7826_v40 = vunpack.i.h.bf16 %v7824_v50  ;;  %v7825_v27 = vunpack.i.l.bf16 %v7824_v50 }
 0x4ee   : > { %v7819_v11 = vpop.permute.xlu0 %7818  ;;  %v5232_v28 = vpack.c.bf16 %v5192_v9, %v5191_v6 }
 0x4ef   : > { %v7821_v32 = vunpack.i.h.bf16 %v7819_v11  ;;  %v7820_v23 = vunpack.i.l.bf16 %v7819_v11  ;;  %v5034_v37 = vsel %vm459_vm0, %v3978_v16, %v7826_v40  ;;  %v5033_v48 = vsel %vm459_vm0, %v3977_v36, %v7825_v27  ;;  %v3979_v16 = vld [vmem:[#allocation2 + $0xf0] sm:$0xff] }
 0x4f0   : > { %5513 = vmatprep.mubr.bf16.mxu1 %v5232_v28  ;;  %v7834_v30 = vpop.permute.xlu1 %7833 }
 0x4f1   : > { %5514 = vmatmul.mubr.bf16.gmra.mrb[64].mxu1 %v5231_v14  ;;  %v7836_v56 = vunpack.i.h.bf16 %v7834_v30  ;;  %v7835_v0 = vunpack.i.l.bf16 %v7834_v30  ;;  %v5130_v24 = vsel %vm459_vm0, %v4106_v60, %v7821_v32  ;;  %v5129_v42 = vsel %vm459_vm0, %v4105_v44, %v7820_v23  ;;  %v4107_v60 = vld [vmem:[#allocation2 + $0x109] sm:$0xff] }
 0x4f2   : > { %v7829_v45 = vpop.permute.xlu0 %7828  ;;  %v12460_v53 = vpop.f32.mrb[72].mxu0 }
 0x4f3   : > { %v12462_v2 = vpop.f32.mrb[73].mxu0  ;;  %v7831_v13 = vunpack.i.h.bf16 %v7829_v45  ;;  %v7830_v35 = vunpack.i.l.bf16 %v7829_v45  ;;  %v5065_v15 = vsel %vm1661_vm5, %v5033_v48, %v7835_v0  ;;  %v5066_v38 = vsel %vm1661_vm5, %v5034_v37, %v7836_v56  ;;  %v4108_v37 = vld [vmem:[#allocation2 + $0x111] sm:$0xff] }
 0x4f4   : > { %v12464_v57 = vpop.f32.mrb[74].mxu0  ;;  %v7844_v7 = vpop.permute.xlu1 %7843 }
 0x4f5   : > { %v7846_v46 = vunpack.i.h.bf16 %v7844_v7  ;;  %v7845_v62 = vunpack.i.l.bf16 %v7844_v7  ;;  %v12468_v63 = vpop.f32.mrb[75].mxu0  ;;  %v5161_v29 = vsel %vm1661_vm5, %v5129_v42, %v7830_v35  ;;  %v5162_v26 = vsel %vm1661_vm5, %v5130_v24, %v7831_v13  ;;  %v3980_v13 = vld [vmem:[#allocation2 + $0xf8] sm:$0xff] }
 0x4f6   : > { %v7839_v41 = vpop.permute.xlu0 %7838 }
 0x4f7   : > { %v7841_v21 = vunpack.i.h.bf16 %v7839_v41  ;;  %v7840_v8 = vunpack.i.l.bf16 %v7839_v41  ;;  %v5097_v55 = vsel %vm1694_vm6, %v5065_v15, %v7845_v62  ;;  %v5098_v49 = vsel %vm1694_vm6, %v5066_v38, %v7846_v46 }
 0x4f8   : > { %v7854_v18 = vpop.permute.xlu1 %7853  ;;  %v5234_v50 = vpack.c.bf16 %v5098_v49, %v5097_v55 }
 0x4f9   : > { %v5193_v22 = vsel %vm1694_vm6, %v5161_v29, %v7840_v8  ;;  %v5194_v25 = vsel %vm1694_vm6, %v5162_v26, %v7841_v21  ;;  %v7856_v40 = vunpack.i.h.bf16 %v7854_v18  ;;  %v7855_v27 = vunpack.i.l.bf16 %v7854_v18 }
 0x4fa   : > { %v7849_v6 = vpop.permute.xlu0 %7848  ;;  %v5235_v9 = vpack.c.bf16 %v5194_v25, %v5193_v22  ;;  %v12480_v14 = vpop.f32.mrb[76].mxu0 }
 0x4fb   : > { %v12482_v11 = vpop.f32.mrb[77].mxu0  ;;  %v7851_v23 = vunpack.i.h.bf16 %v7849_v6  ;;  %v7850_v45 = vunpack.i.l.bf16 %v7849_v6  ;;  %v5036_v48 = vsel %vm459_vm0, %v3980_v13, %v7856_v40  ;;  %v5035_v46 = vsel %vm459_vm0, %v3979_v16, %v7855_v27 }
 0x4fc   : > { %5521 = vmatprep.mubr.bf16.mxu1 %v5235_v9  ;;  %v12484_v28 = vpop.f32.mrb[78].mxu0  ;;  %v7864_v30 = vpop.permute.xlu1 %7863 }
 0x4fd   : > { %5522 = vmatmul.mubr.bf16.gmra.mrb[68].mxu1 %v5234_v50  ;;  %v12486_v32 = vpop.f32.mrb[79].mxu0  ;;  %v7866_v0 = vunpack.i.h.bf16 %v7864_v30  ;;  %v7865_v36 = vunpack.i.l.bf16 %v7864_v30  ;;  %v5132_v42 = vsel %vm459_vm0, %v4108_v37, %v7851_v23  ;;  %v5131_v15 = vsel %vm459_vm0, %v4107_v60, %v7850_v45 }
 0x4fe   : > { %v7859_v56 = vpop.permute.xlu0 %7858 }
 0x4ff   : > { %v7861_v35 = vunpack.i.h.bf16 %v7859_v56  ;;  %v7860_v7 = vunpack.i.l.bf16 %v7859_v56  ;;  %v5067_v38 = vsel %vm1661_vm5, %v5035_v46, %v7865_v36  ;;  %v5068_v41 = vsel %vm1661_vm5, %v5036_v48, %v7866_v0  ;;  %v3981_v48 = vld [vmem:[#allocation2 + $0x108] sm:$0xff]  ;;  %v3982_v46 = vld [vmem:[#allocation2 + $0x110] sm:$0xff] }
 0x500   : > { %v7874_v44 = vpop.permute.xlu1 %7873 }
 0x501   : > { %v7876_v62 = vunpack.i.h.bf16 %v7874_v44  ;;  %v7875_v24 = vunpack.i.l.bf16 %v7874_v44  ;;  %v5163_v22 = vsel %vm1661_vm5, %v5131_v15, %v7860_v7  ;;  %v5164_v25 = vsel %vm1661_vm5, %v5132_v42, %v7861_v35 }
 0x502   : > { %v7869_v21 = vpop.permute.xlu0 %7868  ;;  %v12494_v8 = vpop.f32.mrb[80].mxu0 }
 0x503   : > { %v7871_v55 = vunpack.i.h.bf16 %v7869_v21  ;;  %v7870_v49 = vunpack.i.l.bf16 %v7869_v21  ;;  %v12496_v29 = vpop.f32.mrb[81].mxu0  ;;  %v5099_v26 = vsel %vm1694_vm6, %v5067_v38, %v7875_v24  ;;  %v5100_v18 = vsel %vm1694_vm6, %v5068_v41, %v7876_v62 }
 0x504   : > { %v12502_v50 = vpop.f32.mrb[82].mxu0  ;;  %v7884_v6 = vpop.permute.xlu1 %7883  ;;  %v5237_v27 = vpack.c.bf16 %v5100_v18, %v5099_v26 }
 0x505   : > { %v12504_v9 = vpop.f32.mrb[83].mxu0  ;;  %v5195_v30 = vsel %vm1694_vm6, %v5163_v22, %v7870_v49  ;;  %v5196_v40 = vsel %vm1694_vm6, %v5164_v25, %v7871_v55  ;;  %v7886_v0 = vunpack.i.h.bf16 %v7884_v6  ;;  %v7885_v36 = vunpack.i.l.bf16 %v7884_v6 }
 0x506   : > { %v7879_v23 = vpop.permute.xlu0 %7878  ;;  %v5238_v45 = vpack.c.bf16 %v5196_v40, %v5195_v30 }
 0x507   : > { %v7881_v16 = vunpack.i.h.bf16 %v7879_v23  ;;  %v7880_v13 = vunpack.i.l.bf16 %v7879_v23  ;;  %v5038_v38 = vsel %vm459_vm0, %v3982_v46, %v7886_v0  ;;  %v5037_v41 = vsel %vm459_vm0, %v3981_v48, %v7885_v36 }
 0x508   : > { %5529 = vmatprep.mubr.bf16.mxu1 %v5238_v45  ;;  %v7894_v56 = vpop.permute.xlu1 %7893 }
 0x509   : > { %5530 = vmatmul.mubr.bf16.gmra.mrb[72].mxu1 %v5237_v27  ;;  %v7896_v7 = vunpack.i.h.bf16 %v7894_v56  ;;  %v7895_v44 = vunpack.i.l.bf16 %v7894_v56  ;;  %v5134_v26 = vsel %vm459_vm0, %v12218_v51, %v7881_v16  ;;  %v5133_v18 = vsel %vm459_vm0, %v12216_v20, %v7880_v13 }
 0x50a   : > { %v7889_v35 = vpop.permute.xlu0 %7888  ;;  %v12508_v60 = vpop.f32.mrb[84].mxu0 }
 0x50b   : > { %v12510_v37 = vpop.f32.mrb[85].mxu0  ;;  %v7891_v62 = vunpack.i.h.bf16 %v7889_v35  ;;  %v7890_v24 = vunpack.i.l.bf16 %v7889_v35  ;;  %v5069_v22 = vsel %vm1661_vm5, %v5037_v41, %v7895_v44  ;;  %v5070_v25 = vsel %vm1661_vm5, %v5038_v38, %v7896_v7 }
 0x50c   : > { %v12512_v42 = vpop.f32.mrb[86].mxu0  ;;  %v7904_v15 = vpop.permute.xlu1 %7903 }
 0x50d   : > { %v7906_v21 = vunpack.i.h.bf16 %v7904_v15  ;;  %v7905_v55 = vunpack.i.l.bf16 %v7904_v15  ;;  %v12516_v49 = vpop.f32.mrb[87].mxu0  ;;  %v5165_v45 = vsel %vm1661_vm5, %v5133_v18, %v7890_v24  ;;  %v5166_v56 = vsel %vm1661_vm5, %v5134_v26, %v7891_v62  ;;  %v3983_v26 = vld [vmem:[#allocation2 + $0x120] sm:$0xff]  ;;  %v3984_v18 = vld [vmem:[#allocation2 + $0x128] sm:$0xff] }
 0x50e   : > { %v7899_v6 = vpop.permute.xlu0 %7898 }
 0x50f   : > { %v7901_v30 = vunpack.i.h.bf16 %v7899_v6  ;;  %v7900_v40 = vunpack.i.l.bf16 %v7899_v6  ;;  %v5101_v27 = vsel %vm1694_vm6, %v5069_v22, %v7905_v55  ;;  %v5102_v23 = vsel %vm1694_vm6, %v5070_v25, %v7906_v21 }
 0x510   : > { %v7914_v0 = vpop.permute.xlu1 %7913  ;;  %v5240_v36 = vpack.c.bf16 %v5102_v23, %v5101_v27 }
 0x511   : > { %v5197_v51 = vsel %vm1694_vm6, %v5165_v45, %v7900_v40  ;;  %v5198_v20 = vsel %vm1694_vm6, %v5166_v56, %v7901_v30  ;;  %v7916_v46 = vunpack.i.h.bf16 %v7914_v0  ;;  %v7915_v24 = vunpack.i.l.bf16 %v7914_v0 }
 0x512   : > { %v7909_v16 = vpop.permute.xlu0 %7908  ;;  %v5241_v13 = vpack.c.bf16 %v5198_v20, %v5197_v51  ;;  %v12530_v35 = vpop.f32.mrb[88].mxu0 }
 0x513   : > { %v12532_v7 = vpop.f32.mrb[89].mxu0  ;;  %v7911_v15 = vunpack.i.h.bf16 %v7909_v16  ;;  %v7910_v38 = vunpack.i.l.bf16 %v7909_v16  ;;  %v5040_v30 = vsel %vm459_vm0, %v3984_v18, %v7916_v46  ;;  %v5039_v40 = vsel %vm459_vm0, %v3983_v26, %v7915_v24 }
 0x514   : > { %5537 = vmatprep.mubr.bf16.mxu1 %v5241_v13  ;;  %v12534_v44 = vpop.f32.mrb[90].mxu0  ;;  %v7924_v48 = vpop.permute.xlu1 %7923 }
 0x515   : > { %5538 = vmatmul.mubr.bf16.gmra.mrb[76].mxu1 %v5240_v36  ;;  %v12536_v62 = vpop.f32.mrb[91].mxu0  ;;  %v7926_v21 = vunpack.i.h.bf16 %v7924_v48  ;;  %v7925_v55 = vunpack.i.l.bf16 %v7924_v48  ;;  %v5136_v45 = vsel %vm459_vm0, %v12256_v33, %v7911_v15  ;;  %v5135_v56 = vsel %vm459_vm0, %v12254_v43, %v7910_v38 }
 0x516   : > { %v7919_v41 = vpop.permute.xlu0 %7918 }
 0x517   : > { %v7921_v22 = vunpack.i.h.bf16 %v7919_v41  ;;  %v7920_v25 = vunpack.i.l.bf16 %v7919_v41  ;;  %v5071_v0 = vsel %vm1661_vm5, %v5039_v40, %v7925_v55  ;;  %v5072_v51 = vsel %vm1661_vm5, %v5040_v30, %v7926_v21 }
 0x518   : > { %v7934_v6 = vpop.permute.xlu1 %7933 }
 0x519   : > { %v7936_v27 = vunpack.i.h.bf16 %v7934_v6  ;;  %v7935_v23 = vunpack.i.l.bf16 %v7934_v6  ;;  %v5167_v46 = vsel %vm1661_vm5, %v5135_v56, %v7920_v25  ;;  %v5168_v24 = vsel %vm1661_vm5, %v5136_v45, %v7921_v22  ;;  %v3986_v22 = vld [vmem:[#allocation2 + $0x140] sm:$0xff] }
 0x51a   : > { %v7929_v20 = vpop.permute.xlu0 %7928 }
 0x51b   : > { %v7931_v36 = vunpack.i.h.bf16 %v7929_v20  ;;  %v7930_v16 = vunpack.i.l.bf16 %v7929_v20  ;;  %v5103_v13 = vsel %vm1694_vm6, %v5071_v0, %v7935_v23  ;;  %v5104_v48 = vsel %vm1694_vm6, %v5072_v51, %v7936_v27  ;;  %v3985_v23 = vld [vmem:[#allocation2 + $0x138] sm:$0xff] }
 0x51c   : > { %v7944_v41 = vpop.permute.xlu1 %7943  ;;  %v5243_v15 = vpack.c.bf16 %v5104_v48, %v5103_v13 }
 0x51d   : > { %v5199_v33 = vsel %vm1694_vm6, %v5167_v46, %v7930_v16  ;;  %v5200_v43 = vsel %vm1694_vm6, %v5168_v24, %v7931_v36  ;;  %v7946_v26 = vunpack.i.h.bf16 %v7944_v41  ;;  %v7945_v18 = vunpack.i.l.bf16 %v7944_v41 }
 0x51e   : > { %v7939_v38 = vpop.permute.xlu0 %7938  ;;  %v5244_v55 = vpack.c.bf16 %v5200_v43, %v5199_v33 }
 0x51f   : > { %v7941_v6 = vunpack.i.h.bf16 %v7939_v38  ;;  %v7940_v30 = vunpack.i.l.bf16 %v7939_v38  ;;  %v5042_v51 = vsel %vm459_vm0, %v3986_v22, %v7946_v26  ;;  %v5041_v20 = vsel %vm459_vm0, %v3985_v23, %v7945_v18 }
 0x520   : > { %5545 = vmatprep.mubr.bf16.mxu1 %v5244_v55  ;;  %v7954_v21 = vpop.permute.xlu1 %7953 }
 0x521   : > { %5546 = vmatmul.mubr.bf16.gmra.mrb[80].mxu1 %v5243_v15  ;;  %v7956_v27 = vunpack.i.h.bf16 %v7954_v21  ;;  %v7955_v25 = vunpack.i.l.bf16 %v7954_v21  ;;  %v5138_v13 = vsel %vm459_vm0, %v12291_v19, %v7941_v6  ;;  %v5137_v48 = vsel %vm459_vm0, %v12289_v10, %v7940_v30 }
 0x522   : > { %v7949_v40 = vpop.permute.xlu0 %7948 }
 0x523   : > { %v7951_v45 = vunpack.i.h.bf16 %v7949_v40  ;;  %v7950_v56 = vunpack.i.l.bf16 %v7949_v40  ;;  %v5073_v46 = vsel %vm1661_vm5, %v5041_v20, %v7955_v25  ;;  %v5074_v24 = vsel %vm1661_vm5, %v5042_v51, %v7956_v27  ;;  %v3987_v20 = vld [vmem:[#allocation2 + $0x150] sm:$0xff] }
 0x524   : > { %v7964_v0 = vpop.permute.xlu1 %7963 }
 0x525   : > { %v7966_v36 = vunpack.i.h.bf16 %v7964_v0  ;;  %v7965_v16 = vunpack.i.l.bf16 %v7964_v0  ;;  %v5169_v55 = vsel %vm1661_vm5, %v5137_v48, %v7950_v56  ;;  %v5170_v21 = vsel %vm1661_vm5, %v5138_v13, %v7951_v45  ;;  %v3988_v45 = vld [vmem:[#allocation2 + $0x158] sm:$0xff] }
 0x526   : > { %v7959_v41 = vpop.permute.xlu0 %7958 }
 0x527   : > { %v7961_v33 = vunpack.i.h.bf16 %v7959_v41  ;;  %v7960_v43 = vunpack.i.l.bf16 %v7959_v41  ;;  %v5105_v15 = vsel %vm1694_vm6, %v5073_v46, %v7965_v16  ;;  %v5106_v38 = vsel %vm1694_vm6, %v5074_v24, %v7966_v36 }
 0x528   : > { %v7974_v26 = vpop.permute.xlu1 %7973  ;;  %v5246_v18 = vpack.c.bf16 %v5106_v38, %v5105_v15 }
 0x529   : > { %v5201_v19 = vsel %vm1694_vm6, %v5169_v55, %v7960_v43  ;;  %v5202_v10 = vsel %vm1694_vm6, %v5170_v21, %v7961_v33  ;;  %v7976_v27 = vunpack.i.h.bf16 %v7974_v26  ;;  %v7975_v25 = vunpack.i.l.bf16 %v7974_v26 }
 0x52a   : > { %v7969_v6 = vpop.permute.xlu0 %7968  ;;  %v5247_v30 = vpack.c.bf16 %v5202_v10, %v5201_v19 }
 0x52b   : > { %v7971_v23 = vunpack.i.h.bf16 %v7969_v6  ;;  %v7970_v22 = vunpack.i.l.bf16 %v7969_v6  ;;  %v5044_v48 = vsel %vm459_vm0, %v3988_v45, %v7976_v27  ;;  %v5043_v46 = vsel %vm459_vm0, %v3987_v20, %v7975_v25 }
 0x52c   : > { %5553 = vmatprep.mubr.bf16.mxu1 %v5247_v30  ;;  %v7984_v40 = vpop.permute.xlu1 %7983 }
 0x52d   : > { %5554 = vmatmul.mubr.bf16.gmra.mrb[84].mxu1 %v5246_v18  ;;  %v7986_v51 = vunpack.i.h.bf16 %v7984_v40  ;;  %v7985_v56 = vunpack.i.l.bf16 %v7984_v40  ;;  %v5140_v33 = vsel %vm459_vm0, %v12330_v39, %v7971_v23  ;;  %v5139_v43 = vsel %vm459_vm0, %v12328_v12, %v7970_v22 }
 0x52e   : > { %v7979_v0 = vpop.permute.xlu0 %7978 }
 0x52f   : > { %v7981_v36 = vunpack.i.h.bf16 %v7979_v0  ;;  %v7980_v16 = vunpack.i.l.bf16 %v7979_v0  ;;  %v5075_v15 = vsel %vm1661_vm5, %v5043_v46, %v7985_v56  ;;  %v5076_v38 = vsel %vm1661_vm5, %v5044_v48, %v7986_v51 }
 0x530   : > { %v7994_v13 = vpop.permute.xlu1 %7993 }
 0x531   : > { %v7996_v24 = vunpack.i.h.bf16 %v7994_v13  ;;  %v7995_v41 = vunpack.i.l.bf16 %v7994_v13  ;;  %v5171_v18 = vsel %vm1661_vm5, %v5139_v43, %v7980_v16  ;;  %v5172_v6 = vsel %vm1661_vm5, %v5140_v33, %v7981_v36  ;;  %v3989_v13 = vld [vmem:[#allocation2 + $0x168] sm:$0xff]  ;;  %v3990_v36 = vld [vmem:[#allocation2 + $0x170] sm:$0xff] }
 0x532   : > { %v7989_v55 = vpop.permute.xlu0 %7988 }
 0x533   : > { %v7991_v21 = vunpack.i.h.bf16 %v7989_v55  ;;  %v7990_v26 = vunpack.i.l.bf16 %v7989_v55  ;;  %v5107_v19 = vsel %vm1694_vm6, %v5075_v15, %v7995_v41  ;;  %v5108_v10 = vsel %vm1694_vm6, %v5076_v38, %v7996_v24 }
 0x534   : > { %v8004_v30 = vpop.permute.xlu1 %8003  ;;  %v5249_v40 = vpack.c.bf16 %v5108_v10, %v5107_v19 }
 0x535   : > { %v5203_v39 = vsel %vm1694_vm6, %v5171_v18, %v7990_v26  ;;  %v5204_v12 = vsel %vm1694_vm6, %v5172_v6, %v7991_v21  ;;  %v8006_v22 = vunpack.i.h.bf16 %v8004_v30  ;;  %v8005_v0 = vunpack.i.l.bf16 %v8004_v30 }
 0x536   : > { %v7999_v27 = vpop.permute.xlu0 %7998  ;;  %v5250_v25 = vpack.c.bf16 %v5204_v12, %v5203_v39 }
 0x537   : > { %v8001_v51 = vunpack.i.h.bf16 %v7999_v27  ;;  %v8000_v56 = vunpack.i.l.bf16 %v7999_v27  ;;  %v5046_v41 = vsel %vm459_vm0, %v3990_v36, %v8006_v22  ;;  %v5045_v33 = vsel %vm459_vm0, %v3989_v13, %v8005_v0 }
 0x538   : > { %5561 = vmatprep.mubr.bf16.mxu1 %v5250_v25  ;;  %v8014_v23 = vpop.permute.xlu1 %8013  ;;  %v4245_v25 = vld [vmem:[#allocation2 + $0x19a] sm:$0xff] }
 0x539   : > { %5562 = vmatmul.mubr.bf16.gmra.mrb[88].mxu1 %v5249_v40  ;;  %v8016_v45 = vunpack.i.h.bf16 %v8014_v23  ;;  %v8015_v16 = vunpack.i.l.bf16 %v8014_v23  ;;  %v5142_v38 = vsel %vm459_vm0, %v12369_v1, %v8001_v51  ;;  %v5141_v55 = vsel %vm459_vm0, %v12367_v52, %v8000_v56  ;;  %v4246_v23 = vld [vmem:[#allocation2 + $0x1a2] sm:$0xff]  ;;  %v12599_v51 = vld [vmem:[#allocation3] ss:$0 sm:$0xff] }
 0x53a   : > { %v8009_v20 = vpop.permute.xlu0 %8008  ;;  %v5254_v22 = vpack.c.bf16 %v4246_v23, %v4245_v25 }
 0x53b   : > { %v8011_v48 = vunpack.i.h.bf16 %v8009_v20  ;;  %v8010_v46 = vunpack.i.l.bf16 %v8009_v20  ;;  %v5077_v21 = vsel %vm1661_vm5, %v5045_v33, %v8015_v16  ;;  %v5078_v26 = vsel %vm1661_vm5, %v5046_v41, %v8016_v45 }
 0x53c   : > { %v8024_v24 = vpop.permute.xlu1 %8023 }
 0x53d   : > { %v8026_v43 = vunpack.i.h.bf16 %v8024_v24  ;;  %v8025_v15 = vunpack.i.l.bf16 %v8024_v24  ;;  %v5173_v39 = vsel %vm1661_vm5, %v5141_v55, %v8010_v46  ;;  %v5174_v12 = vsel %vm1661_vm5, %v5142_v38, %v8011_v48 }
 0x53e   : > { %v8019_v19 = vpop.permute.xlu0 %8018 }
 0x53f   : > { %v8021_v10 = vunpack.i.h.bf16 %v8019_v19  ;;  %v8020_v18 = vunpack.i.l.bf16 %v8019_v19  ;;  %v5109_v6 = vsel %vm1694_vm6, %v5077_v21, %v8025_v15  ;;  %v5110_v30 = vsel %vm1694_vm6, %v5078_v26, %v8026_v43 }
 0x540   : > { %v5252_v52 = vpack.c.bf16 %v5110_v30, %v5109_v6 }
 0x541   : > { %v5205_v1 = vsel %vm1694_vm6, %v5173_v39, %v8020_v18  ;;  %v5206_v40 = vsel %vm1694_vm6, %v5174_v12, %v8021_v10 }
 0x542   : > { %v5253_v27 = vpack.c.bf16 %v5206_v40, %v5205_v1 }
 0x544   : > { %5569 = vmatprep.mubr.bf16.mxu1 %v5253_v27 }
 0x545   : > { %5570 = vmatmul.mubr.bf16.gmra.mrb[92].mxu1 %v5252_v52 }
 0x546   : > { %6903 = vmatprep.mubr.msk.bf16.mxu1 %vm459_vm0, %v5251_v31 }
 0x54d   : > { %6904 = vmatmul.mubr.msk.bf16.vlgmr.msra.gmra.mrb[96].mxu1 %vm459_vm0, %v5254_v22 }
 0x564   : > { %v6699_v0 = vpop.f32.mrb[32].mxu1 }
 0x565   : > { %v6700_v56 = vpop.f32.mrb[33].mxu1 }
 0x566   : > { %v6701_v20 = vadd.f32 %v6700_v56, %v6699_v0  ;;  %v6702_v45 = vpop.f32.mrb[34].mxu1 }
 0x567   : > { %v6703_v16 = vpop.f32.mrb[35].mxu1 }
 0x568   : > { %v5452_v13 = vadd.f32 %v6701_v20, %v12599_v51  ;;  %v6704_v36 = vadd.f32 %v6703_v16, %v6702_v45 }
 0x56a   : > { %v12603_v48 = vadd.f32 %v12434_v47, %v5452_v13  ;;  %v5455_v5 = vadd.f32 %v6704_v36, %v12599_v51 }
 0x56c   : > { %v12607_v4 = vadd.f32 %v12438_v58, %v5455_v5 }
 0x570   : > { %v6705_v31 = vpop.f32.mrb[36].mxu1 }
 0x571   : > { %v6706_v46 = vpop.f32.mrb[37].mxu1 }
 0x572   : > { %v6707_v24 = vadd.f32 %v6706_v46, %v6705_v31  ;;  %v6708_v41 = vpop.f32.mrb[38].mxu1 }
 0x573   : > { %v6709_v33 = vpop.f32.mrb[39].mxu1 }
 0x574   : > { %v5460_v43 = vadd.f32 %v6707_v24, %v12599_v51  ;;  %v6710_v15 = vadd.f32 %v6709_v33, %v6708_v41 }
 0x576   : > { %v12611_v38 = vadd.f32 %v12432_v59, %v5460_v43  ;;  %v5463_v55 = vadd.f32 %v6710_v15, %v12599_v51 }
 0x578   : > { %v12615_v47 = vadd.f32 %v12436_v17, %v5463_v55 }
 0x57c   : > { %v6711_v21 = vpop.f32.mrb[40].mxu1 }
 0x57d   : > { %v6712_v26 = vpop.f32.mrb[41].mxu1 }
 0x57e   : > { %v6713_v58 = vadd.f32 %v6712_v26, %v6711_v21  ;;  %v6714_v19 = vpop.f32.mrb[42].mxu1 }
 0x57f   : > { %v6715_v10 = vpop.f32.mrb[43].mxu1 }
 0x580   : > { %v5468_v18 = vadd.f32 %v6713_v58, %v12599_v51  ;;  %v6716_v6 = vadd.f32 %v6715_v10, %v6714_v19 }
 0x582   : > { %v12619_v30 = vadd.f32 %v12448_v54, %v5468_v18  ;;  %v5471_v39 = vadd.f32 %v6716_v6, %v12599_v51 }
 0x584   : > { %v12623_v59 = vadd.f32 %v12456_v34, %v5471_v39 }
 0x588   : > { %v6717_v12 = vpop.f32.mrb[44].mxu1 }
 0x589   : > { %v6718_v1 = vpop.f32.mrb[45].mxu1 }
 0x58a   : > { %v6719_v17 = vadd.f32 %v6718_v1, %v6717_v12  ;;  %v6720_v40 = vpop.f32.mrb[46].mxu1 }
 0x58b   : > { %v6721_v52 = vpop.f32.mrb[47].mxu1 }
 0x58c   : > { %v5476_v27 = vadd.f32 %v6719_v17, %v12599_v51  ;;  %v6722_v25 = vadd.f32 %v6721_v52, %v6720_v40  ;;  %v5809_v52 = vmul.f32 %v12603_v48, %v12603_v48 }
 0x58e   : > { %v12627_v23 = vadd.f32 %v12446_v61, %v5476_v27  ;;  %v5479_v22 = vadd.f32 %v6722_v25, %v12599_v51  ;;  %v5811_v25 = vmul.f32 %v12611_v38, %v12611_v38 }
 0x590   : > { %v12631_v54 = vadd.f32 %v12454_v3, %v5479_v22 }
 0x594   : > { %v6723_v0 = vpop.f32.mrb[48].mxu1 }
 0x595   : > { %v6724_v56 = vpop.f32.mrb[49].mxu1 }
 0x596   : > { %v6725_v34 = vadd.f32 %v6724_v56, %v6723_v0  ;;  %v6726_v20 = vpop.f32.mrb[50].mxu1  ;;  %v5739_v0 = vsel %vm459_vm0, %v12603_v48, 0.0 }
 0x597   : > { %v6727_v45 = vpop.f32.mrb[51].mxu1 }
 0x598   : > { %v5484_v16 = vadd.f32 %v6725_v34, %v12599_v51  ;;  %v6728_v13 = vadd.f32 %v6727_v45, %v6726_v20  ;;  %v5742_v34 = vsel %vm459_vm0, %v12611_v38, 0.0 }
 0x59a   : > { %v12635_v36 = vadd.f32 %v12462_v2, %v5484_v16  ;;  %v5487_v5 = vadd.f32 %v6728_v13, %v12599_v51  ;;  %v5841_v13 = vsel %vm459_vm0, %v5809_v52, 0.0 }
 0x59c   : > { %v12639_v61 = vadd.f32 %v12468_v63, %v5487_v5  ;;  %v5844_v5 = vsel %vm459_vm0, %v5811_v25, 0.0 }
 0x5a0   : > { %v6729_v31 = vpop.f32.mrb[52].mxu1 }
 0x5a1   : > { %v6730_v46 = vpop.f32.mrb[53].mxu1 }
 0x5a2   : > { %v6731_v3 = vadd.f32 %v6730_v46, %v6729_v31  ;;  %v6732_v24 = vpop.f32.mrb[54].mxu1  ;;  %v5812_v31 = vmul.f32 %v12615_v47, %v12615_v47 }
 0x5a3   : > { %v6733_v41 = vpop.f32.mrb[55].mxu1 }
 0x5a4   : > { %v5492_v33 = vadd.f32 %v6731_v3, %v12599_v51  ;;  %v6734_v43 = vadd.f32 %v6733_v41, %v6732_v24  ;;  %v5744_v41 = vsel %vm459_vm0, %v12615_v47, 0.0 }
 0x5a6   : > { %v12643_v15 = vadd.f32 %v12460_v53, %v5492_v33  ;;  %v5495_v55 = vadd.f32 %v6734_v43, %v12599_v51  ;;  %v5846_v43 = vsel %vm459_vm0, %v5812_v31, 0.0 }
 0x5a8   : > { %v12647_v2 = vadd.f32 %v12464_v57, %v5495_v55  ;;  %v5810_v57 = vmul.f32 %v12607_v4, %v12607_v4  ;;  %v5746_v55 = vsel %vm459_vm0, %v12619_v30, 0.0 }
 0x5aa   : > { %v5842_v56 = vsel %vm459_vm0, %v5810_v57, 0.0  ;;  %v5815_v57 = vmul.f32 %v12627_v23, %v12627_v23 }
 0x5ab   : > { %v5843_v3 = vadd.f32 %v5842_v56, %v5841_v13  ;;  %v5816_v56 = vmul.f32 %v12631_v54, %v12631_v54  ;;  %v5752_v13 = vsel %vm459_vm0, %v12631_v54, 0.0 }
 0x5ac   : > { %v6735_v21 = vpop.f32.mrb[56].mxu1 }
 0x5ad   : > { %v6736_v26 = vpop.f32.mrb[57].mxu1  ;;  %v5845_v33 = vadd.f32 %v5844_v5, %v5843_v3  ;;  %v5854_v31 = vsel %vm459_vm0, %v5816_v56, 0.0  ;;  %v5754_v3 = vsel %vm459_vm0, %v12635_v36, 0.0 }
 0x5ae   : > { %v6737_v63 = vadd.f32 %v6736_v26, %v6735_v21  ;;  %v6738_v58 = vpop.f32.mrb[58].mxu1 }
 0x5af   : > { %v6739_v19 = vpop.f32.mrb[59].mxu1 }
 0x5b0   : > { %v5500_v10 = vadd.f32 %v6737_v63, %v12599_v51  ;;  %v6740_v18 = vadd.f32 %v6739_v19, %v6738_v58  ;;  %v5814_v58 = vmul.f32 %v12623_v59, %v12623_v59 }
 0x5b2   : > { %v12651_v6 = vadd.f32 %v12482_v11, %v5500_v10  ;;  %v5503_v39 = vadd.f32 %v6740_v18, %v12599_v51  ;;  %v5740_v11 = vsel %vm459_vm0, %v12607_v4, 0.0  ;;  %v5847_v18 = vadd.f32 %v5846_v43, %v5845_v33 }
 0x5b3   : > { %v5741_v16 = vadd.f32 %v5740_v11, %v5739_v0  ;;  %v5750_v11 = vsel %vm459_vm0, %v12627_v23, 0.0  ;;  %v5852_v0 = vsel %vm459_vm0, %v5815_v57, 0.0  ;;  %v5818_v33 = vmul.f32 %v12639_v61, %v12639_v61 }
 0x5b4   : > { %v12655_v53 = vadd.f32 %v12486_v32, %v5503_v39 }
 0x5b5   : > { %v5743_v24 = vadd.f32 %v5742_v34, %v5741_v16 }
 0x5b7   : > { %v5745_v26 = vadd.f32 %v5744_v41, %v5743_v24 }
 0x5b8   : > { %v6741_v12 = vpop.f32.mrb[60].mxu1 }
 0x5b9   : > { %v6742_v1 = vpop.f32.mrb[61].mxu1  ;;  %v5747_v39 = vadd.f32 %v5746_v55, %v5745_v26 }
 0x5ba   : > { %v6743_v17 = vadd.f32 %v6742_v1, %v6741_v12  ;;  %v6744_v40 = vpop.f32.mrb[62].mxu1  ;;  %v5748_v1 = vsel %vm459_vm0, %v12623_v59, 0.0 }
 0x5bb   : > { %v6745_v27 = vpop.f32.mrb[63].mxu1 }
 0x5bc   : > { %v5508_v32 = vadd.f32 %v6743_v17, %v12599_v51  ;;  %v6746_v22 = vadd.f32 %v6745_v27, %v6744_v40  ;;  %v5850_v27 = vsel %vm459_vm0, %v5814_v58, 0.0  ;;  %v5819_v58 = vmul.f32 %v12643_v15, %v12643_v15 }
 0x5be   : > { %v12672_v20 = vadd.f32 %v12480_v14, %v5508_v32  ;;  %v5511_v45 = vadd.f32 %v6746_v22, %v12599_v51  ;;  %v5813_v14 = vmul.f32 %v12619_v30, %v12619_v30  ;;  %v5749_v22 = vadd.f32 %v5748_v1, %v5747_v39 }
 0x5bf   : > { %v5858_v39 = vsel %vm459_vm0, %v5818_v33, 0.0 }
 0x5c0   : > { %v12680_v46 = vadd.f32 %v12484_v28, %v5511_v45  ;;  %v5848_v28 = vsel %vm459_vm0, %v5813_v14, 0.0  ;;  %v5751_v16 = vadd.f32 %v5750_v11, %v5749_v22  ;;  %v5760_v22 = vsel %vm459_vm0, %v12647_v2, 0.0 }
 0x5c1   : > { %v5849_v52 = vadd.f32 %v5848_v28, %v5847_v18  ;;  %v5756_v28 = vsel %vm459_vm0, %v12639_v61, 0.0  ;;  %v5823_v33 = vmul.f32 %v12672_v20, %v12672_v20 }
 0x5c2   : > { %v5753_v41 = vadd.f32 %v5752_v13, %v5751_v16 }
 0x5c3   : > { %v5851_v45 = vadd.f32 %v5850_v27, %v5849_v52  ;;  %v5820_v52 = vmul.f32 %v12647_v2, %v12647_v2 }
 0x5c4   : > { %v6747_v21 = vpop.f32.mrb[64].mxu1  ;;  %v5755_v26 = vadd.f32 %v5754_v3, %v5753_v41 }
 0x5c5   : > { %v6748_v63 = vpop.f32.mrb[65].mxu1  ;;  %v5853_v5 = vadd.f32 %v5852_v0, %v5851_v45  ;;  %v5862_v56 = vsel %vm459_vm0, %v5820_v52, 0.0  ;;  %v5762_v45 = vsel %vm459_vm0, %v12651_v6, 0.0 }
 0x5c6   : > { %v6749_v19 = vadd.f32 %v6748_v63, %v6747_v21  ;;  %v6750_v10 = vpop.f32.mrb[66].mxu1 }
 0x5c7   : > { %v6751_v12 = vpop.f32.mrb[67].mxu1  ;;  %v5855_v21 = vadd.f32 %v5854_v31, %v5853_v5  ;;  %v5822_v5 = vmul.f32 %v12655_v53, %v12655_v53 }
 0x5c8   : > { %v5516_v17 = vadd.f32 %v6749_v19, %v12599_v51  ;;  %v6752_v40 = vadd.f32 %v6751_v12, %v6750_v10  ;;  %v5758_v12 = vsel %vm459_vm0, %v12643_v15, 0.0 }
 0x5ca   : > { %v12701_v25 = vadd.f32 %v12496_v29, %v5516_v17  ;;  %v5519_v32 = vadd.f32 %v6752_v40, %v12599_v51  ;;  %v5817_v29 = vmul.f32 %v12635_v36, %v12635_v36  ;;  %v5757_v17 = vadd.f32 %v5756_v28, %v5755_v26 }
 0x5cb   : > { %v5860_v40 = vsel %vm459_vm0, %v5819_v58, 0.0  ;;  %v5866_v26 = vsel %vm459_vm0, %v5822_v5, 0.0 }
 0x5cc   : > { %v12708_v34 = vadd.f32 %v12504_v9, %v5519_v32  ;;  %v5856_v9 = vsel %vm459_vm0, %v5817_v29, 0.0  ;;  %v5759_v32 = vadd.f32 %v5758_v12, %v5757_v17  ;;  %v5768_v17 = vsel %vm459_vm0, %v12680_v46, 0.0 }
 0x5cd   : > { %v5857_v18 = vadd.f32 %v5856_v9, %v5855_v21  ;;  %v5764_v9 = vsel %vm459_vm0, %v12655_v53, 0.0 }
 0x5ce   : > { %v5761_v13 = vadd.f32 %v5760_v22, %v5759_v32 }
 0x5cf   : > { %v5859_v11 = vadd.f32 %v5858_v39, %v5857_v18  ;;  %v5824_v18 = vmul.f32 %v12680_v46, %v12680_v46 }
 0x5d0   : > { %v6753_v24 = vpop.f32.mrb[68].mxu1  ;;  %v5763_v41 = vadd.f32 %v5762_v45, %v5761_v13 }
 0x5d1   : > { %v6754_v14 = vpop.f32.mrb[69].mxu1  ;;  %v5861_v0 = vadd.f32 %v5860_v40, %v5859_v11  ;;  %v5870_v52 = vsel %vm459_vm0, %v5824_v18, 0.0  ;;  %v5770_v11 = vsel %vm459_vm0, %v12701_v25, 0.0 }
 0x5d2   : > { %v6755_v43 = vadd.f32 %v6754_v14, %v6753_v24  ;;  %v6756_v55 = vpop.f32.mrb[70].mxu1 }
 0x5d3   : > { %v6757_v63 = vpop.f32.mrb[71].mxu1  ;;  %v5863_v24 = vadd.f32 %v5862_v56, %v5861_v0  ;;  %v5826_v0 = vmul.f32 %v12708_v34, %v12708_v34 }
 0x5d4   : > { %v5524_v19 = vadd.f32 %v6755_v43, %v12599_v51  ;;  %v6758_v10 = vadd.f32 %v6757_v63, %v6756_v55  ;;  %v5766_v63 = vsel %vm459_vm0, %v12672_v20, 0.0 }
 0x5d6   : > { %v12729_v1 = vadd.f32 %v12494_v8, %v5524_v19  ;;  %v5527_v57 = vadd.f32 %v6758_v10, %v12599_v51  ;;  %v5821_v8 = vmul.f32 %v12651_v6, %v12651_v6  ;;  %v5765_v19 = vadd.f32 %v5764_v9, %v5763_v41 }
 0x5d7   : > { %v5868_v10 = vsel %vm459_vm0, %v5823_v33, 0.0  ;;  %v5874_v41 = vsel %vm459_vm0, %v5826_v0, 0.0 }
 0x5d8   : > { %v12736_v27 = vadd.f32 %v12502_v50, %v5527_v57  ;;  %v5864_v50 = vsel %vm459_vm0, %v5821_v8, 0.0  ;;  %v5767_v57 = vadd.f32 %v5766_v63, %v5765_v19  ;;  %v5827_v5 = vmul.f32 %v12729_v1, %v12729_v1 }
 0x5d9   : > { %v5865_v21 = vadd.f32 %v5864_v50, %v5863_v24  ;;  %v5772_v50 = vsel %vm459_vm0, %v12708_v34, 0.0 }
 0x5da   : > { %v5769_v22 = vadd.f32 %v5768_v17, %v5767_v57  ;;  %v5776_v19 = vsel %vm459_vm0, %v12736_v27, 0.0 }
 0x5db   : > { %v5867_v12 = vadd.f32 %v5866_v26, %v5865_v21  ;;  %v5828_v21 = vmul.f32 %v12736_v27, %v12736_v27 }
 0x5dc   : > { %v6759_v16 = vpop.f32.mrb[72].mxu1  ;;  %v5771_v13 = vadd.f32 %v5770_v11, %v5769_v22 }
 0x5dd   : > { %v6760_v29 = vpop.f32.mrb[73].mxu1  ;;  %v5869_v40 = vadd.f32 %v5868_v10, %v5867_v12  ;;  %v5878_v18 = vsel %vm459_vm0, %v5828_v21, 0.0 }
 0x5de   : > { %v6761_v31 = vadd.f32 %v6760_v29, %v6759_v16  ;;  %v6762_v3 = vpop.f32.mrb[74].mxu1 }
 0x5df   : > { %v6763_v14 = vpop.f32.mrb[75].mxu1  ;;  %v5871_v16 = vadd.f32 %v5870_v52, %v5869_v40 }
 0x5e0   : > { %v5532_v43 = vadd.f32 %v6761_v31, %v12599_v51  ;;  %v6764_v55 = vadd.f32 %v6763_v14, %v6762_v3  ;;  %v5774_v14 = vsel %vm459_vm0, %v12729_v1, 0.0 }
 0x5e2   : > { %v12757_v28 = vadd.f32 %v12510_v37, %v5532_v43  ;;  %v5535_v58 = vadd.f32 %v6764_v55, %v12599_v51  ;;  %v5825_v37 = vmul.f32 %v12701_v25, %v12701_v25  ;;  %v5773_v43 = vadd.f32 %v5772_v50, %v5771_v13 }
 0x5e3   : > { %v5876_v55 = vsel %vm459_vm0, %v5827_v5, 0.0 }
 0x5e4   : > { %v12764_v39 = vadd.f32 %v12516_v49, %v5535_v58  ;;  %v5872_v49 = vsel %vm459_vm0, %v5825_v37, 0.0  ;;  %v5775_v58 = vadd.f32 %v5774_v14, %v5773_v43  ;;  %v5778_v12 = vsel %vm459_vm0, %v12757_v28, 0.0 }
 0x5e5   : > { %v5873_v24 = vadd.f32 %v5872_v49, %v5871_v16 }
 0x5e6   : > { %v5777_v17 = vadd.f32 %v5776_v19, %v5775_v58  ;;  %v5830_v40 = vmul.f32 %v12764_v39, %v12764_v39  ;;  %v5780_v49 = vsel %vm459_vm0, %v12764_v39, 0.0 }
 0x5e7   : > { %v5875_v63 = vadd.f32 %v5874_v41, %v5873_v24 }
 0x5e8   : > { %v6765_v32 = vpop.f32.mrb[76].mxu1  ;;  %v5779_v22 = vadd.f32 %v5778_v12, %v5777_v17  ;;  %v5882_v13 = vsel %vm459_vm0, %v5830_v40, 0.0 }
 0x5e9   : > { %v6766_v8 = vpop.f32.mrb[77].mxu1  ;;  %v5877_v10 = vadd.f32 %v5876_v55, %v5875_v63 }
 0x5ea   : > { %v6767_v56 = vadd.f32 %v6766_v8, %v6765_v32  ;;  %v6768_v45 = vpop.f32.mrb[78].mxu1 }
 0x5eb   : > { %v6769_v29 = vpop.f32.mrb[79].mxu1  ;;  %v5879_v32 = vadd.f32 %v5878_v18, %v5877_v10 }
 0x5ec   : > { %v5540_v31 = vadd.f32 %v6767_v56, %v12599_v51  ;;  %v6770_v3 = vadd.f32 %v6769_v29, %v6768_v45 }
 0x5ee   : > { %v12785_v9 = vadd.f32 %v12508_v60, %v5540_v31  ;;  %v5543_v33 = vadd.f32 %v6770_v3, %v12599_v51  ;;  %v5829_v60 = vmul.f32 %v12757_v28, %v12757_v28  ;;  %v5781_v31 = vadd.f32 %v5780_v49, %v5779_v22 }
 0x5f0   : > { %v12792_v26 = vadd.f32 %v12512_v42, %v5543_v33  ;;  %v5880_v42 = vsel %vm459_vm0, %v5829_v60, 0.0  ;;  %v5831_v0 = vmul.f32 %v12785_v9, %v12785_v9  ;;  %v5782_v29 = vsel %vm459_vm0, %v12785_v9, 0.0 }
 0x5f1   : > { %v5881_v16 = vadd.f32 %v5880_v42, %v5879_v32  ;;  %v5783_v33 = vadd.f32 %v5782_v29, %v5781_v31 }
 0x5f2   : > { %v5884_v3 = vsel %vm459_vm0, %v5831_v0, 0.0  ;;  %v5832_v24 = vmul.f32 %v12792_v26, %v12792_v26  ;;  %v5784_v43 = vsel %vm459_vm0, %v12792_v26, 0.0 }
 0x5f3   : > { %v5883_v14 = vadd.f32 %v5882_v13, %v5881_v16  ;;  %v5785_v19 = vadd.f32 %v5784_v43, %v5783_v33 }
 0x5f4   : > { %v6771_v57 = vpop.f32.mrb[80].mxu1  ;;  %v5886_v21 = vsel %vm459_vm0, %v5832_v24, 0.0 }
 0x5f5   : > { %v6772_v37 = vpop.f32.mrb[81].mxu1  ;;  %v5885_v55 = vadd.f32 %v5884_v3, %v5883_v14 }
 0x5f6   : > { %v6773_v52 = vadd.f32 %v6772_v37, %v6771_v57  ;;  %v6774_v11 = vpop.f32.mrb[82].mxu1 }
 0x5f7   : > { %v6775_v8 = vpop.f32.mrb[83].mxu1  ;;  %v5887_v57 = vadd.f32 %v5886_v21, %v5885_v55 }
 0x5f8   : > { %v5548_v56 = vadd.f32 %v6773_v52, %v12599_v51  ;;  %v6776_v45 = vadd.f32 %v6775_v8, %v6774_v11 }
 0x5fa   : > { %v12813_v50 = vadd.f32 %v12532_v7, %v5548_v56  ;;  %v5551_v5 = vadd.f32 %v6776_v45, %v12599_v51 }
 0x5fc   : > { %v12820_v41 = vadd.f32 %v12536_v62, %v5551_v5  ;;  %v5833_v7 = vmul.f32 %v12813_v50, %v12813_v50  ;;  %v5786_v63 = vsel %vm459_vm0, %v12813_v50, 0.0 }
 0x5fd   : > { %v5787_v17 = vadd.f32 %v5786_v63, %v5785_v19 }
 0x5fe   : > { %v5888_v62 = vsel %vm459_vm0, %v5833_v7, 0.0  ;;  %v5834_v10 = vmul.f32 %v12820_v41, %v12820_v41  ;;  %v5788_v42 = vsel %vm459_vm0, %v12820_v41, 0.0 }
 0x5ff   : > { %v5889_v11 = vadd.f32 %v5888_v62, %v5887_v57  ;;  %v5789_v49 = vadd.f32 %v5788_v42, %v5787_v17  ;;  %v6050_v62 = vld [vmem:[#allocation6] sm:$0xff]  ;;  %v8240_v57 = vmov 0.0|0.0   ;;  %v14011_v42 = vmov 0.0  }
 0x600   : > { %v6777_v58 = vpop.f32.mrb[84].mxu1  ;;  %v5890_v32 = vsel %vm459_vm0, %v5834_v10, 0.0  ;;  %v6051_v10 = vld [vmem:[#allocation6 + $0x8] sm:$0xff]  ;;  %6953 = vmatprep.subr.bf16.mxu1 %v8240_v57  ;;  %6915 = vmatprep.mubr.msk.f32.mxu1 %vm8241_vm7, %v14011_v42 }
 0x601   : > { %v6778_v60 = vpop.f32.mrb[85].mxu1  ;;  %v5891_v16 = vadd.f32 %v5890_v32, %v5889_v11  ;;  %v6954_v17 = vpack.c.bf16 %v6051_v10, %v6050_v62  ;;  %6959 = vmatprep.subr.bf16.mxu0 %v8240_v57  ;;  %6950 = vmatprep.mubr.msk.f32.mxu0 %vm8241_vm7, %v14011_v42  ;;  %v6132_v62 = vld [vmem:[%s13395_s9 + $0x18] sm:$0xff] }
 0x602   : > { %v6779_v18 = vadd.f32 %v6778_v60, %v6777_v58  ;;  %v6780_v12 = vpop.f32.mrb[86].mxu1 }
 0x603   : > { %v6781_v37 = vpop.f32.mrb[87].mxu1  ;;  %6955 = vmatpush3.bf16.msra.mxu1 %v6954_v17 }
 0x604   : > { %v5556_v40 = vadd.f32 %v6779_v18, %v12599_v51  ;;  %v6782_v52 = vadd.f32 %v6781_v37, %v6780_v12  ;;  %v6052_v18 = vld [vmem:[#allocation6 + $0x10] sm:$0xff]  ;;  %v6053_v37 = vld [vmem:[#allocation6 + $0x18] sm:$0xff]  ;;  %6956 = vmatprep.subr.bf16.mxu1 %v8240_v57 }
 0x606   : > { %v12837_v22 = vadd.f32 %v12530_v35, %v5556_v40  ;;  %v5559_v8 = vadd.f32 %v6782_v52, %v12599_v51  ;;  %v6957_v52 = vpack.c.bf16 %v6053_v37, %v6052_v18 }
 0x608   : > { %v5790_v0 = vsel %vm459_vm0, %v12837_v22, 0.0  ;;  %v5835_v56 = vmul.f32 %v12837_v22, %v12837_v22  ;;  %v12845_v45 = vadd.f32 %v12534_v44, %v5559_v8  ;;  %6958 = vmatpush3.bf16.msra.mxu1 %v6957_v52  ;;  %v6133_v52 = vld [vmem:[%s13395_s9 + $0x20] sm:$0xff] }
 0x609   : > { %v5791_v13 = vadd.f32 %v5790_v0, %v5789_v49 }
 0x60a   : > { %v5892_v29 = vsel %vm459_vm0, %v5835_v56, 0.0  ;;  %v5836_v35 = vmul.f32 %v12845_v45, %v12845_v45  ;;  %v5792_v5 = vsel %vm459_vm0, %v12845_v45, 0.0 }
 0x60b   : > { %v5793_v31 = vadd.f32 %v5792_v5, %v5791_v13  ;;  %v5893_v3 = vadd.f32 %v5892_v29, %v5891_v16 }
 0x60c   : > { %v6783_v24 = vpop.f32.mrb[88].mxu1  ;;  %v5894_v14 = vsel %vm459_vm0, %v5836_v35, 0.0 }
 0x60d   : > { %v6784_v33 = vpop.f32.mrb[89].mxu1  ;;  %v5895_v43 = vadd.f32 %v5894_v14, %v5893_v3 }
 0x60e   : > { %v6785_v7 = vadd.f32 %v6784_v33, %v6783_v24  ;;  %v6786_v44 = vpop.f32.mrb[90].mxu1 }
 0x60f   : > { %v6787_v55 = vpop.f32.mrb[91].mxu1 }
 0x610   : > { %v6788_v21 = vadd.f32 %v6787_v55, %v6786_v44  ;;  %v5564_v8 = vadd.f32 %v6785_v7, %v12599_v51 }
 0x612   : > { %v5567_v29 = vadd.f32 %v6788_v21, %v12599_v51  ;;  %v6129_v21 = vld [vmem:[%s13395_s9] sm:$0xff] }
 0x618   : > { %v6789_v63 = vpop.f32.mrb[92].mxu1 }
 0x619   : > { %v6790_v58 = vpop.f32.mrb[93].mxu1 }
 0x61a   : > { %v6791_v19 = vadd.f32 %v6790_v58, %v6789_v63  ;;  %v6792_v60 = vpop.f32.mrb[94].mxu1  ;;  %v6130_v63 = vld [vmem:[%s13395_s9 + $0x8] sm:$0xff] }
 0x61b   : > { %v6793_v12 = vpop.f32.mrb[95].mxu1 }
 0x61c   : > { %v6794_v40 = vadd.f32 %v6793_v12, %v6792_v60  ;;  %v5572_v11 = vadd.f32 %v6791_v19, %v12599_v51  ;;  %v6960_v60 = vpack.c.bf16 %v6130_v63, %v6129_v21  ;;  %v6138_v21 = vld [vmem:[%s13395_s9 + $0x48] sm:$0xff] }
 0x61e   : > { %v5575_v56 = vadd.f32 %v6794_v40, %v12599_v51  ;;  %6961 = vmatpush3.bf16.msra.mxu0 %v6960_v60 }
 0x61f   : > { %6962 = vmatprep.subr.bf16.mxu0 %v8240_v57 }
 0x620   : > { %v6905_v32 = vpop.f32.mrb[96].mxu1 }
 0x621   : > { %v12860_v49 = vadd.f32 %v6905_v32, %v5572_v11  ;;  %v5724_v0 = vpop.f32.mrb[97].mxu1  ;;  %v6134_v11 = vld [vmem:[%s13395_s9 + $0x28] sm:$0xff] }
 0x622   : > { %v12863_v16 = vadd.f32 %v5724_v0, %v5564_v8  ;;  %v6906_v13 = vpop.f32.mrb[98].mxu1 }
 0x623   : > { %v12866_v35 = vadd.f32 %v6906_v13, %v5575_v56  ;;  %v5727_v5 = vpop.f32.mrb[99].mxu1  ;;  %v5839_v7 = vmul.f32 %v12860_v49, %v12860_v49  ;;  %v5798_v10 = vsel %vm459_vm0, %v12860_v49, 0.0 }
 0x624   : > { %v5794_v3 = vsel %vm459_vm0, %v12863_v16, 0.0  ;;  %v5837_v24 = vmul.f32 %v12863_v16, %v12863_v16  ;;  %v12872_v14 = vadd.f32 %v5727_v5, %v5567_v29  ;;  %v6966_v29 = vpack.c.bf16 %v6134_v11, %v6133_v52  ;;  %v6135_v5 = vld [vmem:[%s13395_s9 + $0x30] sm:$0xff] }
 0x625   : > { %v5795_v33 = vadd.f32 %v5794_v3, %v5793_v31  ;;  %v6131_v31 = vld [vmem:[%s13395_s9 + $0x10] sm:$0xff]  ;;  %v5840_v18 = vmul.f32 %v12866_v35, %v12866_v35  ;;  %v5800_v40 = vsel %vm459_vm0, %v12866_v35, 0.0  ;;  %v6136_v3 = vld [vmem:[%s13395_s9 + $0x38] sm:$0xff] }
 0x626   : > { %v5896_v44 = vsel %vm459_vm0, %v5837_v24, 0.0  ;;  %v5796_v51 = vsel %vm459_vm0, %v12872_v14, 0.0  ;;  %v5838_v55 = vmul.f32 %v12872_v14, %v12872_v14  ;;  %v6963_v42 = vpack.c.bf16 %v6132_v62, %v6131_v31  ;;  %v6139_v62 = vld [vmem:[%s13395_s9 + $0x50] sm:$0xff] }
 0x627   : > { %v5897_v58 = vadd.f32 %v5896_v44, %v5895_v43  ;;  %v5797_v19 = vadd.f32 %v5796_v51, %v5795_v33  ;;  %v5900_v43 = vsel %vm459_vm0, %v5839_v7, 0.0  ;;  %v5902_v0 = vsel %vm459_vm0, %v5840_v18, 0.0 }
 0x628   : > { %v5898_v12 = vsel %vm459_vm0, %v5838_v55, 0.0  ;;  %6964 = vmatpush3.bf16.msra.mxu0 %v6963_v42  ;;  %v6969_v51 = vpack.c.bf16 %v6136_v3, %v6135_v5  ;;  %v6137_v55 = vld [vmem:[%s13395_s9 + $0x40] sm:$0xff] }
 0x629   : > { %v5799_v17 = vadd.f32 %v5798_v10, %v5797_v19  ;;  %v5899_v37 = vadd.f32 %v5898_v12, %v5897_v58  ;;  %6965 = vmatprep.subr.bf16.mxu0 %v8240_v57  ;;  %v6972_v60 = vpack.c.bf16 %v6138_v21, %v6137_v55  ;;  %v6140_v10 = vld [vmem:[%s13395_s9 + $0x58] sm:$0xff] }
 0x62a   : > { %v6975_v42 = vpack.c.bf16 %v6140_v10, %v6139_v62 }
 0x62b   : > { %v5801_v32 = vadd.f32 %v5800_v40, %v5799_v17  ;;  %v5901_v8 = vadd.f32 %v5900_v43, %v5899_v37  ;;  %v6141_v43 = vld [vmem:[%s13395_s9 + $0x60] sm:$0xff]  ;;  %v6142_v40 = vld [vmem:[%s13395_s9 + $0x68] sm:$0xff] }
 0x62c   : > { %6967 = vmatpush3.bf16.msra.mxu0 %v6966_v29 }
 0x62d   : > { %v5802_v56 = vrot.slane %v5801_v32, 4  ;;  %v5903_v13 = vadd.f32 %v5902_v0, %v5901_v8  ;;  %6968 = vmatprep.subr.bf16.mxu0 %v8240_v57  ;;  %v6978_v8 = vpack.c.bf16 %v6142_v40, %v6141_v43  ;;  %v6143_v0 = vld [vmem:[%s13395_s9 + $0x70] sm:$0xff] }
 0x62f   : > { %v5803_v24 = vadd.f32 %v5802_v56, %v5801_v32  ;;  %v5904_v33 = vrot.slane %v5903_v13, 4  ;;  %v6144_v56 = vld [vmem:[%s13395_s9 + $0x78] sm:$0xff] }
 0x630   : > { %6970 = vmatpush3.bf16.msra.mxu0 %v6969_v51  ;;  %v6981_v29 = vpack.c.bf16 %v6144_v56, %v6143_v0 }
 0x631   : > { %v5804_v7 = vrot.slane %v5803_v24, 2  ;;  %v5905_v44 = vadd.f32 %v5904_v33, %v5903_v13  ;;  %6971 = vmatprep.subr.bf16.mxu0 %v8240_v57 }
 0x633   : > { %v5805_v63 = vadd.f32 %v5804_v7, %v5803_v24  ;;  %v5906_v31 = vrot.slane %v5905_v44, 2 }
 0x634   : > { %6973 = vmatpush3.bf16.msra.mxu0 %v6972_v60 }
 0x635   : > { %v5806_v58 = vrot.slane %v5805_v63, 1  ;;  %v5907_v19 = vadd.f32 %v5906_v31, %v5905_v44  ;;  %6974 = vmatprep.subr.bf16.mxu0 %v8240_v57 }
 0x637   : > { %v5807_v18 = vadd.f32 %v5806_v58, %v5805_v63  ;;  %v5908_v12 = vrot.slane %v5907_v19, 1 }
 0x638   : > { %6976 = vmatpush3.bf16.msra.mxu0 %v6975_v42 }
 0x639   : > { %v12930_v17 = vmul.f32 0.00390625, %v5807_v18  ;;  %v5909_v37 = vadd.f32 %v5908_v12, %v5907_v19  ;;  %6977 = vmatprep.subr.bf16.mxu0 %v8240_v57 }
 0x63b   : > { %v5910_v52 = vmul.f32 0.00390625, %v5909_v37  ;;  %v5911_v11 = vmul.f32 %v12930_v17, %v12930_v17  ;;  %v5940_v5 = vsub.f32 %v12837_v22, %v12930_v17  ;;  %v5941_v3 = vsub.f32 %v12845_v45, %v12930_v17 }
 0x63c   : > { %6979 = vmatpush3.bf16.msra.mxu0 %v6978_v8  ;;  %v5942_v24 = vsub.f32 %v12863_v16, %v12930_v17  ;;  %v5943_v33 = vsub.f32 %v12872_v14, %v12930_v17  ;;  %v5944_v7 = vsub.f32 %v12860_v49, %v12930_v17  ;;  %v5945_v44 = vsub.f32 %v12866_v35, %v12930_v17 }
 0x63d   : > { %v5912_v32 = vsub.f32 %v5910_v52, %v5911_v11  ;;  %6980 = vmatprep.subr.bf16.mxu0 %v8240_v57  ;;  %v5914_v55 = vsub.f32 %v12603_v48, %v12930_v17  ;;  %v5915_v57 = vsub.f32 %v12607_v4, %v12930_v17  ;;  %v5916_v16 = vsub.f32 %v12611_v38, %v12930_v17 }
 0x63e   : > { %v5917_v14 = vsub.f32 %v12615_v47, %v12930_v17  ;;  %v5918_v49 = vsub.f32 %v12619_v30, %v12930_v17  ;;  %v5919_v35 = vsub.f32 %v12623_v59, %v12930_v17  ;;  %v5920_v21 = vsub.f32 %v12627_v23, %v12930_v17 }
 0x63f   : > { %v5913_v13 = vmax.f32 %v5912_v32, 0.0  ;;  %v5921_v48 = vsub.f32 %v12631_v54, %v12930_v17  ;;  %v5922_v4 = vsub.f32 %v12635_v36, %v12930_v17  ;;  %v5923_v38 = vsub.f32 %v12639_v61, %v12930_v17 }
 0x640   : > { %6982 = vmatpush3.bf16.msra.mxu0 %v6981_v29  ;;  %v5924_v47 = vsub.f32 %v12643_v15, %v12930_v17  ;;  %v5925_v30 = vsub.f32 %v12647_v2, %v12930_v17  ;;  %v5926_v59 = vsub.f32 %v12651_v6, %v12930_v17  ;;  %v5927_v23 = vsub.f32 %v12655_v53, %v12930_v17 }
 0x641   : > { %v5946_v51 = vadd.f32 1e-05, %v5913_v13  ;;  %v5928_v54 = vsub.f32 %v12672_v20, %v12930_v17  ;;  %v5929_v36 = vsub.f32 %v12680_v46, %v12930_v17  ;;  %v5930_v61 = vsub.f32 %v12701_v25, %v12930_v17 }
 0x642   : > { %v5931_v15 = vsub.f32 %v12708_v34, %v12930_v17  ;;  %v5932_v2 = vsub.f32 %v12729_v1, %v12930_v17  ;;  %v5933_v6 = vsub.f32 %v12736_v27, %v12930_v17  ;;  %v5934_v53 = vsub.f32 %v12757_v28, %v12930_v17 }
 0x643   : > { %8067 = vrsqrt.f32 %v5946_v51  ;;  %v5935_v20 = vsub.f32 %v12764_v39, %v12930_v17  ;;  %v5936_v46 = vsub.f32 %v12785_v9, %v12930_v17  ;;  %v5937_v25 = vsub.f32 %v12792_v26, %v12930_v17 }
 0x644   : > { %v5938_v34 = vsub.f32 %v12813_v50, %v12930_v17  ;;  %v5939_v1 = vsub.f32 %v12820_v41, %v12930_v17 }
 0x64d   : > { %v8068_v63 = vpop.eup %8067 }
 0x64e   : > { %v13013_v27 = vmul.f32 %v8068_v63, %v5914_v55  ;;  %v13015_v31 = vmul.f32 %v8068_v63, %v5915_v57  ;;  %v13017_v28 = vmul.f32 %v8068_v63, %v5916_v16  ;;  %v13019_v39 = vmul.f32 %v8068_v63, %v5917_v14 }
 0x64f   : > { %v13021_v58 = vmul.f32 %v8068_v63, %v5918_v49  ;;  %v13023_v9 = vmul.f32 %v8068_v63, %v5919_v35  ;;  %v13025_v19 = vmul.f32 %v8068_v63, %v5920_v21  ;;  %v13027_v26 = vmul.f32 %v8068_v63, %v5921_v48 }
 0x650   : > { %v13029_v50 = vmul.f32 %v8068_v63, %v5922_v4  ;;  %v13031_v60 = vmul.f32 %v8068_v63, %v5923_v38  ;;  %v13033_v41 = vmul.f32 %v8068_v63, %v5924_v47  ;;  %v13035_v62 = vmul.f32 %v8068_v63, %v5925_v30 }
 0x651   : > { %v13037_v10 = vmul.f32 %v8068_v63, %v5926_v59  ;;  %v13039_v18 = vmul.f32 %v8068_v63, %v5927_v23  ;;  %v13041_v12 = vmul.f32 %v8068_v63, %v5928_v54  ;;  %v13043_v37 = vmul.f32 %v8068_v63, %v5929_v36 }
 0x652   : > { %v13045_v42 = vmul.f32 %v8068_v63, %v5930_v61  ;;  %v13047_v43 = vmul.f32 %v8068_v63, %v5931_v15  ;;  %v13049_v40 = vmul.f32 %v8068_v63, %v5932_v2  ;;  %v13051_v52 = vmul.f32 %v8068_v63, %v5933_v6 }
 0x653   : > { %v13053_v11 = vmul.f32 %v8068_v63, %v5934_v53  ;;  %v13055_v32 = vmul.f32 %v8068_v63, %v5935_v20  ;;  %v13057_v8 = vmul.f32 %v8068_v63, %v5936_v46  ;;  %v13059_v0 = vmul.f32 %v8068_v63, %v5937_v25 }
 0x654   : > { %v13061_v56 = vmul.f32 %v8068_v63, %v5938_v34  ;;  %v13063_v13 = vmul.f32 %v8068_v63, %v5939_v1  ;;  %v13068_v29 = vmul.f32 %v8068_v63, %v5940_v5  ;;  %v13073_v51 = vmul.f32 %v8068_v63, %v5941_v3 }
 0x655   : > { %v13075_v55 = vmul.f32 %v8068_v63, %v5942_v24  ;;  %v13077_v57 = vmul.f32 %v8068_v63, %v5943_v33  ;;  %v13079_v16 = vmul.f32 %v8068_v63, %v5944_v7  ;;  %v13081_v14 = vmul.f32 %v8068_v63, %v5945_v44 }
 0x656   : > { %v5980_v49 = vsel %vm459_vm0, %v13013_v27, 0.0  ;;  %v5981_v22 = vsel %vm459_vm0, %v13015_v31, 0.0  ;;  %v5983_v45 = vsel %vm459_vm0, %v13017_v28, 0.0  ;;  %v5985_v3 = vsel %vm459_vm0, %v13019_v39, 0.0 }
 0x657   : > { %v5982_v5 = vadd.f32 %v5981_v22, %v5980_v49  ;;  %v5987_v33 = vsel %vm459_vm0, %v13021_v58, 0.0  ;;  %v5989_v44 = vsel %vm459_vm0, %v13023_v9, 0.0  ;;  %v5991_v21 = vsel %vm459_vm0, %v13025_v19, 0.0 }
 0x658   : > { %v5993_v4 = vsel %vm459_vm0, %v13027_v26, 0.0  ;;  %v5995_v47 = vsel %vm459_vm0, %v13029_v50, 0.0  ;;  %v5997_v59 = vsel %vm459_vm0, %v13031_v60, 0.0  ;;  %v5999_v54 = vsel %vm459_vm0, %v13033_v41, 0.0 }
 0x659   : > { %v5984_v17 = vadd.f32 %v5983_v45, %v5982_v5  ;;  %v6001_v61 = vsel %vm459_vm0, %v13035_v62, 0.0  ;;  %v6003_v2 = vsel %vm459_vm0, %v13037_v10, 0.0  ;;  %v6005_v53 = vsel %vm459_vm0, %v13039_v18, 0.0 }
 0x65a   : > { %v6007_v63 = vsel %vm459_vm0, %v13041_v12, 0.0  ;;  %v6009_v25 = vsel %vm459_vm0, %v13043_v37, 0.0  ;;  %v6011_v1 = vsel %vm459_vm0, %v13045_v42, 0.0  ;;  %v6013_v22 = vsel %vm459_vm0, %v13047_v43, 0.0 }
 0x65b   : > { %v5986_v24 = vadd.f32 %v5985_v3, %v5984_v17  ;;  %v6015_v45 = vsel %vm459_vm0, %v13049_v40, 0.0  ;;  %v6017_v3 = vsel %vm459_vm0, %v13051_v52, 0.0 }
 0x65d   : > { %v5988_v7 = vadd.f32 %v5987_v33, %v5986_v24  ;;  %v6019_v33 = vsel %vm459_vm0, %v13053_v11, 0.0 }
 0x65f   : > { %v5990_v35 = vadd.f32 %v5989_v44, %v5988_v7  ;;  %v6021_v44 = vsel %vm459_vm0, %v13055_v32, 0.0 }
 0x661   : > { %v5992_v48 = vadd.f32 %v5991_v21, %v5990_v35  ;;  %v6023_v21 = vsel %vm459_vm0, %v13057_v8, 0.0 }
 0x663   : > { %v5994_v38 = vadd.f32 %v5993_v4, %v5992_v48  ;;  %v6025_v4 = vsel %vm459_vm0, %v13059_v0, 0.0 }
 0x665   : > { %v5996_v30 = vadd.f32 %v5995_v47, %v5994_v38  ;;  %v6027_v47 = vsel %vm459_vm0, %v13061_v56, 0.0 }
 0x667   : > { %v5998_v23 = vadd.f32 %v5997_v59, %v5996_v30  ;;  %v6029_v59 = vsel %vm459_vm0, %v13063_v13, 0.0 }
 0x669   : > { %v6000_v36 = vadd.f32 %v5999_v54, %v5998_v23  ;;  %v6031_v54 = vsel %vm459_vm0, %v13068_v29, 0.0 }
 0x66b   : > { %v6002_v15 = vadd.f32 %v6001_v61, %v6000_v36  ;;  %v6033_v61 = vsel %vm459_vm0, %v13073_v51, 0.0 }
 0x66d   : > { %v6004_v6 = vadd.f32 %v6003_v2, %v6002_v15  ;;  %v6035_v2 = vsel %vm459_vm0, %v13075_v55, 0.0 }
 0x66f   : > { %v6006_v20 = vadd.f32 %v6005_v53, %v6004_v6  ;;  %v6037_v53 = vsel %vm459_vm0, %v13077_v57, 0.0 }
 0x671   : > { %v6008_v46 = vadd.f32 %v6007_v63, %v6006_v20  ;;  %v6039_v63 = vsel %vm459_vm0, %v13079_v16, 0.0 }
 0x673   : > { %v6010_v34 = vadd.f32 %v6009_v25, %v6008_v46  ;;  %v6041_v25 = vsel %vm459_vm0, %v13081_v14, 0.0 }
 0x675   : > { %v6012_v49 = vadd.f32 %v6011_v1, %v6010_v34 }
 0x677   : > { %v6014_v5 = vadd.f32 %v6013_v22, %v6012_v49 }
 0x679   : > { %v6016_v17 = vadd.f32 %v6015_v45, %v6014_v5 }
 0x67b   : > { %v6018_v24 = vadd.f32 %v6017_v3, %v6016_v17 }
 0x67d   : > { %v6020_v7 = vadd.f32 %v6019_v33, %v6018_v24  ;;  %v6054_v24 = vld [vmem:[#allocation8] sm:$0x1] }
 0x67f   : > { %v6022_v35 = vadd.f32 %v6021_v44, %v6020_v7 }
 0x681   : > { %v6024_v48 = vadd.f32 %v6023_v21, %v6022_v35  ;;  %v6145_v21 = vld [vmem:[%s13396_s10] sm:$0x1] }
 0x683   : > { %v6026_v38 = vadd.f32 %v6025_v4, %v6024_v48 }
 0x685   : > { %v6028_v30 = vadd.f32 %v6027_v47, %v6026_v38 }
 0x687   : > { %v6030_v23 = vadd.f32 %v6029_v59, %v6028_v30 }
 0x689   : > { %v6032_v36 = vadd.f32 %v6031_v54, %v6030_v23 }
 0x68b   : > { %v6034_v15 = vadd.f32 %v6033_v61, %v6032_v36  ;;  %v14012_v36 = vld [vmem:[#allocation84_spill] sm:$0xff] }
 0x68c   : > { %v14013_v61 = vsub.s32 0, %v14012_v36 }
 0x68d   : > { %v6036_v6 = vadd.f32 %v6035_v2, %v6034_v15 }
 0x68f   : > { %v6038_v20 = vadd.f32 %v6037_v53, %v6036_v6 }
 0x691   : > { %v6040_v46 = vadd.f32 %v6039_v63, %v6038_v20 }
 0x693   : > { %v6042_v34 = vadd.f32 %v6041_v25, %v6040_v46 }
 0x695   : > { %v6043_v1 = vrot.slane %v6042_v34, 4 }
 0x697   : > { %v6044_v49 = vadd.f32 %v6043_v1, %v6042_v34 }
 0x699   : > { %v6045_v22 = vrot.slane %v6044_v49, 2 }
 0x69b   : > { %v6046_v5 = vadd.f32 %v6045_v22, %v6044_v49  ;;  %v14014_v22 = vld [vmem:[#allocation22_spill] sm:$0xff] }
 0x69d   : > { %v6047_v45 = vrot.slane %v6046_v5, 1 }
 0x69f   : > { %v6048_v17 = vadd.f32 %v6047_v45, %v6046_v5  ;;  %v14015_v5 = vld [vmem:[#allocation23_spill] sm:$0xff]  ;;  %v14016_v45 = vld [vmem:[#allocation20_spill] sm:$0xff] }
 0x6a1   : > { %v6049_v3 = vmul.f32 0.00390625, %v6048_v17 }
 0x6a3   : > { %6916 = vmatmul.mubr.msk.f32.vlgmr.msra.gmra.mrb[100].mxu1 %vm459_vm0, %v6049_v3  ;;  %v14019_v3 = vld [vmem:[#allocation25_spill] sm:$0xff] }
 0x776   : > { %v6124_v33 = vpop.f32.mrb[100].mxu1 }
 0x777   : > { %v6125_v7 = vadd.f32 %v6124_v33, %v6054_v24  ;;  %v6917_v44 = vpop.f32.mrb[101].mxu1  ;;  %v14020_v24 = vld [vmem:[#allocation26_spill] sm:$0xff]  ;;  %v14021_v33 = vld [vmem:[#allocation27_spill] sm:$0xff] }
 0x778   : > { %v14023_v44 = vld [vmem:[#allocation29_spill] sm:$0xff] }
 0x779   : > { %v6128_v35 = vmax.f32 %v6125_v7, 0.0  ;;  %v14022_v7 = vld [vmem:[#allocation28_spill] sm:$0xff] }
 0x77b   : > { %6951 = vmatmul.mubr.f32.vlgmr.msra.gmra.mrb[92].mxu0 %v6128_v35 }
 0x84e   : > { %v6212_v48 = vpop.f32.mrb[92].mxu0 }
 0x84f   : > { %v6213_v4 = vadd.f32 %v6212_v48, %v6145_v21  ;;  %v6952_v38 = vpop.f32.mrb[93].mxu0  ;;  %v14024_v21 = vld [vmem:[#allocation30_spill] sm:$0xff] }
 0x851   : > { %v6216_v47 = vsub.f32 0.0, %v6213_v4  ;;  %v14025_v4 = vld [vmem:[#allocation31_spill] sm:$0xff] }
 0x853   : > { %v6217_v30 = vmul.f32 1.442695, %v6216_v47  ;;  %v14026_v47 = vld [vmem:[#allocation32_spill] sm:$0xff] }
 0x855   : > { %8069 = vpow2.f32 %v6217_v30 }
 0x85f   : > { %v8070_v59 = vpop.eup %8069 }
 0x860   : > { %v6219_v23 = vadd.f32 1.0, %v8070_v59  ;;  %v14027_v59 = vld [vmem:[#allocation33_spill] sm:$0xff] }
 0x862   : > { %8071 = vrcp.f32 %v6219_v23 }
 0x86c   : > { %v8072_v54 = vpop.eup %8071 }
 0x86d   : > { %v6224_v15 = vrot.slane %v8072_v54, %v14013_v61  ;;  %v14028_v54 = vld [vmem:[#allocation34_spill] sm:$0xff]  ;;  %v14029_v61 = vld [vmem:[#allocation35_spill] sm:$0xff] }
 0x86f   : > { %v6225_v2 = vmul.f32 %v6224_v15, %v13013_v27  ;;  %v6226_v6 = vmul.f32 %v6224_v15, %v13015_v31  ;;  %v6227_v53 = vmul.f32 %v6224_v15, %v13017_v28  ;;  %v6228_v20 = vmul.f32 %v6224_v15, %v13019_v39 }
 0x870   : > { %v6229_v63 = vmul.f32 %v6224_v15, %v13021_v58  ;;  %v6230_v46 = vmul.f32 %v6224_v15, %v13023_v9  ;;  %v6231_v25 = vmul.f32 %v6224_v15, %v13025_v19  ;;  %v6232_v34 = vmul.f32 %v6224_v15, %v13027_v26 }
 0x871   : > { %v6233_v1 = vmul.f32 %v6224_v15, %v13029_v50  ;;  %v6234_v49 = vmul.f32 %v6224_v15, %v13031_v60  ;;  %v6235_v27 = vmul.f32 %v6224_v15, %v13033_v41  ;;  %v6236_v31 = vmul.f32 %v6224_v15, %v13035_v62 }
 0x872   : > { %v6237_v28 = vmul.f32 %v6224_v15, %v13037_v10  ;;  %v6238_v39 = vmul.f32 %v6224_v15, %v13039_v18  ;;  %v6239_v58 = vmul.f32 %v6224_v15, %v13041_v12  ;;  %v6240_v9 = vmul.f32 %v6224_v15, %v13043_v37 }
 0x873   : > { %v6241_v19 = vmul.f32 %v6224_v15, %v13045_v42  ;;  %v6242_v26 = vmul.f32 %v6224_v15, %v13047_v43  ;;  %v6243_v50 = vmul.f32 %v6224_v15, %v13049_v40  ;;  %v6244_v60 = vmul.f32 %v6224_v15, %v13051_v52 }
 0x874   : > { %v6245_v41 = vmul.f32 %v6224_v15, %v13053_v11  ;;  %v6246_v62 = vmul.f32 %v6224_v15, %v13055_v32  ;;  %v6247_v10 = vmul.f32 %v6224_v15, %v13057_v8  ;;  %v6248_v18 = vmul.f32 %v6224_v15, %v13059_v0 }
 0x875   : > { %v6249_v12 = vmul.f32 %v6224_v15, %v13061_v56  ;;  %v6250_v37 = vmul.f32 %v6224_v15, %v13063_v13  ;;  %v6251_v42 = vmul.f32 %v6224_v15, %v13068_v29  ;;  %v6252_v43 = vmul.f32 %v6224_v15, %v13073_v51  ;;  %v14017_v13 = vld [vmem:[#allocation21_spill] sm:$0xff]  ;;  %v14018_v29 = vld [vmem:[#allocation24_spill] sm:$0xff] }
 0x876   : > { %v6253_v40 = vmul.f32 %v6224_v15, %v13075_v55  ;;  %v6254_v52 = vmul.f32 %v6224_v15, %v13077_v57  ;;  %v6255_v11 = vmul.f32 %v6224_v15, %v13079_v16  ;;  %v6256_v32 = vmul.f32 %v6224_v15, %v13081_v14 }
 0x877   : > { %v6257_v8 = vadd.f32 %v6225_v2, %v14014_v22  ;;  %v6258_v0 = vadd.f32 %v6226_v6, %v14015_v5  ;;  %v6259_v56 = vadd.f32 %v6227_v53, %v14016_v45  ;;  %v6260_v17 = vadd.f32 %v6228_v20, %v14017_v13  ;;  %v14030_v2 = vld [vmem:[#allocation36_spill] sm:$0xff]  ;;  %v14031_v53 = vld [vmem:[#allocation37_spill] sm:$0xff] }
 0x878   : > { %v6261_v51 = vadd.f32 %v6229_v63, %v14018_v29  ;;  %v6262_v55 = vadd.f32 %v6230_v46, %v14019_v3  ;;  %v6263_v57 = vadd.f32 %v6231_v25, %v14020_v24  ;;  %v6264_v16 = vadd.f32 %v6232_v34, %v14021_v33  ;;  %v14032_v63 = vld [vmem:[#allocation38_spill] sm:$0xff]  ;;  %v14033_v25 = vld [vmem:[#allocation39_spill] sm:$0xff] }
 0x879   : > { %v6265_v14 = vadd.f32 %v6233_v1, %v14022_v7  ;;  %v6266_v35 = vadd.f32 %v6234_v49, %v14023_v44  ;;  %v6267_v48 = vadd.f32 %v6235_v27, %v14024_v21  ;;  %v6268_v38 = vadd.f32 %v6236_v31, %v14025_v4  ;;  %v14034_v1 = vld [vmem:[#allocation40_spill] sm:$0xff]  ;;  %v14035_v27 = vld [vmem:[#allocation41_spill] sm:$0xff] }
 0x87a   : > { %v6269_v30 = vadd.f32 %v6237_v28, %v14026_v47  ;;  %v6270_v23 = vadd.f32 %v6238_v39, %v14027_v59  ;;  %v6271_v36 = vadd.f32 %v6239_v58, %v14028_v54  ;;  %v6272_v15 = vadd.f32 %v6240_v9, %v14029_v61  ;;  %v14036_v28 = vld [vmem:[#allocation42_spill] sm:$0xff]  ;;  %v14037_v58 = vld [vmem:[#allocation43_spill] sm:$0xff] }
 0x87b   : > { %v13205_v6 = vadd.f32 %v6241_v19, %v14030_v2  ;;  %v13208_v20 = vadd.f32 %v6242_v26, %v14031_v53  ;;  %v13211_v46 = vadd.f32 %v6243_v50, %v14032_v63  ;;  %v13214_v34 = vadd.f32 %v6244_v60, %v14033_v25  ;;  %v14038_v19 = vld [vmem:[#allocation44_spill] sm:$0xff]  ;;  %v14039_v50 = vld [vmem:[#allocation45_spill] sm:$0xff]  ;;  %v14040_v60 = vld [vmem:[#allocation46_spill] sm:$0xff] }
 0x87c   : > { %v13217_v49 = vadd.f32 %v6245_v41, %v14034_v1  ;;  %v13220_v31 = vadd.f32 %v6246_v62, %v14035_v27  ;;  %v13223_v39 = vadd.f32 %v6247_v10, %v14036_v28  ;;  %v13226_v9 = vadd.f32 %v6248_v18, %v14037_v58  ;;  %v14041_v41 = vld [vmem:[#allocation47_spill] sm:$0xff]  ;;  %v14042_v62 = vld [vmem:[#allocation48_spill] sm:$0xff]  ;;  %v14043_v10 = vld [vmem:[#allocation49_spill] sm:$0xff] }
 0x87d   : > { %v13229_v26 = vadd.f32 %v6249_v12, %v14038_v19  ;;  %v13232_v22 = vadd.f32 %v6250_v37, %v14039_v50  ;;  %v13235_v5 = vadd.f32 %v6251_v42, %v14040_v60  ;;  %v13238_v45 = vadd.f32 %v6252_v43, %v14041_v41  ;;  %v14044_v18 = vld [vmem:[#allocation50_spill] sm:$0xff]  ;;  %v14045_v12 = vld [vmem:[#allocation51_spill] sm:$0xff] }
 0x87e   : > { %v13241_v13 = vadd.f32 %v6253_v40, %v14042_v62  ;;  %v13244_v29 = vadd.f32 %v6254_v52, %v14043_v10  ;;  %v13247_v3 = vadd.f32 %v6255_v11, %v14044_v18  ;;  %v13250_v24 = vadd.f32 %v6256_v32, %v14045_v12 }
 0x87f   : > { %v6289_v37 = vmax.f32 %v6257_v8, 0.0  ;;  %v6290_v33 = vmax.f32 %v6258_v0, 0.0  ;;  %v6291_v7 = vmax.f32 %v6259_v56, 0.0  ;;  %v6292_v42 = vmax.f32 %v6260_v17, 0.0 }
 0x880   : > { %v6293_v44 = vmax.f32 %v6261_v51, 0.0  ;;  %v6294_v21 = vmax.f32 %v6262_v55, 0.0  ;;  %v6295_v43 = vmax.f32 %v6263_v57, 0.0  ;;  %v6296_v4 = vmax.f32 %v6264_v16, 0.0 }
 0x881   : > { %v6297_v47 = vmax.f32 %v6265_v14, 0.0  ;;  %v6298_v40 = vmax.f32 %v6266_v35, 0.0  ;;  %v6299_v59 = vmax.f32 %v6267_v48, 0.0  ;;  %v6300_v52 = vmax.f32 %v6268_v38, 0.0  ;;  %6321 = vst.msk [vmem:[%s13252_s14] sm:$0xff] %vm459_vm0, %v6289_v37  ;;  %6322 = vst.msk [vmem:[%s13252_s14 + $0x8] sm:$0xff] %vm459_vm0, %v6290_v33 }
 0x882   : > { %6323 = vst.msk [vmem:[%s13252_s14 + $0x10] sm:$0xff] %vm459_vm0, %v6291_v7  ;;  %6324 = vst.msk [vmem:[%s13252_s14 + $0x18] sm:$0xff] %vm459_vm0, %v6292_v42  ;;  %v6301_v11 = vmax.f32 %v6269_v30, 0.0  ;;  %v6302_v32 = vmax.f32 %v6270_v23, 0.0  ;;  %v6303_v8 = vmax.f32 %v6271_v36, 0.0  ;;  %v6304_v0 = vmax.f32 %v6272_v15, 0.0 }
 0x883   : > { %6325 = vst.msk [vmem:[%s13252_s14 + $0x20] sm:$0xff] %vm459_vm0, %v6293_v44  ;;  %6326 = vst.msk [vmem:[%s13252_s14 + $0x28] sm:$0xff] %vm459_vm0, %v6294_v21  ;;  %v6305_v56 = vmax.f32 %v13205_v6, 0.0  ;;  %v6306_v17 = vmax.f32 %v13208_v20, 0.0  ;;  %v6307_v51 = vmax.f32 %v13211_v46, 0.0  ;;  %v6308_v55 = vmax.f32 %v13214_v34, 0.0 }
 0x884   : > { %6327 = vst.msk [vmem:[%s13252_s14 + $0x30] sm:$0xff] %vm459_vm0, %v6295_v43  ;;  %6328 = vst.msk [vmem:[%s13252_s14 + $0x38] sm:$0xff] %vm459_vm0, %v6296_v4  ;;  %v6309_v57 = vmax.f32 %v13217_v49, 0.0  ;;  %v6310_v16 = vmax.f32 %v13220_v31, 0.0  ;;  %v6311_v14 = vmax.f32 %v13223_v39, 0.0  ;;  %v6312_v35 = vmax.f32 %v13226_v9, 0.0 }
 0x885   : > { %6329 = vst.msk [vmem:[%s13252_s14 + $0x40] sm:$0xff] %vm459_vm0, %v6297_v47  ;;  %6330 = vst.msk [vmem:[%s13252_s14 + $0x48] sm:$0xff] %vm459_vm0, %v6298_v40  ;;  %v6313_v48 = vmax.f32 %v13229_v26, 0.0  ;;  %v6314_v38 = vmax.f32 %v13232_v22, 0.0  ;;  %v6315_v30 = vmax.f32 %v13235_v5, 0.0  ;;  %v6316_v23 = vmax.f32 %v13238_v45, 0.0 }
 0x886   : > { %6331 = vst.msk [vmem:[%s13252_s14 + $0x50] sm:$0xff] %vm459_vm0, %v6299_v59  ;;  %6332 = vst.msk [vmem:[%s13252_s14 + $0x58] sm:$0xff] %vm459_vm0, %v6300_v52  ;;  %v6317_v54 = vmax.f32 %v13241_v13, 0.0  ;;  %v6318_v36 = vmax.f32 %v13244_v29, 0.0  ;;  %v6319_v61 = vmax.f32 %v13247_v3, 0.0  ;;  %v6320_v15 = vmax.f32 %v13250_v24, 0.0 }
 0x887   : > { %6333 = vst.msk [vmem:[%s13252_s14 + $0x60] sm:$0xff] %vm459_vm0, %v6301_v11  ;;  %6334 = vst.msk [vmem:[%s13252_s14 + $0x68] sm:$0xff] %vm459_vm0, %v6302_v32 }
 0x888   : > { %6335 = vst.msk [vmem:[%s13252_s14 + $0x70] sm:$0xff] %vm459_vm0, %v6303_v8  ;;  %6336 = vst.msk [vmem:[%s13252_s14 + $0x78] sm:$0xff] %vm459_vm0, %v6304_v0 }
 0x889   : > { %6337 = vst.msk [vmem:[%s13252_s14 + $0x80] sm:$0xff] %vm459_vm0, %v6305_v56  ;;  %6338 = vst.msk [vmem:[%s13252_s14 + $0x88] sm:$0xff] %vm459_vm0, %v6306_v17 }
 0x88a   : > { %6339 = vst.msk [vmem:[%s13252_s14 + $0x90] sm:$0xff] %vm459_vm0, %v6307_v51  ;;  %6340 = vst.msk [vmem:[%s13252_s14 + $0x98] sm:$0xff] %vm459_vm0, %v6308_v55 }
 0x88b   : > { %6341 = vst.msk [vmem:[%s13252_s14 + $0xa0] sm:$0xff] %vm459_vm0, %v6309_v57  ;;  %6342 = vst.msk [vmem:[%s13252_s14 + $0xa8] sm:$0xff] %vm459_vm0, %v6310_v16 }
 0x88c   : > { %6343 = vst.msk [vmem:[%s13252_s14 + $0xb0] sm:$0xff] %vm459_vm0, %v6311_v14  ;;  %6344 = vst.msk [vmem:[%s13252_s14 + $0xb8] sm:$0xff] %vm459_vm0, %v6312_v35 }
 0x88d   : > { %6345 = vst.msk [vmem:[%s13252_s14 + $0xc0] sm:$0xff] %vm459_vm0, %v6313_v48  ;;  %6346 = vst.msk [vmem:[%s13252_s14 + $0xc8] sm:$0xff] %vm459_vm0, %v6314_v38 }
 0x88e   : > { %6347 = vst.msk [vmem:[%s13252_s14 + $0xd0] sm:$0xff] %vm459_vm0, %v6315_v30  ;;  %6348 = vst.msk [vmem:[%s13252_s14 + $0xd8] sm:$0xff] %vm459_vm0, %v6316_v23 }
 0x88f   : > { %6349 = vst.msk [vmem:[%s13252_s14 + $0xe0] sm:$0xff] %vm459_vm0, %v6317_v54  ;;  %6350 = vst.msk [vmem:[%s13252_s14 + $0xe8] sm:$0xff] %vm459_vm0, %v6318_v36 }
 0x890   : > { %6351 = vst.msk [vmem:[%s13252_s14 + $0xf0] sm:$0xff] %vm459_vm0, %v6319_v61  ;;  %6352 = vst.msk [vmem:[%s13252_s14 + $0xf8] sm:$0xff] %vm459_vm0, %v6320_v15 }
 0x891   : > { %8172 = shalt.err (!%p8169_p9)
}
 0x892   : > { %s8173_s22 = scalar_lea.hbm %s13311_s19, 4096  ;;  %s8177_s28 = scalar_lea.hbm %s13397_s11, 8192 }
 0x893   : > { %p8174_p2 = scmp.ne.s32.totalorder %s13311_s19, %s8173_s22  ;;  %p8178_p4 = scmp.lt.u32.totalorder %s13311_s19, %s13397_s11 }
 0x894   : > { %p8179_p5 = scmp.lt.u32.totalorder %s8177_s28, %s8173_s22  ;;  %p8181_p12 = scmp.lt.u32.totalorder %s8173_s22, %s13311_s19 }
 0x895   : > { %p8175_p3 = pnand %p8174_p2, %p14047_p7 }
 0x896   : > { %p8180_p10 = por %p8179_p5, %p8178_p4 }
 0x897   : > { %p8176_p0 = pneg %p8175_p3 }
 0x898   : > { %p8182_p8 = por %p8181_p12, %p8180_p10 }
 0x89a   : > { %p8183_p11 = pnand %p8182_p8, %p8176_p0 }
 0x89c   : > { %8186 = shalt.err (!%p8183_p11)
}
 0x89d   : > { %s8243_s14 = smov 128   ;;  %s8244_s26 = smov 8  }
 0x89e   : > { %6999 = dma.vmem_to_hbm [thread:$0]  (%p14047_p7), %s13313_s24, 4096, %s13311_s19, %s13345_s12, %s8243_s14, %s8243_s14, %s8244_s26  }
 0x89f PF: > { %s14048_s21 = sld [smem:[#allocation15_spill]]  ;;  %s14049_s16 = sld [smem:[#allocation13_spill]] }
 0x8a0   : > { %s14050_s17 = sld [smem:[#allocation19_spill]] }
 0x8a5   : > { %p7021_p13 = scmp.ge.s32.totalorder %s14048_s21, 2  ;;  %s6382_s23 = sand.u32 1, %s14049_s16  }
 0x8a6   : > { %p14051_p1 = scmp.ne.s32.totalorder %s14050_s17, 0  ;;  %s6383_s20 = scalar_lea.sflag [#allocation5], %s6382_s23 }
 0x8a8   : > { %p7012_p6 = pnand %p7021_p13, %p14051_p1 }
 0x8aa   : > { %8212 = dma.done.wait (!%p7012_p6), %s6383_s20, 4096  }
 0x8ab   : > { %8214 = vsyncadd (!%p7012_p6), %s6383_s20, 4294963200  ;;  %s14052_s20 = sld [smem:[#allocation16_spill]]  ;;  %s14053_s13 = sld [smem:[#allocation14_spill]] }
 0x8ac   : > { %s14054_s19 = sld [smem:[#allocation17_spill]]  ;;  %s14055_s17 = smov %s8221_s18 }
 0x8b1   : > { %p23_p9 = scmp.ge.s32.totalorder %s14052_s20, 4   ;;  %s14056_s18 = smov %s14053_s13 }
 0x8b3   :  { %25 = sbr.rel (!%p23_p9) target bundleno = 5 (0x5), region = 115 }
 0x8ba   :  { %6388 = vsyncpa [#allocation4], 1 }
 0x8bb   :  { %6390 = vsyncpa [#allocation4 + $0x1], 1 }
 0x8bc   :  { %6391 = vsyncpa [#allocation7], 1 }
 0x8bd   :  { %6392 = vsyncpa [#allocation5], 1 }
 0x8be   :  { %6394 = vsyncpa [#allocation5 + $0x1], 1 }

</bundles_post_ra>
